<compile_context>
chip_gen: v7x
topology: tpu7x:2x2x1
jax: 0.10.0
libtpu: 0.0.40
codegen_flags: <defaults>
</compile_context>

<pallas_src>
import functools

import jax
import jax.numpy as jnp
from jax.experimental import pallas as pl
from jax.experimental.pallas import tpu as pltpu


def _attention_kernel(x_ref, wqkv_ref, wproj_ref, bproj_ref, o_ref, *,
                      num_heads: int, head_dim: int, q_tile: int):
    """One grid step handles one batch element.

    x_ref     : (1, C, N)   input pixels (mxu dtype), channels on sublanes, N = H*W on lanes
    wqkv_ref  : (3C, C)     1x1-conv qkv weight, scale pre-folded into the q rows (resident)
    wproj_ref : (C, C)      1x1-conv proj weight (resident)
    bproj_ref : (C, 1)      proj bias, f32 (resident)
    o_ref     : (1, C, N)   output (f32)
    """
    nh, hd = num_heads, head_dim
    C = nh * hd
    x = x_ref[0]                                  # (C, N)
    N = x.shape[-1]
    mxu_dtype = x.dtype

    # qkv projection on the MXU: (3C, C) @ (C, N) -> (3C, N), f32 accumulation.
    qkv = jnp.dot(wqkv_ref[...], x, preferred_element_type=jnp.float32)
    # PyTorch reshape+chunk layout: per head the 3*hd rows are [q | k | v].
    qkv = qkv.reshape(nh, 3 * hd, N)
    q_all = qkv[:, :hd, :]                        # (nh, hd, N) f32 (scale already folded)
    k = qkv[:, hd:2 * hd, :]                      # (nh, hd, N)
    v = qkv[:, 2 * hd:, :].astype(mxu_dtype)      # (nh, hd, N)
    # Keys-major copy of K so both batched matmuls are canonical (no transposed
    # MXU operands). Tiny: (nh, N, hd).
    kt = jnp.swapaxes(k, 1, 2).astype(mxu_dtype)

    wproj = wproj_ref[...]                        # (C, C)
    bias = bproj_ref[...]                         # (C, 1) f32

    # Query-axis tiling (single tile at the demo shapes).
    n_tiles = N // q_tile
    for t in range(n_tiles):
        sl = slice(t * q_tile, (t + 1) * q_tile)
        q = q_all[:, :, sl].astype(mxu_dtype)     # (nh, hd, tq)

        # scores[h, i, j] = sum_d k[h, d, i] * q[h, d, j]   (i: key, j: query)
        s = jnp.einsum('hid,hdj->hij', kt, q,
                       preferred_element_type=jnp.float32)       # (nh, N, tq)

        # softmax over keys (axis 1 == dim=-2 of the torch (B,nh,N,N) tensor);
        # all VPU/EUP math in f32.
        m = jnp.max(s, axis=1, keepdims=True)                     # (nh, 1, tq)
        e = jnp.exp(s - m)                                        # (nh, N, tq)
        denom = jnp.sum(e, axis=1, keepdims=True)                 # (nh, 1, tq)
        # TODO(synk): attn_drop omitted (p=0.0 default / eval mode).

        # Unnormalized PV matmul, normalization deferred (EUP reciprocal).
        o = jnp.einsum('hdi,hij->hdj', v, e.astype(mxu_dtype),
                       preferred_element_type=jnp.float32)        # (nh, hd, tq)
        o = o * pl.reciprocal(denom, approx=True)

        # Output projection on the head-concatenated block: (C, C) @ (C, tq) + bias.
        # (register concatenate -> no acc scratch round-trip, K = C on the MXU)
        y = jnp.dot(wproj, o.reshape(C, q_tile).astype(mxu_dtype),
                    preferred_element_type=jnp.float32) + bias
        # TODO(synk): proj_drop omitted (p=0.0 default / eval mode).
        o_ref[0, :, sl] = y.astype(o_ref.dtype)


def attention_pallas(x, w_qkv, w_proj, b_proj, *, num_heads: int, scale=None,
                     mxu_dtype=jnp.bfloat16, q_tile=None):
    """Pallas equivalent of Attention.forward(x). x: (B, C, H, W) NCHW, f32."""
    B, C, H, W = x.shape
    N = H * W
    assert C % num_heads == 0
    hd = C // num_heads
    if scale is None:
        scale = hd ** -0.5
    assert w_qkv.shape == (3 * C, C)
    assert w_proj.shape == (C, C)
    assert b_proj.shape == (C,)
    assert N % 128 == 0, "use H*W multiple of 128 for a lane-dense layout"
    assert hd % 8 == 0, "head_dim multiple of 8 keeps head slices sublane-aligned"
    if q_tile is None:
        q_tile = N if N <= 512 else 512
    assert N % q_tile == 0 and q_tile % 128 == 0

    # Fold the softmax scale into the q rows of the qkv weight (done once, on host).
    wq = w_qkv.reshape(num_heads, 3, hd, C)
    wq = wq.at[:, 0, :, :].multiply(jnp.asarray(scale, w_qkv.dtype))
    w_qkv_s = wq.reshape(3 * C, C).astype(mxu_dtype)

    xf = x.reshape(B, C, N).astype(mxu_dtype)     # lane axis = H*W (dense)
    wp = w_proj.astype(mxu_dtype)
    b2 = b_proj.reshape(C, 1).astype(jnp.float32)

    kernel = functools.partial(
        _attention_kernel, num_heads=num_heads, head_dim=hd, q_tile=int(q_tile))

    flops = int(B * (2 * (3 * C) * C * N            # qkv projection
                     + num_heads * 4 * hd * N * N   # scores + PV
                     + 2 * C * C * N))              # output projection
    transcendentals = int(B * num_heads * N * N)    # exp in softmax
    bytes_accessed = int(
        xf.size * xf.dtype.itemsize + w_qkv_s.size * w_qkv_s.dtype.itemsize
        + wp.size * wp.dtype.itemsize + b2.size * 4
        + B * C * N * jnp.dtype(x.dtype).itemsize)

    grid_spec = pltpu.PrefetchScalarGridSpec(
        num_scalar_prefetch=0,
        grid=(B,),
        in_specs=[
            pl.BlockSpec((1, C, N), lambda b: (b, 0, 0)),       # x
            pl.BlockSpec((3 * C, C), lambda b: (0, 0)),         # w_qkv (resident)
            pl.BlockSpec((C, C), lambda b: (0, 0)),             # w_proj (resident)
            pl.BlockSpec((C, 1), lambda b: (0, 0)),             # b_proj (resident)
        ],
        out_specs=pl.BlockSpec((1, C, N), lambda b: (b, 0, 0)),
    )

    out = pl.pallas_call(
        kernel,
        out_shape=jax.ShapeDtypeStruct((B, C, N), x.dtype),
        grid_spec=grid_spec,
        compiler_params=pltpu.CompilerParams(
            dimension_semantics=("parallel",),
        ),
        cost_estimate=pl.CostEstimate(
            flops=flops, transcendentals=transcendentals,
            bytes_accessed=bytes_accessed),
    )(xf, w_qkv_s, wp, b2)

    return out.reshape(B, C, H, W)


def attention_reference(x, w_qkv, w_proj, b_proj, *, num_heads: int, scale=None):
    """Plain-JAX reference reproducing the PyTorch forward exactly."""
    B, C, H, W = x.shape
    N = H * W
    hd = C // num_heads
    if scale is None:
        scale = hd ** -0.5
    xf = x.reshape(B, C, N)
    qkv = jnp.einsum('oc,bcn->bon', w_qkv, xf)                 # 1x1 conv (qkv_bias=False)
    qkv = qkv.reshape(B, num_heads, 3 * hd, N)
    q, k, v = qkv[:, :, :hd], qkv[:, :, hd:2 * hd], qkv[:, :, 2 * hd:]
    attn = jnp.einsum('bhdi,bhdj->bhij', k, q) * scale
    attn = jax.nn.softmax(attn, axis=-2)                       # softmax over keys (dim=-2)
    out = jnp.einsum('bhdi,bhij->bhdj', v, attn).reshape(B, C, N)
    y = jnp.einsum('oc,bcn->bon', w_proj, out) + b_proj[None, :, None]
    return y.reshape(B, C, H, W)


if __name__ == "__main__":
    # dim divisible by num_heads (=8 default); 16x16 spatial so N = 256 is lane-dense.
    B, C, H, W = 2, 64, 16, 16
    num_heads = 8

    key = jax.random.PRNGKey(0)
    kx, kq, kp, kb = jax.random.split(key, 4)
    x = jax.random.normal(kx, (B, C, H, W), dtype=jnp.float32)
    w_qkv = jax.random.normal(kq, (3 * C, C), dtype=jnp.float32) * (C ** -0.5)
    w_proj = jax.random.normal(kp, (C, C), dtype=jnp.float32) * (C ** -0.5)
    b_proj = jax.random.normal(kb, (C,), dtype=jnp.float32) * 0.1

    y = attention_pallas(x, w_qkv, w_proj, b_proj, num_heads=num_heads)
    y = jax.block_until_ready(y)

    y_ref = attention_reference(x, w_qkv, w_proj, b_proj, num_heads=num_heads)

    assert y.shape == (B, C, H, W), y.shape
    # Kernel uses bf16 MXU operands (f32 accumulation / f32 softmax math),
    # reference uses default-precision f32 einsums -> modest tolerance.
    max_err = float(jnp.max(jnp.abs(y - y_ref)))
    assert jnp.allclose(y, y_ref, atol=5e-2, rtol=5e-2), f"mismatch, max_err={max_err}"

    print("KERNEL_OK")
</pallas_src>

<mosaic_0001>
module attributes {stable_mosaic.version = 11 : i64} {
  func.func @_attention_kernel(%arg0: i32, %arg1: memref<1x64x256xbf16, #tpu.memory_space<vmem>>, %arg2: memref<192x64xbf16, #tpu.memory_space<vmem>>, %arg3: memref<64x64xbf16, #tpu.memory_space<vmem>>, %arg4: memref<64x1xf32, #tpu.memory_space<vmem>>, %arg5: memref<1x64x256xf32, #tpu.memory_space<vmem>>) attributes {dimension_semantics = [#tpu.dimension_semantics<parallel>], iteration_bounds = array<i64: 2>, scalar_prefetch = 0 : i64, scratch_operands = 0 : i64, tpu.core_type = #tpu.core_type<tc>, window_params = [{transform_indices = @transform_0, window_bounds = array<i64: 1, 64, 256>}, {pipeline_mode = #tpu.pipeline_mode<synchronous>, transform_indices = @transform_1, window_bounds = array<i64: 192, 64>}, {pipeline_mode = #tpu.pipeline_mode<synchronous>, transform_indices = @transform_2, window_bounds = array<i64: 64, 64>}, {pipeline_mode = #tpu.pipeline_mode<synchronous>, transform_indices = @transform_3, window_bounds = array<i64: 64, 1>}, {transform_indices = @transform_4, window_bounds = array<i64: 1, 64, 256>}]} {
    %c0 = arith.constant 0 : index
    %c0_0 = arith.constant 0 : index
    %c0_1 = arith.constant 0 : index
    %0 = vector.load %arg1[%c0, %c0_0, %c0_1] : memref<1x64x256xbf16, #tpu.memory_space<vmem>>, vector<1x64x256xbf16>
    %1 = vector.shape_cast %0 : vector<1x64x256xbf16> to vector<64x256xbf16>
    %c0_2 = arith.constant 0 : index
    %c0_3 = arith.constant 0 : index
    %2 = vector.load %arg2[%c0_2, %c0_3] : memref<192x64xbf16, #tpu.memory_space<vmem>>, vector<192x64xbf16>
    %cst = arith.constant dense<0.000000e+00> : vector<192x256xf32>
    %3 = tpu.matmul %2, %1, %cst {dimension_numbers = #tpu.dot_dimension_numbers<[1], [0], [0], [1], [0, 0, 1, 1], [], []>} : vector<192x64xbf16>, vector<64x256xbf16>, vector<192x256xf32> -> vector<192x256xf32>
    %4 = vector.shape_cast %3 : vector<192x256xf32> to vector<8x24x256xf32>
    %5 = vector.extract_strided_slice %4 {offsets = [0, 0, 0], sizes = [8, 8, 256], strides = [1, 1, 1]} : vector<8x24x256xf32> to vector<8x8x256xf32>
    %6 = vector.extract_strided_slice %4 {offsets = [0, 8, 0], sizes = [8, 8, 256], strides = [1, 1, 1]} : vector<8x24x256xf32> to vector<8x8x256xf32>
    %7 = vector.extract_strided_slice %4 {offsets = [0, 16, 0], sizes = [8, 8, 256], strides = [1, 1, 1]} : vector<8x24x256xf32> to vector<8x8x256xf32>
    %8 = arith.truncf %7 : vector<8x8x256xf32> to vector<8x8x256xbf16>
    %9 = tpu.transpose %6, [0, 2, 1] : vector<8x8x256xf32> -> vector<8x256x8xf32>
    %10 = arith.truncf %9 : vector<8x256x8xf32> to vector<8x256x8xbf16>
    %c0_4 = arith.constant 0 : index
    %c0_5 = arith.constant 0 : index
    %11 = vector.load %arg3[%c0_4, %c0_5] : memref<64x64xbf16, #tpu.memory_space<vmem>>, vector<64x64xbf16>
    %c0_6 = arith.constant 0 : index
    %c0_7 = arith.constant 0 : index
    %12 = vector.load %arg4[%c0_6, %c0_7] : memref<64x1xf32, #tpu.memory_space<vmem>>, vector<64x1xf32>
    %13 = arith.truncf %5 : vector<8x8x256xf32> to vector<8x8x256xbf16>
    "tpu.trace_start"() <{level = 10 : i32, message = "hid,hdj->hij"}> : () -> ()
    %cst_8 = arith.constant dense<0.000000e+00> : vector<8x256x256xf32>
    %14 = tpu.matmul %10, %13, %cst_8 {dimension_numbers = #tpu.dot_dimension_numbers<[2], [1], [1], [2], [0, 0, 0, 1, 1, 2], [0], [0]>} : vector<8x256x8xbf16>, vector<8x8x256xbf16>, vector<8x256x256xf32> -> vector<8x256x256xf32>
    "tpu.trace_stop"() : () -> ()
    %cst_9 = arith.constant dense<0xFF800000> : vector<8x256xf32>
    %15 = vector.multi_reduction <maximumf>, %14, %cst_9 [1] : vector<8x256x256xf32> to vector<8x256xf32>
    %16 = vector.shape_cast %15 : vector<8x256xf32> to vector<8x1x256xf32>
    %17 = vector.broadcast %16 : vector<8x1x256xf32> to vector<8x256x256xf32>
    %18 = arith.subf %14, %17 : vector<8x256x256xf32>
    %19 = math.exp %18 : vector<8x256x256xf32>
    %cst_10 = arith.constant dense<0.000000e+00> : vector<8x256xf32>
    %20 = vector.multi_reduction <add>, %19, %cst_10 [1] : vector<8x256x256xf32> to vector<8x256xf32>
    %21 = vector.shape_cast %20 : vector<8x256xf32> to vector<8x1x256xf32>
    %22 = arith.truncf %19 : vector<8x256x256xf32> to vector<8x256x256xbf16>
    "tpu.trace_start"() <{level = 10 : i32, message = "hdi,hij->hdj"}> : () -> ()
    %cst_11 = arith.constant dense<0.000000e+00> : vector<8x8x256xf32>
    %23 = tpu.matmul %8, %22, %cst_11 {dimension_numbers = #tpu.dot_dimension_numbers<[2], [1], [1], [2], [0, 0, 0, 1, 1, 2], [0], [0]>} : vector<8x8x256xbf16>, vector<8x256x256xbf16>, vector<8x8x256xf32> -> vector<8x8x256xf32>
    "tpu.trace_stop"() : () -> ()
    %24 = tpu.reciprocal %21 {approx = true} : vector<8x1x256xf32> -> vector<8x1x256xf32>
    %25 = vector.broadcast %24 : vector<8x1x256xf32> to vector<8x8x256xf32>
    %26 = arith.mulf %23, %25 : vector<8x8x256xf32>
    %27 = vector.shape_cast %26 : vector<8x8x256xf32> to vector<64x256xf32>
    %28 = arith.truncf %27 : vector<64x256xf32> to vector<64x256xbf16>
    %cst_12 = arith.constant dense<0.000000e+00> : vector<64x256xf32>
    %29 = tpu.matmul %11, %28, %cst_12 {dimension_numbers = #tpu.dot_dimension_numbers<[1], [0], [0], [1], [0, 0, 1, 1], [], []>} : vector<64x64xbf16>, vector<64x256xbf16>, vector<64x256xf32> -> vector<64x256xf32>
    %30 = vector.broadcast %12 : vector<64x1xf32> to vector<64x256xf32>
    %31 = arith.addf %29, %30 : vector<64x256xf32>
    %c0_13 = arith.constant 0 : index
    %c0_14 = arith.constant 0 : index
    %c0_15 = arith.constant 0 : index
    %32 = vector.load %arg5[%c0_13, %c0_14, %c0_15] : memref<1x64x256xf32, #tpu.memory_space<vmem>>, vector<1x64x256xf32>
    %33 = vector.shape_cast %32 : vector<1x64x256xf32> to vector<64x256xf32>
    %34 = vector.shape_cast %31 : vector<64x256xf32> to vector<1x64x256xf32>
    tpu.vector_store %arg5[%c0_13, %c0_14, %c0_15], %34 {strides = array<i32>} : memref<1x64x256xf32, #tpu.memory_space<vmem>>, vector<1x64x256xf32>,
    return
  }
  func.func @transform_0(%arg0: i32) -> (i32, i32, i32) {
    %c0_i32 = arith.constant 0 : i32
    %c0_i32_0 = arith.constant 0 : i32
    %c0_i32_1 = arith.constant 0 : i32
    return %arg0, %c0_i32, %c0_i32_0 : i32, i32, i32
  }
  func.func @transform_1(%arg0: i32) -> (i32, i32) {
    %c0_i32 = arith.constant 0 : i32
    %c0_i32_0 = arith.constant 0 : i32
    %c0_i32_1 = arith.constant 0 : i32
    return %c0_i32, %c0_i32_0 : i32, i32
  }
  func.func @transform_2(%arg0: i32) -> (i32, i32) {
    %c0_i32 = arith.constant 0 : i32
    %c0_i32_0 = arith.constant 0 : i32
    %c0_i32_1 = arith.constant 0 : i32
    return %c0_i32, %c0_i32_0 : i32, i32
  }
  func.func @transform_3(%arg0: i32) -> (i32, i32) {
    %c0_i32 = arith.constant 0 : i32
    %c0_i32_0 = arith.constant 0 : i32
    %c0_i32_1 = arith.constant 0 : i32
    return %c0_i32, %c0_i32_0 : i32, i32
  }
  func.func @transform_4(%arg0: i32) -> (i32, i32, i32) {
    %c0_i32 = arith.constant 0 : i32
    %c0_i32_0 = arith.constant 0 : i32
    %c0_i32_1 = arith.constant 0 : i32
    return %arg0, %c0_i32, %c0_i32_0 : i32, i32, i32
  }
}

</mosaic_0001>

<bundles_post_ra>
// kernel: tpu_custom_call.1
= control target key start
LH: loop header
LB: loop body
LE: loop exit
PB: predicated region body
PF: predicated region fallthrough
CT: control target
= control target key end

     0   :  { %9 = vsyncpa [#allocation3], 0  ;;  %s17045_s0 = inlined_call_operand.vmem [shape: bf16[2,64,256], index: 0, kind: input, shape index: {}]   ;;  %s17046_s1 = inlined_call_operand.vmem [shape: bf16[192,64], index: 1, kind: input, shape index: {}]   ;;  %s17047_s2 = inlined_call_operand.vmem [shape: bf16[64,64], index: 2, kind: input, shape index: {}]   ;;  %s17048_s3 = inlined_call_operand.vmem [shape: f32[64,1], index: 3, kind: input, shape index: {}]   ;;  %s17049_s4 = inlined_call_operand.hbm [shape: f32[2,64,256], index: 4, kind: output, shape index: {}]  }
   0x1   :  { %11 = vsyncpa [#allocation3 + $0x1], 0  ;;  %s8836_s15 = smov 0   ;;  %s8838_s16 = smov 0  }
   0x2   :  { %s8840_s17 = smov 0   ;;  %s8842_s18 = smov 0  }
   0x3 LB: > { %s8857_s19 = sadd.s32 4294967295, %s8805_s18   ;;  %s6766_s20 = sadd.s32 4294967294, %s8805_s18   ;;  %s8805_s18 = sphi %s8842_s18, %s21230_s18   ;;  %s8801_s17 = sphi %s8840_s17, %s21229_s17   ;;  %s8797_s16 = sphi %s8838_s16, %s21228_s16   ;;  %s8793_s15 = sphi %s8836_s15, %s21227_s15  }
   0x4   : > { %s8861_s21 = sadd.s32 1, %s8805_s18   ;;  %s113_s22 = sadd.s32 1, %s8801_s17 }
   0x5   : > { %s110_s23 = ssub.s32 %s8805_s18, %s8861_s21  ;;  %p123_p0 = scmp.ne.s32.totalorder %s8801_s17, %s8797_s16 }
   0x6   : > { %p111_p1 = scmp.eq.s32.totalorder %s110_s23, 0  ;;  %p124_p2 = scmp.eq.s32.totalorder %s8857_s19, 1 }
   0x7   : > { %p129_p3 = scmp.ne.s32.totalorder %s8797_s16, %s8793_s15  ;;  %p130_p4 = scmp.eq.s32.totalorder %s6766_s20, 1 }
   0x8   : > { %s8872_s24 = scalar_select %p111_p1, %s8801_s17, %s113_s22  }
   0x9   : > { %p8874_p5 = por %p124_p2, %p123_p0  ;;  %p8878_p6 = por %p130_p4, %p129_p3 }
   0xa   : > { %p6769_p7 = scmp.ge.s32.totalorder %s8805_s18, 1  ;;  %p165_p8 = scmp.lt.s32.totalorder %s8805_s18, 3 }
   0xc   : > { %p166_p9 = pnand %p6769_p7, %p165_p8 }
   0xe   : > { %169 = sbr.rel (%p166_p9) target bundleno = 2124 (0x84c), region = 36 }
  0x15   : > { %p191_p10 = scmp.lt.s32.totalorder %s8857_s19, 1  ;;  %v17050_v0 = vmov 0   ;;  %v7671_v9 = vld [vmem:[%s17046_s1] sm:$0xff]   ;;  %vm329_vm0 = vcmask 523264   ;;  %v7672_v10 = vld [vmem:[%s17046_s1 + $0x8] sm:$0xff]   ;;  %v7673_v11 = vld [vmem:[%s17046_s1 + $0x10] sm:$0xff]  }
  0x16   : > { %398 = vmatprep.mubr.bf16.mxu0 %v17050_v0  ;;  %1295 = vmatprep.mubr.bf16.mxu1 %v17050_v0  ;;  %v7674_v12 = vld [vmem:[%s17046_s1 + $0x18] sm:$0xff]   ;;  %v7675_v13 = vld [vmem:[%s17046_s1 + $0x20] sm:$0xff]   ;;  %v7676_v14 = vld [vmem:[%s17046_s1 + $0x28] sm:$0xff]   ;;  %vm1256_vm1 = vcmask 1043456   ;;  %vm1207_vm2 = vcmask 64512   ;;  %s188_s29 = sand.u32 1, %s8797_s16  }
  0x17   : > { %s192_s27 = scalar_select %p191_p10, %s8857_s19, 1  ;;  %v7677_v15 = vld [vmem:[%s17046_s1 + $0x30] sm:$0xff]   ;;  %v7678_v16 = vld [vmem:[%s17046_s1 + $0x38] sm:$0xff]   ;;  %v7679_v17 = vld [vmem:[%s17046_s1 + $0x40] sm:$0xff]  }
  0x18   : > { %v7680_v18 = vld [vmem:[%s17046_s1 + $0x48] sm:$0xff]   ;;  %v7681_v19 = vld [vmem:[%s17046_s1 + $0x50] sm:$0xff]   ;;  %v7682_v20 = vld [vmem:[%s17046_s1 + $0x58] sm:$0xff]   ;;  %s6770_s30 = sshll.u32 %s188_s29, 7  ;;  %s6955_s6 = sshll.u32 %s8857_s19, 11 }
  0x19   : > { %s6954_s28 = sshll.u32 %s192_s27, 6  ;;  %s16995_s10 = scalar_lea.hbm %s17049_s4, %s6955_s6 }
  0x1a   : > { %s195_s5 = scalar_lea.vmem %s17045_s0, %s6954_s28  ;;  %s17004_s19 = scalar_lea.sflag [#allocation3], %s188_s29 }
  0x1b   : > { %v7659_v1 = vld [vmem:[%s195_s5 + $0x4] ss:$8 sps:$4 sm:$0xff]   ;;  %v7661_v2 = vld [vmem:[%s195_s5] ss:$8 sps:$4 sm:$0xff]   ;;  %v7662_v3 = vld [vmem:[%s195_s5 + $0x14] ss:$8 sps:$4 sm:$0xff]  }
  0x1c   : > { %366 = vmatprep.subr.bf16.mxu0 %v7659_v1  ;;  %v7664_v4 = vld [vmem:[%s195_s5 + $0x10] ss:$8 sps:$4 sm:$0xff]   ;;  %v7665_v5 = vld [vmem:[%s195_s5 + $0x24] ss:$8 sps:$4 sm:$0xff]   ;;  %v7667_v6 = vld [vmem:[%s195_s5 + $0x20] ss:$8 sps:$4 sm:$0xff]  }
  0x1d   : > { %367 = vmatpush1.bf16.msra.mxu0 %v7661_v2  ;;  %v7668_v7 = vld [vmem:[%s195_s5 + $0x34] ss:$8 sps:$4 sm:$0xff]   ;;  %v7670_v8 = vld [vmem:[%s195_s5 + $0x30] ss:$8 sps:$4 sm:$0xff]   ;;  %s16975_s5 = scalar_lea.vmem [#allocation2], %s6770_s30  ;;  %s8808_s12 = smov [#allocation2]  }
  0x1e   : > { %368 = vmatprep.subr.bf16.mxu0 %v7662_v3  ;;  %s6704_s7 = sshll.u32 %s16975_s5, 4  ;;  %s8747_s13 = sshll.u32 %s8808_s12, 4  ;;  %s16997_s7 = int_to_ptr.vmem [resolvable:$true] %s6704_s7  ;;  %s8748_s13 = int_to_ptr.vmem [resolvable:$false] %s8747_s13 }
  0x1f   : > { %s8743_s11 = scalar_lea.vmem %s16997_s7, 2048  ;;  %s8749_s14 = scalar_lea.vmem %s8748_s13, 4096 }
  0x20   : > { %p8744_p11 = scmp.ne.s32.totalorder %s16997_s7, %s8743_s11  ;;  %p8750_p0 = scmp.lt.s32.totalorder %s16997_s7, %s8748_s13 }
  0x21   : > { %369 = vmatpush1.bf16.msra.mxu0 %v7664_v4  ;;  %p8751_p1 = scmp.lt.s32.totalorder %s8749_s14, %s8743_s11 }
  0x22   : > { %370 = vmatprep.subr.bf16.mxu0 %v7665_v5  ;;  %p8745_p12 = pnand %p8744_p11, %p8874_p5 }
  0x23   : > { %p8752_p2 = por %p8751_p1, %p8750_p0 }
  0x24   : > { %p8746_p13 = pneg %p8745_p12 }
  0x25   : > { %371 = vmatpush1.bf16.msra.mxu0 %v7667_v6 }
  0x26   : > { %372 = vmatprep.subr.bf16.mxu0 %v7668_v7  ;;  %p8753_p3 = pnand %p8752_p2, %p8746_p13 }
  0x29   : > { %373 = vmatpush1.bf16.msra.mxu0 %v7670_v8 }
  0x2c   : > { %6793 = vmatmul.mubr.msk.bf16.vlgmr.msra.gmra.mrb[0].mxu0 %vm329_vm0, %v7671_v9 }
  0x2d   : > { %408 = vmatprep.mubr.bf16.mxu0 %v17050_v0 }
  0x34   : > { %6794 = vmatmul.mubr.msk.bf16.gmra.mrb[4].mxu0 %vm329_vm0, %v7672_v10 }
  0x35   : > { %418 = vmatprep.mubr.bf16.mxu0 %v17050_v0 }
  0x3c   : > { %6795 = vmatmul.mubr.msk.bf16.gmra.mrb[8].mxu0 %vm329_vm0, %v7673_v11 }
  0x3d   : > { %428 = vmatprep.mubr.bf16.mxu0 %v17050_v0 }
  0x44   : > { %6796 = vmatmul.mubr.msk.bf16.gmra.mrb[12].mxu0 %vm329_vm0, %v7674_v12 }
  0x45   : > { %438 = vmatprep.mubr.bf16.mxu0 %v17050_v0 }
  0x4c   : > { %6797 = vmatmul.mubr.msk.bf16.gmra.mrb[16].mxu0 %vm329_vm0, %v7675_v13 }
  0x4d   : > { %448 = vmatprep.mubr.bf16.mxu0 %v17050_v0 }
  0x54   : > { %6798 = vmatmul.mubr.msk.bf16.gmra.mrb[20].mxu0 %vm329_vm0, %v7676_v14 }
  0x55   : > { %458 = vmatprep.mubr.bf16.mxu0 %v17050_v0 }
  0x5c   : > { %6799 = vmatmul.mubr.msk.bf16.gmra.mrb[24].mxu0 %vm329_vm0, %v7677_v15 }
  0x5d   : > { %468 = vmatprep.mubr.bf16.mxu0 %v17050_v0 }
  0x64   : > { %6800 = vmatmul.mubr.msk.bf16.gmra.mrb[28].mxu0 %vm329_vm0, %v7678_v16 }
  0x65   : > { %478 = vmatprep.mubr.bf16.mxu0 %v17050_v0 }
  0x6c   : > { %6801 = vmatmul.mubr.msk.bf16.gmra.mrb[32].mxu0 %vm329_vm0, %v7679_v17 }
  0x6d   : > { %488 = vmatprep.mubr.bf16.mxu0 %v17050_v0 }
  0x74   : > { %6802 = vmatmul.mubr.msk.bf16.gmra.mrb[36].mxu0 %vm329_vm0, %v7680_v18 }
  0x75   : > { %498 = vmatprep.mubr.bf16.mxu0 %v17050_v0 }
  0x7c   : > { %6803 = vmatmul.mubr.msk.bf16.gmra.mrb[40].mxu0 %vm329_vm0, %v7681_v19 }
  0x7d   : > { %508 = vmatprep.mubr.bf16.mxu0 %v17050_v0 }
  0x84   : > { %6804 = vmatmul.mubr.msk.bf16.gmra.mrb[44].mxu0 %vm329_vm0, %v7682_v20 }
  0x85   : > { %1542 = vmatprep.mubr.bf16.mxu0 %v17050_v0 }
  0xff   : > { %v400_v21 = vpop.f32.mrb[0].mxu0 }
 0x100   : > { %v402_v22 = vpop.f32.mrb[1].mxu0  ;;  %v1191_v23 = vpack.c.bf16 %v400_v21, %v400_v21 }
 0x101   : > { %v404_v24 = vpop.f32.mrb[2].mxu0  ;;  %v1192_v25 = vpack.c.bf16 %v402_v22, %v402_v22 }
 0x102   : > { %v406_v26 = vpop.f32.mrb[3].mxu0  ;;  %v1258_v27 = vsel %vm1256_vm1, %v1191_v23, 0 }
 0x103   : > { %6805 = vmatprep.subr.msk.bf16.mxu1 %vm1256_vm1, %v1192_v25 }
 0x104   : > { %1264 = vmatpush1.bf16.msra.mxu1 %v1258_v27 }
 0x107   : > { %v8953_v28 = vpop.f32.mrb[4].mxu0 }
 0x108   : > { %18181 = vst [vmem:[#allocation5_spill] sm:$0xff] %v8953_v28  ;;  %v8955_v29 = vpop.f32.mrb[5].mxu0 }
 0x109   : > { %18182 = vst [vmem:[#allocation6_spill] sm:$0xff] %v8955_v29  ;;  %v414_v30 = vpop.f32.mrb[6].mxu0 }
 0x10a   : > { %v1193_v31 = vpack.c.bf16 %v414_v30, %v414_v30  ;;  %v416_v32 = vpop.f32.mrb[7].mxu0 }
 0x10b   : > { %v1194_v33 = vpack.c.bf16 %v416_v32, %v416_v32 }
 0x10c   : > { %v1505_v34 = vsel %vm1256_vm1, %v1193_v31, 0 }
 0x10d   : > { %6822 = vmatprep.subr.msk.bf16.mxu0 %vm1256_vm1, %v1194_v33  ;;  %6956 = vmatprep.subr.msk.bf16.mxu1 %vm1256_vm1, %v1194_v33 }
 0x10e   : > { %1511 = vmatpush1.bf16.msra.mxu0 %v1505_v34 }
 0x10f   : > { %v420_v35 = vpop.f32.mrb[8].mxu0 }
 0x110   : > { %v422_v36 = vpop.f32.mrb[9].mxu0  ;;  %v7001_v37 = vpack.i.bf16 %v420_v35, %v404_v24 }
 0x111   : > { %v8960_v38 = vpop.f32.mrb[10].mxu0  ;;  %v7083_v39 = vpack.i.bf16 %v422_v36, %v406_v26 }
 0x112   : > { %18183 = vst [vmem:[#allocation7_spill] sm:$0xff] %v8960_v38  ;;  %7002 = vxpose.xlu0.b32.start.end [1/1] (short) %v7001_v37, 128  ;;  %v8962_v40 = vpop.f32.mrb[11].mxu0 }
 0x113   : > { %18184 = vst [vmem:[#allocation8_spill] sm:$0xff] %v8962_v40 }
 0x117   : > { %v8964_v41 = vpop.f32.mrb[12].mxu0 }
 0x118   : > { %v432_v42 = vpop.f32.mrb[13].mxu0 }
 0x119   : > { %v434_v43 = vpop.f32.mrb[14].mxu0  ;;  %v1196_v18 = vpack.c.bf16 %v432_v42, %v432_v42 }
 0x11a   : > { %v436_v44 = vpop.f32.mrb[15].mxu0 }
 0x11f   : > { %v8966_v45 = vpop.f32.mrb[16].mxu0 }
 0x120   : > { %18185 = vst [vmem:[#allocation9_spill] sm:$0xff] %v8966_v45  ;;  %v8968_v46 = vpop.f32.mrb[17].mxu0 }
 0x121   : > { %18186 = vst [vmem:[#allocation10_spill] sm:$0xff] %v8968_v46  ;;  %v444_v47 = vpop.f32.mrb[18].mxu0 }
 0x122   : > { %v446_v48 = vpop.f32.mrb[19].mxu0  ;;  %v1197_v8 = vpack.c.bf16 %v444_v47, %v444_v47 }
 0x123   : > { %v1198_v49 = vpack.c.bf16 %v446_v48, %v446_v48 }
 0x124   : > { %v1999_v19 = vsel %vm1256_vm1, %v1197_v8, 0 }
 0x125   : > { %6856 = vmatprep.subr.msk.bf16.mxu0 %vm1256_vm1, %v1198_v49 }
 0x127   : > { %v450_v50 = vpop.f32.mrb[20].mxu0 }
 0x128   : > { %v7165_v51 = vpack.i.bf16 %v450_v50, %v434_v43  ;;  %v452_v52 = vpop.f32.mrb[21].mxu0 }
 0x129   : > { %v7247_v53 = vpack.i.bf16 %v452_v52, %v436_v44  ;;  %v8971_v54 = vpop.f32.mrb[22].mxu0 }
 0x12a   : > { %18187 = vst [vmem:[#allocation11_spill] sm:$0xff] %v8971_v54  ;;  %7166 = vxpose.xlu1.b32.start.end [1/1] (short) %v7165_v51, 128  ;;  %v8973_v55 = vpop.f32.mrb[23].mxu0 }
 0x12b   : > { %18188 = vst [vmem:[#allocation12_spill] sm:$0xff] %v8973_v55 }
 0x12f   : > { %v8975_v56 = vpop.f32.mrb[24].mxu0 }
 0x130   : > { %v8977_v57 = vpop.f32.mrb[25].mxu0 }
 0x131   : > { %v464_v58 = vpop.f32.mrb[26].mxu0 }
 0x132   : > { %v466_v59 = vpop.f32.mrb[27].mxu0 }
 0x137   : > { %v8979_v60 = vpop.f32.mrb[28].mxu0 }
 0x138   : > { %18189 = vst [vmem:[#allocation13_spill] sm:$0xff] %v8979_v60  ;;  %v8981_v61 = vpop.f32.mrb[29].mxu0 }
 0x139   : > { %18190 = vst [vmem:[#allocation14_spill] sm:$0xff] %v8981_v61  ;;  %v8983_v62 = vpop.f32.mrb[30].mxu0 }
 0x13a   : > { %v476_v63 = vpop.f32.mrb[31].mxu0 }
 0x13b   : > { %v1202_v17 = vpack.c.bf16 %v476_v63, %v476_v63 }
 0x13f   : > { %v480_v1 = vpop.f32.mrb[32].mxu0 }
 0x140   : > { %v482_v2 = vpop.f32.mrb[33].mxu0  ;;  %v7329_v3 = vpack.i.bf16 %v480_v1, %v464_v58 }
 0x141   : > { %v7411_v4 = vpack.i.bf16 %v482_v2, %v466_v59  ;;  %v8985_v6 = vpop.f32.mrb[34].mxu0 }
 0x142   : > { %18191 = vst [vmem:[#allocation15_spill] sm:$0xff] %v8985_v6  ;;  %v8987_v7 = vpop.f32.mrb[35].mxu0 }
 0x143   : > { %18192 = vst [vmem:[#allocation16_spill] sm:$0xff] %v8987_v7 }
 0x14f   : > { %7084 = vxpose.xlu0.b32.start.end [1/1] (short) %v7083_v39, 128 }
 0x167   : > { %7248 = vxpose.xlu1.b32.start.end [1/1] (short) %v7247_v53, 128 }
 0x18c   : > { %7330 = vxpose.xlu0.b32.start.end [1/1] (short) %v7329_v3, 128 }
 0x192   : > { %v7003_v5 = vpop.trf.xlu0 }
 0x193   : > { %v7007_v9 = vunpack.i.h.bf16 %v7003_v5  ;;  %v7004_v10 = vunpack.i.l.bf16 %v7003_v5 }
 0x196   : > { %v7008_v11 = vpop.trf.xlu0 }
 0x197   : > { %v7012_v12 = vunpack.i.h.bf16 %v7008_v11  ;;  %v7009_v13 = vunpack.i.l.bf16 %v7008_v11 }
 0x199   : > { %v1063_v14 = vpack.c.bf16 %v7012_v12, %v7007_v9  ;;  %v1047_v15 = vpack.c.bf16 %v7009_v13, %v7004_v10 }
 0x19a   : > { %v7013_v16 = vpop.trf.xlu0 }
 0x19b   : > { %6806 = vmatmul.mubr.msk.bf16.vlgmr.msra.gmra.mrb[0].mxu1 %vm1207_vm2, %v1047_v15  ;;  %6823 = vmatmul.mubr.msk.bf16.vlgmr.msra.gmra.mrb[48].mxu0 %vm1207_vm2, %v1063_v14  ;;  %v7017_v20 = vunpack.i.h.bf16 %v7013_v16  ;;  %v7014_v21 = vunpack.i.l.bf16 %v7013_v16 }
 0x19c   : > { %6957 = vmatpush1.bf16.msra.mxu1 %v1505_v34  ;;  %2005 = vmatpush1.bf16.msra.mxu0 %v1999_v19 }
 0x19d   : > { %6839 = vmatprep.subr.msk.bf16.mxu1 %vm1256_vm1, %v1196_v18  ;;  %1305 = vmatprep.mubr.bf16.mxu1 %v17050_v0 }
 0x19e   : > { %v7018_v22 = vpop.trf.xlu0  ;;  %1552 = vmatprep.mubr.bf16.mxu0 %v17050_v0  ;;  %6890 = vmatprep.subr.msk.bf16.mxu0 %vm1256_vm1, %v1202_v17 }
 0x19f   : > { %v7022_v23 = vunpack.i.h.bf16 %v7018_v22  ;;  %v7019_v24 = vunpack.i.l.bf16 %v7018_v22 }
 0x1a1   : > { %v1048_v25 = vpack.c.bf16 %v7019_v24, %v7014_v21  ;;  %v1064_v26 = vpack.c.bf16 %v7022_v23, %v7017_v20 }
 0x1a2   : > { %v7023_v27 = vpop.trf.xlu0 }
 0x1a3   : > { %6807 = vmatmul.mubr.msk.bf16.gmra.mrb[4].mxu1 %vm1207_vm2, %v1048_v25  ;;  %6824 = vmatmul.mubr.msk.bf16.gmra.mrb[52].mxu0 %vm1207_vm2, %v1064_v26  ;;  %v7027_v30 = vunpack.i.h.bf16 %v7023_v27  ;;  %v7024_v31 = vunpack.i.l.bf16 %v7023_v27 }
 0x1a4   : > { %1315 = vmatprep.mubr.bf16.mxu1 %v17050_v0  ;;  %1562 = vmatprep.mubr.bf16.mxu0 %v17050_v0 }
 0x1a5   : > { %7412 = vxpose.xlu1.b32.start.end [1/1] (short) %v7411_v4, 128 }
 0x1a6   : > { %v7028_v32 = vpop.trf.xlu0 }
 0x1a7   : > { %v7032_v33 = vunpack.i.h.bf16 %v7028_v32  ;;  %v7029_v34 = vunpack.i.l.bf16 %v7028_v32 }
 0x1a9   : > { %v1049_v35 = vpack.c.bf16 %v7029_v34, %v7024_v31  ;;  %v1065_v36 = vpack.c.bf16 %v7032_v33, %v7027_v30 }
 0x1aa   : > { %v7033_v37 = vpop.trf.xlu0  ;;  %v7167_v39 = vpop.trf.xlu1 }
 0x1ab   : > { %6808 = vmatmul.mubr.msk.bf16.gmra.mrb[8].mxu1 %vm1207_vm2, %v1049_v35  ;;  %6825 = vmatmul.mubr.msk.bf16.gmra.mrb[56].mxu0 %vm1207_vm2, %v1065_v36  ;;  %v7037_v42 = vunpack.i.h.bf16 %v7033_v37  ;;  %v7034_v43 = vunpack.i.l.bf16 %v7033_v37  ;;  %v7171_v47 = vunpack.i.h.bf16 %v7167_v39  ;;  %v7168_v48 = vunpack.i.l.bf16 %v7167_v39 }
 0x1ac   : > { %1325 = vmatprep.mubr.bf16.mxu1 %v17050_v0  ;;  %1572 = vmatprep.mubr.bf16.mxu0 %v17050_v0 }
 0x1ae   : > { %v7038_v44 = vpop.trf.xlu0  ;;  %v7172_v49 = vpop.trf.xlu1 }
 0x1af   : > { %v7042_v50 = vunpack.i.h.bf16 %v7038_v44  ;;  %v7039_v51 = vunpack.i.l.bf16 %v7038_v44  ;;  %v7176_v52 = vunpack.i.h.bf16 %v7172_v49  ;;  %v7173_v53 = vunpack.i.l.bf16 %v7172_v49 }
 0x1b1   : > { %v1050_v58 = vpack.c.bf16 %v7039_v51, %v7034_v43  ;;  %v1066_v59 = vpack.c.bf16 %v7042_v50, %v7037_v42  ;;  %v9004_v1 = vpack.c.bf16 %v7173_v53, %v7168_v48  ;;  %v9006_v2 = vpack.c.bf16 %v7176_v52, %v7171_v47 }
 0x1b2   : > { %v7043_v63 = vpop.trf.xlu0  ;;  %v7177_v3 = vpop.trf.xlu1 }
 0x1b3   : > { %6809 = vmatmul.mubr.msk.bf16.gmra.mrb[12].mxu1 %vm1207_vm2, %v1050_v58  ;;  %6826 = vmatmul.mubr.msk.bf16.gmra.mrb[60].mxu0 %vm1207_vm2, %v1066_v59  ;;  %v7047_v4 = vunpack.i.h.bf16 %v7043_v63  ;;  %v7044_v5 = vunpack.i.l.bf16 %v7043_v63  ;;  %v7181_v9 = vunpack.i.h.bf16 %v7177_v3  ;;  %v7178_v10 = vunpack.i.l.bf16 %v7177_v3 }
 0x1b4   : > { %1335 = vmatprep.mubr.bf16.mxu1 %v17050_v0  ;;  %1582 = vmatprep.mubr.bf16.mxu0 %v17050_v0 }
 0x1b6   : > { %v7048_v8 = vpop.trf.xlu0  ;;  %v7182_v11 = vpop.trf.xlu1 }
 0x1b7   : > { %v7052_v12 = vunpack.i.h.bf16 %v7048_v8  ;;  %v7049_v13 = vunpack.i.l.bf16 %v7048_v8  ;;  %v7186_v14 = vunpack.i.h.bf16 %v7182_v11  ;;  %v7183_v15 = vunpack.i.l.bf16 %v7182_v11 }
 0x1b9   : > { %v1051_v16 = vpack.c.bf16 %v7049_v13, %v7044_v5  ;;  %v1067_v17 = vpack.c.bf16 %v7052_v12, %v7047_v4  ;;  %v9012_v20 = vpack.c.bf16 %v7186_v14, %v7181_v9  ;;  %v9014_v21 = vpack.c.bf16 %v7183_v15, %v7178_v10 }
 0x1ba   : > { %v7053_v18 = vpop.trf.xlu0  ;;  %v7187_v19 = vpop.trf.xlu1 }
 0x1bb   : > { %6810 = vmatmul.mubr.msk.bf16.gmra.mrb[16].mxu1 %vm1207_vm2, %v1051_v16  ;;  %6827 = vmatmul.mubr.msk.bf16.gmra.mrb[64].mxu0 %vm1207_vm2, %v1067_v17  ;;  %v7057_v22 = vunpack.i.h.bf16 %v7053_v18  ;;  %v7054_v23 = vunpack.i.l.bf16 %v7053_v18  ;;  %v7191_v25 = vunpack.i.h.bf16 %v7187_v19  ;;  %v7188_v26 = vunpack.i.l.bf16 %v7187_v19 }
 0x1bc   : > { %1345 = vmatprep.mubr.bf16.mxu1 %v17050_v0  ;;  %1592 = vmatprep.mubr.bf16.mxu0 %v17050_v0 }
 0x1be   : > { %v7058_v24 = vpop.trf.xlu0  ;;  %v7192_v27 = vpop.trf.xlu1 }
 0x1bf   : > { %v7062_v30 = vunpack.i.h.bf16 %v7058_v24  ;;  %v7059_v31 = vunpack.i.l.bf16 %v7058_v24  ;;  %v7196_v32 = vunpack.i.h.bf16 %v7192_v27  ;;  %v7193_v33 = vunpack.i.l.bf16 %v7192_v27 }
 0x1c1   : > { %v1052_v34 = vpack.c.bf16 %v7059_v31, %v7054_v23  ;;  %v1068_v35 = vpack.c.bf16 %v7062_v30, %v7057_v22  ;;  %v9020_v39 = vpack.c.bf16 %v7196_v32, %v7191_v25  ;;  %v9022_v42 = vpack.c.bf16 %v7193_v33, %v7188_v26 }
 0x1c2   : > { %v7063_v36 = vpop.trf.xlu0  ;;  %v7197_v37 = vpop.trf.xlu1 }
 0x1c3   : > { %6811 = vmatmul.mubr.msk.bf16.gmra.mrb[20].mxu1 %vm1207_vm2, %v1052_v34  ;;  %6828 = vmatmul.mubr.msk.bf16.gmra.mrb[68].mxu0 %vm1207_vm2, %v1068_v35  ;;  %v7067_v43 = vunpack.i.h.bf16 %v7063_v36  ;;  %v7064_v44 = vunpack.i.l.bf16 %v7063_v36  ;;  %v7201_v48 = vunpack.i.h.bf16 %v7197_v37  ;;  %v7198_v49 = vunpack.i.l.bf16 %v7197_v37 }
 0x1c4   : > { %1355 = vmatprep.mubr.bf16.mxu1 %v17050_v0  ;;  %1602 = vmatprep.mubr.bf16.mxu0 %v17050_v0 }
 0x1c6   : > { %v7068_v47 = vpop.trf.xlu0  ;;  %v7202_v50 = vpop.trf.xlu1 }
 0x1c7   : > { %v7072_v51 = vunpack.i.h.bf16 %v7068_v47  ;;  %v7069_v52 = vunpack.i.l.bf16 %v7068_v47  ;;  %v7206_v53 = vunpack.i.h.bf16 %v7202_v50  ;;  %v7203_v58 = vunpack.i.l.bf16 %v7202_v50 }
 0x1c9   : > { %v1053_v59 = vpack.c.bf16 %v7069_v52, %v7064_v44  ;;  %v1069_v63 = vpack.c.bf16 %v7072_v51, %v7067_v43  ;;  %v9028_v5 = vpack.c.bf16 %v7206_v53, %v7201_v48  ;;  %v9030_v8 = vpack.c.bf16 %v7203_v58, %v7198_v49  ;;  %v9050_v52 = vpop.f32.mrb[36].mxu0 }
 0x1ca   : > { %v7073_v3 = vpop.trf.xlu0  ;;  %v7207_v4 = vpop.trf.xlu1 }
 0x1cb   : > { %6812 = vmatmul.mubr.msk.bf16.gmra.mrb[24].mxu1 %vm1207_vm2, %v1053_v59  ;;  %6829 = vmatmul.mubr.msk.bf16.gmra.mrb[72].mxu0 %vm1207_vm2, %v1069_v63  ;;  %v7077_v9 = vunpack.i.h.bf16 %v7073_v3  ;;  %v7074_v10 = vunpack.i.l.bf16 %v7073_v3  ;;  %v7211_v12 = vunpack.i.h.bf16 %v7207_v4  ;;  %v7208_v13 = vunpack.i.l.bf16 %v7207_v4  ;;  %v9054_v53 = vpop.f32.mrb[37].mxu0 }
 0x1cc   : > { %1365 = vmatprep.mubr.bf16.mxu1 %v17050_v0  ;;  %1612 = vmatprep.mubr.bf16.mxu0 %v17050_v0  ;;  %v494_v58 = vpop.f32.mrb[38].mxu0 }
 0x1ce   : > { %v7078_v11 = vpop.trf.xlu0  ;;  %v7212_v14 = vpop.trf.xlu1 }
 0x1cf   : > { %v7082_v15 = vunpack.i.h.bf16 %v7078_v11  ;;  %v7079_v16 = vunpack.i.l.bf16 %v7078_v11  ;;  %v7216_v17 = vunpack.i.h.bf16 %v7212_v14  ;;  %v7213_v18 = vunpack.i.l.bf16 %v7212_v14 }
 0x1d1   : > { %v1054_v19 = vpack.c.bf16 %v7079_v16, %v7074_v10  ;;  %v1070_v22 = vpack.c.bf16 %v7082_v15, %v7077_v9  ;;  %v9036_v25 = vpack.c.bf16 %v7216_v17, %v7211_v12  ;;  %v9038_v26 = vpack.c.bf16 %v7213_v18, %v7208_v13  ;;  %v496_v13 = vpop.f32.mrb[39].mxu0 }
 0x1d2   : > { %v7085_v23 = vpop.trf.xlu0  ;;  %v7217_v24 = vpop.trf.xlu1 }
 0x1d3   : > { %6813 = vmatmul.mubr.msk.bf16.gmra.mrb[28].mxu1 %vm1207_vm2, %v1054_v19  ;;  %6830 = vmatmul.mubr.msk.bf16.gmra.mrb[76].mxu0 %vm1207_vm2, %v1070_v22  ;;  %v7089_v27 = vunpack.i.h.bf16 %v7085_v23  ;;  %v7086_v30 = vunpack.i.l.bf16 %v7085_v23  ;;  %v7221_v32 = vunpack.i.h.bf16 %v7217_v24  ;;  %v7218_v33 = vunpack.i.l.bf16 %v7217_v24  ;;  %v9056_v16 = vpop.f32.mrb[40].mxu0 }
 0x1d4   : > { %1375 = vmatprep.mubr.bf16.mxu1 %v17050_v0  ;;  %1622 = vmatprep.mubr.bf16.mxu0 %v17050_v0  ;;  %18193 = vst [vmem:[#allocation17_spill] sm:$0xff] %v9056_v16  ;;  %v9058_v19 = vpop.f32.mrb[41].mxu0 }
 0x1d5   : > { %18194 = vst [vmem:[#allocation18_spill] sm:$0xff] %v9058_v19 }
 0x1d6   : > { %v7090_v31 = vpop.trf.xlu0  ;;  %v7222_v34 = vpop.trf.xlu1 }
 0x1d7   : > { %v7094_v35 = vunpack.i.h.bf16 %v7090_v31  ;;  %v7091_v36 = vunpack.i.l.bf16 %v7090_v31  ;;  %v7226_v37 = vunpack.i.h.bf16 %v7222_v34  ;;  %v7223_v43 = vunpack.i.l.bf16 %v7222_v34 }
 0x1d9   : > { %v1055_v44 = vpack.c.bf16 %v7091_v36, %v7086_v30  ;;  %v1071_v47 = vpack.c.bf16 %v7094_v35, %v7089_v27  ;;  %v9044_v50 = vpack.c.bf16 %v7226_v37, %v7221_v32  ;;  %v9046_v51 = vpack.c.bf16 %v7223_v43, %v7218_v33  ;;  %v9068_v30 = vpop.f32.mrb[42].mxu0 }
 0x1da   : > { %v7095_v48 = vpop.trf.xlu0  ;;  %v7227_v49 = vpop.trf.xlu1 }
 0x1db   : > { %6814 = vmatmul.mubr.msk.bf16.gmra.mrb[32].mxu1 %vm1207_vm2, %v1055_v44  ;;  %6831 = vmatmul.mubr.msk.bf16.gmra.mrb[80].mxu0 %vm1207_vm2, %v1071_v47  ;;  %v7099_v59 = vunpack.i.h.bf16 %v7095_v48  ;;  %v7096_v63 = vunpack.i.l.bf16 %v7095_v48  ;;  %v7231_v4 = vunpack.i.h.bf16 %v7227_v49  ;;  %v7228_v9 = vunpack.i.l.bf16 %v7227_v49  ;;  %v9072_v31 = vpop.f32.mrb[43].mxu0 }
 0x1dc   : > { %1385 = vmatprep.mubr.bf16.mxu1 %v17050_v0  ;;  %1632 = vmatprep.mubr.bf16.mxu0 %v17050_v0  ;;  %v510_v32 = vpop.f32.mrb[44].mxu0 }
 0x1dd   : > { %v7493_v37 = vpack.i.bf16 %v510_v32, %v494_v58  ;;  %v512_v47 = vpop.f32.mrb[45].mxu0 }
 0x1de   : > { %v7100_v3 = vpop.trf.xlu0  ;;  %v7232_v10 = vpop.trf.xlu1 }
 0x1df   : > { %v7104_v11 = vunpack.i.h.bf16 %v7100_v3  ;;  %v7101_v12 = vunpack.i.l.bf16 %v7100_v3  ;;  %v7236_v14 = vunpack.i.h.bf16 %v7232_v10  ;;  %v7233_v15 = vunpack.i.l.bf16 %v7232_v10  ;;  %7494 = vxpose.xlu0.b32.start.end [1/1] (short) %v7493_v37, 128 }
 0x1e1   : > { %v1056_v17 = vpack.c.bf16 %v7101_v12, %v7096_v63  ;;  %v1072_v18 = vpack.c.bf16 %v7104_v11, %v7099_v59  ;;  %v9062_v24 = vpack.c.bf16 %v7236_v14, %v7231_v4  ;;  %v9064_v27 = vpack.c.bf16 %v7233_v15, %v7228_v9  ;;  %v9080_v4 = vpop.f32.mrb[46].mxu0 }
 0x1e2   : > { %v7105_v22 = vpop.trf.xlu0  ;;  %v9060_v23 = vpop.trf.xlu1  ;;  %v7575_v59 = vpack.i.bf16 %v512_v47, %v496_v13  ;;  %18195 = vst [vmem:[#allocation19_spill] sm:$0xff] %v9080_v4 }
 0x1e3   : > { %6815 = vmatmul.mubr.msk.bf16.gmra.mrb[36].mxu1 %vm1207_vm2, %v1056_v17  ;;  %6832 = vmatmul.mubr.msk.bf16.gmra.mrb[84].mxu0 %vm1207_vm2, %v1072_v18  ;;  %v7109_v33 = vunpack.i.h.bf16 %v7105_v22  ;;  %v7106_v34 = vunpack.i.l.bf16 %v7105_v22  ;;  %v9084_v58 = vpop.f32.mrb[47].mxu0 }
 0x1e4   : > { %1395 = vmatprep.mubr.bf16.mxu1 %v17050_v0  ;;  %1642 = vmatprep.mubr.bf16.mxu0 %v17050_v0  ;;  %18196 = vst [vmem:[#allocation20_spill] sm:$0xff] %v9084_v58 }
 0x1e5   : > { %7576 = vxpose.xlu1.b32.start.end [1/1] (short) %v7575_v59, 128 }
 0x1e6   : > { %v7110_v35 = vpop.trf.xlu0  ;;  %v9074_v36 = vpop.trf.xlu1 }
 0x1e7   : > { %v7114_v43 = vunpack.i.h.bf16 %v7110_v35  ;;  %v7111_v44 = vunpack.i.l.bf16 %v7110_v35 }
 0x1e9   : > { %v1057_v48 = vpack.c.bf16 %v7111_v44, %v7106_v34  ;;  %v1073_v49 = vpack.c.bf16 %v7114_v43, %v7109_v33 }
 0x1ea   : > { %v7115_v63 = vpop.trf.xlu0  ;;  %v9076_v3 = vpop.trf.xlu1 }
 0x1eb   : > { %6816 = vmatmul.mubr.msk.bf16.gmra.mrb[40].mxu1 %vm1207_vm2, %v1057_v48  ;;  %6833 = vmatmul.mubr.msk.bf16.gmra.mrb[88].mxu0 %vm1207_vm2, %v1073_v49  ;;  %v7119_v9 = vunpack.i.h.bf16 %v7115_v63  ;;  %v7116_v10 = vunpack.i.l.bf16 %v7115_v63 }
 0x1ec   : > { %1405 = vmatprep.mubr.bf16.mxu1 %v17050_v0  ;;  %1652 = vmatprep.mubr.bf16.mxu0 %v17050_v0 }
 0x1ee   : > { %v7120_v11 = vpop.trf.xlu0  ;;  %v9086_v12 = vpop.trf.xlu1 }
 0x1ef   : > { %v7124_v13 = vunpack.i.h.bf16 %v7120_v11  ;;  %v7121_v14 = vunpack.i.l.bf16 %v7120_v11 }
 0x1f1   : > { %v1058_v15 = vpack.c.bf16 %v7121_v14, %v7116_v10  ;;  %v1074_v17 = vpack.c.bf16 %v7124_v13, %v7119_v9 }
 0x1f2   : > { %v7125_v18 = vpop.trf.xlu0  ;;  %v9088_v22 = vpop.trf.xlu1 }
 0x1f3   : > { %6817 = vmatmul.mubr.msk.bf16.gmra.mrb[44].mxu1 %vm1207_vm2, %v1058_v15  ;;  %6834 = vmatmul.mubr.msk.bf16.gmra.mrb[92].mxu0 %vm1207_vm2, %v1074_v17  ;;  %v7129_v32 = vunpack.i.h.bf16 %v7125_v18  ;;  %v7126_v33 = vunpack.i.l.bf16 %v7125_v18 }
 0x1f4   : > { %1415 = vmatprep.mubr.bf16.mxu1 %v17050_v0  ;;  %1662 = vmatprep.mubr.bf16.mxu0 %v17050_v0 }
 0x1f6   : > { %v7130_v34 = vpop.trf.xlu0  ;;  %v9094_v35 = vpop.trf.xlu1 }
 0x1f7   : > { %v7134_v37 = vunpack.i.h.bf16 %v7130_v34  ;;  %v7131_v43 = vunpack.i.l.bf16 %v7130_v34 }
 0x1f9   : > { %v1059_v44 = vpack.c.bf16 %v7131_v43, %v7126_v33  ;;  %v1075_v47 = vpack.c.bf16 %v7134_v37, %v7129_v32 }
 0x1fa   : > { %v7135_v48 = vpop.trf.xlu0  ;;  %v7269_v49 = vpop.trf.xlu1 }
 0x1fb   : > { %6818 = vmatmul.mubr.msk.bf16.gmra.mrb[48].mxu1 %vm1207_vm2, %v1059_v44  ;;  %6835 = vmatmul.mubr.msk.bf16.gmra.mrb[96].mxu0 %vm1207_vm2, %v1075_v47  ;;  %v7139_v59 = vunpack.i.h.bf16 %v7135_v48  ;;  %v7136_v63 = vunpack.i.l.bf16 %v7135_v48  ;;  %v7273_v10 = vunpack.i.h.bf16 %v7269_v49  ;;  %v7270_v11 = vunpack.i.l.bf16 %v7269_v49 }
 0x1fc   : > { %1425 = vmatprep.mubr.bf16.mxu1 %v17050_v0  ;;  %1672 = vmatprep.mubr.bf16.mxu0 %v17050_v0 }
 0x1fe   : > { %v7140_v9 = vpop.trf.xlu0  ;;  %v7274_v13 = vpop.trf.xlu1 }
 0x1ff   : > { %v7144_v14 = vunpack.i.h.bf16 %v7140_v9  ;;  %v7141_v15 = vunpack.i.l.bf16 %v7140_v9  ;;  %v7278_v17 = vunpack.i.h.bf16 %v7274_v13  ;;  %v7275_v18 = vunpack.i.l.bf16 %v7274_v13 }
 0x201   : > { %v1060_v32 = vpack.c.bf16 %v7141_v15, %v7136_v63  ;;  %v1076_v33 = vpack.c.bf16 %v7144_v14, %v7139_v59  ;;  %v9100_v43 = vpack.c.bf16 %v7278_v17, %v7273_v10  ;;  %v9102_v44 = vpack.c.bf16 %v7275_v18, %v7270_v11 }
 0x202   : > { %v7145_v34 = vpop.trf.xlu0  ;;  %v7279_v37 = vpop.trf.xlu1 }
 0x203   : > { %6819 = vmatmul.mubr.msk.bf16.gmra.mrb[52].mxu1 %vm1207_vm2, %v1060_v32  ;;  %6836 = vmatmul.mubr.msk.bf16.gmra.mrb[100].mxu0 %vm1207_vm2, %v1076_v33  ;;  %v7149_v47 = vunpack.i.h.bf16 %v7145_v34  ;;  %v7146_v48 = vunpack.i.l.bf16 %v7145_v34  ;;  %v7283_v9 = vunpack.i.h.bf16 %v7279_v37  ;;  %v7280_v63 = vunpack.i.l.bf16 %v7279_v37 }
 0x204   : > { %1435 = vmatprep.mubr.bf16.mxu1 %v17050_v0  ;;  %1682 = vmatprep.mubr.bf16.mxu0 %v17050_v0  ;;  %v1201_v34 = vpack.c.bf16 %v8983_v62, %v8983_v62 }
 0x205   : > { %7658 = vset.pattern.permute.xlu1 %v17050_v0 }
 0x206   : > { %v7150_v49 = vpop.trf.xlu0  ;;  %v7284_v59 = vpop.trf.xlu1 }
 0x207   : > { %v7154_v13 = vunpack.i.h.bf16 %v7150_v49  ;;  %v7151_v14 = vunpack.i.l.bf16 %v7150_v49  ;;  %v7288_v10 = vunpack.i.h.bf16 %v7284_v59  ;;  %v7285_v15 = vunpack.i.l.bf16 %v7284_v59 }
 0x208   : > { %7657 = vset.pattern.permute.xlu0 %v17050_v0 }
 0x209   : > { %v1061_v11 = vpack.c.bf16 %v7151_v14, %v7146_v48  ;;  %v1077_v17 = vpack.c.bf16 %v7154_v13, %v7149_v47  ;;  %v9108_v16 = vpack.c.bf16 %v7288_v10, %v7283_v9  ;;  %v9110_v33 = vpack.c.bf16 %v7285_v15, %v7280_v63 }
 0x20a   : > { %v7155_v18 = vpop.trf.xlu0  ;;  %v7289_v32 = vpop.trf.xlu1  ;;  %v2493_v10 = vsel %vm1256_vm1, %v1201_v34, 0  ;;  %v1206_v15 = vpack.c.bf16 %v9072_v31, %v9072_v31 }
 0x20b   : > { %6820 = vmatmul.mubr.msk.bf16.gmra.mrb[56].mxu1 %vm1207_vm2, %v1061_v11  ;;  %6837 = vmatmul.mubr.msk.bf16.gmra.mrb[104].mxu0 %vm1207_vm2, %v1077_v17  ;;  %v7293_v47 = vunpack.i.h.bf16 %v7289_v32  ;;  %v7290_v48 = vunpack.i.l.bf16 %v7289_v32  ;;  %v7156_v9 = vunpack.i.l.bf16 %v7155_v18 }
 0x20c   : > { %1445 = vmatprep.mubr.bf16.mxu1 %v17050_v0  ;;  %2036 = vmatprep.mubr.bf16.mxu0 %v17050_v0 }
 0x20e   : > { %v7160_v37 = vpop.trf.xlu0  ;;  %v7294_v49 = vpop.trf.xlu1 }
 0x20f   : > { %v7161_v63 = vunpack.i.l.bf16 %v7160_v37  ;;  %v7298_v59 = vunpack.i.h.bf16 %v7294_v49  ;;  %v7295_v13 = vunpack.i.l.bf16 %v7294_v49  ;;  %v7164_v32 = vunpack.i.h.bf16 %v7160_v37 }
 0x211   : > { %v1062_v14 = vpack.c.bf16 %v7161_v63, %v7156_v9  ;;  %v9123_v62 = vpack.c.bf16 %v7298_v59, %v7293_v47  ;;  %v9125_v17 = vpack.c.bf16 %v7295_v13, %v7290_v48  ;;  %v1195_v47 = vpack.c.bf16 %v8964_v41, %v8964_v41 }
 0x212   : > { %v7299_v11 = vpop.trf.xlu1  ;;  %v7331_v4 = vpop.trf.xlu0  ;;  %v7159_v48 = vunpack.i.h.bf16 %v7155_v18  ;;  %v1200_v18 = vpack.c.bf16 %v8977_v57, %v8977_v57 }
 0x213   : > { %6821 = vmatmul.mubr.msk.bf16.gmra.mrb[60].mxu1 %vm1207_vm2, %v1062_v14  ;;  %6857 = vmatmul.mubr.msk.bf16.vlgmr.msra.gmra.mrb[108].mxu0 %vm1207_vm2, %v9006_v2  ;;  %v7303_v31 = vunpack.i.h.bf16 %v7299_v11  ;;  %v7300_v34 = vunpack.i.l.bf16 %v7299_v11  ;;  %v7335_v9 = vunpack.i.h.bf16 %v7331_v4  ;;  %v7332_v63 = vunpack.i.l.bf16 %v7331_v4 }
 0x214   : > { %2499 = vmatpush1.bf16.msra.mxu0 %v2493_v10  ;;  %1692 = vmatprep.mubr.bf16.mxu1 %v17050_v0  ;;  %v1078_v58 = vpack.c.bf16 %v7164_v32, %v7159_v48  ;;  %v1752_v4 = vsel %vm1256_vm1, %v1195_v47, 0  ;;  %v18197_v32 = vmov 0   ;;  %v1199_v48 = vpack.c.bf16 %v8975_v56, %v8975_v56 }
 0x215   : > { %2046 = vmatprep.mubr.bf16.mxu0 %v17050_v0  ;;  %6924 = vmatprep.subr.msk.bf16.mxu0 %vm1256_vm1, %v1206_v15 }
 0x216   : > { %v7304_v49 = vpop.trf.xlu1  ;;  %v7336_v59 = vpop.trf.xlu0  ;;  %v2246_v56 = vsel %vm1256_vm1, %v1199_v48, 0 }
 0x217   : > { %v7308_v13 = vunpack.i.h.bf16 %v7304_v49  ;;  %v7305_v2 = vunpack.i.l.bf16 %v7304_v49  ;;  %v7340_v14 = vunpack.i.h.bf16 %v7336_v59  ;;  %v7337_v10 = vunpack.i.l.bf16 %v7336_v59 }
 0x219   : > { %v9135_v37 = vpack.c.bf16 %v7308_v13, %v7303_v31  ;;  %v9137_v0 = vpack.c.bf16 %v7305_v2, %v7300_v34  ;;  %v9139_v6 = vpack.c.bf16 %v7337_v10, %v7332_v63  ;;  %v9141_v11 = vpack.c.bf16 %v7340_v14, %v7335_v9 }
 0x21a   : > { %v7309_v15 = vpop.trf.xlu1  ;;  %v7341_v41 = vpop.trf.xlu0 }
 0x21b   : > { %6838 = vmatmul.mubr.msk.bf16.vlgmr.msra.gmra.mrb[64].mxu1 %vm1207_vm2, %v1078_v58  ;;  %6858 = vmatmul.mubr.msk.bf16.gmra.mrb[112].mxu0 %vm1207_vm2, %v9012_v20  ;;  %v7313_v31 = vunpack.i.h.bf16 %v7309_v15  ;;  %v7310_v34 = vunpack.i.l.bf16 %v7309_v15  ;;  %v7345_v49 = vunpack.i.h.bf16 %v7341_v41  ;;  %v1204_v20 = vpack.c.bf16 %v9054_v53, %v9054_v53 }
 0x21c   : > { %1758 = vmatpush1.bf16.msra.mxu1 %v1752_v4  ;;  %1789 = vmatprep.mubr.bf16.mxu1 %v18197_v32  ;;  %v7342_v14 = vunpack.i.l.bf16 %v7341_v41 }
 0x21d   : > { %6873 = vmatprep.subr.msk.bf16.mxu1 %vm1256_vm1, %v1200_v18  ;;  %2056 = vmatprep.mubr.bf16.mxu0 %v18197_v32 }
 0x21e   : > { %v7314_v57 = vpop.trf.xlu1  ;;  %v7346_v58 = vpop.trf.xlu0 }
 0x21f   : > { %v7318_v9 = vunpack.i.h.bf16 %v7314_v57  ;;  %v7315_v47 = vunpack.i.l.bf16 %v7314_v57  ;;  %v7350_v63 = vunpack.i.h.bf16 %v7346_v58  ;;  %v7347_v10 = vunpack.i.l.bf16 %v7346_v58 }
 0x221   : > { %v9156_v59 = vpack.c.bf16 %v7318_v9, %v7313_v31  ;;  %v9158_v13 = vpack.c.bf16 %v7315_v47, %v7310_v34  ;;  %v9160_v18 = vpack.c.bf16 %v7350_v63, %v7345_v49  ;;  %v9170_v57 = vpack.c.bf16 %v7347_v10, %v7342_v14 }
 0x222   : > { %v7319_v2 = vpop.trf.xlu1  ;;  %v7351_v15 = vpop.trf.xlu0 }
 0x223   : > { %6840 = vmatmul.mubr.msk.bf16.vlgmr.msra.gmra.mrb[68].mxu1 %vm1207_vm2, %v9004_v1  ;;  %6859 = vmatmul.mubr.msk.bf16.gmra.mrb[116].mxu0 %vm1207_vm2, %v9020_v39  ;;  %v7323_v53 = vunpack.i.h.bf16 %v7319_v2  ;;  %v7320_v41 = vunpack.i.l.bf16 %v7319_v2  ;;  %v7355_v31 = vunpack.i.h.bf16 %v7351_v15  ;;  %v7352_v9 = vunpack.i.l.bf16 %v7351_v15 }
 0x224   : > { %2252 = vmatpush1.bf16.msra.mxu1 %v2246_v56  ;;  %1799 = vmatprep.mubr.bf16.mxu1 %v18197_v32 }
 0x225   : > { %2066 = vmatprep.mubr.bf16.mxu0 %v18197_v32  ;;  %6907 = vmatprep.subr.msk.bf16.mxu1 %vm1256_vm1, %v1204_v20 }
 0x226   : > { %v7324_v4 = vpop.trf.xlu1  ;;  %v7356_v34 = vpop.trf.xlu0 }
 0x227   : > { %v7328_v1 = vunpack.i.h.bf16 %v7324_v4  ;;  %v7325_v49 = vunpack.i.l.bf16 %v7324_v4  ;;  %v7360_v58 = vunpack.i.h.bf16 %v7356_v34  ;;  %v7357_v47 = vunpack.i.l.bf16 %v7356_v34 }
 0x229   : > { %v9172_v39 = vpack.c.bf16 %v7328_v1, %v7323_v53  ;;  %v9174_v48 = vpack.c.bf16 %v7325_v49, %v7320_v41  ;;  %v9176_v56 = vpack.c.bf16 %v7360_v58, %v7355_v31  ;;  %v9184_v14 = vpack.c.bf16 %v7357_v47, %v7352_v9 }
 0x22a   : > { %v7361_v63 = vpop.trf.xlu0 }
 0x22b   : > { %6841 = vmatmul.mubr.msk.bf16.gmra.mrb[72].mxu1 %vm1207_vm2, %v9014_v21  ;;  %6860 = vmatmul.mubr.msk.bf16.gmra.mrb[120].mxu0 %vm1207_vm2, %v9028_v5  ;;  %v7365_v20 = vunpack.i.h.bf16 %v7361_v63  ;;  %v7362_v53 = vunpack.i.l.bf16 %v7361_v63 }
 0x22c   : > { %1809 = vmatprep.mubr.bf16.mxu1 %v18197_v32  ;;  %2076 = vmatprep.mubr.bf16.mxu0 %v18197_v32 }
 0x22e   : > { %v7366_v2 = vpop.trf.xlu0 }
 0x22f   : > { %v7370_v10 = vunpack.i.h.bf16 %v7366_v2  ;;  %v7367_v41 = vunpack.i.l.bf16 %v7366_v2 }
 0x231   : > { %v9186_v15 = vpack.c.bf16 %v7370_v10, %v7365_v20  ;;  %v9194_v31 = vpack.c.bf16 %v7367_v41, %v7362_v53  ;;  %v7241_v41 = vunpack.i.h.bf16 %v9060_v23 }
 0x232   : > { %v7371_v4 = vpop.trf.xlu0 }
 0x233   : > { %6842 = vmatmul.mubr.msk.bf16.gmra.mrb[76].mxu1 %vm1207_vm2, %v9022_v42  ;;  %6861 = vmatmul.mubr.msk.bf16.gmra.mrb[124].mxu0 %vm1207_vm2, %v9036_v25  ;;  %v7375_v21 = vunpack.i.h.bf16 %v7371_v4  ;;  %v7372_v49 = vunpack.i.l.bf16 %v7371_v4 }
 0x234   : > { %1819 = vmatprep.mubr.bf16.mxu1 %v18197_v32  ;;  %2086 = vmatprep.mubr.bf16.mxu0 %v18197_v32 }
 0x236   : > { %v7376_v5 = vpop.trf.xlu0 }
 0x237   : > { %v7380_v34 = vunpack.i.h.bf16 %v7376_v5  ;;  %v7377_v58 = vunpack.i.l.bf16 %v7376_v5 }
 0x239   : > { %v9196_v1 = vpack.c.bf16 %v7380_v34, %v7375_v21  ;;  %v9204_v47 = vpack.c.bf16 %v7377_v58, %v7372_v49 }
 0x23a   : > { %v7381_v9 = vpop.trf.xlu0 }
 0x23b   : > { %6843 = vmatmul.mubr.msk.bf16.gmra.mrb[80].mxu1 %vm1207_vm2, %v9030_v8  ;;  %6862 = vmatmul.mubr.msk.bf16.gmra.mrb[128].mxu0 %vm1207_vm2, %v9044_v50  ;;  %v7385_v42 = vunpack.i.h.bf16 %v7381_v9  ;;  %v7382_v2 = vunpack.i.l.bf16 %v7381_v9  ;;  %v7246_v8 = vunpack.i.h.bf16 %v9074_v36 }
 0x23c   : > { %1829 = vmatprep.mubr.bf16.mxu1 %v18197_v32  ;;  %2096 = vmatprep.mubr.bf16.mxu0 %v18197_v32 }
 0x23d   : > { %v1102_v5 = vpack.c.bf16 %v7246_v8, %v7241_v41 }
 0x23e   : > { %v7386_v25 = vpop.trf.xlu0 }
 0x23f   : > { %v7390_v63 = vunpack.i.h.bf16 %v7386_v25  ;;  %v7387_v10 = vunpack.i.l.bf16 %v7386_v25  ;;  %v7258_v25 = vunpack.i.h.bf16 %v9086_v12 }
 0x241   : > { %v9206_v20 = vpack.c.bf16 %v7390_v63, %v7385_v42  ;;  %v9216_v21 = vpack.c.bf16 %v7387_v10, %v7382_v2  ;;  %v7413_v42 = vpop.trf.xlu1 }
 0x242   : > { %v7391_v53 = vpop.trf.xlu0  ;;  %v7417_v2 = vunpack.i.h.bf16 %v7413_v42 }
 0x243   : > { %6844 = vmatmul.mubr.msk.bf16.gmra.mrb[84].mxu1 %vm1207_vm2, %v9038_v26  ;;  %6863 = vmatmul.mubr.msk.bf16.gmra.mrb[132].mxu0 %vm1207_vm2, %v9062_v24  ;;  %v7395_v50 = vunpack.i.h.bf16 %v7391_v53  ;;  %v7392_v58 = vunpack.i.l.bf16 %v7391_v53  ;;  %v7253_v24 = vunpack.i.h.bf16 %v9076_v3 }
 0x244   : > { %1839 = vmatprep.mubr.bf16.mxu1 %v18197_v32  ;;  %2106 = vmatprep.mubr.bf16.mxu0 %v18197_v32 }
 0x245   : > { %v1103_v53 = vpack.c.bf16 %v7258_v25, %v7253_v24  ;;  %v7418_v41 = vpop.trf.xlu1 }
 0x246   : > { %v7396_v4 = vpop.trf.xlu0  ;;  %v7422_v8 = vunpack.i.h.bf16 %v7418_v41 }
 0x247   : > { %v7400_v34 = vunpack.i.h.bf16 %v7396_v4  ;;  %v7397_v9 = vunpack.i.l.bf16 %v7396_v4  ;;  %v7268_v4 = vunpack.i.h.bf16 %v9094_v35 }
 0x249   : > { %v9218_v49 = vpack.c.bf16 %v7400_v34, %v7395_v50  ;;  %v9231_v10 = vpack.c.bf16 %v7397_v9, %v7392_v58  ;;  %v9233_v50 = vpack.c.bf16 %v7422_v8, %v7417_v2  ;;  %v7238_v34 = vunpack.i.l.bf16 %v9060_v23 }
 0x24a   : > { %v9220_v26 = vpop.trf.xlu0  ;;  %v7243_v58 = vunpack.i.l.bf16 %v9074_v36  ;;  %v7419_v8 = vunpack.i.l.bf16 %v7418_v41  ;;  %v7250_v23 = vunpack.i.l.bf16 %v9076_v3  ;;  %v7255_v36 = vunpack.i.l.bf16 %v9086_v12 }
 0x24b   : > { %6845 = vmatmul.mubr.msk.bf16.gmra.mrb[88].mxu1 %vm1207_vm2, %v9046_v51  ;;  %6864 = vmatmul.mubr.msk.bf16.gmra.mrb[136].mxu0 %vm1207_vm2, %v1102_v5  ;;  %v7263_v51 = vunpack.i.h.bf16 %v9088_v22  ;;  %v9240_v5 = vpop.trf.xlu1  ;;  %v7260_v3 = vunpack.i.l.bf16 %v9088_v22  ;;  %v7265_v12 = vunpack.i.l.bf16 %v9094_v35 }
 0x24c   : > { %1849 = vmatprep.mubr.bf16.mxu1 %v18197_v32  ;;  %2116 = vmatprep.mubr.bf16.mxu0 %v18197_v32  ;;  %v7427_v9 = vunpack.i.h.bf16 %v9240_v5  ;;  %v1086_v2 = vpack.c.bf16 %v7243_v58, %v7238_v34  ;;  %v1087_v34 = vpack.c.bf16 %v7255_v36, %v7250_v23 }
 0x24d   : > { %v1104_v24 = vpack.c.bf16 %v7268_v4, %v7263_v51 }
 0x24e   : > { %v9229_v63 = vpop.trf.xlu0 }
 0x24f   : > { %v9247_v25 = vpop.trf.xlu1 }
 0x253   : > { %6846 = vmatmul.mubr.msk.bf16.gmra.mrb[92].mxu1 %vm1207_vm2, %v9064_v27  ;;  %6865 = vmatmul.mubr.msk.bf16.gmra.mrb[140].mxu0 %vm1207_vm2, %v1103_v53  ;;  %v7432_v27 = vunpack.i.h.bf16 %v9247_v25  ;;  %v7414_v53 = vunpack.i.l.bf16 %v7413_v42  ;;  %v9254_v7 = vpop.trf.xlu1 }
 0x254   : > { %1859 = vmatprep.mubr.bf16.mxu1 %v18197_v32  ;;  %2126 = vmatprep.mubr.bf16.mxu0 %v18197_v32  ;;  %v7437_v51 = vunpack.i.h.bf16 %v9254_v7 }
 0x255   : > { %v9250_v19 = vpack.c.bf16 %v7432_v27, %v7427_v9  ;;  %v9261_v42 = vpack.c.bf16 %v7419_v8, %v7414_v53  ;;  %v1088_v27 = vpack.c.bf16 %v7265_v12, %v7260_v3 }
 0x257   : > { %v9263_v41 = vpop.trf.xlu1 }
 0x258   : > { %v7442_v4 = vunpack.i.h.bf16 %v9263_v41 }
 0x25a   : > { %v9266_v58 = vpack.c.bf16 %v7442_v4, %v7437_v51 }
 0x25b   : > { %6847 = vmatmul.mubr.msk.bf16.gmra.mrb[96].mxu1 %vm1207_vm2, %v1086_v2  ;;  %6866 = vmatmul.mubr.msk.bf16.gmra.mrb[144].mxu0 %vm1207_vm2, %v1104_v24  ;;  %v9271_v9 = vpop.trf.xlu1 }
 0x25c   : > { %1869 = vmatprep.mubr.bf16.mxu1 %v18197_v32  ;;  %2136 = vmatprep.mubr.bf16.mxu0 %v18197_v32 }
 0x25f   : > { %v9277_v24 = vpop.trf.xlu1 }
 0x263   : > { %6848 = vmatmul.mubr.msk.bf16.gmra.mrb[100].mxu1 %vm1207_vm2, %v1087_v34  ;;  %6867 = vmatmul.mubr.msk.bf16.gmra.mrb[148].mxu0 %vm1207_vm2, %v9100_v43 }
 0x264   : > { %1879 = vmatprep.mubr.bf16.mxu1 %v18197_v32  ;;  %2146 = vmatprep.mubr.bf16.mxu0 %v18197_v32 }
 0x26b   : > { %6849 = vmatmul.mubr.msk.bf16.gmra.mrb[104].mxu1 %vm1207_vm2, %v1088_v27  ;;  %6868 = vmatmul.mubr.msk.bf16.gmra.mrb[152].mxu0 %vm1207_vm2, %v9108_v16 }
 0x26c   : > { %1889 = vmatprep.mubr.bf16.mxu1 %v18197_v32  ;;  %2156 = vmatprep.mubr.bf16.mxu0 %v18197_v32 }
 0x26e   : > { %v9284_v43 = vpop.f32.mrb[0].mxu1  ;;  %v9286_v2 = vpop.f32.mrb[48].mxu0 }
 0x26f   : > { %18198 = vst [vmem:[#allocation21_spill] sm:$0xff] %v9286_v2  ;;  %v9288_v53 = vpop.f32.mrb[1].mxu1  ;;  %v9290_v22 = vpop.f32.mrb[49].mxu0 }
 0x270   : > { %18199 = vst [vmem:[#allocation22_spill] sm:$0xff] %v9290_v22  ;;  %v9292_v35 = vpop.f32.mrb[2].mxu1  ;;  %v9294_v8 = vpop.f32.mrb[50].mxu0 }
 0x271   : > { %18200 = vst [vmem:[#allocation23_spill] sm:$0xff] %v9294_v8  ;;  %v3185_v23 = vmax.f32 %v9284_v43, %v9292_v35  ;;  %v3259_v16 = vmax.f32 %v9286_v2, %v9294_v8  ;;  %v9300_v36 = vpop.f32.mrb[3].mxu1  ;;  %v9302_v51 = vpop.f32.mrb[51].mxu0 }
 0x272   : > { %18201 = vst [vmem:[#allocation24_spill] sm:$0xff] %v9302_v51  ;;  %v3222_v4 = vmax.f32 %v9288_v53, %v9300_v36  ;;  %v3296_v34 = vmax.f32 %v9290_v22, %v9302_v51 }
 0x273   : > { %6850 = vmatmul.mubr.msk.bf16.gmra.mrb[108].mxu1 %vm1207_vm2, %v9102_v44  ;;  %6869 = vmatmul.mubr.msk.bf16.gmra.mrb[156].mxu0 %vm1207_vm2, %v9123_v62 }
 0x274   : > { %1899 = vmatprep.mubr.bf16.mxu1 %v18197_v32  ;;  %2166 = vmatprep.mubr.bf16.mxu0 %v18197_v32 }
 0x276   : > { %v9314_v3 = vpop.f32.mrb[4].mxu1  ;;  %v9316_v12 = vpop.f32.mrb[52].mxu0 }
 0x277   : > { %18202 = vst [vmem:[#allocation25_spill] sm:$0xff] %v9316_v12  ;;  %v3186_v27 = vmax.f32 %v3185_v23, %v9314_v3  ;;  %v3260_v60 = vmax.f32 %v3259_v16, %v9316_v12  ;;  %v9320_v55 = vpop.f32.mrb[5].mxu1  ;;  %v9322_v54 = vpop.f32.mrb[53].mxu0 }
 0x278   : > { %18203 = vst [vmem:[#allocation26_spill] sm:$0xff] %v9322_v54  ;;  %v3223_v44 = vmax.f32 %v3222_v4, %v9320_v55  ;;  %v3297_v62 = vmax.f32 %v3296_v34, %v9322_v54  ;;  %v9326_v38 = vpop.f32.mrb[6].mxu1  ;;  %v9328_v61 = vpop.f32.mrb[54].mxu0 }
 0x279   : > { %18204 = vst [vmem:[#allocation27_spill] sm:$0xff] %v9328_v61  ;;  %v3187_v46 = vmax.f32 %v3186_v27, %v9326_v38  ;;  %v3261_v45 = vmax.f32 %v3260_v60, %v9328_v61  ;;  %v9332_v40 = vpop.f32.mrb[7].mxu1  ;;  %v9334_v23 = vpop.f32.mrb[55].mxu0 }
 0x27a   : > { %18205 = vst [vmem:[#allocation28_spill] sm:$0xff] %v9334_v23  ;;  %v3224_v16 = vmax.f32 %v3223_v44, %v9332_v40  ;;  %v3298_v29 = vmax.f32 %v3297_v62, %v9334_v23 }
 0x27b   : > { %6851 = vmatmul.mubr.msk.bf16.gmra.mrb[112].mxu1 %vm1207_vm2, %v9110_v33  ;;  %6870 = vmatmul.mubr.msk.bf16.gmra.mrb[160].mxu0 %vm1207_vm2, %v9135_v37 }
 0x27c   : > { %1909 = vmatprep.mubr.bf16.mxu1 %v18197_v32  ;;  %2176 = vmatprep.mubr.bf16.mxu0 %v18197_v32 }
 0x27e   : > { %v9344_v4 = vpop.f32.mrb[8].mxu1  ;;  %v9346_v60 = vpop.f32.mrb[56].mxu0 }
 0x27f   : > { %18206 = vst [vmem:[#allocation29_spill] sm:$0xff] %v9346_v60  ;;  %v3188_v34 = vmax.f32 %v3187_v46, %v9344_v4  ;;  %v3262_v27 = vmax.f32 %v3261_v45, %v9346_v60  ;;  %v9350_v44 = vpop.f32.mrb[9].mxu1  ;;  %v9352_v62 = vpop.f32.mrb[57].mxu0 }
 0x280   : > { %18207 = vst [vmem:[#allocation30_spill] sm:$0xff] %v9352_v62  ;;  %v3225_v33 = vmax.f32 %v3224_v16, %v9350_v44  ;;  %v3299_v37 = vmax.f32 %v3298_v29, %v9352_v62  ;;  %v9356_v28 = vpop.f32.mrb[10].mxu1  ;;  %v9358_v23 = vpop.f32.mrb[58].mxu0 }
 0x281   : > { %18208 = vst [vmem:[#allocation31_spill] sm:$0xff] %v9358_v23  ;;  %v3189_v54 = vmax.f32 %v3188_v34, %v9356_v28  ;;  %v3263_v51 = vmax.f32 %v3262_v27, %v9358_v23  ;;  %v9362_v22 = vpop.f32.mrb[11].mxu1  ;;  %v9364_v46 = vpop.f32.mrb[59].mxu0 }
 0x282   : > { %18209 = vst [vmem:[#allocation32_spill] sm:$0xff] %v9364_v46  ;;  %v3226_v45 = vmax.f32 %v3225_v33, %v9362_v22  ;;  %v3300_v60 = vmax.f32 %v3299_v37, %v9364_v46 }
 0x283   : > { %6852 = vmatmul.mubr.msk.bf16.gmra.mrb[116].mxu1 %vm1207_vm2, %v9125_v17  ;;  %6871 = vmatmul.mubr.msk.bf16.gmra.mrb[164].mxu0 %vm1207_vm2, %v9156_v59 }
 0x284   : > { %1919 = vmatprep.mubr.bf16.mxu1 %v18197_v32  ;;  %2186 = vmatprep.mubr.bf16.mxu0 %v18197_v32 }
 0x286   : > { %v9374_v29 = vpop.f32.mrb[12].mxu1  ;;  %v9376_v16 = vpop.f32.mrb[60].mxu0 }
 0x287   : > { %18210 = vst [vmem:[#allocation33_spill] sm:$0xff] %v9376_v16  ;;  %v3190_v34 = vmax.f32 %v3189_v54, %v9374_v29  ;;  %v3264_v27 = vmax.f32 %v3263_v51, %v9376_v16  ;;  %v9380_v33 = vpop.f32.mrb[13].mxu1  ;;  %v9382_v37 = vpop.f32.mrb[61].mxu0 }
 0x288   : > { %18211 = vst [vmem:[#allocation34_spill] sm:$0xff] %v9380_v33  ;;  %18212 = vst [vmem:[#allocation35_spill] sm:$0xff] %v9382_v37  ;;  %v3227_v17 = vmax.f32 %v3226_v45, %v9380_v33  ;;  %v3301_v59 = vmax.f32 %v3300_v60, %v9382_v37  ;;  %v9386_v46 = vpop.f32.mrb[14].mxu1  ;;  %v9388_v62 = vpop.f32.mrb[62].mxu0 }
 0x289   : > { %18213 = vst [vmem:[#allocation36_spill] sm:$0xff] %v9388_v62  ;;  %v3191_v23 = vmax.f32 %v3190_v34, %v9386_v46  ;;  %v3265_v61 = vmax.f32 %v3264_v27, %v9388_v62  ;;  %v9392_v12 = vpop.f32.mrb[15].mxu1  ;;  %v9394_v54 = vpop.f32.mrb[63].mxu0  ;;  %v1205_v34 = vpack.c.bf16 %v9068_v30, %v9068_v30 }
 0x28a   : > { %18214 = vst [vmem:[#allocation37_spill] sm:$0xff] %v9392_v12  ;;  %18215 = vst [vmem:[#allocation38_spill] sm:$0xff] %v9394_v54  ;;  %v3228_v51 = vmax.f32 %v3227_v17, %v9392_v12  ;;  %v3302_v16 = vmax.f32 %v3301_v59, %v9394_v54 }
 0x28b   : > { %6853 = vmatmul.mubr.msk.bf16.gmra.mrb[120].mxu1 %vm1207_vm2, %v9137_v0  ;;  %6872 = vmatmul.mubr.msk.bf16.gmra.mrb[168].mxu0 %vm1207_vm2, %v9172_v39 }
 0x28c   : > { %1929 = vmatprep.mubr.bf16.mxu1 %v18197_v32  ;;  %2530 = vmatprep.mubr.bf16.mxu0 %v18197_v32 }
 0x28e   : > { %v9404_v60 = vpop.f32.mrb[16].mxu1  ;;  %v9406_v45 = vpop.f32.mrb[64].mxu0 }
 0x28f   : > { %18216 = vst [vmem:[#allocation39_spill] sm:$0xff] %v9406_v45  ;;  %v3192_v27 = vmax.f32 %v3191_v23, %v9404_v60  ;;  %v3266_v17 = vmax.f32 %v3265_v61, %v9406_v45  ;;  %v9412_v59 = vpop.f32.mrb[17].mxu1  ;;  %v9414_v0 = vpop.f32.mrb[65].mxu0 }
 0x290   : > { %18217 = vst [vmem:[#allocation40_spill] sm:$0xff] %v9412_v59  ;;  %18218 = vst [vmem:[#allocation41_spill] sm:$0xff] %v9414_v0  ;;  %v3229_v39 = vmax.f32 %v3228_v51, %v9412_v59  ;;  %v3303_v54 = vmax.f32 %v3302_v16, %v9414_v0  ;;  %v9418_v37 = vpop.f32.mrb[18].mxu1  ;;  %v9420_v62 = vpop.f32.mrb[66].mxu0  ;;  %v2987_v16 = vsel %vm1256_vm1, %v1205_v34, 0 }
 0x291   : > { %18219 = vst [vmem:[#allocation42_spill] sm:$0xff] %v9420_v62  ;;  %v3193_v8 = vmax.f32 %v3192_v27, %v9418_v37  ;;  %v3267_v30 = vmax.f32 %v3266_v17, %v9420_v62  ;;  %v9424_v2 = vpop.f32.mrb[19].mxu1  ;;  %v9426_v23 = vpop.f32.mrb[67].mxu0 }
 0x292   : > { %18220 = vst [vmem:[#allocation43_spill] sm:$0xff] %v9424_v2  ;;  %18221 = vst [vmem:[#allocation44_spill] sm:$0xff] %v9426_v23  ;;  %v3230_v61 = vmax.f32 %v3229_v39, %v9424_v2  ;;  %v3304_v45 = vmax.f32 %v3303_v54, %v9426_v23 }
 0x293   : > { %6854 = vmatmul.mubr.msk.bf16.gmra.mrb[124].mxu1 %vm1207_vm2, %v9158_v13  ;;  %6891 = vmatmul.mubr.msk.bf16.vlgmr.msra.gmra.mrb[172].mxu0 %vm1207_vm2, %v9141_v11 }
 0x294   : > { %2993 = vmatpush1.bf16.msra.mxu0 %v2987_v16  ;;  %1939 = vmatprep.mubr.bf16.mxu1 %v18197_v32 }
 0x295   : > { %2540 = vmatprep.mubr.bf16.mxu0 %v18197_v32 }
 0x296   : > { %v9437_v51 = vpop.f32.mrb[20].mxu1  ;;  %v9439_v27 = vpop.f32.mrb[68].mxu0 }
 0x297   : > { %18222 = vst [vmem:[#allocation45_spill] sm:$0xff] %v9439_v27  ;;  %v9441_v17 = vpop.f32.mrb[21].mxu1  ;;  %v9443_v54 = vpop.f32.mrb[69].mxu0  ;;  %v3194_v13 = vmax.f32 %v3193_v8, %v9437_v51  ;;  %v3268_v39 = vmax.f32 %v3267_v30, %v9439_v27 }
 0x298   : > { %18223 = vst [vmem:[#allocation46_spill] sm:$0xff] %v9441_v17  ;;  %18224 = vst [vmem:[#allocation47_spill] sm:$0xff] %v9443_v54  ;;  %v9447_v11 = vpop.f32.mrb[22].mxu1  ;;  %v9449_v34 = vpop.f32.mrb[70].mxu0  ;;  %v3231_v16 = vmax.f32 %v3230_v61, %v9441_v17  ;;  %v3305_v23 = vmax.f32 %v3304_v45, %v9443_v54 }
 0x299   : > { %18225 = vst [vmem:[#allocation48_spill] sm:$0xff] %v9449_v34  ;;  %v9453_v0 = vpop.f32.mrb[23].mxu1  ;;  %v9455_v62 = vpop.f32.mrb[71].mxu0  ;;  %v3195_v2 = vmax.f32 %v3194_v13, %v9447_v11  ;;  %v3269_v59 = vmax.f32 %v3268_v39, %v9449_v34  ;;  %v1203_v13 = vpack.c.bf16 %v9050_v52, %v9050_v52 }
 0x29a   : > { %18226 = vst [vmem:[#allocation49_spill] sm:$0xff] %v9453_v0  ;;  %18227 = vst [vmem:[#allocation50_spill] sm:$0xff] %v9455_v62  ;;  %v3232_v8 = vmax.f32 %v3231_v16, %v9453_v0  ;;  %v3306_v30 = vmax.f32 %v3305_v23, %v9455_v62 }
 0x29b   : > { %6855 = vmatmul.mubr.msk.bf16.gmra.mrb[128].mxu1 %vm1207_vm2, %v9174_v48  ;;  %6892 = vmatmul.mubr.msk.bf16.gmra.mrb[176].mxu0 %vm1207_vm2, %v9160_v18 }
 0x29c   : > { %2283 = vmatprep.mubr.bf16.mxu1 %v18197_v32  ;;  %2550 = vmatprep.mubr.bf16.mxu0 %v18197_v32 }
 0x29e   : > { %v9467_v45 = vpop.f32.mrb[24].mxu1  ;;  %v9469_v61 = vpop.f32.mrb[72].mxu0 }
 0x29f   : > { %18228 = vst [vmem:[#allocation51_spill] sm:$0xff] %v9469_v61  ;;  %v3196_v39 = vmax.f32 %v3195_v2, %v9467_v45  ;;  %v3270_v23 = vmax.f32 %v3269_v59, %v9469_v61  ;;  %v9475_v16 = vpop.f32.mrb[25].mxu1  ;;  %v9477_v48 = vpop.f32.mrb[73].mxu0 }
 0x2a0   : > { %18229 = vst [vmem:[#allocation52_spill] sm:$0xff] %v9475_v16  ;;  %18230 = vst [vmem:[#allocation53_spill] sm:$0xff] %v9477_v48  ;;  %v3233_v18 = vmax.f32 %v3232_v8, %v9475_v16  ;;  %v3307_v62 = vmax.f32 %v3306_v30, %v9477_v48  ;;  %v9481_v54 = vpop.f32.mrb[26].mxu1  ;;  %v9483_v34 = vpop.f32.mrb[74].mxu0  ;;  %v2740_v8 = vsel %vm1256_vm1, %v1203_v13, 0  ;;  %v7424_v30 = vunpack.i.l.bf16 %v9240_v5 }
 0x2a1   : > { %18231 = vst [vmem:[#allocation54_spill] sm:$0xff] %v9483_v34  ;;  %v3197_v27 = vmax.f32 %v3196_v39, %v9481_v54  ;;  %v3271_v52 = vmax.f32 %v3270_v23, %v9483_v34  ;;  %v9487_v0 = vpop.f32.mrb[27].mxu1  ;;  %v9489_v2 = vpop.f32.mrb[75].mxu0  ;;  %v7429_v39 = vunpack.i.l.bf16 %v9247_v25 }
 0x2a2   : > { %18232 = vst [vmem:[#allocation55_spill] sm:$0xff] %v9487_v0  ;;  %18233 = vst [vmem:[#allocation56_spill] sm:$0xff] %v9489_v2  ;;  %v3234_v59 = vmax.f32 %v3233_v18, %v9487_v0  ;;  %v3308_v61 = vmax.f32 %v3307_v62, %v9489_v2 }
 0x2a3   : > { %6874 = vmatmul.mubr.msk.bf16.vlgmr.msra.gmra.mrb[132].mxu1 %vm1207_vm2, %v9139_v6  ;;  %6893 = vmatmul.mubr.msk.bf16.gmra.mrb[180].mxu0 %vm1207_vm2, %v9176_v56 }
 0x2a4   : > { %2746 = vmatpush1.bf16.msra.mxu1 %v2740_v8  ;;  %2293 = vmatprep.mubr.bf16.mxu1 %v18197_v32 }
 0x2a5   : > { %2560 = vmatprep.mubr.bf16.mxu0 %v18197_v32 }
 0x2a6   : > { %v9502_v23 = vpop.f32.mrb[28].mxu1  ;;  %v9504_v62 = vpop.f32.mrb[76].mxu0 }
 0x2a7   : > { %18234 = vst [vmem:[#allocation57_spill] sm:$0xff] %v9504_v62  ;;  %v3198_v6 = vmax.f32 %v3197_v27, %v9502_v23  ;;  %v3272_v18 = vmax.f32 %v3271_v52, %v9504_v62  ;;  %v9508_v56 = vpop.f32.mrb[29].mxu1  ;;  %v9510_v13 = vpop.f32.mrb[77].mxu0  ;;  %v9524_v52 = vpack.c.bf16 %v7429_v39, %v7424_v30 }
 0x2a8   : > { %18235 = vst [vmem:[#allocation58_spill] sm:$0xff] %v9508_v56  ;;  %18236 = vst [vmem:[#allocation59_spill] sm:$0xff] %v9510_v13  ;;  %v3235_v8 = vmax.f32 %v3234_v59, %v9508_v56  ;;  %v3309_v2 = vmax.f32 %v3308_v61, %v9510_v13  ;;  %v9514_v48 = vpop.f32.mrb[30].mxu1  ;;  %v9516_v5 = vpop.f32.mrb[78].mxu0 }
 0x2a9   : > { %18237 = vst [vmem:[#allocation60_spill] sm:$0xff] %v9516_v5  ;;  %v3199_v25 = vmax.f32 %v3198_v6, %v9514_v48  ;;  %v3273_v34 = vmax.f32 %v3272_v18, %v9516_v5  ;;  %v9520_v0 = vpop.f32.mrb[31].mxu1  ;;  %v9522_v27 = vpop.f32.mrb[79].mxu0 }
 0x2aa   : > { %18238 = vst [vmem:[#allocation61_spill] sm:$0xff] %v9520_v0  ;;  %18239 = vst [vmem:[#allocation62_spill] sm:$0xff] %v9522_v27  ;;  %v3236_v62 = vmax.f32 %v3235_v8, %v9520_v0  ;;  %v3310_v59 = vmax.f32 %v3309_v2, %v9522_v27  ;;  %v9558_v56 = vpop.trf.xlu1 }
 0x2ab   : > { %6875 = vmatmul.mubr.msk.bf16.gmra.mrb[136].mxu1 %vm1207_vm2, %v9170_v57  ;;  %6894 = vmatmul.mubr.msk.bf16.gmra.mrb[184].mxu0 %vm1207_vm2, %v9186_v15  ;;  %18246 = vst [vmem:[#allocation69_spill] sm:$0xff] %v9558_v56 }
 0x2ac   : > { %2303 = vmatprep.mubr.bf16.mxu1 %v18197_v32  ;;  %2570 = vmatprep.mubr.bf16.mxu0 %v18197_v32 }
 0x2ae   : > { %v9534_v61 = vpop.f32.mrb[32].mxu1  ;;  %v9536_v6 = vpop.f32.mrb[80].mxu0 }
 0x2af   : > { %18240 = vst [vmem:[#allocation63_spill] sm:$0xff] %v9536_v6  ;;  %v3200_v30 = vmax.f32 %v3199_v25, %v9534_v61  ;;  %v3274_v39 = vmax.f32 %v3273_v34, %v9536_v6  ;;  %v9540_v18 = vpop.f32.mrb[33].mxu1  ;;  %v9542_v2 = vpop.f32.mrb[81].mxu0 }
 0x2b0   : > { %18241 = vst [vmem:[#allocation64_spill] sm:$0xff] %v9540_v18  ;;  %18242 = vst [vmem:[#allocation65_spill] sm:$0xff] %v9542_v2  ;;  %v3237_v57 = vmax.f32 %v3236_v62, %v9540_v18  ;;  %v3311_v15 = vmax.f32 %v3310_v59, %v9542_v2  ;;  %v9546_v8 = vpop.f32.mrb[34].mxu1  ;;  %v9548_v27 = vpop.f32.mrb[82].mxu0 }
 0x2b1   : > { %18243 = vst [vmem:[#allocation66_spill] sm:$0xff] %v9548_v27  ;;  %v3201_v13 = vmax.f32 %v3200_v30, %v9546_v8  ;;  %v3275_v5 = vmax.f32 %v3274_v39, %v9548_v27  ;;  %v9552_v0 = vpop.f32.mrb[35].mxu1  ;;  %v9554_v25 = vpop.f32.mrb[83].mxu0 }
 0x2b2   : > { %18244 = vst [vmem:[#allocation67_spill] sm:$0xff] %v9552_v0  ;;  %18245 = vst [vmem:[#allocation68_spill] sm:$0xff] %v9554_v25  ;;  %v3238_v34 = vmax.f32 %v3237_v57, %v9552_v0  ;;  %v3312_v6 = vmax.f32 %v3311_v15, %v9554_v25  ;;  %v9590_v16 = vpop.trf.xlu1 }
 0x2b3   : > { %6876 = vmatmul.mubr.msk.bf16.gmra.mrb[140].mxu1 %vm1207_vm2, %v9184_v14  ;;  %6895 = vmatmul.mubr.msk.bf16.gmra.mrb[188].mxu0 %vm1207_vm2, %v9196_v1  ;;  %18253 = vst [vmem:[#allocation76_spill] sm:$0xff] %v9590_v16 }
 0x2b4   : > { %2313 = vmatprep.mubr.bf16.mxu1 %v18197_v32  ;;  %2580 = vmatprep.mubr.bf16.mxu0 %v18197_v32 }
 0x2b6   : > { %v9566_v62 = vpop.f32.mrb[36].mxu1  ;;  %v9568_v59 = vpop.f32.mrb[84].mxu0 }
 0x2b7   : > { %18247 = vst [vmem:[#allocation70_spill] sm:$0xff] %v9568_v59  ;;  %v3202_v30 = vmax.f32 %v3201_v13, %v9566_v62  ;;  %v3276_v39 = vmax.f32 %v3275_v5, %v9568_v59  ;;  %v9572_v57 = vpop.f32.mrb[37].mxu1  ;;  %v9574_v15 = vpop.f32.mrb[85].mxu0 }
 0x2b8   : > { %18248 = vst [vmem:[#allocation71_spill] sm:$0xff] %v9572_v57  ;;  %18249 = vst [vmem:[#allocation72_spill] sm:$0xff] %v9574_v15  ;;  %v3239_v14 = vmax.f32 %v3238_v34, %v9572_v57  ;;  %v3313_v1 = vmax.f32 %v3312_v6, %v9574_v15  ;;  %v9578_v25 = vpop.f32.mrb[38].mxu1  ;;  %v9580_v2 = vpop.f32.mrb[86].mxu0 }
 0x2b9   : > { %18250 = vst [vmem:[#allocation73_spill] sm:$0xff] %v9580_v2  ;;  %v3203_v27 = vmax.f32 %v3202_v30, %v9578_v25  ;;  %v3277_v0 = vmax.f32 %v3276_v39, %v9580_v2  ;;  %v9584_v18 = vpop.f32.mrb[39].mxu1  ;;  %v9586_v13 = vpop.f32.mrb[87].mxu0 }
 0x2ba   : > { %18251 = vst [vmem:[#allocation74_spill] sm:$0xff] %v9584_v18  ;;  %18252 = vst [vmem:[#allocation75_spill] sm:$0xff] %v9586_v13  ;;  %v3240_v5 = vmax.f32 %v3239_v14, %v9584_v18  ;;  %v3314_v59 = vmax.f32 %v3313_v1, %v9586_v13 }
 0x2bb   : > { %6877 = vmatmul.mubr.msk.bf16.gmra.mrb[144].mxu1 %vm1207_vm2, %v9194_v31  ;;  %6896 = vmatmul.mubr.msk.bf16.gmra.mrb[192].mxu0 %vm1207_vm2, %v9206_v20 }
 0x2bc   : > { %2323 = vmatprep.mubr.bf16.mxu1 %v18197_v32  ;;  %2590 = vmatprep.mubr.bf16.mxu0 %v18197_v32 }
 0x2be   : > { %v9598_v6 = vpop.f32.mrb[40].mxu1  ;;  %v9600_v34 = vpop.f32.mrb[88].mxu0 }
 0x2bf   : > { %18254 = vst [vmem:[#allocation77_spill] sm:$0xff] %v9600_v34  ;;  %v3204_v30 = vmax.f32 %v3203_v27, %v9598_v6  ;;  %v3278_v39 = vmax.f32 %v3277_v0, %v9600_v34  ;;  %v9604_v14 = vpop.f32.mrb[41].mxu1  ;;  %v9606_v1 = vpop.f32.mrb[89].mxu0 }
 0x2c0   : > { %18255 = vst [vmem:[#allocation78_spill] sm:$0xff] %v9604_v14  ;;  %18256 = vst [vmem:[#allocation79_spill] sm:$0xff] %v9606_v1  ;;  %v3241_v31 = vmax.f32 %v3240_v5, %v9604_v14  ;;  %v3315_v20 = vmax.f32 %v3314_v59, %v9606_v1  ;;  %v9610_v13 = vpop.f32.mrb[42].mxu1  ;;  %v9612_v15 = vpop.f32.mrb[90].mxu0  ;;  %v7405_v5 = vunpack.i.h.bf16 %v9220_v26  ;;  %v7410_v59 = vunpack.i.h.bf16 %v9229_v63 }
 0x2c1   : > { %18257 = vst [vmem:[#allocation80_spill] sm:$0xff] %v9612_v15  ;;  %v3205_v2 = vmax.f32 %v3204_v30, %v9610_v13  ;;  %v3279_v18 = vmax.f32 %v3278_v39, %v9612_v15  ;;  %v9616_v57 = vpop.f32.mrb[43].mxu1  ;;  %v9618_v27 = vpop.f32.mrb[91].mxu0 }
 0x2c2   : > { %18258 = vst [vmem:[#allocation81_spill] sm:$0xff] %v9616_v57  ;;  %18259 = vst [vmem:[#allocation82_spill] sm:$0xff] %v9618_v27  ;;  %v3242_v0 = vmax.f32 %v3241_v31, %v9616_v57  ;;  %v3316_v34 = vmax.f32 %v3315_v20, %v9618_v27  ;;  %v1134_v1 = vpack.c.bf16 %v7410_v59, %v7405_v5 }
 0x2c3   : > { %6878 = vmatmul.mubr.msk.bf16.gmra.mrb[148].mxu1 %vm1207_vm2, %v9204_v47  ;;  %6897 = vmatmul.mubr.msk.bf16.gmra.mrb[196].mxu0 %vm1207_vm2, %v9218_v49 }
 0x2c4   : > { %2333 = vmatprep.mubr.bf16.mxu1 %v18197_v32  ;;  %2600 = vmatprep.mubr.bf16.mxu0 %v18197_v32 }
 0x2c6   : > { %v9630_v30 = vpop.f32.mrb[44].mxu1  ;;  %v9632_v39 = vpop.f32.mrb[92].mxu0 }
 0x2c7   : > { %18260 = vst [vmem:[#allocation83_spill] sm:$0xff] %v9632_v39  ;;  %v3206_v31 = vmax.f32 %v3205_v2, %v9630_v30  ;;  %v3280_v20 = vmax.f32 %v3279_v18, %v9632_v39  ;;  %v9636_v27 = vpop.f32.mrb[45].mxu1  ;;  %v9638_v47 = vpop.f32.mrb[93].mxu0 }
 0x2c8   : > { %18261 = vst [vmem:[#allocation84_spill] sm:$0xff] %v9636_v27  ;;  %18262 = vst [vmem:[#allocation85_spill] sm:$0xff] %v9638_v47  ;;  %v3243_v49 = vmax.f32 %v3242_v0, %v9636_v27  ;;  %v3317_v15 = vmax.f32 %v3316_v34, %v9638_v47  ;;  %v9642_v57 = vpop.f32.mrb[46].mxu1  ;;  %v9644_v14 = vpop.f32.mrb[94].mxu0 }
 0x2c9   : > { %18263 = vst [vmem:[#allocation86_spill] sm:$0xff] %v9644_v14  ;;  %v3207_v17 = vmax.f32 %v3206_v31, %v9642_v57  ;;  %v3281_v12 = vmax.f32 %v3280_v20, %v9644_v14  ;;  %v9648_v2 = vpop.f32.mrb[47].mxu1  ;;  %v9650_v18 = vpop.f32.mrb[95].mxu0 }
 0x2ca   : > { %18264 = vst [vmem:[#allocation87_spill] sm:$0xff] %v9648_v2  ;;  %18265 = vst [vmem:[#allocation88_spill] sm:$0xff] %v9650_v18  ;;  %v3244_v39 = vmax.f32 %v3243_v49, %v9648_v2  ;;  %v3318_v5 = vmax.f32 %v3317_v15, %v9650_v18 }
 0x2cb   : > { %6879 = vmatmul.mubr.msk.bf16.gmra.mrb[152].mxu1 %vm1207_vm2, %v9216_v21  ;;  %6898 = vmatmul.mubr.msk.bf16.gmra.mrb[200].mxu0 %vm1207_vm2, %v1134_v1 }
 0x2cc   : > { %2343 = vmatprep.mubr.bf16.mxu1 %v18197_v32  ;;  %2610 = vmatprep.mubr.bf16.mxu0 %v18197_v32 }
 0x2ce   : > { %v9659_v34 = vpop.f32.mrb[48].mxu1  ;;  %v9661_v0 = vpop.f32.mrb[96].mxu0 }
 0x2cf   : > { %18266 = vst [vmem:[#allocation89_spill] sm:$0xff] %v9661_v0  ;;  %v3208_v59 = vmax.f32 %v3207_v17, %v9659_v34  ;;  %v3282_v31 = vmax.f32 %v3281_v12, %v9661_v0  ;;  %v9665_v20 = vpop.f32.mrb[49].mxu1  ;;  %v9667_v15 = vpop.f32.mrb[97].mxu0 }
 0x2d0   : > { %18267 = vst [vmem:[#allocation90_spill] sm:$0xff] %v9665_v20  ;;  %18268 = vst [vmem:[#allocation91_spill] sm:$0xff] %v9667_v15  ;;  %v3245_v21 = vmax.f32 %v3244_v39, %v9665_v20  ;;  %v3319_v1 = vmax.f32 %v3318_v5, %v9667_v15  ;;  %v9671_v49 = vpop.f32.mrb[50].mxu1  ;;  %v9673_v18 = vpop.f32.mrb[98].mxu0  ;;  %v7402_v39 = vunpack.i.l.bf16 %v9220_v26  ;;  %v7407_v5 = vunpack.i.l.bf16 %v9229_v63 }
 0x2d1   : > { %18269 = vst [vmem:[#allocation92_spill] sm:$0xff] %v9673_v18  ;;  %v3209_v47 = vmax.f32 %v3208_v59, %v9671_v49  ;;  %v3283_v14 = vmax.f32 %v3282_v31, %v9673_v18  ;;  %v9677_v2 = vpop.f32.mrb[51].mxu1  ;;  %v9679_v17 = vpop.f32.mrb[99].mxu0 }
 0x2d2   : > { %18270 = vst [vmem:[#allocation93_spill] sm:$0xff] %v9677_v2  ;;  %18271 = vst [vmem:[#allocation94_spill] sm:$0xff] %v9679_v17  ;;  %v3246_v12 = vmax.f32 %v3245_v21, %v9677_v2  ;;  %v3320_v0 = vmax.f32 %v3319_v1, %v9679_v17 }
 0x2d3   : > { %6880 = vmatmul.mubr.msk.bf16.gmra.mrb[156].mxu1 %vm1207_vm2, %v9231_v10  ;;  %6899 = vmatmul.mubr.msk.bf16.gmra.mrb[204].mxu0 %vm1207_vm2, %v9233_v50 }
 0x2d4   : > { %2353 = vmatprep.mubr.bf16.mxu1 %v18197_v32  ;;  %2620 = vmatprep.mubr.bf16.mxu0 %v18197_v32 }
 0x2d6   : > { %v9691_v59 = vpop.f32.mrb[52].mxu1  ;;  %v9693_v31 = vpop.f32.mrb[100].mxu0 }
 0x2d7   : > { %18272 = vst [vmem:[#allocation95_spill] sm:$0xff] %v9693_v31  ;;  %v3210_v21 = vmax.f32 %v3209_v47, %v9691_v59  ;;  %v3284_v1 = vmax.f32 %v3283_v14, %v9693_v31  ;;  %v9697_v10 = vpop.f32.mrb[53].mxu1  ;;  %v9699_v17 = vpop.f32.mrb[101].mxu0  ;;  %v1118_v14 = vpack.c.bf16 %v7407_v5, %v7402_v39 }
 0x2d8   : > { %18273 = vst [vmem:[#allocation96_spill] sm:$0xff] %v9697_v10  ;;  %18274 = vst [vmem:[#allocation97_spill] sm:$0xff] %v9699_v17  ;;  %v3247_v50 = vmax.f32 %v3246_v12, %v9697_v10  ;;  %v3321_v15 = vmax.f32 %v3320_v0, %v9699_v17  ;;  %v9703_v18 = vpop.f32.mrb[54].mxu1  ;;  %v9705_v26 = vpop.f32.mrb[102].mxu0  ;;  %v7457_v10 = vunpack.i.h.bf16 %v9558_v56 }
 0x2d9   : > { %18275 = vst [vmem:[#allocation98_spill] sm:$0xff] %v9705_v26  ;;  %v3211_v63 = vmax.f32 %v3210_v21, %v9703_v18  ;;  %v3285_v2 = vmax.f32 %v3284_v1, %v9705_v26  ;;  %v9709_v20 = vpop.f32.mrb[55].mxu1  ;;  %v9711_v47 = vpop.f32.mrb[103].mxu0 }
 0x2da   : > { %18276 = vst [vmem:[#allocation99_spill] sm:$0xff] %v9709_v20  ;;  %18277 = vst [vmem:[#allocation100_spill] sm:$0xff] %v9711_v47  ;;  %v3248_v31 = vmax.f32 %v3247_v50, %v9709_v20  ;;  %v3322_v27 = vmax.f32 %v3321_v15, %v9711_v47 }
 0x2db   : > { %6881 = vmatmul.mubr.msk.bf16.gmra.mrb[160].mxu1 %vm1207_vm2, %v1118_v14  ;;  %6900 = vmatmul.mubr.msk.bf16.gmra.mrb[208].mxu0 %vm1207_vm2, %v9250_v19 }
 0x2dc   : > { %2363 = vmatprep.mubr.bf16.mxu1 %v18197_v32  ;;  %2630 = vmatprep.mubr.bf16.mxu0 %v18197_v32 }
 0x2de   : > { %v9720_v0 = vpop.f32.mrb[56].mxu1  ;;  %v9722_v12 = vpop.f32.mrb[104].mxu0 }
 0x2df   : > { %18278 = vst [vmem:[#allocation101_spill] sm:$0xff] %v9722_v12  ;;  %v3212_v21 = vmax.f32 %v3211_v63, %v9720_v0  ;;  %v3286_v39 = vmax.f32 %v3285_v2, %v9722_v12  ;;  %v9726_v5 = vpop.f32.mrb[57].mxu1  ;;  %v9728_v15 = vpop.f32.mrb[105].mxu0 }
 0x2e0   : > { %18279 = vst [vmem:[#allocation102_spill] sm:$0xff] %v9726_v5  ;;  %18280 = vst [vmem:[#allocation103_spill] sm:$0xff] %v9728_v15  ;;  %v3249_v1 = vmax.f32 %v3248_v31, %v9726_v5  ;;  %v3323_v19 = vmax.f32 %v3322_v27, %v9728_v15  ;;  %v9732_v50 = vpop.f32.mrb[58].mxu1  ;;  %v9734_v14 = vpop.f32.mrb[106].mxu0  ;;  %v7447_v31 = vunpack.i.h.bf16 %v9271_v9  ;;  %v7452_v27 = vunpack.i.h.bf16 %v9277_v24 }
 0x2e1   : > { %18281 = vst [vmem:[#allocation104_spill] sm:$0xff] %v9734_v14  ;;  %v3213_v47 = vmax.f32 %v3212_v21, %v9732_v50  ;;  %v3287_v17 = vmax.f32 %v3286_v39, %v9734_v14  ;;  %v9738_v26 = vpop.f32.mrb[59].mxu1  ;;  %v9740_v63 = vpop.f32.mrb[107].mxu0  ;;  %v7434_v21 = vunpack.i.l.bf16 %v9254_v7  ;;  %v7439_v39 = vunpack.i.l.bf16 %v9263_v41 }
 0x2e2   : > { %18282 = vst [vmem:[#allocation105_spill] sm:$0xff] %v9738_v26  ;;  %18283 = vst [vmem:[#allocation106_spill] sm:$0xff] %v9740_v63  ;;  %v3250_v2 = vmax.f32 %v3249_v1, %v9738_v26  ;;  %v3324_v12 = vmax.f32 %v3323_v19, %v9740_v63  ;;  %v1138_v15 = vpack.c.bf16 %v7452_v27, %v7447_v31 }
 0x2e3   : > { %6882 = vmatmul.mubr.msk.bf16.gmra.mrb[164].mxu1 %vm1207_vm2, %v9261_v42  ;;  %6901 = vmatmul.mubr.msk.bf16.gmra.mrb[212].mxu0 %vm1207_vm2, %v9266_v58  ;;  %v1121_v41 = vpack.c.bf16 %v7439_v39, %v7434_v21  ;;  %v9781_v21 = vpop.trf.xlu1 }
 0x2e4   : > { %2373 = vmatprep.mubr.bf16.mxu1 %v18197_v32  ;;  %2640 = vmatprep.mubr.bf16.mxu0 %v18197_v32  ;;  %18290 = vst [vmem:[#allocation113_spill] sm:$0xff] %v9781_v21 }
 0x2e6   : > { %v9754_v1 = vpop.f32.mrb[60].mxu1  ;;  %v9756_v19 = vpop.f32.mrb[108].mxu0 }
 0x2e7   : > { %18284 = vst [vmem:[#allocation107_spill] sm:$0xff] %v9756_v19  ;;  %v3214_v63 = vmax.f32 %v3213_v47, %v9754_v1  ;;  %v9759_v42 = vpop.f32.mrb[61].mxu1  ;;  %v9761_v58 = vpop.f32.mrb[109].mxu0  ;;  %v7462_v47 = vunpack.i.h.bf16 %v9590_v16 }
 0x2e8   : > { %18285 = vst [vmem:[#allocation108_spill] sm:$0xff] %v9759_v42  ;;  %18286 = vst [vmem:[#allocation109_spill] sm:$0xff] %v9761_v58  ;;  %v3251_v14 = vmax.f32 %v3250_v2, %v9759_v42  ;;  %v9764_v26 = vpop.f32.mrb[62].mxu1  ;;  %v9777_v31 = vpop.f32.mrb[110].mxu0 }
 0x2e9   : > { %v3215_v5 = vmax.f32 %v3214_v63, %v9764_v26  ;;  %v9767_v7 = vpop.f32.mrb[63].mxu1  ;;  %18288 = vst [vmem:[#allocation111_spill] sm:$0xff] %v9777_v31  ;;  %v1139_v39 = vpack.c.bf16 %v7462_v47, %v7457_v10  ;;  %v7444_v10 = vunpack.i.l.bf16 %v9271_v9 }
 0x2ea   : > { %18287 = vst [vmem:[#allocation110_spill] sm:$0xff] %v9767_v7  ;;  %v3252_v20 = vmax.f32 %v3251_v14, %v9767_v7  ;;  %v9788_v7 = vpop.f32.mrb[111].mxu0 }
 0x2eb   : > { %v3216_v33 = vrot.slane %v3215_v5, 4  ;;  %6883 = vmatmul.mubr.msk.bf16.gmra.mrb[168].mxu1 %vm1207_vm2, %v9524_v52  ;;  %6902 = vmatmul.mubr.msk.bf16.gmra.mrb[216].mxu0 %vm1207_vm2, %v1138_v15  ;;  %v3407_v15 = vmax.f32 %v9756_v19, %v9777_v31  ;;  %18292 = vst [vmem:[#allocation115_spill] sm:$0xff] %v9788_v7 }
 0x2ec   : > { %v3253_v2 = vrot.slane %v3252_v20, 4  ;;  %2383 = vmatprep.mubr.bf16.mxu1 %v18197_v32  ;;  %2650 = vmatprep.mubr.bf16.mxu0 %v18197_v32 }
 0x2ed   : > { %v3217_v63 = vmax.f32 %v3215_v5, %v3216_v33 }
 0x2ee   : > { %v3254_v27 = vmax.f32 %v3252_v20, %v3253_v2  ;;  %v9779_v14 = vpop.f32.mrb[64].mxu1  ;;  %v3444_v20 = vmax.f32 %v9761_v58, %v9788_v7  ;;  %v9795_v2 = vpop.f32.mrb[112].mxu0 }
 0x2ef   : > { %18289 = vst [vmem:[#allocation112_spill] sm:$0xff] %v9779_v14  ;;  %v3218_v16 = vrot.slane %v3217_v63, 2  ;;  %v3288_v56 = vmax.f32 %v3287_v17, %v9779_v14  ;;  %v9784_v52 = vpop.f32.mrb[65].mxu1  ;;  %18294 = vst [vmem:[#allocation117_spill] sm:$0xff] %v9795_v2  ;;  %v9804_v31 = vmax.f32 %v3407_v15, %v9795_v2  ;;  %v9806_v19 = vpop.f32.mrb[113].mxu0 }
 0x2f0   : > { %18291 = vst [vmem:[#allocation114_spill] sm:$0xff] %v9784_v52  ;;  %v3255_v42 = vrot.slane %v3254_v27, 2  ;;  %v3325_v33 = vmax.f32 %v3324_v12, %v9784_v52  ;;  %v9791_v5 = vpop.f32.mrb[66].mxu1  ;;  %18296 = vst [vmem:[#allocation119_spill] sm:$0xff] %v9806_v19  ;;  %v7449_v12 = vunpack.i.l.bf16 %v9277_v24  ;;  %v9813_v58 = vmax.f32 %v3444_v20, %v9806_v19  ;;  %v9815_v9 = vpop.f32.mrb[114].mxu0 }
 0x2f1   : > { %18293 = vst [vmem:[#allocation116_spill] sm:$0xff] %v9791_v5  ;;  %v3219_v17 = vmax.f32 %v3217_v63, %v3218_v16  ;;  %v9799_v47 = vmax.f32 %v3288_v56, %v9791_v5  ;;  %v9801_v14 = vpop.f32.mrb[67].mxu1  ;;  %18297 = vst [vmem:[#allocation120_spill] sm:$0xff] %v9815_v9  ;;  %v9817_v16 = vpop.trf.xlu1  ;;  %v7467_v63 = vunpack.i.h.bf16 %v9781_v21 }
 0x2f2   : > { %18295 = vst [vmem:[#allocation118_spill] sm:$0xff] %v9801_v14  ;;  %v3256_v52 = vmax.f32 %v3254_v27, %v3255_v42  ;;  %v9810_v7 = vmax.f32 %v3325_v33, %v9801_v14  ;;  %18298 = vst [vmem:[#allocation121_spill] sm:$0xff] %v9817_v16  ;;  %v9824_v42 = vpop.f32.mrb[115].mxu0  ;;  %v7472_v15 = vunpack.i.h.bf16 %v9817_v16  ;;  %v1122_v24 = vpack.c.bf16 %v7449_v12, %v7444_v10 }
 0x2f3   : > { %v3220_v56 = vrot.slane %v3219_v17, 1  ;;  %6884 = vmatmul.mubr.msk.bf16.gmra.mrb[172].mxu1 %vm1207_vm2, %v1121_v41  ;;  %6903 = vmatmul.mubr.msk.bf16.gmra.mrb[220].mxu0 %vm1207_vm2, %v1139_v39  ;;  %18299 = vst [vmem:[#allocation122_spill] sm:$0xff] %v9824_v42 }
 0x2f4   : > { %v3257_v27 = vrot.slane %v3256_v52, 1  ;;  %2393 = vmatprep.mubr.bf16.mxu1 %v18197_v32  ;;  %2660 = vmatprep.mubr.bf16.mxu0 %v18197_v32  ;;  %v1140_v2 = vpack.c.bf16 %v7472_v15, %v7467_v63 }
 0x2f5   : > { %v9829_v33 = vmax.f32 %v3219_v17, %v3220_v56 }
 0x2f6   : > { %v9833_v41 = vmax.f32 %v3256_v52, %v3257_v27  ;;  %v9835_v39 = vpop.f32.mrb[68].mxu1  ;;  %v9837_v19 = vpop.f32.mrb[116].mxu0 }
 0x2f7   : > { %18300 = vst [vmem:[#allocation123_spill] sm:$0xff] %v9835_v39  ;;  %18301 = vst [vmem:[#allocation124_spill] sm:$0xff] %v9837_v19  ;;  %v3777_v16 = vsub.f32 %v9284_v43, %v9829_v33  ;;  %v3779_v21 = vsub.f32 %v9292_v35, %v9829_v33  ;;  %v3781_v17 = vsub.f32 %v9314_v3, %v9829_v33  ;;  %v9847_v52 = vpop.f32.mrb[69].mxu1  ;;  %v9849_v27 = vpop.f32.mrb[117].mxu0 }
 0x2f8   : > { %v3783_v56 = vsub.f32 %v9326_v38, %v9829_v33  ;;  %18302 = vst [vmem:[#allocation125_spill] sm:$0xff] %v9847_v52  ;;  %18303 = vst [vmem:[#allocation126_spill] sm:$0xff] %v9849_v27  ;;  %v3785_v10 = vsub.f32 %v9344_v4, %v9829_v33  ;;  %v3787_v12 = vsub.f32 %v9356_v28, %v9829_v33  ;;  %v9859_v3 = vpop.f32.mrb[70].mxu1  ;;  %v9861_v63 = vpop.f32.mrb[118].mxu0 }
 0x2f9   : > { %v3789_v43 = vsub.f32 %v9374_v29, %v9829_v33  ;;  %v3791_v35 = vsub.f32 %v9386_v46, %v9829_v33  ;;  %18304 = vst [vmem:[#allocation127_spill] sm:$0xff] %v9859_v3  ;;  %18305 = vst [vmem:[#allocation128_spill] sm:$0xff] %v9861_v63  ;;  %v3793_v38 = vsub.f32 %v9404_v60, %v9829_v33  ;;  %v9871_v29 = vpop.f32.mrb[71].mxu1  ;;  %v9881_v14 = vpop.f32.mrb[119].mxu0  ;;  %v4293_v20 = vmul.f32 1.442695, %v3779_v21 }
 0x2fa   : > { %v3795_v15 = vsub.f32 %v9418_v37, %v9829_v33  ;;  %18306 = vst [vmem:[#allocation129_spill] sm:$0xff] %v9871_v29  ;;  %18307 = vst [vmem:[#allocation130_spill] sm:$0xff] %v9881_v14  ;;  %v4289_v37 = vmul.f32 1.442695, %v3777_v16  ;;  %v4297_v5 = vmul.f32 1.442695, %v3781_v17 }
 0x2fb   : > { %6885 = vmatmul.mubr.msk.bf16.gmra.mrb[176].mxu1 %vm1207_vm2, %v1122_v24  ;;  %6904 = vmatmul.mubr.msk.bf16.gmra.mrb[224].mxu0 %vm1207_vm2, %v1140_v2  ;;  %v4301_v46 = vmul.f32 1.442695, %v3783_v56  ;;  %v4305_v24 = vmul.f32 1.442695, %v3785_v10  ;;  %v4317_v14 = vmul.f32 1.442695, %v3791_v35 }
 0x2fc   : > { %2403 = vmatprep.mubr.bf16.mxu1 %v18197_v32  ;;  %2670 = vmatprep.mubr.bf16.mxu0 %v18197_v32  ;;  %7687 = vpow2.f32 %v4289_v37  ;;  %v4321_v32 = vmul.f32 1.442695, %v3793_v38  ;;  %v4325_v35 = vmul.f32 1.442695, %v3795_v15  ;;  %v18315_v38 = vld [vmem:[#allocation34_spill] sm:$0xff]  ;;  %v18321_v2 = vld [vmem:[#allocation43_spill] sm:$0xff] }
 0x2fd   : > { %7689 = vpow2.f32 %v4293_v20  ;;  %v18326_v20 = vsub.f32 %v9437_v51, %v9829_v33 }
 0x2fe   : > { %v9918_v28 = vpop.f32.mrb[72].mxu1  ;;  %v9920_v60 = vpop.f32.mrb[120].mxu0  ;;  %7691 = vpow2.f32 %v4297_v5 }
 0x2ff   : > { %18308 = vst [vmem:[#allocation131_spill] sm:$0xff] %v9918_v28  ;;  %18309 = vst [vmem:[#allocation132_spill] sm:$0xff] %v9920_v60  ;;  %7693 = vpow2.f32 %v4301_v46  ;;  %v4309_v28 = vmul.f32 1.442695, %v3787_v12  ;;  %v4313_v60 = vmul.f32 1.442695, %v3789_v43 }
 0x300   : > { %7695 = vpow2.f32 %v4305_v24  ;;  %v9929_v16 = vpop.f32.mrb[73].mxu1  ;;  %v9931_v17 = vpop.f32.mrb[121].mxu0  ;;  %v18317_v24 = vld [vmem:[#allocation40_spill] sm:$0xff] }
 0x301   : > { %18310 = vst [vmem:[#allocation133_spill] sm:$0xff] %v9929_v16  ;;  %18311 = vst [vmem:[#allocation134_spill] sm:$0xff] %v9931_v17  ;;  %7697 = vpow2.f32 %v4309_v28  ;;  %v9939_v10 = vpop.f32.mrb[74].mxu1  ;;  %v9941_v12 = vpop.f32.mrb[122].mxu0  ;;  %v18316_v28 = vld [vmem:[#allocation37_spill] sm:$0xff] }
 0x302   : > { %18312 = vst [vmem:[#allocation135_spill] sm:$0xff] %v9939_v10  ;;  %18313 = vst [vmem:[#allocation136_spill] sm:$0xff] %v9941_v12  ;;  %v9951_v5 = vpop.f32.mrb[75].mxu1  ;;  %v9953_v21 = vpop.f32.mrb[123].mxu0  ;;  %7699 = vpow2.f32 %v4313_v60  ;;  %v18337_v12 = vsub.f32 %v9447_v11, %v9829_v33 }
 0x303   : > { %18318 = vst [vmem:[#allocation34_spill] sm:$0xff] %v9951_v5  ;;  %18319 = vst [vmem:[#allocation37_spill] sm:$0xff] %v9953_v21  ;;  %v4329_v21 = vmul.f32 1.442695, %v18326_v20  ;;  %7701 = vpow2.f32 %v4317_v14 }
 0x304   : > { %7703 = vpow2.f32 %v4321_v32 }
 0x305   : > { %7705 = vpow2.f32 %v4325_v35  ;;  %v18359_v35 = vld [vmem:[#allocation99_spill] sm:$0xff] }
 0x306   : > { %v9943_v43 = vpop.eup %7687  ;;  %v9963_v37 = vpop.f32.mrb[76].mxu1  ;;  %7707 = vpow2.f32 %v4329_v21  ;;  %v18370_v21 = vsub.f32 %v9514_v48, %v9829_v33  ;;  %v18375_v48 = vsub.f32 %v9546_v8, %v9829_v33  ;;  %v3327_v8 = vrot.slane %v9810_v7, 4 }
 0x307   : > { %18314 = vst [vmem:[#allocation137_spill] sm:$0xff] %v9943_v43  ;;  %v9955_v56 = vpop.eup %7689  ;;  %18324 = vst [vmem:[#allocation43_spill] sm:$0xff] %v9963_v37  ;;  %v9965_v17 = vpop.f32.mrb[124].mxu0 }
 0x308   : > { %18320 = vst [vmem:[#allocation40_spill] sm:$0xff] %v9955_v56  ;;  %18325 = vst [vmem:[#allocation138_spill] sm:$0xff] %v9965_v17  ;;  %v5313_v60 = vadd.f32 %v9955_v56, %v9943_v43  ;;  %v9976_v15 = vpop.f32.mrb[77].mxu1  ;;  %v9978_v10 = vpop.f32.mrb[125].mxu0  ;;  %v18334_v56 = vld [vmem:[#allocation64_spill] sm:$0xff]  ;;  %v18347_v17 = vsub.f32 %v9467_v45, %v9829_v33 }
 0x309   : > { %18329 = vst [vmem:[#allocation139_spill] sm:$0xff] %v9976_v15  ;;  %18330 = vst [vmem:[#allocation140_spill] sm:$0xff] %v9978_v10  ;;  %v9980_v37 = vpop.eup %7691  ;;  %v9988_v4 = vpop.f32.mrb[78].mxu1  ;;  %v4333_v10 = vmul.f32 1.442695, %v18337_v12 }
 0x30a   : > { %18331 = vst [vmem:[#allocation141_spill] sm:$0xff] %v9980_v37  ;;  %18335 = vst [vmem:[#allocation64_spill] sm:$0xff] %v9988_v4  ;;  %v9990_v5 = vpop.f32.mrb[126].mxu0  ;;  %v5314_v15 = vadd.f32 %v9980_v37, %v5313_v60  ;;  %v10000_v46 = vpop.f32.mrb[79].mxu1  ;;  %v18345_v60 = vld [vmem:[#allocation81_spill] sm:$0xff]  ;;  %v18358_v4 = vsub.f32 %v9481_v54, %v9829_v33  ;;  %v18365_v54 = vld [vmem:[#allocation108_spill] sm:$0xff]  ;;  %v18368_v37 = vsub.f32 %v9502_v23, %v9829_v33 }
 0x30b   : > { %18336 = vst [vmem:[#allocation142_spill] sm:$0xff] %v9990_v5  ;;  %18340 = vst [vmem:[#allocation143_spill] sm:$0xff] %v10000_v46  ;;  %v10002_v20 = vpop.f32.mrb[127].mxu0  ;;  %v10004_v43 = vpop.eup %7693  ;;  %v4337_v46 = vmul.f32 1.442695, %v18347_v17  ;;  %7709 = vpow2.f32 %v4333_v10 }
 0x30c   : > { %18341 = vst [vmem:[#allocation144_spill] sm:$0xff] %v10002_v20  ;;  %18342 = vst [vmem:[#allocation145_spill] sm:$0xff] %v10004_v43  ;;  %v5315_v20 = vadd.f32 %v10004_v43, %v5314_v15  ;;  %v10026_v11 = vpop.eup %7695  ;;  %v18355_v15 = vld [vmem:[#allocation96_spill] sm:$0xff]  ;;  %v4357_v10 = vmul.f32 1.442695, %v18375_v48 }
 0x30d   : > { %18352 = vst [vmem:[#allocation148_spill] sm:$0xff] %v10026_v11  ;;  %v10050_v43 = vpop.eup %7697  ;;  %7711 = vpow2.f32 %v4337_v46 }
 0x30e   : > { %v10012_v16 = vpop.f32.mrb[80].mxu1  ;;  %v10022_v5 = vpop.f32.mrb[128].mxu0  ;;  %18363 = vst [vmem:[#allocation151_spill] sm:$0xff] %v10050_v43 }
 0x30f   : > { %18346 = vst [vmem:[#allocation81_spill] sm:$0xff] %v10012_v16  ;;  %18350 = vst [vmem:[#allocation146_spill] sm:$0xff] %v10022_v5  ;;  %v10024_v12 = vpop.f32.mrb[81].mxu1  ;;  %v10034_v32 = vpop.f32.mrb[129].mxu0  ;;  %v5316_v5 = vadd.f32 %v10026_v11, %v5315_v20  ;;  %v3290_v20 = vrot.slane %v9799_v47, 4 }
 0x310   : > { %18351 = vst [vmem:[#allocation147_spill] sm:$0xff] %v10024_v12  ;;  %18356 = vst [vmem:[#allocation96_spill] sm:$0xff] %v10034_v32  ;;  %v10036_v51 = vpop.f32.mrb[82].mxu1  ;;  %v4341_v12 = vmul.f32 1.442695, %v18358_v4  ;;  %v10046_v17 = vpop.f32.mrb[130].mxu0  ;;  %v18371_v4 = vsub.f32 %v9534_v61, %v9829_v33  ;;  %v18376_v61 = vsub.f32 %v9566_v62, %v9829_v33  ;;  %v18381_v62 = vsub.f32 %v9598_v6, %v9829_v33 }
 0x311   : > { %18357 = vst [vmem:[#allocation149_spill] sm:$0xff] %v10036_v51  ;;  %18361 = vst [vmem:[#allocation99_spill] sm:$0xff] %v10046_v17  ;;  %v10048_v45 = vpop.f32.mrb[83].mxu1  ;;  %v18364_v51 = vld [vmem:[#allocation105_spill] sm:$0xff]  ;;  %v10058_v14 = vpop.f32.mrb[131].mxu0  ;;  %v3291_v48 = vmax.f32 %v9799_v47, %v3290_v20  ;;  %v18388_v47 = vsub.f32 %v9659_v34, %v9829_v33  ;;  %v18394_v34 = vsub.f32 %v9691_v59, %v9829_v33 }
 0x312   : > { %18362 = vst [vmem:[#allocation150_spill] sm:$0xff] %v10048_v45  ;;  %18367 = vst [vmem:[#allocation105_spill] sm:$0xff] %v10058_v14  ;;  %v4345_v17 = vmul.f32 1.442695, %v18368_v37  ;;  %v5317_v45 = vadd.f32 %v10050_v43, %v5316_v5  ;;  %v10064_v16 = vpop.eup %7699  ;;  %v4349_v32 = vmul.f32 1.442695, %v18370_v21  ;;  %7713 = vpow2.f32 %v4341_v12 }
 0x313   : > { %18369 = vst [vmem:[#allocation108_spill] sm:$0xff] %v10064_v16  ;;  %v4353_v11 = vmul.f32 1.442695, %v18371_v4  ;;  %v10078_v5 = vpop.eup %7701  ;;  %v4361_v46 = vmul.f32 1.442695, %v18376_v61  ;;  %v18380_v12 = vsub.f32 %v9578_v25, %v9829_v33  ;;  %v18385_v25 = vsub.f32 %v9610_v13, %v9829_v33 }
 0x314   : > { %v5318_v14 = vadd.f32 %v10064_v16, %v5317_v45  ;;  %18374 = vst [vmem:[#allocation154_spill] sm:$0xff] %v10078_v5  ;;  %7715 = vpow2.f32 %v4345_v17  ;;  %v10091_v16 = vpop.eup %7703  ;;  %v4369_v17 = vmul.f32 1.442695, %v18381_v62  ;;  %v4385_v20 = vmul.f32 1.442695, %v18388_v47 }
 0x315   : > { %18379 = vst [vmem:[#allocation157_spill] sm:$0xff] %v10091_v16  ;;  %7717 = vpow2.f32 %v4349_v32  ;;  %v4365_v43 = vmul.f32 1.442695, %v18380_v12  ;;  %v10106_v32 = vpop.eup %7705  ;;  %v4373_v12 = vmul.f32 1.442695, %v18385_v25 }
 0x316   : > { %v10074_v23 = vpop.f32.mrb[84].mxu1  ;;  %v10076_v37 = vpop.f32.mrb[132].mxu0  ;;  %v5319_v45 = vadd.f32 %v10078_v5, %v5318_v14  ;;  %7719 = vpow2.f32 %v4353_v11  ;;  %18384 = vst [vmem:[#allocation160_spill] sm:$0xff] %v10106_v32  ;;  %v18386_v11 = vsub.f32 %v9630_v30, %v9829_v33 }
 0x317   : > { %18372 = vst [vmem:[#allocation152_spill] sm:$0xff] %v10074_v23  ;;  %18373 = vst [vmem:[#allocation153_spill] sm:$0xff] %v10076_v37  ;;  %v10087_v4 = vpop.f32.mrb[85].mxu1  ;;  %v10089_v21 = vpop.f32.mrb[133].mxu0  ;;  %7721 = vpow2.f32 %v4357_v10  ;;  %v18389_v10 = vsub.f32 %v9288_v53, %v9833_v41  ;;  %v18395_v53 = vsub.f32 %v9300_v36, %v9833_v41  ;;  %v18401_v36 = vsub.f32 %v9732_v50, %v9829_v33 }
 0x318   : > { %18377 = vst [vmem:[#allocation155_spill] sm:$0xff] %v10087_v4  ;;  %18378 = vst [vmem:[#allocation156_spill] sm:$0xff] %v10089_v21  ;;  %v5320_v14 = vadd.f32 %v10091_v16, %v5319_v45  ;;  %v10102_v61 = vpop.f32.mrb[86].mxu1  ;;  %v10104_v5 = vpop.f32.mrb[134].mxu0  ;;  %v4377_v6 = vmul.f32 1.442695, %v18386_v11  ;;  %v18387_v45 = vsub.f32 %v9642_v57, %v9829_v33  ;;  %7723 = vpow2.f32 %v4361_v46 }
 0x319   : > { %18382 = vst [vmem:[#allocation158_spill] sm:$0xff] %v10102_v61  ;;  %18383 = vst [vmem:[#allocation159_spill] sm:$0xff] %v10104_v5  ;;  %v4291_v13 = vmul.f32 1.442695, %v18389_v10  ;;  %v10124_v25 = vpop.f32.mrb[87].mxu1  ;;  %v10126_v5 = vpop.f32.mrb[135].mxu0  ;;  %7725 = vpow2.f32 %v4365_v43  ;;  %v18393_v57 = vsub.f32 %v9671_v49, %v9829_v33  ;;  %v18397_v43 = vsub.f32 %v9720_v0, %v9829_v33 }
 0x31a   : > { %v4381_v62 = vmul.f32 1.442695, %v18387_v45  ;;  %v5321_v16 = vadd.f32 %v10106_v32, %v5320_v14  ;;  %18390 = vst [vmem:[#allocation161_spill] sm:$0xff] %v10124_v25  ;;  %18391 = vst [vmem:[#allocation162_spill] sm:$0xff] %v10126_v5  ;;  %v10128_v30 = vpop.eup %7707  ;;  %v10136_v11 = vmul.f32 1.442695, %v18394_v34  ;;  %7727 = vpow2.f32 %v4369_v17 }
 0x31b   : > { %18392 = vst [vmem:[#allocation163_spill] sm:$0xff] %v10128_v30  ;;  %v4389_v46 = vmul.f32 1.442695, %v18393_v57  ;;  %v4295_v14 = vmul.f32 1.442695, %v18395_v53  ;;  %v18396_v45 = vsub.f32 %v9703_v18, %v9829_v33  ;;  %v10156_v34 = vpop.eup %7709  ;;  %7729 = vpow2.f32 %v4373_v12  ;;  %v18463_v61 = vld [vmem:[#allocation51_spill] sm:$0xff] }
 0x31c   : > { %v10149_v49 = vmul.f32 1.442695, %v18397_v43  ;;  %v5322_v10 = vadd.f32 %v10128_v30, %v5321_v16  ;;  %18400 = vst [vmem:[#allocation166_spill] sm:$0xff] %v10156_v34  ;;  %v10161_v18 = vmul.f32 1.442695, %v18401_v36  ;;  %v18402_v17 = vsub.f32 %v9754_v1, %v9829_v33 }
 0x31d   : > { %v10144_v47 = vmul.f32 1.442695, %v18396_v45  ;;  %v18403_v16 = vsub.f32 %v9320_v55, %v9833_v41  ;;  %v10171_v45 = vpop.eup %7711  ;;  %v18405_v43 = vsub.f32 %v9764_v26, %v9829_v33  ;;  %7731 = vpow2.f32 %v4291_v13 }
 0x31e   : > { %v10152_v59 = vpop.f32.mrb[88].mxu1  ;;  %v10154_v57 = vpop.f32.mrb[136].mxu0  ;;  %v10166_v0 = vmul.f32 1.442695, %v18402_v17  ;;  %18404 = vst [vmem:[#allocation167_spill] sm:$0xff] %v10171_v45  ;;  %v5323_v50 = vadd.f32 %v10156_v34, %v5322_v10  ;;  %v18406_v36 = vsub.f32 %v9332_v40, %v9833_v41  ;;  %7733 = vpow2.f32 %v4295_v14 }
 0x31f   : > { %18398 = vst [vmem:[#allocation164_spill] sm:$0xff] %v10152_v59  ;;  %18399 = vst [vmem:[#allocation165_spill] sm:$0xff] %v10154_v57  ;;  %v4299_v53 = vmul.f32 1.442695, %v18403_v16  ;;  %v10176_v12 = vmul.f32 1.442695, %v18405_v43  ;;  %v10186_v55 = vpop.eup %7713  ;;  %v18410_v16 = vsub.f32 %v9350_v44, %v9833_v41  ;;  %v10192_v43 = vmax.f32 %v9810_v7, %v3327_v8 }
 0x320   : > { %v4303_v1 = vmul.f32 1.442695, %v18406_v36  ;;  %v10182_v17 = vpop.f32.mrb[89].mxu1  ;;  %v10184_v30 = vpop.f32.mrb[137].mxu0  ;;  %18409 = vst [vmem:[#allocation170_spill] sm:$0xff] %v10186_v55  ;;  %v3292_v33 = vrot.slane %v3291_v48, 2  ;;  %7735 = vpow2.f32 %v4377_v6  ;;  %v5324_v36 = vadd.f32 %v10171_v45, %v5323_v50 }
 0x321   : > { %18407 = vst [vmem:[#allocation168_spill] sm:$0xff] %v10182_v17  ;;  %18408 = vst [vmem:[#allocation169_spill] sm:$0xff] %v10184_v30  ;;  %v4307_v26 = vmul.f32 1.442695, %v18410_v16  ;;  %v10194_v13 = vpop.f32.mrb[90].mxu1  ;;  %v10196_v10 = vpop.f32.mrb[138].mxu0  ;;  %v18414_v14 = vsub.f32 %v9362_v22, %v9833_v41  ;;  %v18415_v44 = vmax.f32 %v9804_v31, %v9815_v9  ;;  %7737 = vpow2.f32 %v4299_v53 }
 0x322   : > { %18411 = vst [vmem:[#allocation171_spill] sm:$0xff] %v10194_v13  ;;  %18412 = vst [vmem:[#allocation172_spill] sm:$0xff] %v10196_v10  ;;  %v10198_v40 = vpop.eup %7715  ;;  %v10210_v7 = vpop.f32.mrb[91].mxu1  ;;  %v18420_v6 = vsub.f32 %v18315_v38, %v9833_v41  ;;  %v3293_v45 = vmax.f32 %v3291_v48, %v3292_v33  ;;  %7739 = vpow2.f32 %v4381_v62  ;;  %v18422_v31 = vsub.f32 %v18316_v28, %v9833_v41  ;;  %v18449_v57 = vld [vmem:[#allocation33_spill] sm:$0xff]  ;;  %v18452_v13 = vld [vmem:[#allocation58_spill] sm:$0xff] }
 0x323   : > { %18413 = vst [vmem:[#allocation173_spill] sm:$0xff] %v10198_v40  ;;  %v4311_v34 = vmul.f32 1.442695, %v18414_v14  ;;  %v10208_v16 = vmax.f32 %v18415_v44, %v9837_v19  ;;  %18417 = vst [vmem:[#allocation175_spill] sm:$0xff] %v10210_v7  ;;  %v10212_v8 = vpop.f32.mrb[139].mxu0  ;;  %v10214_v32 = vpop.eup %7717  ;;  %v18423_v19 = vmax.f32 %v9813_v58, %v9824_v42  ;;  %7741 = vpow2.f32 %v4303_v1 }
 0x324   : > { %18418 = vst [vmem:[#allocation176_spill] sm:$0xff] %v10212_v8  ;;  %18419 = vst [vmem:[#allocation177_spill] sm:$0xff] %v10214_v32  ;;  %v4315_v50 = vmul.f32 1.442695, %v18420_v6  ;;  %v10221_v14 = vpop.eup %7719  ;;  %v4319_v44 = vmul.f32 1.442695, %v18422_v31  ;;  %v18426_v33 = vsub.f32 %v18317_v24, %v9833_v41  ;;  %v10243_v31 = vpop.trf.xlu1  ;;  %7743 = vpow2.f32 %v4385_v20 }
 0x325   : > { %18416 = vst [vmem:[#allocation174_spill] sm:$0xff] %v10208_v16  ;;  %18421 = vst [vmem:[#allocation178_spill] sm:$0xff] %v10221_v14  ;;  %v10230_v53 = vmax.f32 %v18423_v19, %v9849_v27  ;;  %v10234_v48 = vpop.eup %7721  ;;  %v3294_v6 = vrot.slane %v3293_v45, 1  ;;  %v5325_v19 = vadd.f32 %v10186_v55, %v5324_v36  ;;  %v18428_v38 = vsub.f32 %v18321_v2, %v9833_v41  ;;  %v18430_v24 = vld [vmem:[#allocation46_spill] sm:$0xff]  ;;  %v18433_v20 = vld [vmem:[#allocation49_spill] sm:$0xff] }
 0x326   : > { %18425 = vst [vmem:[#allocation180_spill] sm:$0xff] %v10234_v48  ;;  %v10239_v62 = vmul.f32 1.442695, %v18426_v33  ;;  %v10245_v58 = vpop.eup %7723  ;;  %7745 = vpow2.f32 %v4307_v26  ;;  %v18431_v33 = vsub.f32 %v18430_v24, %v9833_v41  ;;  %v18434_v36 = vsub.f32 %v18433_v20, %v9833_v41  ;;  %v18435_v2 = vld [vmem:[#allocation52_spill] sm:$0xff]  ;;  %v18441_v20 = vld [vmem:[#allocation25_spill] sm:$0xff]  ;;  %v18454_v8 = vld [vmem:[#allocation39_spill] sm:$0xff] }
 0x327   : > { %18424 = vst [vmem:[#allocation179_spill] sm:$0xff] %v10230_v53  ;;  %18427 = vst [vmem:[#allocation181_spill] sm:$0xff] %v10245_v58  ;;  %v10251_v1 = vmul.f32 1.442695, %v18428_v38  ;;  %v10253_v22 = vpop.eup %7725  ;;  %v10260_v28 = vmax.f32 %v3293_v45, %v3294_v6  ;;  %7747 = vpow2.f32 %v4389_v46  ;;  %v18436_v38 = vsub.f32 %v18435_v2, %v9833_v41  ;;  %v18439_v45 = vld [vmem:[#allocation21_spill] sm:$0xff]  ;;  %v18440_v46 = vld [vmem:[#allocation23_spill] sm:$0xff] }
 0x328   : > { %18429 = vst [vmem:[#allocation182_spill] sm:$0xff] %v10253_v22  ;;  %v10258_v27 = vmul.f32 1.442695, %v18431_v33  ;;  %v10262_v42 = vpop.eup %7727  ;;  %v10267_v9 = vmul.f32 1.442695, %v18434_v36  ;;  %7749 = vpow2.f32 %v4311_v34  ;;  %v5326_v2 = vadd.f32 %v10198_v40, %v5325_v19  ;;  %v18445_v34 = vld [vmem:[#allocation27_spill] sm:$0xff] }
 0x329   : > { %18432 = vst [vmem:[#allocation46_spill] sm:$0xff] %v10262_v42  ;;  %v10272_v55 = vmul.f32 1.442695, %v18436_v38  ;;  %v10276_v33 = vpop.eup %7729  ;;  %v18443_v38 = vld [vmem:[#allocation55_spill] sm:$0xff]  ;;  %v18446_v6 = vld [vmem:[#allocation29_spill] sm:$0xff]  ;;  %7751 = vpow2.f32 %v4315_v50  ;;  %v18450_v40 = vld [vmem:[#allocation36_spill] sm:$0xff]  ;;  %v18453_v59 = vsub.f32 %v18452_v13, %v9833_v41 }
 0x32a   : > { %18438 = vst [vmem:[#allocation49_spill] sm:$0xff] %v10276_v33  ;;  %v10284_v7 = vpop.eup %7731  ;;  %v18444_v10 = vsub.f32 %v18443_v38, %v9833_v41  ;;  %v18448_v36 = vld [vmem:[#allocation31_spill] sm:$0xff]  ;;  %7753 = vpow2.f32 %v10136_v11  ;;  %v10316_v25 = vpop.f32.mrb[92].mxu1  ;;  %v18457_v38 = vld [vmem:[#allocation42_spill] sm:$0xff]  ;;  %v18458_v11 = vld [vmem:[#allocation45_spill] sm:$0xff]  ;;  %v5327_v5 = vadd.f32 %v10214_v32, %v5326_v2 }
 0x32b   : > { %18442 = vst [vmem:[#allocation52_spill] sm:$0xff] %v10284_v7  ;;  %v10296_v17 = vpop.eup %7733  ;;  %v10310_v30 = vmul.f32 1.442695, %v18453_v59  ;;  %18455 = vst [vmem:[#allocation25_spill] sm:$0xff] %v10316_v25  ;;  %7755 = vpow2.f32 %v4319_v44  ;;  %v18459_v59 = vld [vmem:[#allocation48_spill] sm:$0xff]  ;;  %v10326_v4 = vpop.f32.mrb[140].mxu0 }
 0x32c   : > { %v10290_v24 = vmul.f32 1.442695, %v18444_v10  ;;  %18447 = vst [vmem:[#allocation21_spill] sm:$0xff] %v10296_v17  ;;  %v10304_v10 = vpop.eup %7735  ;;  %v5350_v50 = vadd.f32 %v10296_v17, %v10284_v7  ;;  %18460 = vst [vmem:[#allocation27_spill] sm:$0xff] %v10326_v4  ;;  %v10328_v37 = vpop.f32.mrb[93].mxu1  ;;  %7757 = vpow2.f32 %v10144_v47  ;;  %v18468_v47 = vld [vmem:[#allocation57_spill] sm:$0xff] }
 0x32d   : > { %18451 = vst [vmem:[#allocation23_spill] sm:$0xff] %v10304_v10  ;;  %v10318_v19 = vpop.eup %7737  ;;  %18461 = vst [vmem:[#allocation29_spill] sm:$0xff] %v10328_v37  ;;  %v10337_v17 = vpop.f32.mrb[141].mxu0  ;;  %7759 = vpow2.f32 %v10149_v49  ;;  %v18467_v37 = vld [vmem:[#allocation54_spill] sm:$0xff]  ;;  %v18469_v2 = vld [vmem:[#allocation60_spill] sm:$0xff] }
 0x32e   : > { %18456 = vst [vmem:[#allocation55_spill] sm:$0xff] %v10318_v19  ;;  %v10330_v23 = vpop.eup %7739  ;;  %v5351_v44 = vadd.f32 %v10318_v19, %v5350_v50  ;;  %18464 = vst [vmem:[#allocation33_spill] sm:$0xff] %v10337_v17  ;;  %v10339_v21 = vpop.f32.mrb[94].mxu1  ;;  %7761 = vpow2.f32 %v10161_v18  ;;  %v18475_v26 = vld [vmem:[#allocation63_spill] sm:$0xff]  ;;  %v18479_v18 = vld [vmem:[#allocation70_spill] sm:$0xff] }
 0x32f   : > { %18462 = vst [vmem:[#allocation31_spill] sm:$0xff] %v10330_v23  ;;  %18465 = vst [vmem:[#allocation36_spill] sm:$0xff] %v10339_v21  ;;  %v10341_v13 = vpop.eup %7741  ;;  %v10350_v32 = vpop.f32.mrb[142].mxu0  ;;  %v18473_v21 = vld [vmem:[#allocation61_spill] sm:$0xff]  ;;  %7763 = vpow2.f32 %v10239_v62 }
 0x330   : > { %18466 = vst [vmem:[#allocation58_spill] sm:$0xff] %v10341_v13  ;;  %18470 = vst [vmem:[#allocation39_spill] sm:$0xff] %v10350_v32  ;;  %v10352_v25 = vpop.f32.mrb[95].mxu1  ;;  %v10354_v19 = vpop.eup %7743  ;;  %v18474_v49 = vsub.f32 %v18473_v21, %v9833_v41  ;;  %v5352_v4 = vadd.f32 %v10341_v13, %v5351_v44  ;;  %v18480_v21 = vld [vmem:[#allocation73_spill] sm:$0xff]  ;;  %7765 = vpow2.f32 %v10166_v0  ;;  %v5328_v13 = vadd.f32 %v10221_v14, %v5327_v5  ;;  %v18489_v0 = vld [vmem:[#allocation83_spill] sm:$0xff] }
 0x331   : > { %18471 = vst [vmem:[#allocation42_spill] sm:$0xff] %v10352_v25  ;;  %18472 = vst [vmem:[#allocation45_spill] sm:$0xff] %v10354_v19  ;;  %v10363_v53 = vpop.f32.mrb[143].mxu0  ;;  %v10365_v50 = vpop.eup %7745  ;;  %v18478_v25 = vld [vmem:[#allocation66_spill] sm:$0xff]  ;;  %v18484_v32 = vld [vmem:[#allocation77_spill] sm:$0xff]  ;;  %7767 = vpow2.f32 %v10176_v12 }
 0x332   : > { %v4351_v17 = vmul.f32 1.442695, %v18474_v49  ;;  %18476 = vst [vmem:[#allocation48_spill] sm:$0xff] %v10363_v53  ;;  %18477 = vst [vmem:[#allocation51_spill] sm:$0xff] %v10365_v50  ;;  %v10374_v52 = vpop.f32.mrb[96].mxu1  ;;  %v10376_v44 = vpop.f32.mrb[144].mxu0  ;;  %v5353_v62 = vadd.f32 %v10365_v50, %v5352_v4  ;;  %7769 = vpow2.f32 %v10251_v1  ;;  %v18493_v50 = vsub.f32 %v18334_v56, %v9833_v41 }
 0x333   : > { %18481 = vst [vmem:[#allocation54_spill] sm:$0xff] %v10374_v52  ;;  %18482 = vst [vmem:[#allocation57_spill] sm:$0xff] %v10376_v44  ;;  %v10378_v7 = vpop.eup %7747  ;;  %v10385_v63 = vpop.f32.mrb[97].mxu1  ;;  %v18488_v44 = vld [vmem:[#allocation80_spill] sm:$0xff]  ;;  %v18490_v5 = vld [vmem:[#allocation86_spill] sm:$0xff]  ;;  %7771 = vpow2.f32 %v10258_v27 }
 0x334   : > { %18483 = vst [vmem:[#allocation60_spill] sm:$0xff] %v10378_v7  ;;  %18485 = vst [vmem:[#allocation61_spill] sm:$0xff] %v10385_v63  ;;  %v10387_v29 = vpop.f32.mrb[145].mxu0  ;;  %v10389_v49 = vpop.eup %7749  ;;  %v18494_v52 = vld [vmem:[#allocation89_spill] sm:$0xff]  ;;  %v18498_v1 = vld [vmem:[#allocation95_spill] sm:$0xff]  ;;  %7773 = vpow2.f32 %v10267_v9 }
 0x335   : > { %18486 = vst [vmem:[#allocation63_spill] sm:$0xff] %v10387_v29  ;;  %18487 = vst [vmem:[#allocation66_spill] sm:$0xff] %v10389_v49  ;;  %v10398_v14 = vpop.f32.mrb[98].mxu1  ;;  %v10400_v53 = vpop.f32.mrb[146].mxu0  ;;  %v4355_v29 = vmul.f32 1.442695, %v18493_v50  ;;  %v5354_v12 = vadd.f32 %v10389_v49, %v5353_v62  ;;  %7775 = vpow2.f32 %v10272_v55 }
 0x336   : > { %18491 = vst [vmem:[#allocation70_spill] sm:$0xff] %v10398_v14  ;;  %18492 = vst [vmem:[#allocation73_spill] sm:$0xff] %v10400_v53  ;;  %v10409_v3 = vpop.f32.mrb[99].mxu1  ;;  %v10411_v16 = vpop.eup %7751  ;;  %v18499_v56 = vld [vmem:[#allocation98_spill] sm:$0xff]  ;;  %7777 = vpow2.f32 %v10290_v24 }
 0x337   : > { %18495 = vst [vmem:[#allocation77_spill] sm:$0xff] %v10409_v3  ;;  %18496 = vst [vmem:[#allocation80_spill] sm:$0xff] %v10411_v16  ;;  %v10420_v39 = vpop.f32.mrb[147].mxu0  ;;  %v10422_v62 = vpop.f32.mrb[100].mxu1  ;;  %v5329_v3 = vadd.f32 %v10234_v48, %v5328_v13  ;;  %v5355_v27 = vadd.f32 %v10411_v16, %v5354_v12  ;;  %7779 = vpow2.f32 %v10310_v30  ;;  %v18517_v12 = vld [vmem:[#allocation71_spill] sm:$0xff]  ;;  %v18520_v24 = vld [vmem:[#allocation74_spill] sm:$0xff] }
 0x338   : > { %18500 = vst [vmem:[#allocation83_spill] sm:$0xff] %v10420_v39  ;;  %18501 = vst [vmem:[#allocation86_spill] sm:$0xff] %v10422_v62  ;;  %v10424_v63 = vpop.eup %7753  ;;  %v10431_v4 = vpop.f32.mrb[148].mxu0  ;;  %v3329_v62 = vrot.slane %v10192_v43, 2  ;;  %7781 = vpow2.f32 %v4351_v17  ;;  %v18525_v30 = vld [vmem:[#allocation78_spill] sm:$0xff] }
 0x339   : > { %18502 = vst [vmem:[#allocation89_spill] sm:$0xff] %v10424_v63  ;;  %18504 = vst [vmem:[#allocation95_spill] sm:$0xff] %v10431_v4  ;;  %v10433_v14 = vpop.f32.mrb[101].mxu1  ;;  %v10435_v50 = vpop.eup %7755  ;;  %7783 = vpow2.f32 %v4355_v29 }
 0x33a   : > { %18505 = vst [vmem:[#allocation98_spill] sm:$0xff] %v10433_v14  ;;  %18506 = vst [vmem:[#allocation183_spill] sm:$0xff] %v10435_v50  ;;  %v10444_v16 = vpop.f32.mrb[149].mxu0  ;;  %v10446_v49 = vpop.f32.mrb[102].mxu1  ;;  %v18513_v14 = vld [vmem:[#allocation67_spill] sm:$0xff]  ;;  %v5356_v63 = vadd.f32 %v10435_v50, %v5355_v27 }
 0x33b   : > { %18510 = vst [vmem:[#allocation184_spill] sm:$0xff] %v10444_v16  ;;  %18511 = vst [vmem:[#allocation185_spill] sm:$0xff] %v10446_v49  ;;  %v10448_v4 = vpop.eup %7757  ;;  %v18514_v55 = vsub.f32 %v18513_v14, %v9833_v41  ;;  %v10456_v48 = vpop.f32.mrb[150].mxu0  ;;  %v18518_v49 = vsub.f32 %v18517_v12, %v9833_v41  ;;  %v18521_v14 = vsub.f32 %v18520_v24, %v9833_v41 }
 0x33c   : > { %18512 = vst [vmem:[#allocation186_spill] sm:$0xff] %v10448_v4  ;;  %18515 = vst [vmem:[#allocation67_spill] sm:$0xff] %v10456_v48  ;;  %v10458_v13 = vpop.eup %7759  ;;  %v10469_v27 = vpop.f32.mrb[103].mxu1  ;;  %v18526_v12 = vsub.f32 %v18525_v30, %v9833_v41  ;;  %v18528_v24 = vsub.f32 %v18439_v45, %v10260_v28 }
 0x33d   : > { %v4359_v39 = vmul.f32 1.442695, %v18514_v55  ;;  %18516 = vst [vmem:[#allocation187_spill] sm:$0xff] %v10458_v13  ;;  %v4363_v4 = vmul.f32 1.442695, %v18518_v49  ;;  %v10464_v16 = vpop.eup %7761  ;;  %18522 = vst [vmem:[#allocation74_spill] sm:$0xff] %v10469_v27  ;;  %v5330_v13 = vadd.f32 %v10245_v58, %v5329_v3  ;;  %v18530_v3 = vsub.f32 %v18440_v46, %v10260_v28 }
 0x33e   : > { %18519 = vst [vmem:[#allocation71_spill] sm:$0xff] %v10464_v16  ;;  %v4367_v55 = vmul.f32 1.442695, %v18521_v14  ;;  %v10471_v50 = vpop.f32.mrb[151].mxu0  ;;  %v10473_v48 = vpop.eup %7763  ;;  %v4371_v49 = vmul.f32 1.442695, %v18526_v12  ;;  %v3330_v16 = vmax.f32 %v10192_v43, %v3329_v62 }
 0x33f   : > { %18523 = vst [vmem:[#allocation188_spill] sm:$0xff] %v10471_v50  ;;  %18524 = vst [vmem:[#allocation189_spill] sm:$0xff] %v10473_v48  ;;  %v10479_v9 = vpop.eup %7765  ;;  %7785 = vpow2.f32 %v4359_v39  ;;  %v5357_v17 = vadd.f32 %v10473_v48, %v5356_v63  ;;  %v4417_v14 = vmul.f32 1.442695, %v18528_v24  ;;  %v4421_v29 = vmul.f32 1.442695, %v18530_v3 }
 0x340   : > { %18527 = vst [vmem:[#allocation78_spill] sm:$0xff] %v10479_v9  ;;  %v10486_v50 = vpop.eup %7767  ;;  %7787 = vpow2.f32 %v4363_v4  ;;  %v18532_v39 = vsub.f32 %v18345_v60, %v9833_v41  ;;  %v10496_v12 = vpop.f32.mrb[104].mxu1  ;;  %v5331_v43 = vadd.f32 %v10253_v22, %v5330_v13  ;;  %v18536_v4 = vld [vmem:[#allocation84_spill] sm:$0xff]  ;;  %v3331_v9 = vrot.slane %v3330_v16, 1  ;;  %v18588_v48 = vld [vmem:[#allocation35_spill] sm:$0xff] }
 0x341   : > { %18529 = vst [vmem:[#allocation190_spill] sm:$0xff] %v10486_v50  ;;  %v10491_v30 = vpop.eup %7769  ;;  %7789 = vpow2.f32 %v4367_v55  ;;  %18533 = vst [vmem:[#allocation192_spill] sm:$0xff] %v10496_v12  ;;  %v10498_v45 = vpop.f32.mrb[152].mxu0  ;;  %v18537_v46 = vsub.f32 %v18536_v4, %v9833_v41  ;;  %v18539_v55 = vld [vmem:[#allocation87_spill] sm:$0xff]  ;;  %v18543_v13 = vsub.f32 %v18441_v20, %v10260_v28 }
 0x342   : > { %18531 = vst [vmem:[#allocation191_spill] sm:$0xff] %v10491_v30  ;;  %v4375_v63 = vmul.f32 1.442695, %v18532_v39  ;;  %18534 = vst [vmem:[#allocation193_spill] sm:$0xff] %v10498_v45  ;;  %v10500_v24 = vpop.eup %7771  ;;  %7791 = vpow2.f32 %v4371_v49  ;;  %v18540_v50 = vsub.f32 %v18539_v55, %v9833_v41  ;;  %v5358_v39 = vadd.f32 %v10491_v30, %v5357_v17  ;;  %v10512_v58 = vpop.f32.mrb[105].mxu1 }
 0x343   : > { %18535 = vst [vmem:[#allocation194_spill] sm:$0xff] %v10500_v24  ;;  %v4379_v62 = vmul.f32 1.442695, %v18537_v46  ;;  %v10506_v3 = vpop.eup %7773  ;;  %7793 = vpow2.f32 %v4417_v14  ;;  %18541 = vst [vmem:[#allocation87_spill] sm:$0xff] %v10512_v58  ;;  %v4425_v49 = vmul.f32 1.442695, %v18543_v13  ;;  %v5332_v58 = vadd.f32 %v10262_v42, %v5331_v43 }
 0x344   : > { %18538 = vst [vmem:[#allocation84_spill] sm:$0xff] %v10506_v3  ;;  %v4383_v60 = vmul.f32 1.442695, %v18540_v50  ;;  %v10514_v45 = vpop.eup %7775  ;;  %7795 = vpow2.f32 %v4421_v29  ;;  %v18545_v46 = vld [vmem:[#allocation90_spill] sm:$0xff]  ;;  %v10524_v22 = vpop.f32.mrb[153].mxu0  ;;  %v18550_v29 = vld [vmem:[#allocation93_spill] sm:$0xff]  ;;  %v18557_v43 = vsub.f32 %v18359_v35, %v9833_v41 }
 0x345   : > { %18542 = vst [vmem:[#allocation195_spill] sm:$0xff] %v10514_v45  ;;  %v10519_v4 = vpop.eup %7777  ;;  %7797 = vpow2.f32 %v4375_v63  ;;  %v18546_v55 = vsub.f32 %v18545_v46, %v9833_v41  ;;  %18547 = vst [vmem:[#allocation90_spill] sm:$0xff] %v10524_v22  ;;  %v10526_v17 = vpop.f32.mrb[106].mxu1  ;;  %v18551_v20 = vsub.f32 %v18550_v29, %v9833_v41  ;;  %v18553_v63 = vsub.f32 %v18355_v15, %v9833_v41  ;;  %v18560_v15 = vld [vmem:[#allocation102_spill] sm:$0xff] }
 0x346   : > { %18544 = vst [vmem:[#allocation196_spill] sm:$0xff] %v10519_v4  ;;  %18548 = vst [vmem:[#allocation197_spill] sm:$0xff] %v10526_v17  ;;  %v10528_v14 = vpop.eup %7779  ;;  %7799 = vpow2.f32 %v4379_v62  ;;  %v10540_v22 = vmax.f32 %v3330_v16, %v3331_v9  ;;  %v10542_v17 = vpop.f32.mrb[154].mxu0  ;;  %v4399_v62 = vmul.f32 1.442695, %v18557_v43  ;;  %v18561_v16 = vsub.f32 %v18560_v15, %v9833_v41 }
 0x347   : > { %v4387_v50 = vmul.f32 1.442695, %v18546_v55  ;;  %18549 = vst [vmem:[#allocation198_spill] sm:$0xff] %v10528_v14  ;;  %v4391_v13 = vmul.f32 1.442695, %v18551_v20  ;;  %v10534_v12 = vpop.eup %7781  ;;  %7801 = vpow2.f32 %v4383_v60  ;;  %v5359_v55 = vadd.f32 %v10500_v24, %v5358_v39  ;;  %18555 = vst [vmem:[#allocation200_spill] sm:$0xff] %v10542_v17 }
 0x348   : > { %18552 = vst [vmem:[#allocation93_spill] sm:$0xff] %v10534_v12  ;;  %v4395_v46 = vmul.f32 1.442695, %v18553_v63  ;;  %18554 = vst [vmem:[#allocation199_spill] sm:$0xff] %v10540_v22  ;;  %v10544_v30 = vpop.eup %7783  ;;  %7803 = vpow2.f32 %v4425_v49  ;;  %v18558_v60 = vsub.f32 %v18445_v34, %v10260_v28  ;;  %v4403_v9 = vmul.f32 1.442695, %v18561_v16 }
 0x349   : > { %18556 = vst [vmem:[#allocation201_spill] sm:$0xff] %v10544_v30  ;;  %v10552_v20 = vpop.eup %7785  ;;  %7805 = vpow2.f32 %v4387_v50  ;;  %v18562_v39 = vsub.f32 %v18364_v51, %v9833_v41  ;;  %v10560_v42 = vpop.f32.mrb[107].mxu1  ;;  %v10567_v34 = vadd.f32 %v10276_v33, %v5332_v58  ;;  %v18566_v50 = vsub.f32 %v18365_v54, %v9833_v41 }
 0x34a   : > { %v4429_v29 = vmul.f32 1.442695, %v18558_v60  ;;  %18559 = vst [vmem:[#allocation202_spill] sm:$0xff] %v10552_v20  ;;  %18563 = vst [vmem:[#allocation102_spill] sm:$0xff] %v10560_v42  ;;  %v10562_v35 = vpop.f32.mrb[155].mxu0  ;;  %v10564_v49 = vpop.eup %7787  ;;  %7807 = vpow2.f32 %v4391_v13  ;;  %v18567_v60 = vld [vmem:[#allocation110_spill] sm:$0xff]  ;;  %v18580_v33 = vsub.f32 %v18448_v36, %v10260_v28 }
 0x34b   : > { %v4407_v63 = vmul.f32 1.442695, %v18562_v39  ;;  %18564 = vst [vmem:[#allocation203_spill] sm:$0xff] %v10562_v35  ;;  %18565 = vst [vmem:[#allocation204_spill] sm:$0xff] %v10564_v49  ;;  %v4411_v43 = vmul.f32 1.442695, %v18566_v50  ;;  %v18568_v15 = vsub.f32 %v18567_v60, %v9833_v41  ;;  %v10577_v51 = vpop.eup %7789  ;;  %7809 = vpow2.f32 %v4395_v46 }
 0x34c   : > { %18569 = vst [vmem:[#allocation110_spill] sm:$0xff] %v10577_v51  ;;  %v5360_v39 = vadd.f32 %v10506_v3, %v5359_v55  ;;  %v18570_v35 = vsub.f32 %v18446_v6, %v10260_v28  ;;  %v18571_v13 = vld [vmem:[#allocation22_spill] sm:$0xff]  ;;  %v10585_v42 = vpop.f32.mrb[108].mxu1  ;;  %v10587_v54 = vpop.eup %7791  ;;  %7811 = vpow2.f32 %v4429_v29  ;;  %v18574_v41 = vld [vmem:[#allocation24_spill] sm:$0xff]  ;;  %v4437_v29 = vmul.f32 1.442695, %v18580_v33 }
 0x34d   : > { %v10575_v16 = vmul.f32 1.442695, %v18568_v15  ;;  %18572 = vst [vmem:[#allocation22_spill] sm:$0xff] %v10585_v42  ;;  %18573 = vst [vmem:[#allocation205_spill] sm:$0xff] %v10587_v54  ;;  %v18575_v60 = vld [vmem:[#allocation26_spill] sm:$0xff]  ;;  %v18576_v55 = vld [vmem:[#allocation28_spill] sm:$0xff]  ;;  %7813 = vpow2.f32 %v4399_v62  ;;  %v18581_v50 = vsub.f32 %v18449_v57, %v10260_v28  ;;  %v18586_v62 = vsub.f32 %v18450_v40, %v10260_v28  ;;  %v10636_v57 = vpop.trf.xlu0 }
 0x34e   : > { %v4433_v58 = vmul.f32 1.442695, %v18570_v35  ;;  %v10595_v17 = vpop.f32.mrb[156].mxu0  ;;  %v10597_v6 = vpop.f32.mrb[109].mxu1  ;;  %v18582_v46 = vld [vmem:[#allocation30_spill] sm:$0xff]  ;;  %v18587_v36 = vld [vmem:[#allocation32_spill] sm:$0xff]  ;;  %7815 = vpow2.f32 %v4403_v9  ;;  %v5361_v54 = vadd.f32 %v10514_v45, %v5360_v39  ;;  %v18593_v40 = vsub.f32 %v18454_v8, %v10260_v28 }
 0x34f   : > { %18577 = vst [vmem:[#allocation24_spill] sm:$0xff] %v10595_v17  ;;  %18578 = vst [vmem:[#allocation26_spill] sm:$0xff] %v10597_v6  ;;  %v10599_v35 = vpop.eup %7793  ;;  %v4441_v42 = vmul.f32 1.442695, %v18581_v50  ;;  %v10609_v24 = vpop.f32.mrb[157].mxu0  ;;  %v18589_v50 = vld [vmem:[#allocation38_spill] sm:$0xff] }
 0x350   : > { %18579 = vst [vmem:[#allocation28_spill] sm:$0xff] %v10599_v35  ;;  %18583 = vst [vmem:[#allocation30_spill] sm:$0xff] %v10609_v24  ;;  %v10611_v15 = vpop.f32.mrb[110].mxu1  ;;  %v10613_v17 = vpop.eup %7795  ;;  %v4445_v6 = vmul.f32 1.442695, %v18586_v62  ;;  %7817 = vpow2.f32 %v4433_v58  ;;  %v18598_v9 = vld [vmem:[#allocation44_spill] sm:$0xff]  ;;  %v5362_v39 = vadd.f32 %v10519_v4, %v5361_v54 }
 0x351   : > { %18584 = vst [vmem:[#allocation206_spill] sm:$0xff] %v10611_v15  ;;  %18585 = vst [vmem:[#allocation207_spill] sm:$0xff] %v10613_v17  ;;  %v10624_v3 = vpop.f32.mrb[158].mxu0  ;;  %v10626_v24 = vpop.f32.mrb[111].mxu1  ;;  %v4449_v62 = vmul.f32 1.442695, %v18593_v40  ;;  %v5387_v33 = vadd.f32 %v10613_v17, %v10599_v35  ;;  %7819 = vpow2.f32 %v4407_v63  ;;  %v18603_v35 = vsub.f32 %v18457_v38, %v10260_v28 }
 0x352   : > { %18590 = vst [vmem:[#allocation32_spill] sm:$0xff] %v10624_v3  ;;  %18591 = vst [vmem:[#allocation35_spill] sm:$0xff] %v10626_v24  ;;  %v10628_v15 = vpop.eup %7797  ;;  %v10638_v53 = vpop.f32.mrb[159].mxu0  ;;  %v18597_v24 = vld [vmem:[#allocation41_spill] sm:$0xff]  ;;  %v18604_v3 = vsub.f32 %v18458_v11, %v10260_v28  ;;  %v18609_v63 = vsub.f32 %v18459_v59, %v10260_v28  ;;  %7821 = vpow2.f32 %v4411_v43  ;;  %v18633_v43 = vld [vmem:[#allocation91_spill] sm:$0xff] }
 0x353   : > { %18592 = vst [vmem:[#allocation38_spill] sm:$0xff] %v10628_v15  ;;  %18594 = vst [vmem:[#allocation208_spill] sm:$0xff] %v10636_v57  ;;  %v10640_v27 = vpop.eup %7799  ;;  %v10648_v40 = vpop.f32.mrb[112].mxu1  ;;  %v4453_v58 = vmul.f32 1.442695, %v18603_v35  ;;  %7823 = vpow2.f32 %v4437_v29  ;;  %v18620_v45 = vld [vmem:[#allocation65_spill] sm:$0xff]  ;;  %v18624_v35 = vsub.f32 %v18463_v61, %v10260_v28  ;;  %v18625_v29 = vsub.f32 %v18467_v37, %v10260_v28 }
 0x354   : > { %18595 = vst [vmem:[#allocation209_spill] sm:$0xff] %v10638_v53  ;;  %18596 = vst [vmem:[#allocation210_spill] sm:$0xff] %v10640_v27  ;;  %v10650_v15 = vpop.f32.mrb[160].mxu0  ;;  %v10652_v17 = vpop.eup %7801  ;;  %v4457_v53 = vmul.f32 1.442695, %v18604_v3  ;;  %v18612_v3 = vld [vmem:[#allocation59_spill] sm:$0xff]  ;;  %7825 = vpow2.f32 %v10575_v16  ;;  %v5363_v37 = vadd.f32 %v10528_v14, %v5362_v39  ;;  %v18639_v39 = vsub.f32 %v18468_v47, %v10260_v28 }
 0x355   : > { %18600 = vst [vmem:[#allocation41_spill] sm:$0xff] %v10648_v40  ;;  %18601 = vst [vmem:[#allocation44_spill] sm:$0xff] %v10650_v15  ;;  %v10662_v27 = vpop.f32.mrb[113].mxu1  ;;  %v10664_v8 = vpop.f32.mrb[161].mxu0  ;;  %v4461_v15 = vmul.f32 1.442695, %v18609_v63  ;;  %7827 = vpow2.f32 %v4441_v42 }
 0x356   : > { %18602 = vst [vmem:[#allocation211_spill] sm:$0xff] %v10652_v17  ;;  %18606 = vst [vmem:[#allocation212_spill] sm:$0xff] %v10662_v27  ;;  %v10666_v40 = vpop.eup %7803  ;;  %v10677_v57 = vpop.f32.mrb[114].mxu1  ;;  %v18616_v63 = vld [vmem:[#allocation62_spill] sm:$0xff]  ;;  %7829 = vpow2.f32 %v4445_v6  ;;  %v18632_v42 = vld [vmem:[#allocation88_spill] sm:$0xff] }
 0x357   : > { %18607 = vst [vmem:[#allocation213_spill] sm:$0xff] %v10664_v8  ;;  %18608 = vst [vmem:[#allocation214_spill] sm:$0xff] %v10666_v40  ;;  %v10679_v27 = vpop.f32.mrb[162].mxu0  ;;  %v10681_v8 = vpop.eup %7805  ;;  %v5388_v59 = vadd.f32 %v10666_v40, %v5387_v33  ;;  %v4465_v40 = vmul.f32 1.442695, %v18624_v35  ;;  %7831 = vpow2.f32 %v4449_v62  ;;  %v18634_v16 = vld [vmem:[#allocation94_spill] sm:$0xff] }
 0x358   : > { %18613 = vst [vmem:[#allocation59_spill] sm:$0xff] %v10677_v57  ;;  %18614 = vst [vmem:[#allocation215_spill] sm:$0xff] %v10679_v27  ;;  %v10687_v38 = vpop.f32.mrb[115].mxu1  ;;  %v10689_v11 = vpop.f32.mrb[163].mxu0  ;;  %v18635_v61 = vld [vmem:[#allocation97_spill] sm:$0xff]  ;;  %7833 = vpow2.f32 %v4453_v58 }
 0x359   : > { %18615 = vst [vmem:[#allocation216_spill] sm:$0xff] %v10681_v8  ;;  %18617 = vst [vmem:[#allocation62_spill] sm:$0xff] %v10687_v38  ;;  %v10691_v17 = vpop.eup %7807  ;;  %v18621_v8 = vld [vmem:[#allocation68_spill] sm:$0xff]  ;;  %v10718_v35 = vpop.trf.xlu0  ;;  %v4473_v62 = vmul.f32 1.442695, %v18639_v39  ;;  %7835 = vpow2.f32 %v4457_v53 }
 0x35a   : > { %18618 = vst [vmem:[#allocation217_spill] sm:$0xff] %v10689_v11  ;;  %18619 = vst [vmem:[#allocation218_spill] sm:$0xff] %v10691_v17  ;;  %v10699_v33 = vpop.eup %7809  ;;  %v4469_v17 = vmul.f32 1.442695, %v18625_v29  ;;  %v10732_v27 = vpop.f32.mrb[116].mxu1  ;;  %7837 = vpow2.f32 %v4461_v15  ;;  %v5334_v15 = vadd.f32 %v10304_v10, %v10567_v34 }
 0x35b   : > { %18623 = vst [vmem:[#allocation65_spill] sm:$0xff] %v10699_v33  ;;  %v10710_v38 = vpop.eup %7811  ;;  %18636 = vst [vmem:[#allocation88_spill] sm:$0xff] %v10732_v27  ;;  %v18641_v33 = vld [vmem:[#allocation100_spill] sm:$0xff]  ;;  %7839 = vpow2.f32 %v4465_v40  ;;  %v18658_v40 = vsub.f32 %v18479_v18, %v10260_v28 }
 0x35c   : > { %18627 = vst [vmem:[#allocation68_spill] sm:$0xff] %v10710_v38  ;;  %v10720_v54 = vpop.eup %7813  ;;  %v5389_v29 = vadd.f32 %v10710_v38, %v5388_v59  ;;  %v18640_v59 = vsub.f32 %v18469_v2, %v10260_v28  ;;  %v10746_v38 = vpop.f32.mrb[117].mxu1  ;;  %v18654_v2 = vsub.f32 %v18475_v26, %v10260_v28  ;;  %7841 = vpow2.f32 %v4469_v17 }
 0x35d   : > { %18631 = vst [vmem:[#allocation219_spill] sm:$0xff] %v10720_v54  ;;  %v10734_v54 = vpop.f32.mrb[164].mxu0  ;;  %v10736_v6 = vpop.eup %7815  ;;  %18642 = vst [vmem:[#allocation97_spill] sm:$0xff] %v10746_v38  ;;  %7843 = vpow2.f32 %v4473_v62  ;;  %v4489_v26 = vmul.f32 1.442695, %v18658_v40  ;;  %v18660_v17 = vsub.f32 %v18571_v13, %v10540_v22  ;;  %v18662_v62 = vsub.f32 %v18574_v41, %v10540_v22 }
 0x35e   : > { %18637 = vst [vmem:[#allocation91_spill] sm:$0xff] %v10734_v54  ;;  %18638 = vst [vmem:[#allocation94_spill] sm:$0xff] %v10736_v6  ;;  %v4477_v57 = vmul.f32 1.442695, %v18640_v59  ;;  %v10748_v4 = vpop.f32.mrb[165].mxu0  ;;  %v10750_v27 = vpop.eup %7817  ;;  %v5335_v40 = vadd.f32 %v10330_v23, %v5334_v15  ;;  %v18668_v41 = vsub.f32 %v18575_v60, %v10540_v22  ;;  %v18684_v60 = vld [vmem:[#allocation113_spill] sm:$0xff] }
 0x35f   : > { %18643 = vst [vmem:[#allocation100_spill] sm:$0xff] %v10748_v4  ;;  %18644 = vst [vmem:[#allocation220_spill] sm:$0xff] %v10750_v27  ;;  %v10758_v59 = vpop.f32.mrb[118].mxu1  ;;  %v10760_v14 = vpop.f32.mrb[166].mxu0  ;;  %v5364_v4 = vadd.f32 %v10534_v12, %v5363_v37  ;;  %v5390_v53 = vadd.f32 %v10750_v27, %v5389_v29  ;;  %v4481_v54 = vmul.f32 1.442695, %v18654_v2  ;;  %v18656_v37 = vsub.f32 %v18478_v25, %v10260_v28 }
 0x360   : > { %18648 = vst [vmem:[#allocation221_spill] sm:$0xff] %v10758_v59  ;;  %18649 = vst [vmem:[#allocation222_spill] sm:$0xff] %v10760_v14  ;;  %v10762_v11 = vpop.eup %7819  ;;  %v10768_v58 = vpop.f32.mrb[119].mxu1  ;;  %7845 = vpow2.f32 %v4477_v57  ;;  %v4419_v34 = vmul.f32 1.442695, %v18660_v17 }
 0x361   : > { %18650 = vst [vmem:[#allocation223_spill] sm:$0xff] %v10762_v11  ;;  %18652 = vst [vmem:[#allocation224_spill] sm:$0xff] %v10768_v58  ;;  %v10770_v39 = vpop.f32.mrb[167].mxu0  ;;  %v10775_v14 = vpop.trf.xlu0  ;;  %v4485_v29 = vmul.f32 1.442695, %v18656_v37  ;;  %v5365_v27 = vadd.f32 %v10544_v30, %v5364_v4  ;;  %7847 = vpow2.f32 %v4481_v54  ;;  %v18664_v4 = vsub.f32 %v18480_v21, %v10260_v28 }
 0x362   : > { %18653 = vst [vmem:[#allocation225_spill] sm:$0xff] %v10770_v39  ;;  %v10777_v11 = vpop.eup %7821  ;;  %v4423_v37 = vmul.f32 1.442695, %v18662_v62  ;;  %v10809_v13 = vpop.f32.mrb[168].mxu0  ;;  %v4427_v54 = vmul.f32 1.442695, %v18668_v41  ;;  %v18670_v21 = vsub.f32 %v18484_v32, %v10260_v28  ;;  %v5336_v32 = vadd.f32 %v10354_v19, %v5335_v40 }
 0x363   : > { %18655 = vst [vmem:[#allocation226_spill] sm:$0xff] %v10777_v11  ;;  %v10784_v6 = vpop.eup %7823  ;;  %7849 = vpow2.f32 %v4485_v29  ;;  %v4493_v57 = vmul.f32 1.442695, %v18664_v4  ;;  %18666 = vst [vmem:[#allocation232_spill] sm:$0xff] %v10809_v13  ;;  %v5366_v15 = vadd.f32 %v10552_v20, %v5365_v27  ;;  %v18675_v27 = vsub.f32 %v18576_v55, %v10540_v22  ;;  %v18682_v41 = vld [vmem:[#allocation76_spill] sm:$0xff] }
 0x364   : > { %18657 = vst [vmem:[#allocation227_spill] sm:$0xff] %v10784_v6  ;;  %v10789_v2 = vpop.eup %7825  ;;  %v5391_v38 = vadd.f32 %v10784_v6, %v5390_v53  ;;  %v10807_v53 = vpop.f32.mrb[120].mxu1  ;;  %7851 = vpow2.f32 %v4489_v26  ;;  %v4497_v29 = vmul.f32 1.442695, %v18670_v21  ;;  %v18678_v21 = vsub.f32 %v18488_v44, %v10260_v28 }
 0x365   : > { %18659 = vst [vmem:[#allocation228_spill] sm:$0xff] %v10789_v2  ;;  %v10796_v25 = vpop.eup %7827  ;;  %18665 = vst [vmem:[#allocation231_spill] sm:$0xff] %v10807_v53  ;;  %v10816_v62 = vpop.trf.xlu0  ;;  %7853 = vpow2.f32 %v4419_v34  ;;  %v4431_v23 = vmul.f32 1.442695, %v18675_v27  ;;  %v18683_v27 = vsub.f32 %v18582_v46, %v10540_v22  ;;  %v5367_v44 = vadd.f32 %v10564_v49, %v5366_v15 }
 0x366   : > { %18661 = vst [vmem:[#allocation229_spill] sm:$0xff] %v10796_v25  ;;  %v10801_v18 = vpop.eup %7829  ;;  %v5392_v4 = vadd.f32 %v10796_v25, %v5391_v38  ;;  %v10825_v2 = vpop.f32.mrb[121].mxu1  ;;  %7855 = vpow2.f32 %v4423_v37  ;;  %v18677_v38 = vld [vmem:[#allocation69_spill] sm:$0xff]  ;;  %v4501_v25 = vmul.f32 1.442695, %v18678_v21  ;;  %v18686_v21 = vsub.f32 %v18489_v0, %v10260_v28 }
 0x367   : > { %18663 = vst [vmem:[#allocation230_spill] sm:$0xff] %v10801_v18  ;;  %v10811_v17 = vpop.eup %7831  ;;  %18671 = vst [vmem:[#allocation235_spill] sm:$0xff] %v10825_v2  ;;  %v10827_v26 = vpop.f32.mrb[169].mxu0  ;;  %7857 = vpow2.f32 %v4493_v57  ;;  %v4435_v40 = vmul.f32 1.442695, %v18683_v27  ;;  %v18688_v46 = vsub.f32 %v18587_v36, %v10540_v22  ;;  %v18689_v27 = vld [vmem:[#allocation121_spill] sm:$0xff]  ;;  %v7477_v55 = vunpack.i.h.bf16 %v10243_v31 }
 0x368   : > { %18667 = vst [vmem:[#allocation233_spill] sm:$0xff] %v10811_v17  ;;  %v10818_v6 = vpop.eup %7833  ;;  %18672 = vst [vmem:[#allocation236_spill] sm:$0xff] %v10827_v26  ;;  %v10843_v26 = vpop.f32.mrb[122].mxu1  ;;  %7859 = vpow2.f32 %v4427_v54  ;;  %v4505_v19 = vmul.f32 1.442695, %v18686_v21  ;;  %v10873_v0 = vadd.f32 %v10378_v7, %v5336_v32 }
 0x369   : > { %18669 = vst [vmem:[#allocation234_spill] sm:$0xff] %v10818_v6  ;;  %v10829_v11 = vpop.eup %7835  ;;  %18679 = vst [vmem:[#allocation69_spill] sm:$0xff] %v10843_v26  ;;  %v10845_v2 = vpop.f32.mrb[170].mxu0  ;;  %7861 = vpow2.f32 %v4497_v29  ;;  %v4439_v54 = vmul.f32 1.442695, %v18688_v46  ;;  %v18692_v29 = vsub.f32 %v18490_v5, %v10260_v28  ;;  %v18694_v46 = vsub.f32 %v18494_v52, %v10260_v28 }
 0x36a   : > { %18673 = vst [vmem:[#allocation237_spill] sm:$0xff] %v10829_v11  ;;  %v10836_v10 = vpop.eup %7837  ;;  %18680 = vst [vmem:[#allocation239_spill] sm:$0xff] %v10845_v2  ;;  %v5393_v2 = vadd.f32 %v10801_v18, %v5392_v4  ;;  %7863 = vpow2.f32 %v4431_v23  ;;  %v10868_v13 = vpop.trf.xlu0  ;;  %v18695_v18 = vld [vmem:[#allocation92_spill] sm:$0xff]  ;;  %v5368_v4 = vadd.f32 %v10577_v51, %v5367_v44  ;;  %v18699_v52 = vsub.f32 %v18589_v50, %v10540_v22  ;;  %v18717_v51 = vld [vmem:[#allocation125_spill] sm:$0xff] }
 0x36b   : > { %18676 = vst [vmem:[#allocation238_spill] sm:$0xff] %v10836_v10  ;;  %v10847_v37 = vpop.eup %7839  ;;  %18691 = vst [vmem:[#allocation241_spill] sm:$0xff] %v10873_v0  ;;  %7865 = vpow2.f32 %v4501_v25  ;;  %v4509_v23 = vmul.f32 1.442695, %v18692_v29  ;;  %v10879_v36 = vpop.trf.xlu1  ;;  %v4513_v34 = vmul.f32 1.442695, %v18694_v46  ;;  %v18696_v53 = vsub.f32 %v18695_v18, %v10260_v28 }
 0x36c   : > { %18681 = vst [vmem:[#allocation240_spill] sm:$0xff] %v10847_v37  ;;  %v10854_v57 = vpop.eup %7841  ;;  %7867 = vpow2.f32 %v4435_v40  ;;  %v18697_v25 = vsub.f32 %v18588_v48, %v10540_v22  ;;  %v5394_v0 = vadd.f32 %v10811_v17, %v5393_v2  ;;  %v4447_v46 = vmul.f32 1.442695, %v18699_v52  ;;  %v18702_v48 = vld [vmem:[#allocation131_spill] sm:$0xff]  ;;  %v18708_v2 = vld [vmem:[#allocation101_spill] sm:$0xff] }
 0x36d   : > { %18685 = vst [vmem:[#allocation76_spill] sm:$0xff] %v10854_v57  ;;  %v10861_v26 = vpop.eup %7843  ;;  %v4517_v32 = vmul.f32 1.442695, %v18696_v53  ;;  %7869 = vpow2.f32 %v4505_v19  ;;  %v18701_v18 = vsub.f32 %v18498_v1, %v10260_v28  ;;  %v18703_v40 = vld [vmem:[#allocation123_spill] sm:$0xff]  ;;  %v18707_v19 = vsub.f32 %v18499_v56, %v10260_v28  ;;  %v18718_v56 = vld [vmem:[#allocation129_spill] sm:$0xff] }
 0x36e   : > { %18687 = vst [vmem:[#allocation113_spill] sm:$0xff] %v10861_v26  ;;  %v10870_v15 = vpop.eup %7845  ;;  %v4443_v5 = vmul.f32 1.442695, %v18697_v25  ;;  %7871 = vpow2.f32 %v4439_v54  ;;  %v18704_v25 = vld [vmem:[#allocation127_spill] sm:$0xff]  ;;  %v18709_v52 = vsub.f32 %v18708_v2, %v10260_v28  ;;  %v18711_v1 = vsub.f32 %v18597_v24, %v10540_v22  ;;  %v10929_v20 = vpop.trf.xlu0 }
 0x36f   : > { %18690 = vst [vmem:[#allocation121_spill] sm:$0xff] %v10870_v15  ;;  %v10881_v21 = vpop.eup %7847  ;;  %v4521_v53 = vmul.f32 1.442695, %v18701_v18  ;;  %v18705_v39 = vmax.f32 %v18703_v40, %v18704_v25  ;;  %7873 = vpow2.f32 %v4509_v23  ;;  %v4525_v50 = vmul.f32 1.442695, %v18707_v19  ;;  %v18712_v18 = vld [vmem:[#allocation132_spill] sm:$0xff] }
 0x370   : > { %18693 = vst [vmem:[#allocation242_spill] sm:$0xff] %v10881_v21  ;;  %v10892_v29 = vpop.eup %7849  ;;  %v4529_v17 = vmul.f32 1.442695, %v18709_v52  ;;  %7875 = vpow2.f32 %v4443_v5  ;;  %v4451_v54 = vmul.f32 1.442695, %v18711_v1  ;;  %v18716_v40 = vld [vmem:[#allocation133_spill] sm:$0xff]  ;;  %v18719_v19 = vmax.f32 %v18717_v51, %v18718_v56  ;;  %v10937_v1 = vpop.trf.xlu1 }
 0x371   : > { %18698 = vst [vmem:[#allocation92_spill] sm:$0xff] %v10892_v29  ;;  %v10899_v7 = vpop.eup %7851  ;;  %v3334_v58 = vmax.f32 %v18705_v39, %v18702_v48  ;;  %v18713_v39 = vld [vmem:[#allocation174_spill] sm:$0xff]  ;;  %v18714_v48 = vld [vmem:[#allocation128_spill] sm:$0xff]  ;;  %v18721_v52 = vld [vmem:[#allocation205_spill] sm:$0xff]  ;;  %v5395_v30 = vadd.f32 %v10818_v6, %v5394_v0  ;;  %7877 = vpow2.f32 %v4447_v46 }
 0x372   : > { %18700 = vst [vmem:[#allocation243_spill] sm:$0xff] %v10899_v7  ;;  %v10908_v44 = vpop.eup %7853  ;;  %v18715_v25 = vmax.f32 %v18713_v39, %v18714_v48  ;;  %v3371_v49 = vmax.f32 %v18719_v19, %v18716_v40  ;;  %v5369_v5 = vadd.f32 %v18721_v52, %v5368_v4  ;;  %v7482_v39 = vunpack.i.h.bf16 %v10879_v36  ;;  %v18723_v56 = vld [vmem:[#allocation134_spill] sm:$0xff]  ;;  %v18724_v19 = vld [vmem:[#allocation179_spill] sm:$0xff]  ;;  %v18728_v4 = vld [vmem:[#allocation136_spill] sm:$0xff] }
 0x373   : > { %18706 = vst [vmem:[#allocation244_spill] sm:$0xff] %v10908_v44  ;;  %v10916_v59 = vpop.eup %7855  ;;  %v18725_v40 = vld [vmem:[#allocation130_spill] sm:$0xff]  ;;  %v18727_v48 = vld [vmem:[#allocation135_spill] sm:$0xff]  ;;  %7879 = vpow2.f32 %v4513_v34  ;;  %v18730_v46 = vld [vmem:[#allocation104_spill] sm:$0xff] }
 0x374   : > { %18710 = vst [vmem:[#allocation101_spill] sm:$0xff] %v10916_v59  ;;  %v3412_v23 = vmax.f32 %v18715_v25, %v18712_v18  ;;  %v10931_v2 = vpop.eup %7857  ;;  %v5424_v24 = vadd.f32 %v10916_v59, %v10908_v44  ;;  %v18726_v51 = vmax.f32 %v18724_v19, %v18725_v40  ;;  %v3335_v12 = vmax.f32 %v3334_v58, %v18727_v48  ;;  %v18735_v19 = vld [vmem:[#allocation37_spill] sm:$0xff]  ;;  %v18737_v34 = vld [vmem:[#allocation38_spill] sm:$0xff] }
 0x375   : > { %18720 = vst [vmem:[#allocation174_spill] sm:$0xff] %v10931_v2  ;;  %v10939_v25 = vpop.eup %7859  ;;  %v18731_v6 = vsub.f32 %v18730_v46, %v10260_v28  ;;  %v18732_v2 = vld [vmem:[#allocation34_spill] sm:$0xff]  ;;  %7881 = vpow2.f32 %v4451_v54  ;;  %v18739_v54 = vunpack.i.l.bf16 %v18677_v38 }
 0x376   : > { %18722 = vst [vmem:[#allocation245_spill] sm:$0xff] %v10939_v25  ;;  %v3449_v18 = vmax.f32 %v18726_v51, %v18723_v56  ;;  %v3413_v52 = vmax.f32 %v3412_v23, %v18728_v4  ;;  %v10948_v0 = vpop.eup %7861  ;;  %v5425_v44 = vadd.f32 %v10939_v25, %v5424_v24  ;;  %v3372_v47 = vmax.f32 %v3371_v49, %v18732_v2  ;;  %v10972_v25 = vpop.trf.xlu0  ;;  %v18759_v40 = vld [vmem:[#allocation142_spill] sm:$0xff] }
 0x377   : > { %18729 = vst [vmem:[#allocation179_spill] sm:$0xff] %v10948_v0  ;;  %v4533_v59 = vmul.f32 1.442695, %v18731_v6  ;;  %v10955_v7 = vpop.eup %7863  ;;  %v18734_v51 = vsub.f32 %v18598_v9, %v10540_v22  ;;  %v5370_v56 = vadd.f32 %v18737_v34, %v5369_v5  ;;  %7883 = vpow2.f32 %v4517_v32  ;;  %v18742_v5 = vld [vmem:[#allocation47_spill] sm:$0xff] }
 0x378   : > { %18733 = vst [vmem:[#allocation136_spill] sm:$0xff] %v10955_v7  ;;  %v3450_v23 = vmax.f32 %v3449_v18, %v18735_v19  ;;  %v10961_v48 = vpop.eup %7865  ;;  %v5426_v6 = vadd.f32 %v10955_v7, %v5425_v44  ;;  %7885 = vpow2.f32 %v4521_v53  ;;  %v5396_v49 = vadd.f32 %v10829_v11, %v5395_v30  ;;  %v18744_v53 = vld [vmem:[#allocation43_spill] sm:$0xff]  ;;  %v10981_v30 = vpop.trf.xlu1 }
 0x379   : > { %v4455_v58 = vmul.f32 1.442695, %v18734_v51  ;;  %18736 = vst [vmem:[#allocation104_spill] sm:$0xff] %v10961_v48  ;;  %v10965_v46 = vpop.eup %7867  ;;  %v18740_v24 = vunpack.i.l.bf16 %v18682_v41  ;;  %v1141_v51 = vpack.c.bf16 %v7482_v39, %v7477_v55  ;;  %7887 = vpow2.f32 %v4525_v50  ;;  %v18746_v41 = vld [vmem:[#allocation112_spill] sm:$0xff] }
 0x37a   : > { %18738 = vst [vmem:[#allocation38_spill] sm:$0xff] %v10965_v46  ;;  %v10974_v18 = vpop.eup %7869  ;;  %v18743_v32 = vsub.f32 %v18742_v5, %v10540_v22  ;;  %v5427_v7 = vadd.f32 %v10965_v46, %v5426_v6  ;;  %v3336_v2 = vmax.f32 %v3335_v12, %v18744_v53  ;;  %v18747_v55 = vsub.f32 %v18746_v41, %v10260_v28  ;;  %v18750_v6 = vld [vmem:[#allocation50_spill] sm:$0xff] }
 0x37b   : > { %v1123_v9 = vpack.c.bf16 %v18740_v24, %v18739_v54  ;;  %18741 = vst [vmem:[#allocation246_spill] sm:$0xff] %v10974_v18  ;;  %v10983_v38 = vpop.eup %7871  ;;  %7889 = vpow2.f32 %v4455_v58  ;;  %6905 = vmatmul.mubr.msk.bf16.gmra.mrb[228].mxu0 %vm1207_vm2, %v1141_v51  ;;  %v18749_v54 = vld [vmem:[#allocation210_spill] sm:$0xff]  ;;  %v18751_v12 = vsub.f32 %v18750_v6, %v10540_v22  ;;  %v18752_v11 = vmov 0  }
 0x37c   : > { %v4459_v44 = vmul.f32 1.442695, %v18743_v32  ;;  %18745 = vst [vmem:[#allocation47_spill] sm:$0xff] %v10983_v38  ;;  %v4537_v39 = vmul.f32 1.442695, %v18747_v55  ;;  %v10990_v50 = vpop.eup %7873  ;;  %v5371_v24 = vadd.f32 %v18749_v54, %v5370_v56  ;;  %7891 = vpow2.f32 %v4529_v17  ;;  %2680 = vmatprep.mubr.bf16.mxu0 %v18752_v11  ;;  %v18754_v51 = vld [vmem:[#allocation138_spill] sm:$0xff] }
 0x37d   : > { %6886 = vmatmul.mubr.msk.bf16.gmra.mrb[180].mxu1 %vm1207_vm2, %v1123_v9  ;;  %18748 = vst [vmem:[#allocation112_spill] sm:$0xff] %v10990_v50  ;;  %v4463_v5 = vmul.f32 1.442695, %v18751_v12  ;;  %v5428_v32 = vadd.f32 %v10983_v38, %v5427_v7  ;;  %v10999_v58 = vpop.eup %7875  ;;  %v5397_v9 = vadd.f32 %v10836_v10, %v5396_v49  ;;  %v3414_v41 = vmax.f32 %v3413_v52, %v18754_v51  ;;  %v18755_v55 = vld [vmem:[#allocation139_spill] sm:$0xff]  ;;  %v18756_v56 = vld [vmem:[#allocation140_spill] sm:$0xff] }
 0x37e   : > { %2413 = vmatprep.mubr.bf16.mxu1 %v18752_v11  ;;  %18753 = vst [vmem:[#allocation210_spill] sm:$0xff] %v10999_v58  ;;  %v3373_v46 = vmax.f32 %v3372_v47, %v18755_v55  ;;  %v3451_v17 = vmax.f32 %v3450_v23, %v18756_v56  ;;  %v11005_v53 = vpop.eup %7877  ;;  %7893 = vpow2.f32 %v4459_v44  ;;  %v7487_v7 = vunpack.i.h.bf16 %v10937_v1  ;;  %v18758_v12 = vld [vmem:[#allocation64_spill] sm:$0xff]  ;;  %v18760_v49 = vld [vmem:[#allocation143_spill] sm:$0xff]  ;;  %v11014_v47 = vpop.trf.xlu0 }
 0x37f   : > { %18757 = vst [vmem:[#allocation50_spill] sm:$0xff] %v11005_v53  ;;  %v5429_v6 = vadd.f32 %v10999_v58, %v5428_v32  ;;  %v3337_v38 = vmax.f32 %v3336_v2, %v18758_v12  ;;  %v7492_v19 = vunpack.i.h.bf16 %v10981_v30  ;;  %v3415_v50 = vmax.f32 %v3414_v41, %v18759_v40  ;;  %v18761_v52 = vld [vmem:[#allocation144_spill] sm:$0xff]  ;;  %v11016_v23 = vpop.eup %7879  ;;  %v18766_v12 = vld [vmem:[#allocation21_spill] sm:$0xff]  ;;  %v18768_v41 = vld [vmem:[#allocation211_spill] sm:$0xff] }
 0x380   : > { %v3374_v10 = vmax.f32 %v3373_v46, %v18760_v49  ;;  %v3452_v18 = vmax.f32 %v3451_v17, %v18761_v52  ;;  %18762 = vst [vmem:[#allocation247_spill] sm:$0xff] %v11016_v23  ;;  %7895 = vpow2.f32 %v4533_v59  ;;  %v18763_v44 = vld [vmem:[#allocation116_spill] sm:$0xff]  ;;  %v11024_v51 = vpop.eup %7881  ;;  %v11027_v46 = vadd.f32 %v18768_v41, %v5371_v24  ;;  %v18771_v59 = vld [vmem:[#allocation53_spill] sm:$0xff] }
 0x381   : > { %v18764_v32 = vsub.f32 %v18763_v44, %v10260_v28  ;;  %v5430_v55 = vadd.f32 %v11005_v53, %v5429_v6  ;;  %v18765_v2 = vld [vmem:[#allocation52_spill] sm:$0xff]  ;;  %18767 = vst [vmem:[#allocation116_spill] sm:$0xff] %v11024_v51  ;;  %7897 = vpow2.f32 %v4537_v39  ;;  %v11029_v17 = vpop.eup %7883  ;;  %v5398_v49 = vadd.f32 %v10847_v37, %v5397_v9  ;;  %v18778_v37 = vld [vmem:[#allocation81_spill] sm:$0xff] }
 0x382   : > { %v5906_v56 = vpack.c.bf16 %v18766_v12, %v18765_v2  ;;  %18769 = vst [vmem:[#allocation52_spill] sm:$0xff] %v11027_v46  ;;  %18770 = vst [vmem:[#allocation21_spill] sm:$0xff] %v11029_v17  ;;  %v18772_v23 = vsub.f32 %v18771_v59, %v10540_v22  ;;  %v18773_v44 = vld [vmem:[#allocation56_spill] sm:$0xff]  ;;  %v11039_v2 = vpop.eup %7885  ;;  %7899 = vpow2.f32 %v4463_v5  ;;  %v18776_v39 = vunpack.i.l.bf16 %v18684_v60  ;;  %v18801_v46 = vld [vmem:[#allocation82_spill] sm:$0xff] }
 0x383   : > { %v4541_v58 = vmul.f32 1.442695, %v18764_v32  ;;  %v18774_v6 = vsub.f32 %v18773_v44, %v10540_v22  ;;  %v5431_v12 = vadd.f32 %v11024_v51, %v5430_v55  ;;  %18775 = vst [vmem:[#allocation211_spill] sm:$0xff] %v11039_v2  ;;  %v18777_v24 = vunpack.i.l.bf16 %v18689_v27  ;;  %v11046_v59 = vpop.eup %7887  ;;  %v18794_v51 = vld [vmem:[#allocation79_spill] sm:$0xff] }
 0x384   : > { %v4467_v28 = vmul.f32 1.442695, %v18772_v23  ;;  %6161 = vmatprep.subr.bf16.mxu1 %v5906_v56  ;;  %v1142_v9 = vpack.c.bf16 %v7492_v19, %v7487_v7  ;;  %v3338_v17 = vmax.f32 %v3337_v38, %v18778_v37  ;;  %18779 = vst [vmem:[#allocation53_spill] sm:$0xff] %v11046_v59  ;;  %v18780_v23 = vsub.f32 %v18612_v3, %v10540_v22  ;;  %v18784_v38 = vld [vmem:[#allocation208_spill] sm:$0xff]  ;;  %v18797_v59 = vld [vmem:[#allocation149_spill] sm:$0xff] }
 0x385   : > { %v4471_v32 = vmul.f32 1.442695, %v18774_v6  ;;  %v1124_v53 = vpack.c.bf16 %v18777_v24, %v18776_v39  ;;  %7901 = vpow2.f32 %v4541_v58  ;;  %v18781_v55 = vsub.f32 %v18616_v63, %v10540_v22  ;;  %v11061_v19 = vpop.eup %7889  ;;  %v11067_v58 = vpop.trf.xlu0  ;;  %v18787_v39 = vld [vmem:[#allocation72_spill] sm:$0xff] }
 0x386   : > { %v4475_v44 = vmul.f32 1.442695, %v18780_v23  ;;  %v18782_v60 = vsub.f32 %v18620_v45, %v10540_v22  ;;  %18783 = vst [vmem:[#allocation56_spill] sm:$0xff] %v11061_v19  ;;  %v7499_v5 = vunpack.i.h.bf16 %v18784_v38  ;;  %6906 = vmatmul.mubr.msk.bf16.gmra.mrb[232].mxu0 %vm1207_vm2, %v1142_v9  ;;  %v7504_v3 = vunpack.i.h.bf16 %v10718_v35  ;;  %v11069_v63 = vpop.eup %7891 }
 0x387   : > { %v11054_v56 = vmul.f32 1.442695, %v18781_v55  ;;  %6887 = vmatmul.mubr.msk.bf16.gmra.mrb[184].mxu1 %vm1207_vm2, %v1124_v53  ;;  %18785 = vst [vmem:[#allocation208_spill] sm:$0xff] %v11069_v63  ;;  %v5399_v7 = vadd.f32 %v10854_v57, %v5398_v49  ;;  %v18786_v45 = vsub.f32 %v18621_v8, %v10540_v22  ;;  %v18788_v24 = vsub.f32 %v18787_v39, %v10540_v22  ;;  %v18789_v49 = vld [vmem:[#allocation146_spill] sm:$0xff]  ;;  %v18792_v57 = vld [vmem:[#allocation75_spill] sm:$0xff]  ;;  %v18796_v63 = vld [vmem:[#allocation96_spill] sm:$0xff] }
 0x388   : > { %v11059_v27 = vmul.f32 1.442695, %v18782_v60  ;;  %v5432_v53 = vadd.f32 %v11061_v19, %v5431_v12  ;;  %2423 = vmatprep.mubr.bf16.mxu1 %v18752_v11  ;;  %3024 = vmatprep.mubr.bf16.mxu0 %v18752_v11  ;;  %7903 = vpow2.f32 %v4467_v28  ;;  %v7479_v9 = vunpack.i.l.bf16 %v10879_v36  ;;  %v18790_v60 = vld [vmem:[#allocation147_spill] sm:$0xff] }
 0x389   : > { %v11075_v6 = vmul.f32 1.442695, %v18786_v45  ;;  %v11080_v23 = vmul.f32 1.442695, %v18788_v24  ;;  %v3416_v55 = vmax.f32 %v3415_v50, %v18789_v49  ;;  %v3375_v8 = vmax.f32 %v3374_v10, %v18790_v60  ;;  %v11088_v45 = vpop.eup %7893  ;;  %v18798_v50 = vld [vmem:[#allocation99_spill] sm:$0xff]  ;;  %v18799_v10 = vld [vmem:[#allocation150_spill] sm:$0xff] }
 0x38a   : > { %18791 = vst [vmem:[#allocation72_spill] sm:$0xff] %v11088_v45  ;;  %v18793_v39 = vsub.f32 %v18792_v57, %v10540_v22  ;;  %v18795_v12 = vsub.f32 %v18794_v51, %v10540_v22  ;;  %v3453_v28 = vmax.f32 %v3452_v18, %v18796_v63  ;;  %v3339_v36 = vmax.f32 %v3338_v17, %v18797_v59  ;;  %v11104_v52 = vpop.eup %7895 }
 0x38b   : > { %v1159_v37 = vpack.c.bf16 %v7504_v3, %v7499_v5  ;;  %v3417_v2 = vmax.f32 %v3416_v55, %v18798_v50  ;;  %v3376_v60 = vmax.f32 %v3375_v8, %v18799_v10  ;;  %18800 = vst [vmem:[#allocation75_spill] sm:$0xff] %v11104_v52  ;;  %v18802_v57 = vsub.f32 %v18801_v46, %v10540_v22  ;;  %v11113_v40 = vpop.eup %7897  ;;  %v18806_v3 = vld [vmem:[#allocation152_spill] sm:$0xff]  ;;  %v11119_v8 = vpop.trf.xlu0  ;;  %v18812_v52 = vld [vmem:[#allocation158_spill] sm:$0xff] }
 0x38c   : > { %v11093_v24 = vmul.f32 1.442695, %v18793_v39  ;;  %v11098_v19 = vmul.f32 1.442695, %v18795_v12  ;;  %v5433_v51 = vadd.f32 %v11088_v45, %v5432_v53  ;;  %v18803_v12 = vld [vmem:[#allocation105_spill] sm:$0xff]  ;;  %18804 = vst [vmem:[#allocation79_spill] sm:$0xff] %v11113_v40  ;;  %v5400_v18 = vadd.f32 %v10861_v26, %v5399_v7 }
 0x38d   : > { %v11109_v39 = vmul.f32 1.442695, %v18802_v57  ;;  %v3454_v49 = vmax.f32 %v3453_v28, %v18803_v12  ;;  %7905 = vpow2.f32 %v4471_v32  ;;  %v18805_v17 = vunpack.i.l.bf16 %v10243_v31  ;;  %v11122_v57 = vpop.eup %7899  ;;  %v18808_v7 = vld [vmem:[#allocation153_spill] sm:$0xff]  ;;  %v18809_v28 = vld [vmem:[#allocation155_spill] sm:$0xff] }
 0x38e   : > { %v3340_v55 = vmax.f32 %v3339_v36, %v18806_v3  ;;  %7907 = vpow2.f32 %v4475_v44  ;;  %v7509_v46 = vunpack.i.h.bf16 %v10775_v14  ;;  %18807 = vst [vmem:[#allocation99_spill] sm:$0xff] %v11122_v57  ;;  %6925 = vmatmul.mubr.msk.bf16.vlgmr.msra.gmra.mrb[236].mxu0 %vm1207_vm2, %v1159_v37  ;;  %v7514_v53 = vunpack.i.h.bf16 %v10816_v62  ;;  %v11130_v36 = vpop.trf.xlu1  ;;  %v18814_v45 = vld [vmem:[#allocation161_spill] sm:$0xff] }
 0x38f   : > { %v1125_v5 = vpack.c.bf16 %v7479_v9, %v18805_v17  ;;  %v3418_v32 = vmax.f32 %v3417_v2, %v18808_v7  ;;  %v3377_v31 = vmax.f32 %v3376_v60, %v18809_v28  ;;  %v18810_v9 = vld [vmem:[#allocation156_spill] sm:$0xff]  ;;  %v11132_v26 = vpop.eup %7901  ;;  %v5434_v44 = vadd.f32 %v11122_v57, %v5433_v51  ;;  %3034 = vmatprep.mubr.bf16.mxu0 %v18752_v11  ;;  %v18813_v2 = vld [vmem:[#allocation159_spill] sm:$0xff]  ;;  %v18815_v28 = vld [vmem:[#allocation162_spill] sm:$0xff] }
 0x390   : > { %v3455_v17 = vmax.f32 %v3454_v49, %v18810_v9  ;;  %18811 = vst [vmem:[#allocation82_spill] sm:$0xff] %v11132_v26  ;;  %v7484_v40 = vunpack.i.l.bf16 %v10937_v1  ;;  %v3341_v37 = vmax.f32 %v3340_v55, %v18812_v52  ;;  %v5401_v26 = vadd.f32 %v10870_v15, %v5400_v18  ;;  %v18816_v3 = vld [vmem:[#allocation85_spill] sm:$0xff] }
 0x391   : > { %6888 = vmatmul.mubr.msk.bf16.gmra.mrb[188].mxu1 %vm1207_vm2, %v1125_v5  ;;  %v7489_v5 = vunpack.i.l.bf16 %v10981_v30  ;;  %v3419_v60 = vmax.f32 %v3418_v32, %v18813_v2  ;;  %v3378_v49 = vmax.f32 %v3377_v31, %v18814_v45  ;;  %v18817_v51 = vsub.f32 %v18816_v3, %v10540_v22  ;;  %v11167_v45 = vpop.trf.xlu0  ;;  %v18823_v52 = vld [vmem:[#allocation165_spill] sm:$0xff] }
 0x392   : > { %2433 = vmatprep.mubr.bf16.mxu1 %v18752_v11  ;;  %v3456_v10 = vmax.f32 %v3455_v17, %v18815_v28  ;;  %v18818_v30 = vsub.f32 %v18632_v42, %v10540_v22  ;;  %v11154_v57 = vpop.eup %7903  ;;  %v18820_v32 = vsub.f32 %v18633_v43, %v10540_v22  ;;  %v18821_v18 = vsub.f32 %v18634_v16, %v10540_v22  ;;  %v18824_v43 = vld [vmem:[#allocation168_spill] sm:$0xff]  ;;  %v18825_v28 = vld [vmem:[#allocation169_spill] sm:$0xff]  ;;  %v11174_v12 = vpop.trf.xlu1 }
 0x393   : > { %v11147_v1 = vmul.f32 1.442695, %v18817_v51  ;;  %18819 = vst [vmem:[#allocation153_spill] sm:$0xff] %v11154_v57  ;;  %v1160_v3 = vpack.c.bf16 %v7514_v53, %v7509_v46  ;;  %v18822_v51 = vld [vmem:[#allocation164_spill] sm:$0xff]  ;;  %7909 = vpow2.f32 %v11054_v56  ;;  %v5435_v42 = vadd.f32 %v11154_v57, %v5434_v44 }
 0x394   : > { %v11152_v55 = vmul.f32 1.442695, %v18818_v30  ;;  %v11159_v31 = vmul.f32 1.442695, %v18820_v32  ;;  %v11164_v17 = vmul.f32 1.442695, %v18821_v18  ;;  %v3342_v15 = vmax.f32 %v3341_v37, %v18822_v51 }
 0x395   : > { %v1126_v30 = vpack.c.bf16 %v7489_v5, %v7484_v40  ;;  %v3420_v59 = vmax.f32 %v3419_v60, %v18823_v52  ;;  %v3379_v32 = vmax.f32 %v3378_v49, %v18824_v43  ;;  %v3457_v9 = vmax.f32 %v3456_v10, %v18825_v28  ;;  %v18826_v37 = vld [vmem:[#allocation171_spill] sm:$0xff]  ;;  %v18828_v40 = vld [vmem:[#allocation172_spill] sm:$0xff] }
 0x396   : > { %v5402_v16 = vadd.f32 %v10881_v21, %v5401_v26  ;;  %v7519_v46 = vunpack.i.h.bf16 %v10868_v13  ;;  %v7524_v53 = vunpack.i.h.bf16 %v10929_v20  ;;  %v3343_v18 = vmax.f32 %v3342_v15, %v18826_v37  ;;  %6926 = vmatmul.mubr.msk.bf16.gmra.mrb[240].mxu0 %vm1207_vm2, %v1160_v3  ;;  %v18829_v5 = vld [vmem:[#allocation175_spill] sm:$0xff]  ;;  %v18830_v60 = vld [vmem:[#allocation176_spill] sm:$0xff]  ;;  %v18839_v37 = vld [vmem:[#allocation29_spill] sm:$0xff] }
 0x397   : > { %v11180_v56 = vpop.eup %7905  ;;  %v3421_v44 = vmax.f32 %v3420_v59, %v18828_v40  ;;  %v3380_v10 = vmax.f32 %v3379_v32, %v18829_v5  ;;  %v3458_v49 = vmax.f32 %v3457_v9, %v18830_v60  ;;  %v7496_v21 = vunpack.i.l.bf16 %v18784_v38  ;;  %3044 = vmatprep.mubr.bf16.mxu0 %v18752_v11  ;;  %v11206_v32 = vpop.trf.xlu0  ;;  %v18840_v60 = vld [vmem:[#allocation33_spill] sm:$0xff]  ;;  %v18842_v28 = vld [vmem:[#allocation39_spill] sm:$0xff] }
 0x398   : > { %18827 = vst [vmem:[#allocation159_spill] sm:$0xff] %v11180_v56  ;;  %v11187_v57 = vpop.eup %7907  ;;  %v5436_v26 = vadd.f32 %v11180_v56, %v5435_v42  ;;  %v7501_v15 = vunpack.i.l.bf16 %v10718_v35  ;;  %7911 = vpow2.f32 %v11059_v27  ;;  %v18832_v59 = vsub.f32 %v18635_v61, %v10540_v22  ;;  %v18834_v42 = vld [vmem:[#allocation25_spill] sm:$0xff]  ;;  %v18835_v56 = vld [vmem:[#allocation103_spill] sm:$0xff] }
 0x399   : > { %6889 = vmatmul.mubr.msk.bf16.gmra.mrb[192].mxu1 %vm1207_vm2, %v1126_v30  ;;  %18831 = vst [vmem:[#allocation85_spill] sm:$0xff] %v11187_v57  ;;  %v18833_v9 = vsub.f32 %v18641_v33, %v10540_v22  ;;  %v3344_v38 = vmax.f32 %v3343_v18, %v18834_v42  ;;  %v5403_v35 = vadd.f32 %v10892_v29, %v5402_v16  ;;  %v18838_v61 = vld [vmem:[#allocation27_spill] sm:$0xff]  ;;  %7913 = vpow2.f32 %v11075_v6  ;;  %v18841_v16 = vld [vmem:[#allocation36_spill] sm:$0xff] }
 0x39a   : > { %2777 = vmatprep.mubr.bf16.mxu1 %v18752_v11  ;;  %v11198_v3 = vmul.f32 1.442695, %v18832_v59  ;;  %v18836_v5 = vsub.f32 %v18835_v56, %v10540_v22  ;;  %v1161_v43 = vpack.c.bf16 %v7524_v53, %v7519_v46  ;;  %v3422_v59 = vmax.f32 %v3421_v44, %v18838_v61  ;;  %v18844_v46 = vld [vmem:[#allocation48_spill] sm:$0xff]  ;;  %v18868_v40 = vld [vmem:[#allocation83_spill] sm:$0xff] }
 0x39b   : > { %v11203_v30 = vmul.f32 1.442695, %v18833_v9  ;;  %v3381_v51 = vmax.f32 %v3380_v10, %v18839_v37  ;;  %v3459_v33 = vmax.f32 %v3458_v49, %v18840_v60  ;;  %v11217_v9 = vpop.trf.xlu1  ;;  %v5437_v18 = vadd.f32 %v11187_v57, %v5436_v26  ;;  %v18846_v10 = vld [vmem:[#allocation243_spill] sm:$0xff]  ;;  %v18847_v49 = vld [vmem:[#allocation137_spill] sm:$0xff]  ;;  %v18848_v60 = vld [vmem:[#allocation40_spill] sm:$0xff] }
 0x39c   : > { %v11212_v27 = vmul.f32 1.442695, %v18836_v5  ;;  %v1143_v42 = vpack.c.bf16 %v7501_v15, %v7496_v21  ;;  %v3345_v29 = vmax.f32 %v3344_v38, %v18841_v16  ;;  %v3423_v56 = vmax.f32 %v3422_v59, %v18842_v28  ;;  %v18843_v5 = vld [vmem:[#allocation42_spill] sm:$0xff]  ;;  %v18856_v57 = vld [vmem:[#allocation63_spill] sm:$0xff]  ;;  %v18861_v16 = vld [vmem:[#allocation145_spill] sm:$0xff] }
 0x39d   : > { %v3382_v63 = vmax.f32 %v3381_v51, %v18843_v5  ;;  %v3460_v53 = vmax.f32 %v3459_v33, %v18844_v46  ;;  %v11225_v44 = vpop.eup %7909  ;;  %v5404_v37 = vadd.f32 %v18846_v10, %v5403_v35  ;;  %7915 = vpow2.f32 %v11080_v23  ;;  %v18849_v51 = vld [vmem:[#allocation55_spill] sm:$0xff]  ;;  %v18850_v15 = vld [vmem:[#allocation58_spill] sm:$0xff]  ;;  %v11238_v33 = vpop.trf.xlu0 }
 0x39e   : > { %18837 = vst [vmem:[#allocation103_spill] sm:$0xff] %v11212_v27  ;;  %18845 = vst [vmem:[#allocation248_spill] sm:$0xff] %v11225_v44  ;;  %v5905_v6 = vpack.c.bf16 %v18848_v60, %v18847_v49  ;;  %v7506_v26 = vunpack.i.l.bf16 %v10775_v14  ;;  %v7529_v21 = vunpack.i.h.bf16 %v10972_v25  ;;  %6927 = vmatmul.mubr.msk.bf16.gmra.mrb[244].mxu0 %vm1207_vm2, %v1161_v43  ;;  %v5908_v38 = vpack.c.bf16 %v18850_v15, %v18849_v51  ;;  %v18851_v60 = vld [vmem:[#allocation54_spill] sm:$0xff]  ;;  %v11243_v35 = vpop.f32.mrb[123].mxu1  ;;  %v11245_v49 = vpop.f32.mrb[171].mxu0  ;;  %v18855_v15 = vld [vmem:[#allocation61_spill] sm:$0xff] }
 0x39f   : > { %v7534_v59 = vunpack.i.h.bf16 %v11014_v47  ;;  %v5438_v23 = vadd.f32 %v11225_v44, %v5437_v18  ;;  %v3346_v14 = vmax.f32 %v3345_v29, %v18851_v60  ;;  %18852 = vst [vmem:[#allocation137_spill] sm:$0xff] %v11243_v35  ;;  %18853 = vst [vmem:[#allocation40_spill] sm:$0xff] %v11245_v49  ;;  %v7511_v43 = vunpack.i.l.bf16 %v10816_v62  ;;  %3054 = vmatprep.mubr.bf16.mxu0 %v18752_v11  ;;  %v18857_v44 = vld [vmem:[#allocation106_spill] sm:$0xff]  ;;  %v18860_v60 = vld [vmem:[#allocation141_spill] sm:$0xff] }
 0x3a0   : > { %v3383_v10 = vmax.f32 %v3382_v63, %v18855_v15  ;;  %v3461_v18 = vmax.f32 %v3460_v53, %v18856_v57  ;;  %v18858_v29 = vsub.f32 %v18857_v44, %v10540_v22  ;;  %v5907_v46 = vpack.c.bf16 %v18861_v16, %v18860_v60  ;;  %v18862_v62 = vld [vmem:[#allocation51_spill] sm:$0xff]  ;;  %v18864_v28 = vld [vmem:[#allocation70_spill] sm:$0xff]  ;;  %v18866_v15 = vld [vmem:[#allocation73_spill] sm:$0xff] }
 0x3a1   : > { %6908 = vmatmul.mubr.msk.bf16.vlgmr.msra.gmra.mrb[196].mxu1 %vm1207_vm2, %v1143_v42  ;;  %v18854_v42 = vld [vmem:[#allocation57_spill] sm:$0xff]  ;;  %v3347_v61 = vmax.f32 %v3346_v14, %v18864_v28  ;;  %v1162_v63 = vpack.c.bf16 %v7534_v59, %v7529_v21  ;;  %7917 = vpow2.f32 %v11093_v24  ;;  %v18869_v16 = vld [vmem:[#allocation174_spill] sm:$0xff]  ;;  %v7539_v14 = vunpack.i.h.bf16 %v11067_v58  ;;  %v11274_v21 = vpop.f32.mrb[124].mxu1  ;;  %v18875_v24 = vld [vmem:[#allocation183_spill] sm:$0xff] }
 0x3a2   : > { %6162 = vmatpush1.bf16.msra.mxu1 %v5905_v6  ;;  %2787 = vmatprep.mubr.bf16.mxu1 %v18752_v11  ;;  %v3424_v51 = vmax.f32 %v3423_v56, %v18854_v42  ;;  %v11252_v6 = vpop.trf.xlu1  ;;  %v11257_v5 = vmul.f32 1.442695, %v18858_v29  ;;  %v11264_v56 = vpop.eup %7911  ;;  %v18867_v57 = vld [vmem:[#allocation77_spill] sm:$0xff]  ;;  %v3462_v52 = vmax.f32 %v3461_v18, %v18868_v40  ;;  %v5405_v60 = vadd.f32 %v18869_v16, %v5404_v37  ;;  %v18889_v40 = vld [vmem:[#allocation188_spill] sm:$0xff] }
 0x3a3   : > { %6163 = vmatprep.subr.bf16.mxu1 %v5908_v38  ;;  %v18863_v38 = vld [vmem:[#allocation66_spill] sm:$0xff]  ;;  %18865 = vst [vmem:[#allocation58_spill] sm:$0xff] %v11264_v56  ;;  %v3384_v42 = vmax.f32 %v3383_v10, %v18867_v57  ;;  %v5439_v44 = vadd.f32 %v11264_v56, %v5438_v23  ;;  %7919 = vpow2.f32 %v11098_v19  ;;  %v1144_v29 = vpack.c.bf16 %v7511_v43, %v7506_v26  ;;  %v11276_v59 = vpop.eup %7913  ;;  %v18872_v10 = vld [vmem:[#allocation148_spill] sm:$0xff]  ;;  %v11283_v56 = vpop.trf.xlu0 }
 0x3a4   : > { %18859 = vst [vmem:[#allocation55_spill] sm:$0xff] %v11257_v5  ;;  %v5910_v27 = vpack.c.bf16 %v18863_v38, %v18862_v62  ;;  %v3425_v53 = vmax.f32 %v3424_v51, %v18866_v15  ;;  %18870 = vst [vmem:[#allocation106_spill] sm:$0xff] %v11274_v21  ;;  %v18873_v51 = vld [vmem:[#allocation151_spill] sm:$0xff]  ;;  %v18874_v62 = vld [vmem:[#allocation80_spill] sm:$0xff]  ;;  %v11285_v37 = vpop.f32.mrb[125].mxu1  ;;  %v7544_v19 = vunpack.i.h.bf16 %v11119_v8  ;;  %7921 = vpow2.f32 %v11109_v39 }
 0x3a5   : > { %18871 = vst [vmem:[#allocation141_spill] sm:$0xff] %v11276_v59  ;;  %v5909_v18 = vpack.c.bf16 %v18873_v51, %v18872_v10  ;;  %v5912_v38 = vpack.c.bf16 %v18875_v24, %v18874_v62  ;;  %v18876_v23 = vld [vmem:[#allocation86_spill] sm:$0xff]  ;;  %18877 = vst [vmem:[#allocation145_spill] sm:$0xff] %v11285_v37  ;;  %v11294_v51 = vpop.f32.mrb[126].mxu1  ;;  %7923 = vpow2.f32 %v11147_v1  ;;  %v5406_v5 = vadd.f32 %v10948_v0, %v5405_v60  ;;  %v18892_v1 = vld [vmem:[#allocation192_spill] sm:$0xff] }
 0x3a6   : > { %6164 = vmatpush1.bf16.msra.mxu1 %v5907_v46  ;;  %v3348_v46 = vmax.f32 %v3347_v61, %v18876_v23  ;;  %6928 = vmatmul.mubr.msk.bf16.gmra.mrb[248].mxu0 %vm1207_vm2, %v1162_v63  ;;  %v18879_v43 = vld [vmem:[#allocation98_spill] sm:$0xff]  ;;  %v11292_v10 = vpop.trf.xlu1  ;;  %18880 = vst [vmem:[#allocation51_spill] sm:$0xff] %v11294_v51  ;;  %v5440_v61 = vadd.f32 %v11276_v59, %v5439_v44  ;;  %v18882_v63 = vld [vmem:[#allocation184_spill] sm:$0xff]  ;;  %v18885_v23 = vld [vmem:[#allocation67_spill] sm:$0xff]  ;;  %7925 = vpow2.f32 %v11152_v55  ;;  %v7549_v60 = vunpack.i.h.bf16 %v11167_v45 }
 0x3a7   : > { %6165 = vmatprep.subr.bf16.mxu1 %v5910_v27  ;;  %v18878_v27 = vld [vmem:[#allocation95_spill] sm:$0xff]  ;;  %v3385_v16 = vmax.f32 %v3384_v42, %v18879_v43  ;;  %v11296_v62 = vpop.eup %7915  ;;  %v3463_v24 = vmax.f32 %v3462_v52, %v18882_v63  ;;  %v7521_v42 = vunpack.i.l.bf16 %v10929_v20  ;;  %3064 = vmatprep.mubr.bf16.mxu0 %v18752_v11  ;;  %v18884_v43 = vld [vmem:[#allocation185_spill] sm:$0xff]  ;;  %v18886_v44 = vld [vmem:[#allocation108_spill] sm:$0xff]  ;;  %v1163_v22 = vpack.c.bf16 %v7544_v19, %v7539_v14 }
 0x3a8   : > { %v3426_v26 = vmax.f32 %v3425_v53, %v18878_v27  ;;  %18881 = vst [vmem:[#allocation66_spill] sm:$0xff] %v11296_v62  ;;  %v11303_v53 = vpop.f32.mrb[127].mxu1  ;;  %v3349_v57 = vmax.f32 %v3348_v46, %v18884_v43  ;;  %v18888_v59 = vld [vmem:[#allocation74_spill] sm:$0xff]  ;;  %v18890_v63 = vld [vmem:[#allocation189_spill] sm:$0xff]  ;;  %v18891_v20 = vld [vmem:[#allocation191_spill] sm:$0xff]  ;;  %7927 = vpow2.f32 %v11159_v31  ;;  %v5441_v46 = vadd.f32 %v11296_v62, %v5440_v61 }
 0x3a9   : > { %6909 = vmatmul.mubr.msk.bf16.gmra.mrb[200].mxu1 %vm1207_vm2, %v1144_v29  ;;  %v7516_v29 = vunpack.i.l.bf16 %v10868_v13  ;;  %18883 = vst [vmem:[#allocation73_spill] sm:$0xff] %v11303_v53  ;;  %v18887_v13 = vld [vmem:[#allocation154_spill] sm:$0xff]  ;;  %v3386_v28 = vmax.f32 %v3385_v16, %v18888_v59  ;;  %v3464_v52 = vmax.f32 %v3463_v24, %v18889_v40  ;;  %v18893_v24 = vld [vmem:[#allocation193_spill] sm:$0xff]  ;;  %v11326_v59 = vpop.f32.mrb[128].mxu1  ;;  %v18897_v19 = vld [vmem:[#allocation160_spill] sm:$0xff]  ;;  %7929 = vpow2.f32 %v11164_v17 }
 0x3aa   : > { %6166 = vmatpush1.bf16.msra.mxu1 %v5909_v18  ;;  %2797 = vmatprep.mubr.bf16.mxu1 %v18752_v11  ;;  %v3427_v39 = vmax.f32 %v3426_v26, %v18885_v23  ;;  %v5911_v18 = vpack.c.bf16 %v18887_v13, %v18886_v44  ;;  %v3350_v26 = vmax.f32 %v3349_v57, %v18892_v1  ;;  %v11321_v44 = vpop.trf.xlu0  ;;  %v11324_v55 = vpop.trf.xlu1  ;;  %v18896_v31 = vld [vmem:[#allocation157_spill] sm:$0xff]  ;;  %v18899_v57 = vld [vmem:[#allocation90_spill] sm:$0xff]  ;;  %v7554_v1 = vunpack.i.h.bf16 %v11206_v32 }
 0x3ab   : > { %6167 = vmatprep.subr.bf16.mxu1 %v5912_v38  ;;  %v5914_v38 = vpack.c.bf16 %v18891_v20, %v18890_v63  ;;  %v1145_v16 = vpack.c.bf16 %v7521_v42, %v7516_v29  ;;  %18894 = vst [vmem:[#allocation148_spill] sm:$0xff] %v11326_v59  ;;  %v11328_v14 = vpop.eup %7917  ;;  %v5913_v61 = vpack.c.bf16 %v18897_v19, %v18896_v31  ;;  %v18898_v63 = vld [vmem:[#allocation87_spill] sm:$0xff]  ;;  %v11335_v0 = vpop.f32.mrb[129].mxu1  ;;  %v18905_v31 = vld [vmem:[#allocation197_spill] sm:$0xff]  ;;  %7931 = vpow2.f32 %v11198_v3  ;;  %v18922_v3 = vld [vmem:[#allocation26_spill] sm:$0xff] }
 0x3ac   : > { %v3428_v13 = vmax.f32 %v3427_v39, %v18893_v24  ;;  %18895 = vst [vmem:[#allocation151_spill] sm:$0xff] %v11328_v14  ;;  %v3465_v20 = vmax.f32 %v3464_v52, %v18899_v57  ;;  %18900 = vst [vmem:[#allocation80_spill] sm:$0xff] %v11335_v0  ;;  %v11337_v29 = vpop.f32.mrb[172].mxu0  ;;  %v18903_v39 = vld [vmem:[#allocation194_spill] sm:$0xff]  ;;  %v3351_v19 = vmax.f32 %v3350_v26, %v18905_v31  ;;  %v11348_v52 = vpop.f32.mrb[130].mxu1  ;;  %v7531_v26 = vunpack.i.l.bf16 %v11014_v47 }
 0x3ad   : > { %18901 = vst [vmem:[#allocation183_spill] sm:$0xff] %v11337_v29  ;;  %v11339_v42 = vpop.eup %7919  ;;  %18907 = vst [vmem:[#allocation108_spill] sm:$0xff] %v11348_v52  ;;  %v11350_v43 = vpop.f32.mrb[173].mxu0  ;;  %v5442_v57 = vadd.f32 %v11328_v14, %v5441_v46  ;;  %v11365_v17 = vadd.f32 %v10961_v48, %v5406_v5  ;;  %v18914_v46 = vld [vmem:[#allocation163_spill] sm:$0xff]  ;;  %v18916_v14 = vld [vmem:[#allocation22_spill] sm:$0xff]  ;;  %v1164_v47 = vpack.c.bf16 %v7554_v1, %v7549_v60  ;;  %v7559_v1 = vunpack.i.h.bf16 %v11238_v33 }
 0x3ae   : > { %6168 = vmatpush1.bf16.msra.mxu1 %v5911_v18  ;;  %v3387_v18 = vmax.f32 %v3386_v28, %v18898_v63  ;;  %18902 = vst [vmem:[#allocation95_spill] sm:$0xff] %v11339_v42  ;;  %6929 = vmatmul.mubr.msk.bf16.gmra.mrb[252].mxu0 %vm1207_vm2, %v1163_v22  ;;  %v18906_v28 = vld [vmem:[#allocation200_spill] sm:$0xff]  ;;  %18908 = vst [vmem:[#allocation154_spill] sm:$0xff] %v11350_v43  ;;  %v18909_v22 = vld [vmem:[#allocation102_spill] sm:$0xff]  ;;  %v11362_v40 = vpop.eup %7921  ;;  %7933 = vpow2.f32 %v11203_v30 }
 0x3af   : > { %6169 = vmatprep.subr.bf16.mxu1 %v5914_v38  ;;  %v18904_v38 = vld [vmem:[#allocation84_spill] sm:$0xff]  ;;  %v3429_v63 = vmax.f32 %v3428_v13, %v18906_v28  ;;  %3074 = vmatprep.mubr.bf16.mxu0 %v18752_v11  ;;  %v18911_v13 = vld [vmem:[#allocation203_spill] sm:$0xff]  ;;  %18912 = vst [vmem:[#allocation191_spill] sm:$0xff] %v11362_v40  ;;  %18913 = vst [vmem:[#allocation157_spill] sm:$0xff] %v11365_v17  ;;  %v11375_v23 = vpop.eup %7923 }
 0x3b0   : > { %v5916_v62 = vpack.c.bf16 %v18904_v38, %v18903_v39  ;;  %v11356_v39 = vpop.f32.mrb[131].mxu1  ;;  %v7526_v38 = vunpack.i.l.bf16 %v10972_v25  ;;  %v3466_v31 = vmax.f32 %v3465_v20, %v18911_v13  ;;  %v11371_v25 = vpop.trf.xlu0  ;;  %v18918_v28 = vld [vmem:[#allocation196_spill] sm:$0xff]  ;;  %18919 = vst [vmem:[#allocation160_spill] sm:$0xff] %v11375_v23  ;;  %v11378_v20 = vadd.f32 %v11339_v42, %v5442_v57  ;;  %v18923_v40 = vld [vmem:[#allocation30_spill] sm:$0xff] }
 0x3b1   : > { %6910 = vmatmul.mubr.msk.bf16.gmra.mrb[204].mxu1 %vm1207_vm2, %v1145_v16  ;;  %v3388_v16 = vmax.f32 %v3387_v18, %v18909_v22  ;;  %18910 = vst [vmem:[#allocation189_spill] sm:$0xff] %v11356_v39  ;;  %v3352_v22 = vmax.f32 %v3351_v19, %v18916_v14  ;;  %v18921_v5 = vld [vmem:[#allocation24_spill] sm:$0xff]  ;;  %v7564_v19 = vunpack.i.h.bf16 %v11283_v56  ;;  %v11388_v14 = vpop.trf.xlu1  ;;  %v7536_v23 = vunpack.i.l.bf16 %v11067_v58  ;;  %v18950_v17 = vld [vmem:[#allocation178_spill] sm:$0xff] }
 0x3b2   : > { %6170 = vmatpush1.bf16.msra.mxu1 %v5913_v61  ;;  %2807 = vmatprep.mubr.bf16.mxu1 %v18752_v11  ;;  %v18915_v61 = vld [vmem:[#allocation166_spill] sm:$0xff]  ;;  %18920 = vst [vmem:[#allocation194_spill] sm:$0xff] %v11378_v20  ;;  %v3430_v48 = vmax.f32 %v3429_v63, %v18921_v5  ;;  %v1146_v60 = vpack.c.bf16 %v7531_v26, %v7526_v38  ;;  %18926 = vst [vmem:[#allocation163_spill] sm:$0xff] %v11388_v14  ;;  %v18934_v38 = vld [vmem:[#allocation93_spill] sm:$0xff] }
 0x3b3   : > { %6171 = vmatprep.subr.bf16.mxu1 %v5916_v62  ;;  %v5915_v18 = vpack.c.bf16 %v18915_v61, %v18914_v46  ;;  %v18917_v62 = vld [vmem:[#allocation195_spill] sm:$0xff]  ;;  %v3389_v13 = vmax.f32 %v3388_v16, %v18922_v3  ;;  %v3467_v46 = vmax.f32 %v3466_v31, %v18923_v40  ;;  %v11383_v61 = vpop.eup %7925  ;;  %v18929_v63 = vld [vmem:[#allocation170_spill] sm:$0xff]  ;;  %v18930_v16 = vld [vmem:[#allocation32_spill] sm:$0xff]  ;;  %v1165_v58 = vpack.c.bf16 %v7564_v19, %v7559_v1 }
 0x3b4   : > { %v5918_v24 = vpack.c.bf16 %v18918_v28, %v18917_v62  ;;  %18924 = vst [vmem:[#allocation84_spill] sm:$0xff] %v11383_v61  ;;  %v18925_v28 = vld [vmem:[#allocation206_spill] sm:$0xff]  ;;  %v11390_v57 = vpop.eup %7927  ;;  %v3431_v3 = vmax.f32 %v3430_v48, %v18930_v16  ;;  %v18931_v31 = vld [vmem:[#allocation35_spill] sm:$0xff]  ;;  %v18932_v61 = vld [vmem:[#allocation209_spill] sm:$0xff]  ;;  %v7569_v1 = vunpack.i.h.bf16 %v11321_v44  ;;  %v7574_v19 = vunpack.i.h.bf16 %v11371_v25 }
 0x3b5   : > { %v3353_v62 = vmax.f32 %v3352_v22, %v18925_v28  ;;  %18927 = vst [vmem:[#allocation166_spill] sm:$0xff] %v11390_v57  ;;  %v3390_v40 = vmax.f32 %v3389_v13, %v18931_v31  ;;  %v18933_v22 = vld [vmem:[#allocation198_spill] sm:$0xff]  ;;  %v7541_v28 = vunpack.i.l.bf16 %v11119_v8  ;;  %v7546_v57 = vunpack.i.l.bf16 %v11167_v45  ;;  %v18935_v13 = vld [vmem:[#allocation41_spill] sm:$0xff]  ;;  %v18951_v14 = vld [vmem:[#allocation180_spill] sm:$0xff] }
 0x3b6   : > { %6172 = vmatpush1.bf16.msra.mxu1 %v5915_v18  ;;  %v18928_v18 = vld [vmem:[#allocation167_spill] sm:$0xff]  ;;  %6930 = vmatmul.mubr.msk.bf16.gmra.mrb[0].mxu0 %vm1207_vm2, %v1164_v47  ;;  %v5920_v26 = vpack.c.bf16 %v18934_v38, %v18933_v22  ;;  %v18939_v22 = vld [vmem:[#allocation44_spill] sm:$0xff]  ;;  %v18941_v31 = vld [vmem:[#allocation213_spill] sm:$0xff] }
 0x3b7   : > { %6173 = vmatprep.subr.bf16.mxu1 %v5918_v24  ;;  %v5917_v42 = vpack.c.bf16 %v18929_v63, %v18928_v18  ;;  %v3468_v24 = vmax.f32 %v3467_v46, %v18932_v61  ;;  %v7551_v18 = vunpack.i.l.bf16 %v11206_v32  ;;  %3084 = vmatprep.mubr.bf16.mxu0 %v18752_v11  ;;  %v3354_v47 = vmax.f32 %v3353_v62, %v18935_v13  ;;  %v11409_v46 = vpop.eup %7929  ;;  %v18938_v63 = vld [vmem:[#allocation177_spill] sm:$0xff]  ;;  %v18940_v38 = vld [vmem:[#allocation212_spill] sm:$0xff]  ;;  %v18943_v61 = vld [vmem:[#allocation202_spill] sm:$0xff]  ;;  %v11421_v13 = vpop.trf.xlu1 }
 0x3b8   : > { %18936 = vst [vmem:[#allocation195_spill] sm:$0xff] %v11409_v46  ;;  %v3432_v45 = vmax.f32 %v3431_v3, %v18939_v22  ;;  %v3391_v32 = vmax.f32 %v3390_v40, %v18940_v38  ;;  %18945 = vst [vmem:[#allocation196_spill] sm:$0xff] %v11421_v13  ;;  %v11423_v46 = vpop.eup %7931  ;;  %v18949_v38 = vld [vmem:[#allocation217_spill] sm:$0xff]  ;;  %v18953_v13 = vld [vmem:[#allocation110_spill] sm:$0xff] }
 0x3b9   : > { %6911 = vmatmul.mubr.msk.bf16.gmra.mrb[208].mxu1 %vm1207_vm2, %v1146_v60  ;;  %v18937_v60 = vld [vmem:[#allocation173_spill] sm:$0xff]  ;;  %v3469_v48 = vmax.f32 %v3468_v24, %v18941_v31  ;;  %18946 = vst [vmem:[#allocation24_spill] sm:$0xff] %v11423_v46  ;;  %v7561_v31 = vunpack.i.l.bf16 %v11283_v56  ;;  %v18954_v46 = vld [vmem:[#allocation88_spill] sm:$0xff] }
 0x3ba   : > { %6174 = vmatpush1.bf16.msra.mxu1 %v5917_v42  ;;  %2817 = vmatprep.mubr.bf16.mxu1 %v18752_v11  ;;  %v5919_v8 = vpack.c.bf16 %v18938_v63, %v18937_v60  ;;  %v18942_v42 = vld [vmem:[#allocation201_spill] sm:$0xff]  ;;  %v18947_v60 = vld [vmem:[#allocation215_spill] sm:$0xff]  ;;  %v18948_v63 = vld [vmem:[#allocation62_spill] sm:$0xff] }
 0x3bb   : > { %6175 = vmatprep.subr.bf16.mxu1 %v5920_v26  ;;  %v5922_v20 = vpack.c.bf16 %v18943_v61, %v18942_v42  ;;  %v18944_v26 = vld [vmem:[#allocation59_spill] sm:$0xff]  ;;  %v3433_v3 = vmax.f32 %v3432_v45, %v18947_v60  ;;  %v3392_v40 = vmax.f32 %v3391_v32, %v18948_v63  ;;  %v3470_v24 = vmax.f32 %v3469_v48, %v18949_v38  ;;  %v18958_v61 = vld [vmem:[#allocation182_spill] sm:$0xff]  ;;  %v18965_v48 = vld [vmem:[#allocation225_spill] sm:$0xff] }
 0x3bc   : > { %v3355_v62 = vmax.f32 %v3354_v47, %v18944_v26  ;;  %v1147_v42 = vpack.c.bf16 %v7541_v28, %v7536_v23  ;;  %v5921_v47 = vpack.c.bf16 %v18951_v14, %v18950_v17  ;;  %v18952_v26 = vld [vmem:[#allocation204_spill] sm:$0xff]  ;;  %v18955_v45 = vld [vmem:[#allocation91_spill] sm:$0xff]  ;;  %v1166_v23 = vpack.c.bf16 %v7574_v19, %v7569_v1  ;;  %v18957_v28 = vld [vmem:[#allocation181_spill] sm:$0xff] }
 0x3bd   : > { %v5924_v22 = vpack.c.bf16 %v18953_v13, %v18952_v26  ;;  %v3434_v56 = vmax.f32 %v3433_v3, %v18955_v45  ;;  %v5923_v14 = vpack.c.bf16 %v18958_v61, %v18957_v28  ;;  %v7581_v17 = vunpack.i.h.bf16 %v11130_v36  ;;  %v18959_v13 = vld [vmem:[#allocation100_spill] sm:$0xff]  ;;  %v18963_v1 = vld [vmem:[#allocation205_spill] sm:$0xff]  ;;  %v18966_v63 = vld [vmem:[#allocation46_spill] sm:$0xff] }
 0x3be   : > { %6176 = vmatpush1.bf16.msra.mxu1 %v5919_v8  ;;  %v3356_v8 = vmax.f32 %v3355_v62, %v18954_v46  ;;  %6931 = vmatmul.mubr.msk.bf16.gmra.mrb[4].mxu0 %vm1207_vm2, %v1165_v58  ;;  %v3471_v26 = vmax.f32 %v3470_v24, %v18959_v13  ;;  %v7586_v58 = vunpack.i.h.bf16 %v11174_v12  ;;  %v18960_v62 = vld [vmem:[#allocation221_spill] sm:$0xff]  ;;  %v5926_v19 = vpack.c.bf16 %v18737_v34, %v18963_v1  ;;  %v18964_v61 = vld [vmem:[#allocation224_spill] sm:$0xff]  ;;  %v18968_v38 = vld [vmem:[#allocation231_spill] sm:$0xff] }
 0x3bf   : > { %6177 = vmatprep.subr.bf16.mxu1 %v5922_v20  ;;  %v18956_v20 = vld [vmem:[#allocation97_spill] sm:$0xff]  ;;  %3094 = vmatprep.mubr.bf16.mxu0 %v18752_v11  ;;  %v18969_v1 = vld [vmem:[#allocation232_spill] sm:$0xff] }
 0x3c0   : > { %v3393_v32 = vmax.f32 %v3392_v40, %v18956_v20  ;;  %v3357_v3 = vmax.f32 %v3356_v8, %v18960_v62  ;;  %v3472_v20 = vmax.f32 %v3471_v26, %v18965_v48  ;;  %v18967_v46 = vld [vmem:[#allocation49_spill] sm:$0xff]  ;;  %v5928_v8 = vpack.c.bf16 %v18768_v41, %v18749_v54  ;;  %v18971_v62 = vld [vmem:[#allocation236_spill] sm:$0xff]  ;;  %v18975_v54 = vld [vmem:[#allocation239_spill] sm:$0xff] }
 0x3c1   : > { %6912 = vmatmul.mubr.msk.bf16.gmra.mrb[212].mxu1 %vm1207_vm2, %v1147_v42  ;;  %v18961_v42 = vld [vmem:[#allocation222_spill] sm:$0xff]  ;;  %v5925_v13 = vpack.c.bf16 %v18967_v46, %v18966_v63  ;;  %v1167_v34 = vpack.c.bf16 %v7586_v58, %v7581_v17  ;;  %v7591_v46 = vunpack.i.h.bf16 %v11217_v9  ;;  %v7596_v63 = vunpack.i.h.bf16 %v11252_v6 }
 0x3c2   : > { %6178 = vmatpush1.bf16.msra.mxu1 %v5921_v47  ;;  %2827 = vmatprep.mubr.bf16.mxu1 %v18752_v11  ;;  %v3435_v40 = vmax.f32 %v3434_v56, %v18961_v42  ;;  %v11449_v47 = vpop.trf.xlu1  ;;  %v3394_v28 = vmax.f32 %v3393_v32, %v18964_v61  ;;  %v3358_v45 = vmax.f32 %v3357_v3, %v18968_v38  ;;  %v18970_v61 = vld [vmem:[#allocation235_spill] sm:$0xff]  ;;  %v18982_v56 = vld [vmem:[#allocation65_spill] sm:$0xff]  ;;  %v11490_v38 = vpop.f32.mrb[174].mxu0 }
 0x3c3   : > { %6179 = vmatprep.subr.bf16.mxu1 %v5924_v22  ;;  %18962 = vst [vmem:[#allocation167_spill] sm:$0xff] %v11449_v47  ;;  %v1148_v22 = vpack.c.bf16 %v7551_v18, %v7546_v57  ;;  %v3473_v24 = vmax.f32 %v3472_v20, %v18971_v62  ;;  %v18972_v57 = vld [vmem:[#allocation23_spill] sm:$0xff]  ;;  %18984 = vst [vmem:[#allocation32_spill] sm:$0xff] %v11490_v38 }
 0x3c4   : > { %v3436_v32 = vmax.f32 %v3435_v40, %v18969_v1  ;;  %v3395_v26 = vmax.f32 %v3394_v28, %v18970_v61  ;;  %v18973_v18 = vld [vmem:[#allocation31_spill] sm:$0xff]  ;;  %v18977_v40 = vld [vmem:[#allocation216_spill] sm:$0xff] }
 0x3c5   : > { %v5927_v48 = vpack.c.bf16 %v18973_v18, %v18972_v57  ;;  %v3474_v58 = vmax.f32 %v3473_v24, %v11245_v49  ;;  %v11496_v49 = vpop.f32.mrb[175].mxu0  ;;  %v19053_v1 = vld [vmem:[#allocation163_spill] sm:$0xff] }
 0x3c6   : > { %6180 = vmatpush1.bf16.msra.mxu1 %v5923_v14  ;;  %v18974_v14 = vld [vmem:[#allocation69_spill] sm:$0xff]  ;;  %6932 = vmatmul.mubr.msk.bf16.gmra.mrb[8].mxu0 %vm1207_vm2, %v1166_v23  ;;  %v3437_v41 = vmax.f32 %v3436_v32, %v18975_v54  ;;  %v3396_v17 = vmax.f32 %v3395_v26, %v11243_v35  ;;  %v11475_v20 = vpop.trf.xlu1  ;;  %v18981_v32 = vld [vmem:[#allocation60_spill] sm:$0xff]  ;;  %18987 = vst [vmem:[#allocation198_spill] sm:$0xff] %v11496_v49 }
 0x3c7   : > { %6181 = vmatprep.subr.bf16.mxu1 %v5926_v19  ;;  %v3359_v3 = vmax.f32 %v3358_v45, %v18974_v14  ;;  %18976 = vst [vmem:[#allocation170_spill] sm:$0xff] %v11475_v20  ;;  %v18978_v19 = vld [vmem:[#allocation218_spill] sm:$0xff]  ;;  %v18979_v45 = vunpack.i.l.bf16 %v11238_v33  ;;  %3104 = vmatprep.mubr.bf16.mxu0 %v18752_v11  ;;  %v18980_v23 = vld [vmem:[#allocation45_spill] sm:$0xff]  ;;  %v3475_v18 = vrot.slane %v3474_v58, 4  ;;  %v11492_v33 = vpack.c.bf16 %v7596_v63, %v7591_v46 }
 0x3c8   : > { %v5930_v28 = vpack.c.bf16 %v18978_v19, %v18977_v40  ;;  %v5929_v26 = vpack.c.bf16 %v18981_v32, %v18980_v23  ;;  %v3438_v24 = vrot.slane %v3437_v41, 4  ;;  %v3397_v61 = vmax.f32 %v3396_v17, %v11285_v37  ;;  %v18989_v17 = vld [vmem:[#allocation94_spill] sm:$0xff]  ;;  %v19087_v54 = vld [vmem:[#allocation37_spill] sm:$0xff] }
 0x3c9   : > { %6913 = vmatmul.mubr.msk.bf16.gmra.mrb[216].mxu1 %vm1207_vm2, %v1148_v22  ;;  %v1149_v57 = vpack.c.bf16 %v7561_v31, %v18979_v45  ;;  %v3360_v22 = vmax.f32 %v3359_v3, %v11274_v21  ;;  %v18985_v31 = vld [vmem:[#allocation89_spill] sm:$0xff]  ;;  %v3476_v21 = vmax.f32 %v3474_v58, %v3475_v18  ;;  %v7601_v23 = vunpack.i.h.bf16 %v11292_v10 }
 0x3ca   : > { %6182 = vmatpush1.bf16.msra.mxu1 %v5925_v13  ;;  %2837 = vmatprep.mubr.bf16.mxu1 %v18752_v11  ;;  %v18983_v13 = vld [vmem:[#allocation219_spill] sm:$0xff]  ;;  %v3439_v45 = vmax.f32 %v3437_v41, %v3438_v24  ;;  %v3398_v32 = vmax.f32 %v3397_v61, %v11303_v53  ;;  %v18994_v58 = vunpack.i.l.bf16 %v11371_v25  ;;  %v7606_v61 = vunpack.i.h.bf16 %v11324_v55 }
 0x3cb   : > { %6183 = vmatprep.subr.bf16.mxu1 %v5928_v8  ;;  %v5932_v35 = vpack.c.bf16 %v18983_v13, %v18982_v56  ;;  %v3361_v14 = vmax.f32 %v3360_v22, %v11294_v51  ;;  %v18986_v8 = vld [vmem:[#allocation186_spill] sm:$0xff]  ;;  %v11500_v13 = vpop.f32.mrb[176].mxu0  ;;  %v18990_v22 = vld [vmem:[#allocation223_spill] sm:$0xff]  ;;  %v3477_v63 = vrot.slane %v3476_v21, 2  ;;  %v11505_v56 = vpop.trf.xlu1 }
 0x3cc   : > { %v5931_v3 = vpack.c.bf16 %v18986_v8, %v18985_v31  ;;  %18988 = vst [vmem:[#allocation93_spill] sm:$0xff] %v11500_v13  ;;  %v5934_v37 = vpack.c.bf16 %v18990_v22, %v18989_v17  ;;  %v3440_v46 = vrot.slane %v3439_v45, 2  ;;  %18991 = vst [vmem:[#allocation173_spill] sm:$0xff] %v11505_v56  ;;  %v11507_v41 = vpop.f32.mrb[177].mxu0  ;;  %v11519_v22 = vpop.f32.mrb[132].mxu1  ;;  %v18998_v25 = vld [vmem:[#allocation71_spill] sm:$0xff] }
 0x3cd   : > { %v3362_v51 = vmax.f32 %v3361_v14, %v11326_v59  ;;  %18992 = vst [vmem:[#allocation177_spill] sm:$0xff] %v11507_v41  ;;  %v11514_v18 = vpop.f32.mrb[178].mxu0  ;;  %v3478_v53 = vmax.f32 %v3476_v21, %v3477_v63  ;;  %v3399_v14 = vmax.f32 %v3398_v32, %v11335_v0  ;;  %18996 = vst [vmem:[#allocation202_spill] sm:$0xff] %v11519_v22  ;;  %v11532_v21 = vpop.f32.mrb[133].mxu1  ;;  %v19004_v63 = vld [vmem:[#allocation228_spill] sm:$0xff] }
 0x3ce   : > { %6184 = vmatpush1.bf16.msra.mxu1 %v5927_v48  ;;  %v18993_v48 = vunpack.i.l.bf16 %v11321_v44  ;;  %18995 = vst [vmem:[#allocation201_spill] sm:$0xff] %v11514_v18  ;;  %6933 = vmatmul.mubr.msk.bf16.gmra.mrb[12].mxu0 %vm1207_vm2, %v1167_v34  ;;  %v18997_v44 = vld [vmem:[#allocation187_spill] sm:$0xff]  ;;  %v3555_v34 = vmax.f32 %v11337_v29, %v11490_v38  ;;  %19000 = vst [vmem:[#allocation180_spill] sm:$0xff] %v11532_v21  ;;  %v19005_v38 = vld [vmem:[#allocation78_spill] sm:$0xff] }
 0x3cf   : > { %6185 = vmatprep.subr.bf16.mxu1 %v5930_v28  ;;  %v3441_v28 = vmax.f32 %v3439_v45, %v3440_v46  ;;  %3114 = vmatprep.mubr.bf16.mxu0 %v18752_v11  ;;  %v11536_v45 = vmax.f32 %v3399_v14, %v11356_v39  ;;  %v11540_v46 = vpop.f32.mrb[134].mxu1  ;;  %v19006_v29 = vld [vmem:[#allocation190_spill] sm:$0xff]  ;;  %v11555_v39 = vpack.c.bf16 %v7606_v61, %v7601_v23  ;;  %v19035_v61 = vld [vmem:[#allocation27_spill] sm:$0xff] }
 0x3d0   : > { %v1150_v24 = vpack.c.bf16 %v18994_v58, %v18993_v48  ;;  %v5933_v48 = vpack.c.bf16 %v18998_v25, %v18997_v44  ;;  %v11526_v58 = vmax.f32 %v3362_v51, %v11348_v52  ;;  %19002 = vst [vmem:[#allocation110_spill] sm:$0xff] %v11540_v46  ;;  %v19003_v51 = vld [vmem:[#allocation226_spill] sm:$0xff]  ;;  %v5935_v52 = vpack.c.bf16 %v19006_v29, %v19005_v38  ;;  %v11553_v14 = vpop.f32.mrb[135].mxu1  ;;  %v19011_v46 = vld [vmem:[#allocation244_spill] sm:$0xff] }
 0x3d1   : > { %6914 = vmatmul.mubr.msk.bf16.gmra.mrb[220].mxu1 %vm1207_vm2, %v1149_v57  ;;  %v11530_v57 = vpop.f32.mrb[179].mxu0  ;;  %v3442_v30 = vrot.slane %v3441_v28, 1  ;;  %v5936_v0 = vpack.c.bf16 %v19004_v63, %v19003_v51  ;;  %v11549_v59 = vmax.f32 %v3555_v34, %v11500_v13  ;;  %19009 = vst [vmem:[#allocation205_spill] sm:$0xff] %v11553_v14  ;;  %v19013_v51 = vunpack.i.l.bf16 %v11130_v36  ;;  %v19029_v13 = vld [vmem:[#allocation146_spill] sm:$0xff] }
 0x3d2   : > { %6186 = vmatpush1.bf16.msra.mxu1 %v5929_v26  ;;  %2847 = vmatprep.mubr.bf16.mxu1 %v18752_v11  ;;  %18999 = vst [vmem:[#allocation178_spill] sm:$0xff] %v11530_v57  ;;  %v3479_v26 = vrot.slane %v3478_v53, 1  ;;  %v11538_v32 = vpop.f32.mrb[180].mxu0  ;;  %v19014_v29 = vunpack.i.l.bf16 %v11174_v12  ;;  %v19020_v12 = vld [vmem:[#allocation107_spill] sm:$0xff] }
 0x3d3   : > { %6187 = vmatprep.subr.bf16.mxu1 %v5932_v35  ;;  %19001 = vst [vmem:[#allocation204_spill] sm:$0xff] %v11538_v32  ;;  %v3592_v35 = vmax.f32 %v11350_v43, %v11496_v49  ;;  %19007 = vst [vmem:[#allocation181_spill] sm:$0xff] %v11549_v59  ;;  %v11551_v21 = vpop.f32.mrb[181].mxu0  ;;  %v11557_v22 = vmax.f32 %v3441_v28, %v3442_v30  ;;  %v19012_v32 = vld [vmem:[#allocation101_spill] sm:$0xff]  ;;  %v11567_v49 = vpop.trf.xlu1 }
 0x3d4   : > { %19008 = vst [vmem:[#allocation182_spill] sm:$0xff] %v11551_v21  ;;  %v5938_v63 = vpack.c.bf16 %v19012_v32, %v19011_v46  ;;  %v11565_v38 = vpack.c.bf16 %v19014_v29, %v19013_v51  ;;  %19015 = vst [vmem:[#allocation49_spill] sm:$0xff] %v11567_v49  ;;  %v11569_v34 = vpop.f32.mrb[182].mxu0  ;;  %v11571_v43 = vmax.f32 %v3478_v53, %v3479_v26  ;;  %v19021_v29 = vld [vmem:[#allocation111_spill] sm:$0xff]  ;;  %v19022_v32 = vld [vmem:[#allocation117_spill] sm:$0xff] }
 0x3d5   : > { %19010 = vst [vmem:[#allocation46_spill] sm:$0xff] %v11557_v22  ;;  %19016 = vst [vmem:[#allocation23_spill] sm:$0xff] %v11569_v34  ;;  %v11574_v23 = vmax.f32 %v3592_v35, %v11507_v41  ;;  %v11578_v28 = vpop.f32.mrb[183].mxu0  ;;  %v3969_v36 = vsub.f32 %v19020_v12, %v11557_v22  ;;  %v3971_v30 = vsub.f32 %v19021_v29, %v11557_v22  ;;  %v19023_v53 = vld [vmem:[#allocation120_spill] sm:$0xff]  ;;  %v19027_v29 = vld [vmem:[#allocation138_spill] sm:$0xff]  ;;  %v11605_v34 = vpop.f32.mrb[136].mxu1 }
 0x3d6   : > { %6188 = vmatpush1.bf16.msra.mxu1 %v5931_v3  ;;  %19017 = vst [vmem:[#allocation31_spill] sm:$0xff] %v11571_v43  ;;  %19019 = vst [vmem:[#allocation218_spill] sm:$0xff] %v11578_v28  ;;  %v3973_v3 = vsub.f32 %v19022_v32, %v11557_v22  ;;  %v3975_v26 = vsub.f32 %v19023_v53, %v11557_v22  ;;  %v19024_v46 = vld [vmem:[#allocation124_spill] sm:$0xff]  ;;  %6934 = vmatmul.mubr.msk.bf16.gmra.mrb[16].mxu0 %vm1207_vm2, %v11492_v33  ;;  %v19028_v53 = vld [vmem:[#allocation142_spill] sm:$0xff]  ;;  %v11615_v51 = vpop.f32.mrb[184].mxu0  ;;  %v11617_v14 = vpop.f32.mrb[137].mxu1 }
 0x3d7   : > { %19018 = vst [vmem:[#allocation216_spill] sm:$0xff] %v11574_v23  ;;  %6189 = vmatprep.subr.bf16.mxu1 %v5934_v37  ;;  %v19025_v35 = vld [vmem:[#allocation128_spill] sm:$0xff]  ;;  %v4673_v28 = vmul.f32 1.442695, %v3969_v36  ;;  %19030 = vst [vmem:[#allocation45_spill] sm:$0xff] %v11605_v34  ;;  %v19031_v32 = vld [vmem:[#allocation165_spill] sm:$0xff]  ;;  %3124 = vmatprep.mubr.bf16.mxu0 %v18752_v11 }
 0x3d8   : > { %v19026_v37 = vld [vmem:[#allocation132_spill] sm:$0xff]  ;;  %19032 = vst [vmem:[#allocation60_spill] sm:$0xff] %v11615_v51  ;;  %19033 = vst [vmem:[#allocation89_spill] sm:$0xff] %v11617_v14  ;;  %v19036_v34 = vld [vmem:[#allocation39_spill] sm:$0xff]  ;;  %v11627_v18 = vpop.f32.mrb[185].mxu0  ;;  %v11629_v41 = vpop.f32.mrb[138].mxu1 }
 0x3d9   : > { %6915 = vmatmul.mubr.msk.bf16.gmra.mrb[224].mxu1 %vm1207_vm2, %v1150_v24  ;;  %v19034_v36 = vld [vmem:[#allocation172_spill] sm:$0xff]  ;;  %v19037_v21 = vld [vmem:[#allocation57_spill] sm:$0xff]  ;;  %19038 = vst [vmem:[#allocation186_spill] sm:$0xff] %v11627_v18  ;;  %19039 = vst [vmem:[#allocation94_spill] sm:$0xff] %v11629_v41  ;;  %v11631_v51 = vpop.eup %7933  ;;  %v11642_v33 = vpop.f32.mrb[186].mxu0  ;;  %7935 = vpow2.f32 %v4673_v28 }
 0x3da   : > { %6190 = vmatpush1.bf16.msra.mxu1 %v5933_v48  ;;  %19040 = vst [vmem:[#allocation187_spill] sm:$0xff] %v11631_v51  ;;  %v19041_v12 = vld [vmem:[#allocation67_spill] sm:$0xff]  ;;  %v19042_v24 = vld [vmem:[#allocation193_spill] sm:$0xff]  ;;  %2857 = vmatprep.mubr.bf16.mxu1 %v18752_v11  ;;  %19043 = vst [vmem:[#allocation71_spill] sm:$0xff] %v11642_v33  ;;  %v11644_v18 = vpop.f32.mrb[139].mxu1  ;;  %v11655_v59 = vpop.f32.mrb[187].mxu0  ;;  %v7611_v33 = vunpack.i.h.bf16 %v19053_v1 }
 0x3db   : > { %6191 = vmatprep.subr.bf16.mxu1 %v5936_v0  ;;  %19044 = vst [vmem:[#allocation244_spill] sm:$0xff] %v11644_v18  ;;  %v19045_v41 = vld [vmem:[#allocation200_spill] sm:$0xff]  ;;  %19047 = vst [vmem:[#allocation101_spill] sm:$0xff] %v11655_v59  ;;  %v4677_v57 = vmul.f32 1.442695, %v3971_v30  ;;  %v19051_v51 = vld [vmem:[#allocation103_spill] sm:$0xff] }
 0x3dc   : > { %v4681_v14 = vmul.f32 1.442695, %v3973_v3  ;;  %v19050_v18 = vld [vmem:[#allocation52_spill] sm:$0xff]  ;;  %7937 = vpow2.f32 %v19051_v51  ;;  %v19052_v0 = vld [vmem:[#allocation109_spill] sm:$0xff]  ;;  %v4685_v48 = vmul.f32 1.442695, %v3975_v26 }
 0x3dd   : > { %v5373_v60 = vadd.f32 %v18977_v40, %v19050_v18  ;;  %7939 = vpow2.f32 %v4677_v57  ;;  %v19055_v28 = vld [vmem:[#allocation157_spill] sm:$0xff]  ;;  %v19056_v30 = vld [vmem:[#allocation246_spill] sm:$0xff]  ;;  %v19057_v18 = vld [vmem:[#allocation55_spill] sm:$0xff] }
 0x3de   : > { %6192 = vmatpush1.bf16.msra.mxu1 %v5935_v52  ;;  %v19049_v52 = vld [vmem:[#allocation241_spill] sm:$0xff]  ;;  %6935 = vmatmul.mubr.msk.bf16.gmra.mrb[20].mxu0 %vm1207_vm2, %v11555_v39  ;;  %v5408_v40 = vadd.f32 %v19056_v30, %v19055_v28  ;;  %7941 = vpow2.f32 %v19057_v18  ;;  %v19058_v3 = vld [vmem:[#allocation114_spill] sm:$0xff]  ;;  %v19059_v51 = vld [vmem:[#allocation199_spill] sm:$0xff]  ;;  %v7588_v39 = vunpack.i.l.bf16 %v11217_v9  ;;  %v19063_v28 = vsub.f32 %v19024_v46, %v11557_v22 }
 0x3df   : > { %6202 = vmatprep.subr.bf16.mxu1 %v5938_v63  ;;  %v5338_v59 = vadd.f32 %v18985_v31, %v19049_v52  ;;  %v19054_v63 = vld [vmem:[#allocation196_spill] sm:$0xff]  ;;  %v19060_v52 = vsub.f32 %v19058_v3, %v19059_v51  ;;  %v19061_v26 = vld [vmem:[#allocation194_spill] sm:$0xff]  ;;  %v19062_v23 = vld [vmem:[#allocation191_spill] sm:$0xff]  ;;  %3134 = vmatprep.mubr.bf16.mxu0 %v18752_v11  ;;  %7943 = vpow2.f32 %v4681_v14  ;;  %v7598_v30 = vunpack.i.l.bf16 %v11292_v10 }
 0x3e0   : > { %v7616_v31 = vunpack.i.h.bf16 %v19054_v63  ;;  %v5444_v42 = vadd.f32 %v19062_v23, %v19061_v26  ;;  %v4689_v18 = vmul.f32 1.442695, %v19063_v28  ;;  %v7603_v3 = vunpack.i.l.bf16 %v11324_v55  ;;  %v19066_v55 = vld [vmem:[#allocation112_spill] sm:$0xff] }
 0x3e1   : > { %6916 = vmatmul.mubr.msk.bf16.gmra.mrb[228].mxu1 %vm1207_vm2, %v11565_v38  ;;  %v4539_v57 = vmul.f32 1.442695, %v19060_v52  ;;  %v7593_v38 = vunpack.i.l.bf16 %v11252_v6  ;;  %v7621_v52 = vunpack.i.h.bf16 %v11449_v47  ;;  %v7626_v26 = vunpack.i.h.bf16 %v11475_v20  ;;  %v19067_v20 = vld [vmem:[#allocation160_spill] sm:$0xff] }
 0x3e2   : > { %2867 = vmatprep.mubr.bf16.mxu1 %v18752_v11  ;;  %7945 = vpow2.f32 %v4685_v48  ;;  %v19065_v9 = vsub.f32 %v19025_v35, %v11557_v22  ;;  %v1170_v14 = vpack.c.bf16 %v7616_v31, %v7611_v33  ;;  %v11705_v46 = vadd.f32 %v18986_v8, %v5338_v59 }
 0x3e3   : > { %v11708_v10 = vadd.f32 %v18978_v19, %v5373_v60  ;;  %v11711_v28 = vadd.f32 %v19066_v55, %v5408_v40  ;;  %7947 = vpow2.f32 %v4539_v57  ;;  %v11714_v47 = vadd.f32 %v19067_v20, %v5444_v42  ;;  %v11729_v42 = vpop.eup %7935 }
 0x3e4   : > { %v4693_v6 = vmul.f32 1.442695, %v19065_v9  ;;  %7949 = vpow2.f32 %v4689_v18  ;;  %v19068_v48 = vsub.f32 %v19026_v37, %v11557_v22  ;;  %v1152_v9 = vpack.c.bf16 %v7593_v38, %v7588_v39  ;;  %19071 = vst [vmem:[#allocation107_spill] sm:$0xff] %v11729_v42  ;;  %v19074_v39 = vld [vmem:[#allocation115_spill] sm:$0xff]  ;;  %v11745_v38 = vpop.f32.mrb[188].mxu0 }
 0x3e5   : > { %v19069_v59 = vsub.f32 %v18728_v4, %v11557_v22  ;;  %v19070_v60 = vsub.f32 %v19027_v29, %v11557_v22  ;;  %v11725_v33 = vpack.c.bf16 %v7626_v26, %v7621_v52  ;;  %v11727_v31 = vpack.c.bf16 %v7603_v3, %v7598_v30  ;;  %v11743_v30 = vpop.f32.mrb[140].mxu1  ;;  %19076 = vst [vmem:[#allocation117_spill] sm:$0xff] %v11745_v38  ;;  %v19080_v26 = vld [vmem:[#allocation122_spill] sm:$0xff] }
 0x3e6   : > { %v4697_v35 = vmul.f32 1.442695, %v19068_v48  ;;  %7951 = vpow2.f32 %v4693_v6  ;;  %v19072_v37 = vsub.f32 %v19028_v53, %v11557_v22  ;;  %v19073_v57 = vsub.f32 %v19029_v13, %v11557_v22  ;;  %6936 = vmatmul.mubr.msk.bf16.gmra.mrb[24].mxu0 %vm1207_vm2, %v1170_v14  ;;  %19075 = vst [vmem:[#allocation111_spill] sm:$0xff] %v11743_v30  ;;  %v11747_v18 = vpop.eup %7937  ;;  %v19079_v13 = vld [vmem:[#allocation119_spill] sm:$0xff]  ;;  %v19081_v48 = vld [vmem:[#allocation126_spill] sm:$0xff] }
 0x3e7   : > { %v4701_v8 = vmul.f32 1.442695, %v19069_v59  ;;  %v4705_v19 = vmul.f32 1.442695, %v19070_v60  ;;  %19077 = vst [vmem:[#allocation120_spill] sm:$0xff] %v11747_v18  ;;  %v19078_v53 = vsub.f32 %v18798_v50, %v11557_v22  ;;  %3144 = vmatprep.mubr.bf16.mxu0 %v18752_v11  ;;  %v11764_v59 = vpop.f32.mrb[189].mxu0  ;;  %v11766_v50 = vpop.eup %7939  ;;  %v19091_v55 = vsub.f32 %v18808_v7, %v11557_v22 }
 0x3e8   : > { %v4709_v40 = vmul.f32 1.442695, %v19072_v37  ;;  %v11737_v4 = vmul.f32 1.442695, %v19073_v57  ;;  %19083 = vst [vmem:[#allocation128_spill] sm:$0xff] %v11764_v59  ;;  %19084 = vst [vmem:[#allocation132_spill] sm:$0xff] %v11766_v50  ;;  %7953 = vpow2.f32 %v4697_v35  ;;  %v11778_v29 = vpop.eup %7941  ;;  %v5535_v35 = vadd.f32 %v11766_v50, %v11729_v42 }
 0x3e9   : > { %6917 = vmatmul.mubr.msk.bf16.gmra.mrb[232].mxu1 %vm1207_vm2, %v1152_v9  ;;  %v11752_v3 = vmul.f32 1.442695, %v19078_v53  ;;  %v11762_v9 = vpop.f32.mrb[141].mxu1  ;;  %v19085_v60 = vld [vmem:[#allocation130_spill] sm:$0xff]  ;;  %v11776_v52 = vpop.f32.mrb[190].mxu0  ;;  %19090 = vst [vmem:[#allocation146_spill] sm:$0xff] %v11778_v29  ;;  %7955 = vpow2.f32 %v4701_v8  ;;  %v19102_v14 = vsub.f32 %v18813_v2, %v11557_v22 }
 0x3ea   : > { %2877 = vmatprep.mubr.bf16.mxu1 %v18752_v11  ;;  %19082 = vst [vmem:[#allocation124_spill] sm:$0xff] %v11762_v9  ;;  %v19086_v57 = vld [vmem:[#allocation134_spill] sm:$0xff]  ;;  %v11774_v6 = vpop.f32.mrb[142].mxu1  ;;  %19089 = vst [vmem:[#allocation142_spill] sm:$0xff] %v11776_v52  ;;  %v11783_v20 = vmul.f32 1.442695, %v19091_v55  ;;  %v11795_v52 = vpop.eup %7943  ;;  %7957 = vpow2.f32 %v4705_v19 }
 0x3eb   : > { %19088 = vst [vmem:[#allocation138_spill] sm:$0xff] %v11774_v6  ;;  %v19092_v37 = vld [vmem:[#allocation140_spill] sm:$0xff]  ;;  %v11791_v23 = vpop.f32.mrb[143].mxu1  ;;  %v11793_v6 = vpop.f32.mrb[191].mxu0  ;;  %19096 = vst [vmem:[#allocation27_spill] sm:$0xff] %v11795_v52  ;;  %v19098_v29 = vld [vmem:[#allocation105_spill] sm:$0xff]  ;;  %7959 = vpow2.f32 %v4709_v40  ;;  %v19125_v40 = vsub.f32 %v19034_v36, %v11557_v22 }
 0x3ec   : > { %v19093_v18 = vld [vmem:[#allocation144_spill] sm:$0xff]  ;;  %19094 = vst [vmem:[#allocation165_spill] sm:$0xff] %v11791_v23  ;;  %19095 = vst [vmem:[#allocation172_spill] sm:$0xff] %v11793_v6  ;;  %v11803_v53 = vpop.f32.mrb[144].mxu1  ;;  %v11805_v9 = vpop.f32.mrb[192].mxu0  ;;  %v5536_v23 = vadd.f32 %v11795_v52, %v5535_v35  ;;  %v19103_v8 = vld [vmem:[#allocation162_spill] sm:$0xff]  ;;  %7961 = vpow2.f32 %v11737_v4 }
 0x3ed   : > { %v19097_v7 = vld [vmem:[#allocation96_spill] sm:$0xff]  ;;  %19100 = vst [vmem:[#allocation39_spill] sm:$0xff] %v11803_v53  ;;  %19101 = vst [vmem:[#allocation57_spill] sm:$0xff] %v11805_v9  ;;  %v4725_v6 = vmul.f32 1.442695, %v19102_v14  ;;  %v19104_v55 = vld [vmem:[#allocation169_spill] sm:$0xff]  ;;  %v11819_v42 = vpop.eup %7945  ;;  %7963 = vpow2.f32 %v11752_v3 }
 0x3ee   : > { %v19099_v50 = vld [vmem:[#allocation156_spill] sm:$0xff]  ;;  %v11815_v59 = vpop.f32.mrb[145].mxu1  ;;  %v11817_v63 = vpop.f32.mrb[193].mxu0  ;;  %19107 = vst [vmem:[#allocation200_spill] sm:$0xff] %v11819_v42  ;;  %v5537_v19 = vadd.f32 %v11819_v42, %v5536_v23  ;;  %v19115_v53 = vld [vmem:[#allocation63_spill] sm:$0xff]  ;;  %6937 = vmatmul.mubr.msk.bf16.gmra.mrb[28].mxu0 %vm1207_vm2, %v11725_v33  ;;  %7965 = vpow2.f32 %v11783_v20 }
 0x3ef   : > { %19105 = vst [vmem:[#allocation67_spill] sm:$0xff] %v11815_v59  ;;  %19106 = vst [vmem:[#allocation193_spill] sm:$0xff] %v11817_v63  ;;  %v19110_v35 = vld [vmem:[#allocation48_spill] sm:$0xff]  ;;  %v11827_v38 = vpop.f32.mrb[146].mxu1  ;;  %v11829_v1 = vpop.f32.mrb[194].mxu0  ;;  %v19114_v63 = vsub.f32 %v19031_v32, %v11557_v22  ;;  %v19116_v14 = vld [vmem:[#allocation83_spill] sm:$0xff]  ;;  %3154 = vmatprep.mubr.bf16.mxu0 %v18752_v11  ;;  %7967 = vpow2.f32 %v4725_v6 }
 0x3f0   : > { %19111 = vst [vmem:[#allocation241_spill] sm:$0xff] %v11827_v38  ;;  %19112 = vst [vmem:[#allocation52_spill] sm:$0xff] %v11829_v1  ;;  %v11831_v30 = vpop.eup %7947  ;;  %v11841_v9 = vpop.f32.mrb[147].mxu1  ;;  %v19121_v32 = vld [vmem:[#allocation188_spill] sm:$0xff]  ;;  %v4733_v1 = vmul.f32 1.442695, %v19125_v40 }
 0x3f1   : > { %19113 = vst [vmem:[#allocation103_spill] sm:$0xff] %v11831_v30  ;;  %v4729_v59 = vmul.f32 1.442695, %v19114_v63  ;;  %19117 = vst [vmem:[#allocation109_spill] sm:$0xff] %v11841_v9  ;;  %v11843_v52 = vpop.f32.mrb[195].mxu0  ;;  %v11845_v38 = vpop.eup %7949  ;;  %v19120_v30 = vld [vmem:[#allocation184_spill] sm:$0xff]  ;;  %6918 = vmatmul.mubr.msk.bf16.gmra.mrb[236].mxu1 %vm1207_vm2, %v11727_v31  ;;  %v19144_v63 = vsub.f32 %v19036_v34, %v11557_v22  ;;  %v19150_v34 = vsub.f32 %v18866_v15, %v11557_v22 }
 0x3f2   : > { %19118 = vst [vmem:[#allocation157_spill] sm:$0xff] %v11843_v52  ;;  %19119 = vst [vmem:[#allocation55_spill] sm:$0xff] %v11845_v38  ;;  %v11857_v2 = vpop.f32.mrb[148].mxu1  ;;  %v11859_v51 = vpop.f32.mrb[196].mxu0  ;;  %v5538_v52 = vadd.f32 %v11845_v38, %v5537_v19  ;;  %2887 = vmatprep.mubr.bf16.mxu1 %v18752_v11  ;;  %v19141_v38 = vsub.f32 %v19035_v61, %v11557_v22  ;;  %v19146_v61 = vld [vmem:[#allocation65_spill] sm:$0xff]  ;;  %v19149_v6 = vld [vmem:[#allocation84_spill] sm:$0xff]  ;;  %v19154_v15 = vsub.f32 %v19041_v12, %v11557_v22 }
 0x3f3   : > { %19123 = vst [vmem:[#allocation114_spill] sm:$0xff] %v11857_v2  ;;  %19124 = vst [vmem:[#allocation194_spill] sm:$0xff] %v11859_v51  ;;  %v11871_v33 = vpop.f32.mrb[149].mxu1  ;;  %v11873_v31 = vpop.f32.mrb[197].mxu0  ;;  %7969 = vpow2.f32 %v4729_v59  ;;  %v5446_v4 = vadd.f32 %v19149_v6, %v11714_v47  ;;  %v5340_v59 = vadd.f32 %v18997_v44, %v11705_v46  ;;  %v19158_v44 = vld [vmem:[#allocation219_spill] sm:$0xff] }
 0x3f4   : > { %19128 = vst [vmem:[#allocation115_spill] sm:$0xff] %v11871_v33  ;;  %19129 = vst [vmem:[#allocation119_spill] sm:$0xff] %v11873_v31  ;;  %v11875_v51 = vpop.eup %7951  ;;  %v11884_v2 = vpop.f32.mrb[150].mxu1  ;;  %v4737_v3 = vmul.f32 1.442695, %v19141_v38  ;;  %v5375_v38 = vadd.f32 %v19146_v61, %v11708_v10  ;;  %7971 = vpow2.f32 %v4733_v1 }
 0x3f5   : > { %19130 = vst [vmem:[#allocation122_spill] sm:$0xff] %v11875_v51  ;;  %19134 = vst [vmem:[#allocation126_spill] sm:$0xff] %v11884_v2  ;;  %v11886_v42 = vpop.f32.mrb[198].mxu0  ;;  %v5539_v31 = vadd.f32 %v11875_v51, %v5538_v52  ;;  %v11894_v36 = vpop.f32.mrb[151].mxu1  ;;  %v19147_v52 = vld [vmem:[#allocation247_spill] sm:$0xff]  ;;  %v19148_v51 = vsub.f32 %v19037_v21, %v11557_v22  ;;  %v19153_v21 = vsub.f32 %v18878_v27, %v11557_v22 }
 0x3f6   : > { %19135 = vst [vmem:[#allocation130_spill] sm:$0xff] %v11886_v42  ;;  %19138 = vst [vmem:[#allocation134_spill] sm:$0xff] %v11894_v36  ;;  %v11896_v9 = vpop.f32.mrb[199].mxu0  ;;  %v11898_v40 = vpop.eup %7953  ;;  %v5410_v62 = vadd.f32 %v19147_v52, %v11711_v28  ;;  %7973 = vpow2.f32 %v4737_v3  ;;  %v4757_v1 = vmul.f32 1.442695, %v19154_v15  ;;  %v5376_v46 = vadd.f32 %v19158_v44, %v5375_v38  ;;  %v19159_v3 = vld [vmem:[#allocation21_spill] sm:$0xff] }
 0x3f7   : > { %19139 = vst [vmem:[#allocation37_spill] sm:$0xff] %v11896_v9  ;;  %19140 = vst [vmem:[#allocation140_spill] sm:$0xff] %v11898_v40  ;;  %v4741_v9 = vmul.f32 1.442695, %v19144_v63  ;;  %v5540_v20 = vadd.f32 %v11898_v40, %v5539_v31  ;;  %v11914_v36 = vpop.eup %7955  ;;  %v4745_v19 = vmul.f32 1.442695, %v19148_v51 }
 0x3f8   : > { %19145 = vst [vmem:[#allocation144_spill] sm:$0xff] %v11914_v36  ;;  %v4749_v63 = vmul.f32 1.442695, %v19150_v34  ;;  %v11929_v40 = vpop.eup %7957  ;;  %v4753_v47 = vmul.f32 1.442695, %v19153_v21  ;;  %v11943_v61 = vpop.f32.mrb[152].mxu1  ;;  %v5411_v27 = vadd.f32 %v19159_v3, %v5410_v62 }
 0x3f9   : > { %v5541_v31 = vadd.f32 %v11914_v36, %v5540_v20  ;;  %19151 = vst [vmem:[#allocation96_spill] sm:$0xff] %v11929_v40  ;;  %7975 = vpow2.f32 %v4741_v9  ;;  %v3364_v20 = vrot.slane %v11526_v58, 4  ;;  %19155 = vst [vmem:[#allocation105_spill] sm:$0xff] %v11943_v61  ;;  %v11945_v34 = vpop.f32.mrb[200].mxu0  ;;  %v11947_v28 = vpop.eup %7959  ;;  %v19160_v9 = vsub.f32 %v19042_v24, %v11557_v22  ;;  %v19161_v21 = vld [vmem:[#allocation166_spill] sm:$0xff]  ;;  %v19191_v24 = vld [vmem:[#allocation215_spill] sm:$0xff] }
 0x3fa   : > { %19156 = vst [vmem:[#allocation156_spill] sm:$0xff] %v11945_v34  ;;  %19157 = vst [vmem:[#allocation162_spill] sm:$0xff] %v11947_v28  ;;  %7977 = vpow2.f32 %v4745_v19  ;;  %v5447_v15 = vadd.f32 %v19161_v21, %v5446_v4  ;;  %v11959_v52 = vpop.f32.mrb[153].mxu1  ;;  %v11961_v10 = vpop.f32.mrb[201].mxu0  ;;  %v19168_v4 = vsub.f32 %v19074_v39, %v11571_v43  ;;  %v11986_v39 = vadd.f32 %v18998_v25, %v5340_v59  ;;  %v19234_v61 = vld [vmem:[#allocation152_spill] sm:$0xff] }
 0x3fb   : > { %v5542_v51 = vadd.f32 %v11929_v40, %v5541_v31  ;;  %v4761_v12 = vmul.f32 1.442695, %v19160_v9  ;;  %7979 = vpow2.f32 %v4749_v63  ;;  %v19162_v40 = vsub.f32 %v19052_v0, %v11571_v43  ;;  %19163 = vst [vmem:[#allocation169_spill] sm:$0xff] %v11959_v52  ;;  %19164 = vst [vmem:[#allocation48_spill] sm:$0xff] %v11961_v10  ;;  %v11963_v38 = vpop.eup %7961  ;;  %v11979_v19 = vpop.f32.mrb[154].mxu1  ;;  %v19242_v42 = vld [vmem:[#allocation164_spill] sm:$0xff] }
 0x3fc   : > { %19165 = vst [vmem:[#allocation63_spill] sm:$0xff] %v11963_v38  ;;  %7981 = vpow2.f32 %v4753_v47  ;;  %v4679_v63 = vmul.f32 1.442695, %v19168_v4  ;;  %v19170_v0 = vsub.f32 %v19045_v41, %v11557_v22  ;;  %19171 = vst [vmem:[#allocation184_spill] sm:$0xff] %v11979_v19  ;;  %v11981_v3 = vpop.f32.mrb[202].mxu0  ;;  %v11989_v4 = vadd.f32 %v18989_v17, %v5376_v46  ;;  %v12005_v17 = vpop.f32.mrb[155].mxu1 }
 0x3fd   : > { %v5543_v31 = vadd.f32 %v11947_v28, %v5542_v51  ;;  %v4675_v36 = vmul.f32 1.442695, %v19162_v40  ;;  %v11972_v51 = vpop.eup %7963  ;;  %7983 = vpow2.f32 %v4757_v1  ;;  %v3365_v28 = vmax.f32 %v11526_v58, %v3364_v20  ;;  %19172 = vst [vmem:[#allocation188_spill] sm:$0xff] %v11981_v3  ;;  %19174 = vst [vmem:[#allocation219_spill] sm:$0xff] %v11986_v39  ;;  %v19177_v58 = vld [vmem:[#allocation211_spill] sm:$0xff]  ;;  %v12007_v46 = vpop.f32.mrb[203].mxu0 }
 0x3fe   : > { %19169 = vst [vmem:[#allocation83_spill] sm:$0xff] %v11972_v51  ;;  %v4765_v40 = vmul.f32 1.442695, %v19170_v0  ;;  %v11983_v47 = vpop.eup %7965  ;;  %7985 = vpow2.f32 %v4761_v12  ;;  %v19175_v41 = vsub.f32 %v19079_v13, %v11571_v43  ;;  %v11997_v20 = vadd.f32 %v19177_v58, %v5411_v27  ;;  %v19178_v0 = vld [vmem:[#allocation195_spill] sm:$0xff]  ;;  %19180 = vst [vmem:[#allocation250_spill] sm:$0xff] %v12005_v17  ;;  %v12115_v52 = vpop.f32.mrb[156].mxu1 }
 0x3ff   : > { %v5544_v9 = vadd.f32 %v11963_v38, %v5543_v31  ;;  %19173 = vst [vmem:[#allocation65_spill] sm:$0xff] %v11983_v47  ;;  %v11994_v31 = vpop.eup %7967  ;;  %v12000_v44 = vadd.f32 %v19178_v0, %v5447_v15  ;;  %v19179_v25 = vsub.f32 %v18921_v5, %v11557_v22  ;;  %7987 = vpow2.f32 %v4675_v36  ;;  %19181 = vst [vmem:[#allocation251_spill] sm:$0xff] %v12007_v46  ;;  %v19224_v19 = vld [vmem:[#allocation43_spill] sm:$0xff] }
 0x400   : > { %v4683_v1 = vmul.f32 1.442695, %v19175_v41  ;;  %19176 = vst [vmem:[#allocation249_spill] sm:$0xff] %v11994_v31  ;;  %v12009_v12 = vpop.eup %7969  ;;  %7989 = vpow2.f32 %v4679_v63  ;;  %v19183_v13 = vsub.f32 %v19080_v26, %v11571_v43  ;;  %v7631_v41 = vunpack.i.h.bf16 %v11505_v56 }
 0x401   : > { %v4769_v59 = vmul.f32 1.442695, %v19179_v25  ;;  %19182 = vst [vmem:[#allocation252_spill] sm:$0xff] %v12009_v12  ;;  %v7636_v15 = vunpack.i.h.bf16 %v11567_v49  ;;  %v12016_v38 = vpop.eup %7971  ;;  %7991 = vpow2.f32 %v4765_v40  ;;  %v5545_v5 = vadd.f32 %v11972_v51, %v5544_v9  ;;  %v19189_v40 = vld [vmem:[#allocation44_spill] sm:$0xff] }
 0x402   : > { %v4687_v27 = vmul.f32 1.442695, %v19183_v13  ;;  %19184 = vst [vmem:[#allocation253_spill] sm:$0xff] %v12016_v38  ;;  %v3366_v36 = vrot.slane %v3365_v28, 2  ;;  %v12020_v58 = vpop.eup %7973  ;;  %v19186_v63 = vsub.f32 %v18930_v16, %v11557_v22  ;;  %7993 = vpow2.f32 %v4683_v1 }
 0x403   : > { %19185 = vst [vmem:[#allocation254_spill] sm:$0xff] %v12020_v58  ;;  %v19187_v26 = vsub.f32 %v19081_v48, %v11571_v43  ;;  %v12028_v21 = vpop.eup %7975  ;;  %7995 = vpow2.f32 %v4769_v59  ;;  %v19190_v9 = vsub.f32 %v19189_v40, %v11557_v22  ;;  %v19192_v25 = vsub.f32 %v19191_v24, %v11557_v22 }
 0x404   : > { %v4773_v0 = vmul.f32 1.442695, %v19186_v63  ;;  %19188 = vst [vmem:[#allocation255_spill] sm:$0xff] %v12028_v21  ;;  %v3367_v39 = vmax.f32 %v3365_v28, %v3366_v36  ;;  %v12036_v33 = vpop.eup %7977  ;;  %7997 = vpow2.f32 %v4687_v27  ;;  %v19194_v16 = vsub.f32 %v19085_v60, %v11571_v43  ;;  %v19195_v63 = vld [vmem:[#allocation178_spill] sm:$0xff]  ;;  %v19199_v36 = vld [vmem:[#allocation204_spill] sm:$0xff]  ;;  %v19201_v27 = vld [vmem:[#allocation201_spill] sm:$0xff] }
 0x405   : > { %v4691_v13 = vmul.f32 1.442695, %v19187_v26  ;;  %v4777_v51 = vmul.f32 1.442695, %v19190_v9  ;;  %v4781_v6 = vmul.f32 1.442695, %v19192_v25  ;;  %v1172_v1 = vpack.c.bf16 %v7636_v15, %v7631_v41  ;;  %v12043_v46 = vpop.eup %7979 }
 0x406   : > { %19193 = vst [vmem:[#allocation44_spill] sm:$0xff] %v12036_v33  ;;  %v4695_v48 = vmul.f32 1.442695, %v19194_v16  ;;  %v19196_v26 = vld [vmem:[#allocation216_spill] sm:$0xff]  ;;  %19197 = vst [vmem:[#allocation215_spill] sm:$0xff] %v12043_v46  ;;  %v5546_v40 = vadd.f32 %v11983_v47, %v5545_v5  ;;  %v19198_v24 = vsub.f32 %v19086_v57, %v11571_v43  ;;  %v3368_v28 = vrot.slane %v3367_v39, 1  ;;  %v12055_v60 = vpop.eup %7981 }
 0x407   : > { %v3594_v59 = vmax.f32 %v19196_v26, %v19195_v63  ;;  %v19200_v9 = vld [vmem:[#allocation181_spill] sm:$0xff]  ;;  %7999 = vpow2.f32 %v4691_v13  ;;  %v19205_v41 = vsub.f32 %v19087_v54, %v11571_v43  ;;  %v19208_v47 = vld [vmem:[#allocation182_spill] sm:$0xff]  ;;  %6938 = vmatmul.mubr.msk.bf16.gmra.mrb[32].mxu0 %vm1207_vm2, %v1172_v1  ;;  %v19215_v1 = vsub.f32 %v19093_v18, %v11571_v43 }
 0x408   : > { %v4699_v25 = vmul.f32 1.442695, %v19198_v24  ;;  %v19202_v17 = vmax.f32 %v19200_v9, %v19201_v27  ;;  %19204 = vst [vmem:[#allocation181_spill] sm:$0xff] %v12055_v60  ;;  %v12066_v24 = vpop.eup %7983  ;;  %8001 = vpow2.f32 %v4773_v0  ;;  %v12071_v13 = vmax.f32 %v3367_v39, %v3368_v28  ;;  %3164 = vmatprep.mubr.bf16.mxu0 %v18752_v11 }
 0x409   : > { %v4703_v15 = vmul.f32 1.442695, %v19205_v41  ;;  %v12063_v57 = vmax.f32 %v3594_v59, %v19208_v47  ;;  %19210 = vst [vmem:[#allocation257_spill] sm:$0xff] %v12066_v24  ;;  %v12076_v26 = vpop.eup %7985  ;;  %8003 = vpow2.f32 %v4695_v48  ;;  %v4711_v59 = vmul.f32 1.442695, %v19215_v1  ;;  %v19219_v41 = vld [vmem:[#allocation123_spill] sm:$0xff] }
 0x40a   : > { %v12053_v3 = vmax.f32 %v19202_v17, %v19199_v36  ;;  %v19211_v17 = vsub.f32 %v19092_v37, %v11571_v43  ;;  %19214 = vst [vmem:[#allocation258_spill] sm:$0xff] %v12076_v26  ;;  %v19216_v0 = vsub.f32 %v19097_v7, %v11571_v43  ;;  %v12086_v28 = vpop.eup %7987  ;;  %8005 = vpow2.f32 %v4777_v51  ;;  %v19220_v48 = vld [vmem:[#allocation127_spill] sm:$0xff]  ;;  %v19228_v1 = vld [vmem:[#allocation64_spill] sm:$0xff]  ;;  %v12117_v51 = vpop.f32.mrb[204].mxu0 }
 0x40b   : > { %19209 = vst [vmem:[#allocation256_spill] sm:$0xff] %v12063_v57  ;;  %19218 = vst [vmem:[#allocation259_spill] sm:$0xff] %v12086_v28  ;;  %v12093_v18 = vpop.eup %7989  ;;  %8007 = vpow2.f32 %v4699_v25  ;;  %v19222_v7 = vld [vmem:[#allocation131_spill] sm:$0xff]  ;;  %v19227_v27 = vsub.f32 %v19099_v50, %v11571_v43  ;;  %v19233_v50 = vld [vmem:[#allocation149_spill] sm:$0xff]  ;;  %v19284_v49 = vrot.slane %v11536_v45, 4 }
 0x40c   : > { %19203 = vst [vmem:[#allocation216_spill] sm:$0xff] %v12053_v3  ;;  %v4707_v9 = vmul.f32 1.442695, %v19211_v17  ;;  %v4715_v47 = vmul.f32 1.442695, %v19216_v0  ;;  %v5547_v17 = vadd.f32 %v11994_v31, %v5546_v40  ;;  %19221 = vst [vmem:[#allocation123_spill] sm:$0xff] %v12093_v18  ;;  %v12101_v10 = vpop.eup %7991  ;;  %v19226_v40 = vsub.f32 %v19098_v29, %v11571_v43 }
 0x40d   : > { %v19223_v0 = vld [vmem:[#allocation135_spill] sm:$0xff]  ;;  %19225 = vst [vmem:[#allocation127_spill] sm:$0xff] %v12101_v10  ;;  %v12109_v31 = vmul.f32 1.442695, %v19227_v27  ;;  %v5572_v25 = vadd.f32 %v12093_v18, %v12086_v28  ;;  %19229 = vst [vmem:[#allocation131_spill] sm:$0xff] %v12115_v52  ;;  %v12119_v34 = vpop.eup %7993  ;;  %8009 = vpow2.f32 %v4703_v15  ;;  %v19232_v29 = vld [vmem:[#allocation81_spill] sm:$0xff] }
 0x40e   : > { %v4719_v36 = vmul.f32 1.442695, %v19226_v40  ;;  %19230 = vst [vmem:[#allocation135_spill] sm:$0xff] %v12117_v51  ;;  %19231 = vst [vmem:[#allocation43_spill] sm:$0xff] %v12119_v34  ;;  %v12127_v18 = vpop.f32.mrb[157].mxu1  ;;  %v12129_v28 = vpop.f32.mrb[205].mxu0  ;;  %8011 = vpow2.f32 %v4781_v6  ;;  %v5548_v51 = vadd.f32 %v12009_v12, %v5547_v17  ;;  %v19247_v40 = vsub.f32 %v19103_v8, %v11571_v43 }
 0x40f   : > { %19235 = vst [vmem:[#allocation64_spill] sm:$0xff] %v12127_v18  ;;  %19236 = vst [vmem:[#allocation81_spill] sm:$0xff] %v12129_v28  ;;  %v12131_v39 = vpop.eup %7995  ;;  %v5573_v15 = vadd.f32 %v12119_v34, %v5572_v25  ;;  %v19238_v52 = vld [vmem:[#allocation158_spill] sm:$0xff]  ;;  %v12137_v2 = vpop.f32.mrb[158].mxu1  ;;  %8013 = vpow2.f32 %v4707_v9  ;;  %v19244_v17 = vld [vmem:[#allocation25_spill] sm:$0xff]  ;;  %v19248_v9 = vsub.f32 %v19104_v55, %v11571_v43 }
 0x410   : > { %19237 = vst [vmem:[#allocation149_spill] sm:$0xff] %v12131_v39  ;;  %19239 = vst [vmem:[#allocation152_spill] sm:$0xff] %v12137_v2  ;;  %v12139_v27 = vpop.f32.mrb[206].mxu0  ;;  %v12141_v62 = vpop.eup %7997  ;;  %v19243_v39 = vld [vmem:[#allocation171_spill] sm:$0xff]  ;;  %v19249_v18 = vld [vmem:[#allocation36_spill] sm:$0xff]  ;;  %8015 = vpow2.f32 %v4711_v59 }
 0x411   : > { %19240 = vst [vmem:[#allocation158_spill] sm:$0xff] %v12139_v27  ;;  %19241 = vst [vmem:[#allocation260_spill] sm:$0xff] %v12141_v62  ;;  %v12149_v25 = vpop.f32.mrb[159].mxu1  ;;  %v12151_v34 = vpop.f32.mrb[207].mxu0  ;;  %v4727_v27 = vmul.f32 1.442695, %v19247_v40  ;;  %v5574_v28 = vadd.f32 %v12141_v62, %v5573_v15  ;;  %8017 = vpow2.f32 %v4715_v47  ;;  %v19273_v47 = vsub.f32 %v19110_v35, %v11571_v43 }
 0x412   : > { %19245 = vst [vmem:[#allocation164_spill] sm:$0xff] %v12149_v25  ;;  %19246 = vst [vmem:[#allocation171_spill] sm:$0xff] %v12151_v34  ;;  %v4731_v2 = vmul.f32 1.442695, %v19248_v9  ;;  %v12162_v63 = vpop.f32.mrb[160].mxu1  ;;  %v12164_v12 = vpop.f32.mrb[208].mxu0  ;;  %8019 = vpow2.f32 %v4719_v36 }
 0x413   : > { %19250 = vst [vmem:[#allocation25_spill] sm:$0xff] %v12162_v63  ;;  %19251 = vst [vmem:[#allocation36_spill] sm:$0xff] %v12164_v12  ;;  %v12166_v25 = vpop.eup %7999  ;;  %v19253_v34 = vld [vmem:[#allocation54_spill] sm:$0xff]  ;;  %v12174_v15 = vpop.f32.mrb[161].mxu1  ;;  %v5549_v12 = vadd.f32 %v12016_v38, %v5548_v51  ;;  %v19259_v63 = vld [vmem:[#allocation176_spill] sm:$0xff]  ;;  %8021 = vpow2.f32 %v12109_v31 }
 0x414   : > { %19252 = vst [vmem:[#allocation261_spill] sm:$0xff] %v12166_v25  ;;  %v19254_v40 = vld [vmem:[#allocation70_spill] sm:$0xff]  ;;  %19256 = vst [vmem:[#allocation54_spill] sm:$0xff] %v12174_v15  ;;  %v12176_v62 = vpop.f32.mrb[209].mxu0  ;;  %v12178_v6 = vpop.eup %8001  ;;  %v19260_v59 = vsub.f32 %v19259_v63, %v11571_v43  ;;  %v5575_v8 = vadd.f32 %v12166_v25, %v5574_v28  ;;  %v19261_v3 = vld [vmem:[#allocation185_spill] sm:$0xff]  ;;  %8023 = vpow2.f32 %v4727_v27 }
 0x415   : > { %v19255_v55 = vld [vmem:[#allocation86_spill] sm:$0xff]  ;;  %19257 = vst [vmem:[#allocation70_spill] sm:$0xff] %v12176_v62  ;;  %v12187_v11 = vpop.f32.mrb[162].mxu1  ;;  %v12189_v9 = vpop.f32.mrb[210].mxu0  ;;  %v19266_v51 = vld [vmem:[#allocation197_spill] sm:$0xff]  ;;  %v19280_v35 = vld [vmem:[#allocation88_spill] sm:$0xff]  ;;  %v5550_v57 = vadd.f32 %v12020_v58, %v5549_v12  ;;  %8025 = vpow2.f32 %v4731_v2 }
 0x416   : > { %19258 = vst [vmem:[#allocation86_spill] sm:$0xff] %v12178_v6  ;;  %v4735_v37 = vmul.f32 1.442695, %v19260_v59  ;;  %19262 = vst [vmem:[#allocation176_spill] sm:$0xff] %v12187_v11  ;;  %v12191_v15 = vpop.eup %8003  ;;  %v19265_v6 = vld [vmem:[#allocation192_spill] sm:$0xff]  ;;  %v19267_v63 = vld [vmem:[#allocation22_spill] sm:$0xff] }
 0x417   : > { %19263 = vst [vmem:[#allocation185_spill] sm:$0xff] %v12189_v9  ;;  %19264 = vst [vmem:[#allocation262_spill] sm:$0xff] %v12191_v15  ;;  %v12199_v28 = vpop.f32.mrb[163].mxu1  ;;  %v12201_v25 = vpop.f32.mrb[211].mxu0  ;;  %v19271_v11 = vld [vmem:[#allocation33_spill] sm:$0xff]  ;;  %v5576_v5 = vadd.f32 %v12191_v15, %v5575_v8  ;;  %v19274_v38 = vld [vmem:[#allocation206_spill] sm:$0xff] }
 0x418   : > { %19268 = vst [vmem:[#allocation192_spill] sm:$0xff] %v12199_v28  ;;  %19269 = vst [vmem:[#allocation197_spill] sm:$0xff] %v12201_v25  ;;  %v12203_v54 = vpop.eup %8005  ;;  %v19272_v9 = vsub.f32 %v19271_v11, %v11571_v43  ;;  %v4743_v62 = vmul.f32 1.442695, %v19273_v47  ;;  %v12214_v59 = vpop.f32.mrb[164].mxu1  ;;  %v3402_v11 = vmax.f32 %v11536_v45, %v19284_v49  ;;  %v19290_v36 = vld [vmem:[#allocation106_spill] sm:$0xff]  ;;  %8027 = vpow2.f32 %v4735_v37 }
 0x419   : > { %19270 = vst [vmem:[#allocation22_spill] sm:$0xff] %v12203_v54  ;;  %19275 = vst [vmem:[#allocation33_spill] sm:$0xff] %v12214_v59  ;;  %v12216_v28 = vpop.f32.mrb[212].mxu0  ;;  %v12218_v25 = vpop.eup %8007  ;;  %v19278_v54 = vld [vmem:[#allocation41_spill] sm:$0xff]  ;;  %v19295_v12 = vld [vmem:[#allocation51_spill] sm:$0xff] }
 0x41a   : > { %v4739_v16 = vmul.f32 1.442695, %v19272_v9  ;;  %19276 = vst [vmem:[#allocation206_spill] sm:$0xff] %v12216_v28  ;;  %19277 = vst [vmem:[#allocation263_spill] sm:$0xff] %v12218_v25  ;;  %v19279_v9 = vld [vmem:[#allocation59_spill] sm:$0xff]  ;;  %v12226_v8 = vpop.f32.mrb[165].mxu1  ;;  %v5577_v28 = vadd.f32 %v12218_v25, %v5576_v5  ;;  %v12241_v47 = vpop.eup %8009 }
 0x41b   : > { %19281 = vst [vmem:[#allocation41_spill] sm:$0xff] %v12226_v8  ;;  %v12228_v15 = vpop.f32.mrb[213].mxu0  ;;  %v19283_v59 = vld [vmem:[#allocation221_spill] sm:$0xff]  ;;  %v12237_v56 = vpop.f32.mrb[166].mxu1  ;;  %19287 = vst [vmem:[#allocation264_spill] sm:$0xff] %v12241_v47  ;;  %v3403_v2 = vrot.slane %v3402_v11, 2 }
 0x41c   : > { %19282 = vst [vmem:[#allocation59_spill] sm:$0xff] %v12228_v15  ;;  %19285 = vst [vmem:[#allocation88_spill] sm:$0xff] %v12237_v56  ;;  %v12239_v10 = vpop.f32.mrb[214].mxu0  ;;  %v19288_v15 = vld [vmem:[#allocation231_spill] sm:$0xff]  ;;  %v19289_v5 = vld [vmem:[#allocation69_spill] sm:$0xff]  ;;  %v12250_v8 = vpop.f32.mrb[167].mxu1  ;;  %v5578_v56 = vadd.f32 %v12241_v47, %v5577_v28  ;;  %8029 = vpow2.f32 %v4739_v16 }
 0x41d   : > { %19286 = vst [vmem:[#allocation221_spill] sm:$0xff] %v12239_v10  ;;  %19291 = vst [vmem:[#allocation231_spill] sm:$0xff] %v12250_v8  ;;  %v12252_v49 = vpop.f32.mrb[215].mxu0  ;;  %v12254_v45 = vpop.eup %8011  ;;  %v19294_v10 = vsub.f32 %v19115_v53, %v11571_v43  ;;  %v19307_v53 = vld [vmem:[#allocation53_spill] sm:$0xff]  ;;  %v19308_v28 = vld [vmem:[#allocation24_spill] sm:$0xff]  ;;  %8031 = vpow2.f32 %v4743_v62  ;;  %v19320_v62 = vsub.f32 %v19121_v32, %v11571_v43 }
 0x41e   : > { %19292 = vst [vmem:[#allocation69_spill] sm:$0xff] %v12252_v49  ;;  %19293 = vst [vmem:[#allocation106_spill] sm:$0xff] %v12254_v45  ;;  %v12262_v58 = vpop.f32.mrb[168].mxu1  ;;  %v12264_v26 = vpop.f32.mrb[216].mxu0  ;;  %v19299_v45 = vsub.f32 %v19116_v14, %v11571_v43  ;;  %v5413_v49 = vadd.f32 %v19307_v53, %v11997_v20  ;;  %v19316_v16 = vld [vmem:[#allocation118_spill] sm:$0xff] }
 0x41f   : > { %v4747_v31 = vmul.f32 1.442695, %v19294_v10  ;;  %19296 = vst [vmem:[#allocation51_spill] sm:$0xff] %v12262_v58  ;;  %19297 = vst [vmem:[#allocation265_spill] sm:$0xff] %v12264_v26  ;;  %v12266_v25 = vpop.eup %8013  ;;  %v19301_v10 = vld [vmem:[#allocation108_spill] sm:$0xff]  ;;  %v12275_v47 = vpop.f32.mrb[169].mxu1  ;;  %v5551_v58 = vadd.f32 %v12028_v21, %v5550_v57  ;;  %v19309_v57 = vsub.f32 %v19120_v30, %v11571_v43 }
 0x420   : > { %19298 = vst [vmem:[#allocation266_spill] sm:$0xff] %v12266_v25  ;;  %v4751_v27 = vmul.f32 1.442695, %v19299_v45  ;;  %19302 = vst [vmem:[#allocation108_spill] sm:$0xff] %v12275_v47  ;;  %v12277_v23 = vpop.f32.mrb[217].mxu0  ;;  %v5579_v26 = vadd.f32 %v12266_v25, %v5578_v56  ;;  %v12281_v8 = vpop.f32.mrb[170].mxu1  ;;  %v5449_v47 = vadd.f32 %v19308_v28, %v12000_v44 }
 0x421   : > { %19303 = vst [vmem:[#allocation267_spill] sm:$0xff] %v12277_v23  ;;  %19304 = vst [vmem:[#allocation268_spill] sm:$0xff] %v12281_v8  ;;  %v12283_v14 = vpop.f32.mrb[218].mxu0  ;;  %v12285_v45 = vpop.eup %8015  ;;  %v4755_v37 = vmul.f32 1.442695, %v19309_v57  ;;  %v19310_v56 = vld [vmem:[#allocation223_spill] sm:$0xff]  ;;  %8033 = vpow2.f32 %v4747_v31 }
 0x422   : > { %19305 = vst [vmem:[#allocation269_spill] sm:$0xff] %v12283_v14  ;;  %19306 = vst [vmem:[#allocation270_spill] sm:$0xff] %v12285_v45  ;;  %v12296_v21 = vadd.f32 %v19310_v56, %v11989_v4  ;;  %v5580_v25 = vadd.f32 %v12285_v45, %v5579_v26  ;;  %v19312_v14 = vsub.f32 %v19219_v41, %v12071_v13  ;;  %v12302_v20 = vpop.f32.mrb[171].mxu1  ;;  %v12304_v53 = vpop.f32.mrb[219].mxu0  ;;  %v19317_v30 = vld [vmem:[#allocation199_spill] sm:$0xff]  ;;  %8035 = vpow2.f32 %v4751_v27  ;;  %v19413_v23 = vld [vmem:[#allocation102_spill] sm:$0xff] }
 0x423   : > { %19313 = vst [vmem:[#allocation271_spill] sm:$0xff] %v12302_v20  ;;  %19314 = vst [vmem:[#allocation272_spill] sm:$0xff] %v12304_v53  ;;  %v12306_v44 = vpop.eup %8017  ;;  %v19318_v57 = vsub.f32 %v19316_v16, %v19317_v30  ;;  %v4759_v4 = vmul.f32 1.442695, %v19320_v62  ;;  %v19321_v26 = vsub.f32 %v19220_v48, %v12071_v13  ;;  %v12321_v45 = vmax.f32 %v3402_v11, %v3403_v2  ;;  %v12325_v16 = vpop.f32.mrb[220].mxu0  ;;  %v19325_v30 = vld [vmem:[#allocation208_spill] sm:$0xff] }
 0x424   : > { %19311 = vst [vmem:[#allocation223_spill] sm:$0xff] %v12296_v21  ;;  %v4545_v8 = vmul.f32 1.442695, %v19312_v14  ;;  %19315 = vst [vmem:[#allocation273_spill] sm:$0xff] %v12306_v44  ;;  %v5552_v14 = vadd.f32 %v12036_v33, %v5551_v58  ;;  %v5581_v56 = vadd.f32 %v12306_v44, %v5580_v25  ;;  %v12323_v21 = vpop.f32.mrb[172].mxu1  ;;  %v12327_v31 = vpop.eup %8019  ;;  %v12330_v32 = vadd.f32 %v19325_v30, %v5413_v49  ;;  %v19330_v25 = vld [vmem:[#allocation90_spill] sm:$0xff] }
 0x425   : > { %v12311_v28 = vmul.f32 1.442695, %v19318_v57  ;;  %v4549_v41 = vmul.f32 1.442695, %v19321_v26  ;;  %19322 = vst [vmem:[#allocation199_spill] sm:$0xff] %v12323_v21  ;;  %19323 = vst [vmem:[#allocation274_spill] sm:$0xff] %v12325_v16  ;;  %8037 = vpow2.f32 %v4755_v37  ;;  %v19329_v58 = vsub.f32 %v19222_v7, %v12071_v13 }
 0x426   : > { %19324 = vst [vmem:[#allocation275_spill] sm:$0xff] %v12327_v31  ;;  %19326 = vst [vmem:[#allocation276_spill] sm:$0xff] %v12330_v32  ;;  %v19327_v57 = vld [vmem:[#allocation187_spill] sm:$0xff]  ;;  %v19331_v11 = vsub.f32 %v19330_v25, %v11571_v43  ;;  %v5582_v2 = vadd.f32 %v12327_v31, %v5581_v56  ;;  %8039 = vpow2.f32 %v4545_v8  ;;  %v12343_v44 = vpop.f32.mrb[173].mxu1  ;;  %v12345_v49 = vpop.f32.mrb[221].mxu0  ;;  %v5553_v56 = vadd.f32 %v12043_v46, %v5552_v14  ;;  %v19403_v16 = vld [vmem:[#allocation42_spill] sm:$0xff] }
 0x427   : > { %19319 = vst [vmem:[#allocation118_spill] sm:$0xff] %v12311_v28  ;;  %v12333_v62 = vadd.f32 %v19327_v57, %v5449_v47  ;;  %v4553_v48 = vmul.f32 1.442695, %v19329_v58  ;;  %v19332_v26 = vld [vmem:[#allocation163_spill] sm:$0xff]  ;;  %19333 = vst [vmem:[#allocation90_spill] sm:$0xff] %v12343_v44  ;;  %v12347_v47 = vpop.eup %8021  ;;  %8041 = vpow2.f32 %v4549_v41  ;;  %v19338_v58 = vsub.f32 %v19223_v0, %v12071_v13  ;;  %v12363_v30 = vpop.f32.mrb[222].mxu0 }
 0x428   : > { %v4763_v27 = vmul.f32 1.442695, %v19331_v11  ;;  %19334 = vst [vmem:[#allocation163_spill] sm:$0xff] %v12345_v49  ;;  %19335 = vst [vmem:[#allocation278_spill] sm:$0xff] %v12347_v47  ;;  %v12354_v11 = vpop.eup %8023  ;;  %8043 = vpow2.f32 %v4759_v4  ;;  %v19340_v8 = vld [vmem:[#allocation203_spill] sm:$0xff]  ;;  %v3405_v28 = vrot.slane %v12321_v45, 1  ;;  %v19345_v0 = vsub.f32 %v19224_v19, %v12071_v13 }
 0x429   : > { %19328 = vst [vmem:[#allocation277_spill] sm:$0xff] %v12333_v62  ;;  %v4557_v25 = vmul.f32 1.442695, %v19338_v58  ;;  %19339 = vst [vmem:[#allocation279_spill] sm:$0xff] %v12354_v11  ;;  %v19341_v33 = vsub.f32 %v19340_v8, %v11571_v43  ;;  %v12361_v62 = vpop.f32.mrb[174].mxu1  ;;  %v12365_v41 = vpop.eup %8025  ;;  %8045 = vpow2.f32 %v4553_v48  ;;  %v19346_v4 = vsub.f32 %v19228_v1, %v12071_v13  ;;  %v19401_v49 = vld [vmem:[#allocation175_spill] sm:$0xff] }
 0x42a   : > { %19342 = vst [vmem:[#allocation203_spill] sm:$0xff] %v12361_v62  ;;  %19343 = vst [vmem:[#allocation280_spill] sm:$0xff] %v12363_v30  ;;  %v4561_v58 = vmul.f32 1.442695, %v19345_v0  ;;  %v12376_v7 = vpop.eup %8027  ;;  %8047 = vpow2.f32 %v4763_v27  ;;  %v5583_v46 = vadd.f32 %v12347_v47, %v5582_v2  ;;  %v19349_v48 = vsub.f32 %v19233_v50, %v12071_v13  ;;  %v12385_v30 = vpop.f32.mrb[175].mxu1  ;;  %v19399_v62 = vld [vmem:[#allocation168_spill] sm:$0xff] }
 0x42b   : > { %v4767_v31 = vmul.f32 1.442695, %v19341_v33  ;;  %19344 = vst [vmem:[#allocation281_spill] sm:$0xff] %v12365_v41  ;;  %v4565_v14 = vmul.f32 1.442695, %v19346_v4  ;;  %v19347_v33 = vsub.f32 %v19232_v29, %v12071_v13  ;;  %19348 = vst [vmem:[#allocation282_spill] sm:$0xff] %v12376_v7  ;;  %v19350_v19 = vsub.f32 %v19234_v61, %v12071_v13  ;;  %v12389_v4 = vpop.eup %8029 }
 0x42c   : > { %v4573_v32 = vmul.f32 1.442695, %v19349_v48  ;;  %19351 = vst [vmem:[#allocation283_spill] sm:$0xff] %v12385_v30  ;;  %v12387_v1 = vpop.f32.mrb[223].mxu0  ;;  %19353 = vst [vmem:[#allocation285_spill] sm:$0xff] %v12389_v4  ;;  %8049 = vpow2.f32 %v4557_v25  ;;  %v19354_v29 = vsub.f32 %v19238_v52, %v12071_v13  ;;  %v19355_v2 = vsub.f32 %v19242_v42, %v12071_v13  ;;  %v12400_v48 = vpop.eup %8031  ;;  %v19402_v44 = vld [vmem:[#allocation29_spill] sm:$0xff] }
 0x42d   : > { %v4569_v8 = vmul.f32 1.442695, %v19347_v33  ;;  %v4577_v0 = vmul.f32 1.442695, %v19350_v19  ;;  %19352 = vst [vmem:[#allocation284_spill] sm:$0xff] %v12387_v1  ;;  %v19356_v33 = vsub.f32 %v19243_v39, %v12071_v13  ;;  %19357 = vst [vmem:[#allocation286_spill] sm:$0xff] %v12400_v48  ;;  %v12403_v19 = vadd.f32 %v12055_v60, %v5553_v56  ;;  %v12415_v39 = vpop.eup %8033 }
 0x42e   : > { %v4581_v27 = vmul.f32 1.442695, %v19354_v29  ;;  %v4585_v50 = vmul.f32 1.442695, %v19355_v2  ;;  %8051 = vpow2.f32 %v4767_v31  ;;  %v19358_v25 = vsub.f32 %v19244_v17, %v12071_v13  ;;  %v12411_v42 = vpop.f32.mrb[176].mxu1  ;;  %v12413_v2 = vpop.f32.mrb[224].mxu0 }
 0x42f   : > { %v4589_v61 = vmul.f32 1.442695, %v19356_v33  ;;  %v19359_v52 = vsub.f32 %v19249_v18, %v12071_v13  ;;  %19360 = vst [vmem:[#allocation287_spill] sm:$0xff] %v12411_v42  ;;  %19361 = vst [vmem:[#allocation288_spill] sm:$0xff] %v12413_v2  ;;  %8053 = vpow2.f32 %v4561_v58  ;;  %v19363_v56 = vsub.f32 %v19253_v34, %v12071_v13  ;;  %v12428_v60 = vpop.eup %8035  ;;  %v19395_v1 = vld [vmem:[#allocation150_spill] sm:$0xff]  ;;  %v19408_v20 = vld [vmem:[#allocation77_spill] sm:$0xff] }
 0x430   : > { %v4593_v47 = vmul.f32 1.442695, %v19358_v25  ;;  %19362 = vst [vmem:[#allocation289_spill] sm:$0xff] %v12415_v39  ;;  %v19364_v31 = vsub.f32 %v19254_v40, %v12071_v13  ;;  %v19365_v25 = vsub.f32 %v19255_v55, %v12071_v13  ;;  %19366 = vst [vmem:[#allocation290_spill] sm:$0xff] %v12428_v60  ;;  %v5584_v2 = vadd.f32 %v12354_v11, %v5583_v46  ;;  %v12443_v55 = vpop.f32.mrb[225].mxu0 }
 0x431   : > { %v4597_v29 = vmul.f32 1.442695, %v19359_v52  ;;  %v4601_v33 = vmul.f32 1.442695, %v19363_v56  ;;  %v12426_v52 = vpop.trf.xlu1  ;;  %8055 = vpow2.f32 %v4565_v14  ;;  %v19367_v58 = vsub.f32 %v19261_v3, %v12071_v13  ;;  %19370 = vst [vmem:[#allocation292_spill] sm:$0xff] %v12443_v55  ;;  %v12462_v11 = vpop.f32.mrb[226].mxu0 }
 0x432   : > { %v4605_v17 = vmul.f32 1.442695, %v19364_v31  ;;  %v4609_v18 = vmul.f32 1.442695, %v19365_v25  ;;  %v19368_v40 = vsub.f32 %v19265_v6, %v12071_v13  ;;  %v12441_v31 = vpop.f32.mrb[177].mxu1  ;;  %v12445_v25 = vpop.eup %8037  ;;  %8057 = vpow2.f32 %v4569_v8  ;;  %19375 = vst [vmem:[#allocation295_spill] sm:$0xff] %v12462_v11 }
 0x433   : > { %v12434_v34 = vmul.f32 1.442695, %v19367_v58  ;;  %19369 = vst [vmem:[#allocation291_spill] sm:$0xff] %v12441_v31  ;;  %19371 = vst [vmem:[#allocation293_spill] sm:$0xff] %v12445_v25  ;;  %v19372_v46 = vsub.f32 %v19266_v51, %v12071_v13  ;;  %v19373_v3 = vsub.f32 %v19267_v63, %v12071_v13  ;;  %v12458_v6 = vmax.f32 %v12321_v45, %v3405_v28  ;;  %v12464_v55 = vpop.eup %8039  ;;  %v12478_v28 = vpop.f32.mrb[227].mxu0  ;;  %v19382_v11 = vld [vmem:[#allocation125_spill] sm:$0xff] }
 0x434   : > { %v12439_v56 = vmul.f32 1.442695, %v19368_v40  ;;  %v12460_v40 = vpop.f32.mrb[178].mxu1  ;;  %19376 = vst [vmem:[#allocation296_spill] sm:$0xff] %v12464_v55  ;;  %8059 = vpow2.f32 %v4573_v32  ;;  %v19377_v51 = vsub.f32 %v19274_v38, %v12071_v13  ;;  %v19378_v63 = vsub.f32 %v19278_v54, %v12071_v13  ;;  %19380 = vst [vmem:[#allocation298_spill] sm:$0xff] %v12478_v28  ;;  %v12480_v45 = vpop.eup %8041  ;;  %v19388_v38 = vld [vmem:[#allocation34_spill] sm:$0xff] }
 0x435   : > { %v12450_v14 = vmul.f32 1.442695, %v19372_v46  ;;  %v12455_v58 = vmul.f32 1.442695, %v19373_v3  ;;  %19374 = vst [vmem:[#allocation294_spill] sm:$0xff] %v12460_v40  ;;  %v12476_v3 = vpop.f32.mrb[179].mxu1  ;;  %8061 = vpow2.f32 %v4577_v0  ;;  %v12488_v42 = vpop.eup %8043  ;;  %v5585_v54 = vadd.f32 %v12365_v41, %v5584_v2 }
 0x436   : > { %v12469_v8 = vmul.f32 1.442695, %v19377_v51  ;;  %v12474_v46 = vmul.f32 1.442695, %v19378_v63  ;;  %19379 = vst [vmem:[#allocation297_spill] sm:$0xff] %v12476_v3  ;;  %19381 = vst [vmem:[#allocation299_spill] sm:$0xff] %v12480_v45  ;;  %8063 = vpow2.f32 %v4581_v27  ;;  %v19386_v63 = vsub.f32 %v19279_v9, %v12071_v13  ;;  %v12498_v32 = vpop.eup %8045 }
 0x437   : > { %v19383_v40 = vld [vmem:[#allocation129_spill] sm:$0xff]  ;;  %19385 = vst [vmem:[#allocation125_spill] sm:$0xff] %v12488_v42  ;;  %v5461_v0 = vadd.f32 %v12480_v45, %v12464_v55  ;;  %8065 = vpow2.f32 %v4585_v50  ;;  %v19389_v31 = vld [vmem:[#allocation139_spill] sm:$0xff]  ;;  %v12506_v41 = vpop.eup %8047  ;;  %v19392_v9 = vsub.f32 %v19280_v35, %v12071_v13  ;;  %v19414_v42 = vld [vmem:[#allocation26_spill] sm:$0xff] }
 0x438   : > { %v19384_v51 = vld [vmem:[#allocation133_spill] sm:$0xff]  ;;  %v12494_v28 = vmul.f32 1.442695, %v19386_v63  ;;  %19387 = vst [vmem:[#allocation129_spill] sm:$0xff] %v12498_v32  ;;  %v19390_v2 = vld [vmem:[#allocation143_spill] sm:$0xff]  ;;  %8067 = vpow2.f32 %v4589_v61  ;;  %v12516_v3 = vpop.eup %8049  ;;  %v19432_v55 = vld [vmem:[#allocation170_spill] sm:$0xff] }
 0x439   : > { %19391 = vst [vmem:[#allocation133_spill] sm:$0xff] %v12506_v41  ;;  %v12511_v63 = vmul.f32 1.442695, %v19392_v9  ;;  %v5462_v30 = vadd.f32 %v12498_v32, %v5461_v0  ;;  %v19393_v50 = vld [vmem:[#allocation147_spill] sm:$0xff]  ;;  %19394 = vst [vmem:[#allocation34_spill] sm:$0xff] %v12516_v3  ;;  %8069 = vpow2.f32 %v4593_v47  ;;  %v19397_v61 = vld [vmem:[#allocation161_spill] sm:$0xff]  ;;  %v12524_v35 = vpop.eup %8051  ;;  %v5586_v9 = vadd.f32 %v12376_v7, %v5585_v54 }
 0x43a   : > { %v19396_v27 = vld [vmem:[#allocation155_spill] sm:$0xff]  ;;  %19398 = vst [vmem:[#allocation139_spill] sm:$0xff] %v12524_v35  ;;  %8071 = vpow2.f32 %v4597_v29  ;;  %v12530_v47 = vpop.eup %8053  ;;  %v19409_v35 = vld [vmem:[#allocation98_spill] sm:$0xff]  ;;  %v19420_v45 = vld [vmem:[#allocation97_spill] sm:$0xff] }
 0x43b   : > { %v5463_v0 = vadd.f32 %v12516_v3, %v5462_v30  ;;  %19400 = vst [vmem:[#allocation143_spill] sm:$0xff] %v12530_v47  ;;  %8073 = vpow2.f32 %v4601_v33  ;;  %v12538_v41 = vpop.eup %8055  ;;  %v19405_v30 = vsub.f32 %v19283_v59, %v12071_v13  ;;  %v19406_v33 = vld [vmem:[#allocation61_spill] sm:$0xff]  ;;  %v5587_v59 = vadd.f32 %v12389_v4, %v5586_v9  ;;  %v19415_v32 = vld [vmem:[#allocation35_spill] sm:$0xff] }
 0x43c   : > { %19404 = vst [vmem:[#allocation147_spill] sm:$0xff] %v12538_v41  ;;  %8075 = vpow2.f32 %v4605_v17  ;;  %v12546_v7 = vpop.eup %8057  ;;  %v19410_v17 = vld [vmem:[#allocation74_spill] sm:$0xff] }
 0x43d   : > { %v4645_v29 = vmul.f32 1.442695, %v19405_v30  ;;  %v5464_v54 = vadd.f32 %v12530_v47, %v5463_v0  ;;  %19407 = vst [vmem:[#allocation150_spill] sm:$0xff] %v12546_v7  ;;  %8077 = vpow2.f32 %v4609_v18  ;;  %v19412_v30 = vld [vmem:[#allocation87_spill] sm:$0xff]  ;;  %v19419_v47 = vld [vmem:[#allocation62_spill] sm:$0xff] }
 0x43e   : > { %v12554_v3 = vpop.eup %8059  ;;  %8079 = vpow2.f32 %v12434_v34  ;;  %v19416_v34 = vsub.f32 %v19288_v15, %v12071_v13 }
 0x43f   : > { %19411 = vst [vmem:[#allocation155_spill] sm:$0xff] %v12554_v3  ;;  %v5465_v0 = vadd.f32 %v12538_v41, %v5464_v54  ;;  %v12561_v21 = vpop.eup %8061  ;;  %8081 = vpow2.f32 %v12439_v56  ;;  %v19417_v56 = vld [vmem:[#allocation212_spill] sm:$0xff]  ;;  %v19423_v41 = vld [vmem:[#allocation235_spill] sm:$0xff] }
 0x440   : > { %v12570_v4 = vpop.eup %8063  ;;  %8083 = vpow2.f32 %v12450_v14  ;;  %v4649_v54 = vmul.f32 1.442695, %v19416_v34 }
 0x441   : > { %v5466_v18 = vadd.f32 %v12546_v7, %v5465_v0  ;;  %v12579_v53 = vpop.eup %8065  ;;  %8085 = vpow2.f32 %v12455_v58  ;;  %v5588_v0 = vadd.f32 %v12400_v48, %v5587_v59  ;;  %v19433_v59 = vsub.f32 %v19290_v36, %v12071_v13 }
 0x442   : > { %19418 = vst [vmem:[#allocation161_spill] sm:$0xff] %v12579_v53  ;;  %v12588_v15 = vpop.eup %8067  ;;  %8087 = vpow2.f32 %v12469_v8  ;;  %v19429_v8 = vsub.f32 %v19289_v5, %v12071_v13 }
 0x443   : > { %19422 = vst [vmem:[#allocation168_spill] sm:$0xff] %v12588_v15  ;;  %v5467_v34 = vadd.f32 %v12554_v3, %v5466_v18  ;;  %v12595_v7 = vpop.eup %8069  ;;  %8089 = vpow2.f32 %v12474_v46  ;;  %v4657_v37 = vmul.f32 1.442695, %v19433_v59  ;;  %v19436_v3 = vsub.f32 %v19382_v11, %v12458_v6  ;;  %v19438_v46 = vld [vmem:[#allocation91_spill] sm:$0xff] }
 0x444   : > { %19424 = vst [vmem:[#allocation175_spill] sm:$0xff] %v12595_v7  ;;  %v12604_v48 = vpop.eup %8071  ;;  %8091 = vpow2.f32 %v12494_v28  ;;  %v4653_v18 = vmul.f32 1.442695, %v19429_v8  ;;  %v19439_v36 = vsub.f32 %v19438_v46, %v11557_v22  ;;  %v5589_v57 = vadd.f32 %v12415_v39, %v5588_v0  ;;  %v19451_v39 = vld [vmem:[#allocation209_spill] sm:$0xff] }
 0x445   : > { %19428 = vst [vmem:[#allocation29_spill] sm:$0xff] %v12604_v48  ;;  %v5468_v58 = vadd.f32 %v12561_v21, %v5467_v34  ;;  %v12613_v9 = vpop.eup %8073  ;;  %8093 = vpow2.f32 %v12511_v63  ;;  %v5555_v34 = vadd.f32 %v12066_v24, %v12403_v19  ;;  %v4547_v14 = vmul.f32 1.442695, %v19436_v3 }
 0x446   : > { %19431 = vst [vmem:[#allocation42_spill] sm:$0xff] %v12613_v9  ;;  %v12622_v5 = vpop.eup %8075  ;;  %8095 = vpow2.f32 %v4645_v29  ;;  %v12635_v59 = vmul.f32 1.442695, %v19439_v36  ;;  %v19441_v19 = vsub.f32 %v19383_v40, %v12458_v6  ;;  %v19446_v46 = vsub.f32 %v19295_v12, %v12071_v13 }
 0x447   : > { %19435 = vst [vmem:[#allocation61_spill] sm:$0xff] %v12622_v5  ;;  %v5469_v8 = vadd.f32 %v12570_v4, %v5468_v58  ;;  %v12630_v63 = vpop.eup %8077  ;;  %8097 = vpow2.f32 %v4649_v54  ;;  %v19443_v58 = vld [vmem:[#allocation222_spill] sm:$0xff]  ;;  %v19452_v28 = vsub.f32 %v19451_v39, %v11571_v43  ;;  %v19459_v39 = vld [vmem:[#allocation213_spill] sm:$0xff] }
 0x448   : > { %19437 = vst [vmem:[#allocation77_spill] sm:$0xff] %v12630_v63  ;;  %19440 = vst [vmem:[#allocation98_spill] sm:$0xff] %v12635_v59  ;;  %v4551_v29 = vmul.f32 1.442695, %v19441_v19  ;;  %v12641_v24 = vpop.eup %8079  ;;  %v19444_v11 = vsub.f32 %v19443_v58, %v11557_v22  ;;  %8099 = vpow2.f32 %v4653_v18  ;;  %v4661_v36 = vmul.f32 1.442695, %v19446_v46 }
 0x449   : > { %19442 = vst [vmem:[#allocation74_spill] sm:$0xff] %v12641_v24  ;;  %v5470_v59 = vadd.f32 %v12579_v53, %v5469_v8  ;;  %v12652_v0 = vpop.eup %8081  ;;  %v19448_v54 = vld [vmem:[#allocation30_spill] sm:$0xff]  ;;  %v12662_v58 = vmul.f32 1.442695, %v19452_v28  ;;  %8101 = vpow2.f32 %v4657_v37  ;;  %v19454_v18 = vsub.f32 %v19384_v51, %v12458_v6  ;;  %v19457_v22 = vld [vmem:[#allocation148_spill] sm:$0xff] }
 0x44a   : > { %v12646_v3 = vmul.f32 1.442695, %v19444_v11  ;;  %19447 = vst [vmem:[#allocation102_spill] sm:$0xff] %v12652_v0  ;;  %v19449_v40 = vsub.f32 %v19448_v54, %v11571_v43  ;;  %v12667_v11 = vpop.eup %8083  ;;  %v19456_v8 = vld [vmem:[#allocation258_spill] sm:$0xff]  ;;  %8103 = vpow2.f32 %v4547_v14  ;;  %v19460_v37 = vsub.f32 %v19459_v39, %v11571_v43 }
 0x44b   : > { %19453 = vst [vmem:[#allocation35_spill] sm:$0xff] %v12662_v58  ;;  %v4555_v12 = vmul.f32 1.442695, %v19454_v18  ;;  %19455 = vst [vmem:[#allocation212_spill] sm:$0xff] %v12667_v11  ;;  %v5556_v46 = vadd.f32 %v19456_v8, %v5555_v34  ;;  %v5590_v51 = vadd.f32 %v12428_v60, %v5589_v57  ;;  %8105 = vpow2.f32 %v4551_v29 }
 0x44c   : > { %19445 = vst [vmem:[#allocation87_spill] sm:$0xff] %v12646_v3  ;;  %v12657_v19 = vmul.f32 1.442695, %v19449_v40  ;;  %v19458_v3 = vsub.f32 %v19457_v22, %v12071_v13  ;;  %v5471_v40 = vadd.f32 %v12588_v15, %v5470_v59  ;;  %v12679_v28 = vmul.f32 1.442695, %v19460_v37  ;;  %v19463_v22 = vld [vmem:[#allocation217_spill] sm:$0xff] }
 0x44d   : > { %v19462_v34 = vsub.f32 %v19388_v38, %v12458_v6  ;;  %v19464_v59 = vsub.f32 %v19463_v22, %v11571_v43  ;;  %8107 = vpow2.f32 %v4661_v36  ;;  %v19467_v38 = vsub.f32 %v19389_v31, %v12458_v6  ;;  %v19470_v36 = vld [vmem:[#allocation127_spill] sm:$0xff]  ;;  %v12721_v22 = vpop.trf.xlu1  ;;  %v19494_v43 = vld [vmem:[#allocation218_spill] sm:$0xff] }
 0x44e   : > { %19450 = vst [vmem:[#allocation26_spill] sm:$0xff] %v12657_v19  ;;  %v4665_v54 = vmul.f32 1.442695, %v19458_v3  ;;  %v12674_v19 = vpop.eup %8085  ;;  %19461 = vst [vmem:[#allocation62_spill] sm:$0xff] %v12679_v28  ;;  %v19466_v3 = vsub.f32 %v19301_v10, %v12071_v13  ;;  %v5472_v37 = vadd.f32 %v12595_v7, %v5471_v40  ;;  %8109 = vpow2.f32 %v4555_v12  ;;  %v19469_v28 = vld [vmem:[#allocation49_spill] sm:$0xff] }
 0x44f   : > { %v4559_v18 = vmul.f32 1.442695, %v19462_v34  ;;  %v12685_v8 = vpop.eup %8087  ;;  %v12690_v14 = vmul.f32 1.442695, %v19464_v59  ;;  %v4563_v29 = vmul.f32 1.442695, %v19467_v38  ;;  %v7641_v10 = vunpack.i.h.bf16 %v12426_v52 }
 0x450   : > { %v4669_v39 = vmul.f32 1.442695, %v19466_v3  ;;  %v12696_v57 = vpop.eup %8089  ;;  %v19468_v34 = vld [vmem:[#allocation173_spill] sm:$0xff]  ;;  %8111 = vpow2.f32 %v4665_v54  ;;  %v5473_v13 = vadd.f32 %v12604_v48, %v5472_v37  ;;  %v12713_v12 = vadd.f32 %v12445_v25, %v5590_v51 }
 0x451   : > { %19465 = vst [vmem:[#allocation97_spill] sm:$0xff] %v12690_v14  ;;  %v12703_v59 = vpop.eup %8091  ;;  %v12706_v14 = vadd.f32 %v19470_v36, %v5556_v46  ;;  %8113 = vpow2.f32 %v4559_v18  ;;  %v19473_v31 = vsub.f32 %v19390_v2, %v12458_v6  ;;  %v19474_v38 = vsub.f32 %v19393_v50, %v12458_v6 }
 0x452   : > { %v12710_v40 = vpop.eup %8093  ;;  %19472 = vst [vmem:[#allocation170_spill] sm:$0xff] %v12713_v12  ;;  %8115 = vpow2.f32 %v4669_v39  ;;  %v5474_v37 = vadd.f32 %v12613_v9, %v5473_v13  ;;  %v19475_v51 = vsub.f32 %v19395_v1, %v12458_v6  ;;  %v19476_v18 = vsub.f32 %v19396_v27, %v12458_v6 }
 0x453   : > { %19471 = vst [vmem:[#allocation235_spill] sm:$0xff] %v12706_v14  ;;  %v4567_v3 = vmul.f32 1.442695, %v19473_v31  ;;  %v4571_v46 = vmul.f32 1.442695, %v19474_v38  ;;  %v12723_v54 = vpop.eup %8095  ;;  %8117 = vpow2.f32 %v4563_v29  ;;  %v19477_v50 = vsub.f32 %v19397_v61, %v12458_v6  ;;  %v19495_v14 = vld [vmem:[#allocation256_spill] sm:$0xff] }
 0x454   : > { %v4575_v60 = vmul.f32 1.442695, %v19475_v51  ;;  %v4579_v2 = vmul.f32 1.442695, %v19476_v18  ;;  %v12732_v31 = vpop.eup %8097  ;;  %v19478_v39 = vsub.f32 %v19399_v62, %v12458_v6  ;;  %v19479_v13 = vsub.f32 %v19401_v49, %v12458_v6 }
 0x455   : > { %v4583_v38 = vmul.f32 1.442695, %v19477_v50  ;;  %v12745_v51 = vpop.eup %8099  ;;  %v5475_v27 = vadd.f32 %v12622_v5, %v5474_v37  ;;  %v19480_v29 = vsub.f32 %v19402_v44, %v12458_v6  ;;  %v19481_v61 = vsub.f32 %v19403_v16, %v12458_v6 }
 0x456   : > { %v4587_v36 = vmul.f32 1.442695, %v19478_v39  ;;  %v12743_v1 = vmul.f32 1.442695, %v19479_v13  ;;  %v19482_v62 = vsub.f32 %v19406_v33, %v12458_v6  ;;  %v12763_v39 = vpop.eup %8101  ;;  %8119 = vpow2.f32 %v4567_v3 }
 0x457   : > { %v12751_v18 = vmul.f32 1.442695, %v19480_v29  ;;  %v12756_v50 = vmul.f32 1.442695, %v19481_v61  ;;  %v19483_v37 = vsub.f32 %v19408_v20, %v12458_v6  ;;  %v19484_v44 = vsub.f32 %v19409_v35, %v12458_v6  ;;  %v12780_v33 = vpop.eup %8103 }
 0x458   : > { %v12761_v49 = vmul.f32 1.442695, %v19482_v62  ;;  %v19485_v16 = vsub.f32 %v19410_v17, %v12458_v6  ;;  %v5476_v62 = vadd.f32 %v12630_v63, %v5475_v27  ;;  %v19486_v3 = vsub.f32 %v19412_v30, %v12458_v6  ;;  %v19501_v63 = vld [vmem:[#allocation110_spill] sm:$0xff] }
 0x459   : > { %v12768_v13 = vmul.f32 1.442695, %v19483_v37  ;;  %v12773_v29 = vmul.f32 1.442695, %v19484_v44  ;;  %v19487_v37 = vsub.f32 %v19413_v23, %v12458_v6  ;;  %v19488_v44 = vsub.f32 %v19414_v42, %v12458_v6  ;;  %v12810_v23 = vpop.trf.xlu1 }
 0x45a   : > { %v12778_v61 = vmul.f32 1.442695, %v19485_v16  ;;  %v12786_v20 = vmul.f32 1.442695, %v19486_v3  ;;  %v12798_v16 = vpop.eup %8105  ;;  %8121 = vpow2.f32 %v4571_v46  ;;  %v19489_v27 = vsub.f32 %v19415_v32, %v12458_v6 }
 0x45b   : > { %v12791_v35 = vmul.f32 1.442695, %v19487_v37  ;;  %v12796_v17 = vmul.f32 1.442695, %v19488_v44  ;;  %v19490_v30 = vsub.f32 %v19417_v56, %v12458_v6  ;;  %v12812_v37 = vpop.eup %8107  ;;  %v5477_v42 = vadd.f32 %v12641_v24, %v5476_v62  ;;  %v19497_v62 = vld [vmem:[#allocation196_spill] sm:$0xff]  ;;  %v19500_v24 = vld [vmem:[#allocation202_spill] sm:$0xff] }
 0x45c   : > { %v12803_v25 = vmul.f32 1.442695, %v19489_v27  ;;  %8123 = vpow2.f32 %v4575_v60  ;;  %v19491_v46 = vsub.f32 %v19419_v47, %v12458_v6  ;;  %v5498_v32 = vadd.f32 %v12798_v16, %v12780_v33  ;;  %v12822_v27 = vpop.eup %8109 }
 0x45d   : > { %v12808_v3 = vmul.f32 1.442695, %v19490_v30  ;;  %v19492_v56 = vsub.f32 %v19420_v45, %v12458_v6  ;;  %v3596_v12 = vmax.f32 %v19495_v14, %v19494_v43  ;;  %v19496_v60 = vunpack.i.l.bf16 %v19332_v26  ;;  %v12839_v48 = vpop.eup %8111  ;;  %v19503_v45 = vld [vmem:[#allocation224_spill] sm:$0xff] }
 0x45e   : > { %v12818_v44 = vmul.f32 1.442695, %v19491_v46  ;;  %v19498_v58 = vunpack.i.l.bf16 %v19497_v62  ;;  %v19499_v46 = vld [vmem:[#allocation45_spill] sm:$0xff]  ;;  %v19502_v5 = vmax.f32 %v19500_v24, %v19501_v63  ;;  %v5478_v7 = vadd.f32 %v12652_v0, %v5477_v42  ;;  %v12849_v62 = vpop.eup %8113  ;;  %v19513_v24 = vld [vmem:[#allocation216_spill] sm:$0xff] }
 0x45f   : > { %v12827_v30 = vmul.f32 1.442695, %v19492_v56  ;;  %v19504_v56 = vsub.f32 %v19503_v45, %v12458_v6  ;;  %v5499_v14 = vadd.f32 %v12822_v27, %v5498_v32  ;;  %v7646_v26 = vunpack.i.h.bf16 %v12721_v22  ;;  %v12857_v42 = vpop.eup %8115 }
 0x460   : > { %v1154_v47 = vpack.c.bf16 %v19498_v58, %v19496_v60  ;;  %v3482_v9 = vmax.f32 %v19502_v5, %v19499_v46  ;;  %8125 = vpow2.f32 %v4579_v2  ;;  %v19506_v58 = vsub.f32 %v19423_v41, %v12458_v6  ;;  %v12862_v46 = vpop.eup %8117  ;;  %v19509_v2 = vld [vmem:[#allocation137_spill] sm:$0xff] }
 0x461   : > { %19493 = vst [vmem:[#allocation91_spill] sm:$0xff] %v12827_v30  ;;  %v12845_v15 = vmul.f32 1.442695, %v19504_v56  ;;  %v5479_v60 = vadd.f32 %v12667_v11, %v5478_v7  ;;  %8127 = vpow2.f32 %v4583_v38  ;;  %v5500_v45 = vadd.f32 %v12849_v62, %v5499_v14  ;;  %v19517_v7 = vld [vmem:[#allocation180_spill] sm:$0xff]  ;;  %v19518_v38 = vld [vmem:[#allocation205_spill] sm:$0xff] }
 0x462   : > { %v12854_v5 = vmul.f32 1.442695, %v19506_v58  ;;  %6919 = vmatmul.mubr.msk.bf16.gmra.mrb[240].mxu1 %vm1207_vm2, %v1154_v47  ;;  %v1173_v32 = vpack.c.bf16 %v7646_v26, %v7641_v10  ;;  %v19508_v56 = vmov 0   ;;  %v19510_v63 = vsub.f32 %v19509_v2, %v12458_v6  ;;  %v19512_v58 = vld [vmem:[#allocation60_spill] sm:$0xff]  ;;  %v19514_v47 = vld [vmem:[#allocation23_spill] sm:$0xff]  ;;  %v19520_v10 = vld [vmem:[#allocation186_spill] sm:$0xff] }
 0x463   : > { %19505 = vst [vmem:[#allocation222_spill] sm:$0xff] %v12845_v15  ;;  %2897 = vmatprep.mubr.bf16.mxu1 %v19508_v56  ;;  %v19515_v43 = vmax.f32 %v19513_v24, %v19514_v47  ;;  %v19519_v11 = vmax.f32 %v19517_v7, %v19518_v38  ;;  %v3597_v26 = vmax.f32 %v3596_v12, %v19520_v10  ;;  %v12878_v15 = vpop.trf.xlu1  ;;  %v19521_v30 = vld [vmem:[#allocation145_spill] sm:$0xff]  ;;  %v19523_v24 = vld [vmem:[#allocation94_spill] sm:$0xff]  ;;  %v12893_v12 = vpop.eup %8119  ;;  %8129 = vpow2.f32 %v4587_v36  ;;  %v19527_v38 = vld [vmem:[#allocation244_spill] sm:$0xff] }
 0x464   : > { %19507 = vst [vmem:[#allocation30_spill] sm:$0xff] %v12854_v5  ;;  %v12867_v41 = vmul.f32 1.442695, %v19510_v63  ;;  %v19516_v5 = vld [vmem:[#allocation89_spill] sm:$0xff]  ;;  %v5480_v53 = vadd.f32 %v12674_v19, %v5479_v60  ;;  %v19522_v63 = vsub.f32 %v19521_v30, %v12458_v6  ;;  %6939 = vmatmul.mubr.msk.bf16.gmra.mrb[36].mxu0 %vm1207_vm2, %v1173_v32  ;;  %8131 = vpow2.f32 %v12743_v1 }
 0x465   : > { %v3560_v0 = vmax.f32 %v19515_v43, %v19512_v58  ;;  %v3519_v14 = vmax.f32 %v19519_v11, %v19516_v5  ;;  %v3483_v43 = vmax.f32 %v3482_v9, %v19523_v24  ;;  %v12889_v58 = vpop.f32.mrb[180].mxu1  ;;  %v12891_v11 = vpop.f32.mrb[228].mxu0  ;;  %v19526_v5 = vld [vmem:[#allocation71_spill] sm:$0xff]  ;;  %v19528_v30 = vld [vmem:[#allocation101_spill] sm:$0xff]  ;;  %3174 = vmatprep.mubr.bf16.mxu0 %v19508_v56  ;;  %8133 = vpow2.f32 %v12751_v18 }
 0x466   : > { %19511 = vst [vmem:[#allocation209_spill] sm:$0xff] %v12867_v41  ;;  %v12884_v2 = vmul.f32 1.442695, %v19522_v63  ;;  %v5501_v41 = vadd.f32 %v12862_v46, %v5500_v45  ;;  %19524 = vst [vmem:[#allocation148_spill] sm:$0xff] %v12889_v58  ;;  %v3598_v63 = vmax.f32 %v3597_v26, %v19528_v30  ;;  %v12899_v45 = vpop.f32.mrb[181].mxu1  ;;  %v12901_v9 = vpop.f32.mrb[229].mxu0  ;;  %v5481_v32 = vadd.f32 %v12685_v8, %v5480_v53 }
 0x467   : > { %19525 = vst [vmem:[#allocation213_spill] sm:$0xff] %v12891_v11  ;;  %v3561_v60 = vmax.f32 %v3560_v0, %v19526_v5  ;;  %v3520_v7 = vmax.f32 %v3519_v14, %v19527_v38  ;;  %19529 = vst [vmem:[#allocation217_spill] sm:$0xff] %v12899_v45  ;;  %v19531_v24 = vld [vmem:[#allocation73_spill] sm:$0xff]  ;;  %v12911_v14 = vpop.f32.mrb[182].mxu1  ;;  %v12913_v26 = vpop.f32.mrb[230].mxu0  ;;  %v7651_v30 = vunpack.i.h.bf16 %v12810_v23  ;;  %8135 = vpow2.f32 %v12756_v50  ;;  %v19540_v18 = vld [vmem:[#allocation111_spill] sm:$0xff] }
 0x468   : > { %19530 = vst [vmem:[#allocation173_spill] sm:$0xff] %v12901_v9  ;;  %v19532_v10 = vsub.f32 %v19531_v24, %v12458_v6  ;;  %v5502_v0 = vadd.f32 %v12893_v12, %v5501_v41  ;;  %19533 = vst [vmem:[#allocation49_spill] sm:$0xff] %v12911_v14  ;;  %v12915_v38 = vpop.eup %8121  ;;  %v12919_v53 = vpop.f32.mrb[183].mxu1  ;;  %v19537_v24 = vld [vmem:[#allocation167_spill] sm:$0xff]  ;;  %8137 = vpow2.f32 %v12761_v49  ;;  %v3484_v9 = vmax.f32 %v3483_v43, %v19540_v18  ;;  %v19541_v49 = vld [vmem:[#allocation117_spill] sm:$0xff] }
 0x469   : > { %19534 = vst [vmem:[#allocation256_spill] sm:$0xff] %v12913_v26  ;;  %19535 = vst [vmem:[#allocation196_spill] sm:$0xff] %v12919_v53  ;;  %v12921_v1 = vpop.f32.mrb[231].mxu0  ;;  %v12923_v5 = vpop.eup %8123  ;;  %v19538_v47 = vunpack.i.l.bf16 %v19537_v24  ;;  %v19539_v26 = vunpack.i.l.bf16 %v19432_v55  ;;  %v7656_v53 = vunpack.i.h.bf16 %v12878_v15  ;;  %8139 = vpow2.f32 %v12768_v13 }
 0x46a   : > { %v12908_v36 = vmul.f32 1.442695, %v19532_v10  ;;  %19536 = vst [vmem:[#allocation224_spill] sm:$0xff] %v12921_v1  ;;  %v5482_v10 = vadd.f32 %v12696_v57, %v5481_v32  ;;  %v5503_v41 = vadd.f32 %v12915_v38, %v5502_v0  ;;  %v12939_v50 = vpop.eup %8125  ;;  %8141 = vpow2.f32 %v12773_v29 }
 0x46b   : > { %v1155_v14 = vpack.c.bf16 %v19539_v26, %v19538_v47  ;;  %v7638_v55 = vunpack.i.l.bf16 %v12426_v52  ;;  %v1174_v47 = vpack.c.bf16 %v7656_v53, %v7651_v30  ;;  %v3562_v0 = vmax.f32 %v3561_v60, %v19541_v49  ;;  %v12945_v43 = vpop.eup %8127  ;;  %v19543_v52 = vld [vmem:[#allocation128_spill] sm:$0xff]  ;;  %v19544_v53 = vld [vmem:[#allocation138_spill] sm:$0xff]  ;;  %v19561_v49 = vld [vmem:[#allocation193_spill] sm:$0xff] }
 0x46c   : > { %v5483_v1 = vadd.f32 %v12703_v59, %v5482_v10  ;;  %v5504_v32 = vadd.f32 %v12923_v5, %v5503_v41  ;;  %8143 = vpow2.f32 %v12778_v61  ;;  %v7643_v29 = vunpack.i.l.bf16 %v12721_v22  ;;  %v12965_v22 = vpop.f32.mrb[232].mxu0 }
 0x46d   : > { %6920 = vmatmul.mubr.msk.bf16.gmra.mrb[244].mxu1 %vm1207_vm2, %v1155_v14  ;;  %v19542_v14 = vld [vmem:[#allocation124_spill] sm:$0xff]  ;;  %8145 = vpow2.f32 %v12786_v20  ;;  %v3599_v30 = vmax.f32 %v3598_v63, %v19543_v52  ;;  %v3485_v60 = vmax.f32 %v3484_v9, %v19544_v53  ;;  %6940 = vmatmul.mubr.msk.bf16.gmra.mrb[40].mxu0 %vm1207_vm2, %v1174_v47  ;;  %v12963_v20 = vpop.f32.mrb[184].mxu1  ;;  %19549 = vst [vmem:[#allocation216_spill] sm:$0xff] %v12965_v22  ;;  %v12967_v63 = vpop.eup %8129  ;;  %v19550_v9 = vld [vmem:[#allocation165_spill] sm:$0xff]  ;;  %v19560_v52 = vld [vmem:[#allocation67_spill] sm:$0xff] }
 0x46e   : > { %2907 = vmatprep.mubr.bf16.mxu1 %v19508_v56  ;;  %v5484_v26 = vadd.f32 %v12710_v40, %v5483_v1  ;;  %v5505_v13 = vadd.f32 %v12939_v50, %v5504_v32  ;;  %v3521_v10 = vmax.f32 %v3520_v7, %v19542_v14  ;;  %8147 = vpow2.f32 %v12791_v35  ;;  %v19545_v1 = vld [vmem:[#allocation142_spill] sm:$0xff]  ;;  %19548 = vst [vmem:[#allocation137_spill] sm:$0xff] %v12963_v20  ;;  %v12976_v53 = vpop.f32.mrb[185].mxu1 }
 0x46f   : > { %v3563_v24 = vmax.f32 %v3562_v0, %v19545_v1  ;;  %v19546_v32 = vld [vmem:[#allocation10_spill] sm:$0xff]  ;;  %8149 = vpow2.f32 %v12796_v17  ;;  %v19553_v0 = vunpack.i.l.bf16 %v19469_v28  ;;  %19554 = vst [vmem:[#allocation145_spill] sm:$0xff] %v12976_v53 }
 0x470   : > { %v5485_v41 = vadd.f32 %v12723_v54, %v5484_v26  ;;  %v5506_v61 = vadd.f32 %v12945_v43, %v5505_v13  ;;  %v19547_v7 = vpack.c.bf16 %v19546_v32, %v19546_v32  ;;  %v3522_v47 = vmax.f32 %v3521_v10, %v19550_v9  ;;  %v19551_v26 = vld [vmem:[#allocation172_spill] sm:$0xff]  ;;  %v12978_v32 = vpop.f32.mrb[233].mxu0  ;;  %v19556_v10 = vld [vmem:[#allocation39_spill] sm:$0xff] }
 0x471   : > { %v3600_v35 = vmax.f32 %v3599_v30, %v19551_v26  ;;  %v19552_v13 = vunpack.i.l.bf16 %v19468_v34  ;;  %19555 = vst [vmem:[#allocation73_spill] sm:$0xff] %v12978_v32  ;;  %8151 = vpow2.f32 %v12803_v25  ;;  %v3486_v9 = vmax.f32 %v3485_v60, %v19556_v10  ;;  %v12986_v30 = vpop.f32.mrb[186].mxu1  ;;  %v12988_v34 = vpop.f32.mrb[234].mxu0 }
 0x472   : > { %6275 = vmatprep.mubr.bf16.mxu0 %v19547_v7  ;;  %v12980_v7 = vpop.eup %8131  ;;  %v5486_v18 = vadd.f32 %v12732_v31, %v5485_v41  ;;  %v5507_v17 = vadd.f32 %v12967_v63, %v5506_v61  ;;  %19557 = vst [vmem:[#allocation167_spill] sm:$0xff] %v12986_v30  ;;  %19558 = vst [vmem:[#allocation10_spill] sm:$0xff] %v12988_v34  ;;  %v3523_v1 = vmax.f32 %v3522_v47, %v19560_v52  ;;  %v19562_v61 = vld [vmem:[#allocation241_spill] sm:$0xff]  ;;  %v19567_v30 = vld [vmem:[#allocation299_spill] sm:$0xff] }
 0x473   : > { %v1156_v14 = vpack.c.bf16 %v19553_v0, %v19552_v13  ;;  %v12990_v28 = vpop.eup %8133  ;;  %v19559_v0 = vld [vmem:[#allocation57_spill] sm:$0xff]  ;;  %v3601_v41 = vmax.f32 %v3600_v35, %v19561_v49  ;;  %v3487_v10 = vmax.f32 %v3486_v9, %v19562_v61  ;;  %v5970_v34 = vpack.c.bf16 %v12798_v16, %v12780_v33 }
 0x474   : > { %v3564_v26 = vmax.f32 %v3563_v24, %v19559_v0  ;;  %v12996_v32 = vpop.eup %8135  ;;  %v5487_v25 = vadd.f32 %v12745_v51, %v5486_v18  ;;  %v5508_v60 = vadd.f32 %v12980_v7, %v5507_v17  ;;  %v19563_v24 = vld [vmem:[#allocation52_spill] sm:$0xff]  ;;  %v19564_v47 = vld [vmem:[#allocation109_spill] sm:$0xff]  ;;  %v1157_v33 = vpack.c.bf16 %v7643_v29, %v7638_v55 }
 0x475   : > { %6921 = vmatmul.mubr.msk.bf16.gmra.mrb[248].mxu1 %vm1207_vm2, %v1156_v14  ;;  %v13004_v13 = vpop.eup %8137  ;;  %v3524_v52 = vmax.f32 %v3523_v1, %v19564_v47  ;;  %v19565_v35 = vld [vmem:[#allocation157_spill] sm:$0xff]  ;;  %v19566_v18 = vld [vmem:[#allocation296_spill] sm:$0xff]  ;;  %6243 = vmatprep.subr.bf16.mxu0 %v5970_v34  ;;  %v5972_v16 = vpack.c.bf16 %v12849_v62, %v12822_v27  ;;  %v19568_v1 = vld [vmem:[#allocation114_spill] sm:$0xff]  ;;  %v5974_v29 = vpack.c.bf16 %v12893_v12, %v12862_v46  ;;  %8153 = vpow2.f32 %v12808_v3 }
 0x476   : > { %v3565_v0 = vmax.f32 %v3564_v26, %v19563_v24  ;;  %v3602_v49 = vmax.f32 %v3601_v41, %v19565_v35  ;;  %2917 = vmatprep.mubr.bf16.mxu1 %v19508_v56  ;;  %v5969_v17 = vpack.c.bf16 %v19567_v30, %v19566_v18  ;;  %v13012_v53 = vpop.eup %8139  ;;  %v5488_v14 = vadd.f32 %v12763_v39, %v5487_v25  ;;  %v19569_v47 = vld [vmem:[#allocation194_spill] sm:$0xff]  ;;  %v19570_v35 = vld [vmem:[#allocation129_spill] sm:$0xff]  ;;  %v19572_v24 = vld [vmem:[#allocation115_spill] sm:$0xff] }
 0x477   : > { %v5509_v9 = vadd.f32 %v12990_v28, %v5508_v60  ;;  %v13018_v26 = vpop.eup %8141  ;;  %v3488_v41 = vmax.f32 %v3487_v10, %v19568_v1  ;;  %v19571_v30 = vld [vmem:[#allocation34_spill] sm:$0xff]  ;;  %v3525_v22 = vmax.f32 %v3524_v52, %v19572_v24  ;;  %v19573_v27 = vld [vmem:[#allocation119_spill] sm:$0xff]  ;;  %v5976_v46 = vpack.c.bf16 %v12923_v5, %v12915_v38  ;;  %v19586_v38 = vld [vmem:[#allocation48_spill] sm:$0xff] }
 0x478   : > { %6244 = vmatpush1.bf16.msra.mxu0 %v5969_v17  ;;  %v3566_v61 = vmax.f32 %v3565_v0, %v19569_v47  ;;  %v5971_v18 = vpack.c.bf16 %v19571_v30, %v19570_v35  ;;  %v13025_v25 = vpop.eup %8143  ;;  %v5489_v34 = vadd.f32 %v12812_v37, %v5488_v14  ;;  %v3603_v62 = vmax.f32 %v3602_v49, %v19573_v27  ;;  %v19574_v0 = vld [vmem:[#allocation126_spill] sm:$0xff]  ;;  %v19577_v24 = vld [vmem:[#allocation143_spill] sm:$0xff] }
 0x479   : > { %v5510_v55 = vadd.f32 %v12996_v32, %v5509_v9  ;;  %6245 = vmatprep.subr.bf16.mxu0 %v5972_v16  ;;  %v13032_v10 = vpop.eup %8145  ;;  %v3489_v60 = vmax.f32 %v3488_v41, %v19574_v0  ;;  %v19575_v17 = vld [vmem:[#allocation130_spill] sm:$0xff]  ;;  %v19578_v1 = vld [vmem:[#allocation147_spill] sm:$0xff]  ;;  %v19579_v16 = vld [vmem:[#allocation37_spill] sm:$0xff]  ;;  %8155 = vpow2.f32 %v12818_v44 }
 0x47a   : > { %v3567_v35 = vmax.f32 %v3566_v61, %v19575_v17  ;;  %v19576_v30 = vld [vmem:[#allocation134_spill] sm:$0xff]  ;;  %v5973_v47 = vpack.c.bf16 %v19578_v1, %v19577_v24  ;;  %v13039_v14 = vpop.eup %8147  ;;  %v5490_v9 = vadd.f32 %v12839_v48, %v5489_v34  ;;  %v3604_v27 = vmax.f32 %v3603_v62, %v19579_v16  ;;  %v19580_v61 = vld [vmem:[#allocation105_spill] sm:$0xff]  ;;  %v19583_v24 = vld [vmem:[#allocation155_spill] sm:$0xff] }
 0x47b   : > { %v3526_v52 = vmax.f32 %v3525_v22, %v19576_v30  ;;  %v5511_v49 = vadd.f32 %v13004_v13, %v5510_v55  ;;  %v13046_v12 = vpop.eup %8149  ;;  %v3490_v41 = vmax.f32 %v3489_v60, %v19580_v61  ;;  %v19581_v22 = vld [vmem:[#allocation156_spill] sm:$0xff]  ;;  %v19582_v0 = vld [vmem:[#allocation150_spill] sm:$0xff]  ;;  %v19584_v17 = vld [vmem:[#allocation169_spill] sm:$0xff]  ;;  %v5978_v62 = vpack.c.bf16 %v12945_v43, %v12939_v50 }
 0x47c   : > { %6246 = vmatpush1.bf16.msra.mxu0 %v5971_v18  ;;  %v3568_v30 = vmax.f32 %v3567_v35, %v19581_v22  ;;  %v5975_v1 = vpack.c.bf16 %v19583_v24, %v19582_v0  ;;  %v13053_v34 = vpop.eup %8151  ;;  %v13056_v55 = vadd.f32 %v12857_v42, %v5490_v9  ;;  %v3605_v18 = vmax.f32 %v3604_v27, %v19586_v38  ;;  %v19587_v0 = vld [vmem:[#allocation184_spill] sm:$0xff]  ;;  %v19589_v9 = vld [vmem:[#allocation250_spill] sm:$0xff]  ;;  %v19635_v16 = vld [vmem:[#allocation207_spill] sm:$0xff] }
 0x47d   : > { %v3527_v20 = vmax.f32 %v3526_v52, %v19584_v17  ;;  %v5512_v5 = vadd.f32 %v13012_v53, %v5511_v49  ;;  %6922 = vmatmul.mubr.msk.bf16.gmra.mrb[252].mxu1 %vm1207_vm2, %v1157_v33  ;;  %6247 = vmatprep.subr.bf16.mxu0 %v5974_v29  ;;  %v3491_v60 = vmax.f32 %v3490_v41, %v19587_v0  ;;  %v19588_v35 = vld [vmem:[#allocation188_spill] sm:$0xff]  ;;  %v7653_v49 = vunpack.i.l.bf16 %v12878_v15  ;;  %v19590_v17 = vld [vmem:[#allocation251_spill] sm:$0xff]  ;;  %v19604_v61 = vld [vmem:[#allocation30_spill] sm:$0xff] }
 0x47e   : > { %19585 = vst [vmem:[#allocation296_spill] sm:$0xff] %v13056_v55  ;;  %2927 = vmatprep.mubr.bf16.mxu1 %v19508_v56  ;;  %v3569_v52 = vmax.f32 %v3568_v30, %v19588_v35  ;;  %v3606_v33 = vmax.f32 %v3605_v18, %v19590_v17  ;;  %v5977_v27 = vpack.c.bf16 %v12570_v4, %v12561_v21  ;;  %v19591_v29 = vld [vmem:[#allocation80_spill] sm:$0xff]  ;;  %v19595_v18 = vld [vmem:[#allocation135_spill] sm:$0xff]  ;;  %v19596_v21 = vld [vmem:[#allocation161_spill] sm:$0xff] }
 0x47f   : > { %v3528_v24 = vmax.f32 %v3527_v20, %v19589_v9  ;;  %v5513_v3 = vadd.f32 %v13018_v26, %v5512_v5  ;;  %v19592_v50 = vsub.f32 %v19591_v29, %v12458_v6  ;;  %v5980_v30 = vpack.c.bf16 %v12980_v7, %v12967_v63  ;;  %v19593_v20 = vld [vmem:[#allocation131_spill] sm:$0xff]  ;;  %v19597_v4 = vld [vmem:[#allocation168_spill] sm:$0xff]  ;;  %v19598_v9 = vld [vmem:[#allocation222_spill] sm:$0xff] }
 0x480   : > { %6248 = vmatpush1.bf16.msra.mxu0 %v5973_v47  ;;  %v3492_v41 = vmax.f32 %v3491_v60, %v19593_v20  ;;  %v19594_v5 = vld [vmem:[#allocation91_spill] sm:$0xff]  ;;  %v3570_v56 = vmax.f32 %v3569_v52, %v19595_v18  ;;  %v5979_v44 = vpack.c.bf16 %v19597_v4, %v19596_v21  ;;  %v19599_v29 = vld [vmem:[#allocation64_spill] sm:$0xff]  ;;  %v19600_v47 = vld [vmem:[#allocation81_spill] sm:$0xff]  ;;  %v5982_v63 = vpack.c.bf16 %v12996_v32, %v12990_v28 }
 0x481   : > { %v4667_v43 = vmul.f32 1.442695, %v19592_v50  ;;  %8157 = vpow2.f32 %v19594_v5  ;;  %v5514_v15 = vadd.f32 %v13025_v25, %v5513_v3  ;;  %6249 = vmatprep.subr.bf16.mxu0 %v5976_v46  ;;  %v3529_v50 = vmax.f32 %v3528_v24, %v19599_v29  ;;  %v19602_v46 = vld [vmem:[#allocation152_spill] sm:$0xff]  ;;  %v19603_v52 = vld [vmem:[#allocation158_spill] sm:$0xff]  ;;  %v19606_v24 = vld [vmem:[#allocation171_spill] sm:$0xff] }
 0x482   : > { %8159 = vpow2.f32 %v19598_v9  ;;  %v3607_v0 = vmax.f32 %v3606_v33, %v19600_v47  ;;  %v19601_v60 = vunpack.i.l.bf16 %v12810_v23  ;;  %v3493_v5 = vmax.f32 %v3492_v41, %v19602_v46  ;;  %v19605_v9 = vld [vmem:[#allocation164_spill] sm:$0xff]  ;;  %v19607_v33 = vld [vmem:[#allocation175_spill] sm:$0xff]  ;;  %v19608_v29 = vld [vmem:[#allocation29_spill] sm:$0xff] }
 0x483   : > { %v5515_v7 = vadd.f32 %v13032_v10, %v5514_v15  ;;  %v3571_v20 = vmax.f32 %v3570_v56, %v19603_v52  ;;  %8161 = vpow2.f32 %v19604_v61  ;;  %v3530_v21 = vmax.f32 %v3529_v50, %v19605_v9  ;;  %v19609_v32 = vld [vmem:[#allocation209_spill] sm:$0xff]  ;;  %v19612_v61 = vld [vmem:[#allocation6_spill] sm:$0xff]  ;;  %v19615_v50 = vld [vmem:[#allocation36_spill] sm:$0xff] }
 0x484   : > { %v1158_v3 = vpack.c.bf16 %v7653_v49, %v19601_v60  ;;  %6250 = vmatpush1.bf16.msra.mxu0 %v5975_v1  ;;  %v3608_v4 = vmax.f32 %v3607_v0, %v19606_v24  ;;  %8163 = vpow2.f32 %v19609_v32  ;;  %v19610_v28 = vld [vmem:[#allocation189_spill] sm:$0xff]  ;;  %v19613_v1 = vpack.c.bf16 %v19612_v61, %v19612_v61  ;;  %v19616_v32 = vld [vmem:[#allocation42_spill] sm:$0xff]  ;;  %v19624_v9 = vld [vmem:[#allocation192_spill] sm:$0xff] }
 0x485   : > { %v19611_v23 = vsub.f32 %v19610_v28, %v12458_v6  ;;  %v5516_v41 = vadd.f32 %v13039_v14, %v5515_v7  ;;  %6251 = vmatprep.subr.bf16.mxu0 %v5978_v62  ;;  %v19614_v0 = vld [vmem:[#allocation25_spill] sm:$0xff]  ;;  %v3572_v60 = vmax.f32 %v3571_v20, %v19615_v50  ;;  %v19618_v28 = vld [vmem:[#allocation54_spill] sm:$0xff]  ;;  %v13116_v7 = vpop.f32.mrb[187].mxu1  ;;  %v13120_v62 = vpop.eup %8153  ;;  %8165 = vpow2.f32 %v12884_v2 }
 0x486   : > { %6923 = vmatmul.mubr.msk.bf16.gmra.mrb[0].mxu1 %vm1207_vm2, %v1158_v3  ;;  %v3494_v15 = vmax.f32 %v3493_v5, %v19614_v0  ;;  %v19617_v47 = vld [vmem:[#allocation61_spill] sm:$0xff]  ;;  %19619 = vst [vmem:[#allocation299_spill] sm:$0xff] %v13116_v7  ;;  %v13118_v3 = vpop.f32.mrb[235].mxu0  ;;  %8167 = vpow2.f32 %v12908_v36  ;;  %v19622_v5 = vld [vmem:[#allocation176_spill] sm:$0xff]  ;;  %v13135_v17 = vpop.eup %8155 }
 0x487   : > { %v4671_v49 = vmul.f32 1.442695, %v19611_v23  ;;  %6193 = vmatprep.mubr.bf16.mxu1 %v19613_v1  ;;  %v3531_v23 = vmax.f32 %v3530_v21, %v19618_v28  ;;  %19620 = vst [vmem:[#allocation129_spill] sm:$0xff] %v13118_v3  ;;  %v5517_v61 = vadd.f32 %v13046_v12, %v5516_v41  ;;  %v19621_v1 = vld [vmem:[#allocation70_spill] sm:$0xff]  ;;  %v19623_v6 = vld [vmem:[#allocation185_spill] sm:$0xff]  ;;  %8169 = vpow2.f32 %v4667_v43 }
 0x488   : > { %v3609_v56 = vmax.f32 %v3608_v4, %v19621_v1  ;;  %6252 = vmatpush1.bf16.msra.mxu0 %v5977_v27  ;;  %v3495_v21 = vmax.f32 %v3494_v15, %v19622_v5  ;;  %v3573_v28 = vmax.f32 %v3572_v60, %v19623_v6  ;;  %v19625_v2 = vld [vmem:[#allocation197_spill] sm:$0xff]  ;;  %v19627_v4 = vld [vmem:[#allocation74_spill] sm:$0xff]  ;;  %v19633_v1 = vld [vmem:[#allocation59_spill] sm:$0xff] }
 0x489   : > { %v3532_v0 = vmax.f32 %v3531_v23, %v19624_v9  ;;  %v5518_v46 = vadd.f32 %v13053_v34, %v5517_v61  ;;  %6253 = vmatprep.subr.bf16.mxu0 %v5980_v30  ;;  %v19626_v24 = vld [vmem:[#allocation77_spill] sm:$0xff]  ;;  %8171 = vpow2.f32 %v4671_v49  ;;  %v19629_v60 = vld [vmem:[#allocation206_spill] sm:$0xff]  ;;  %v19631_v61 = vld [vmem:[#allocation212_spill] sm:$0xff] }
 0x48a   : > { %v3610_v41 = vmax.f32 %v3609_v56, %v19625_v2  ;;  %v19628_v27 = vld [vmem:[#allocation33_spill] sm:$0xff]  ;;  %v3574_v20 = vmax.f32 %v3573_v28, %v19629_v60  ;;  %v19630_v30 = vld [vmem:[#allocation102_spill] sm:$0xff]  ;;  %v19634_v49 = vld [vmem:[#allocation28_spill] sm:$0xff] }
 0x48b   : > { %v3496_v15 = vmax.f32 %v3495_v21, %v19628_v27  ;;  %v13141_v23 = vpop.eup %8157  ;;  %v5519_v43 = vadd.f32 %v13120_v62, %v5518_v46  ;;  %v19632_v9 = vld [vmem:[#allocation41_spill] sm:$0xff]  ;;  %v5937_v36 = vpack.c.bf16 %v19635_v16, %v19634_v49  ;;  %v19636_v21 = vld [vmem:[#allocation88_spill] sm:$0xff]  ;;  %v19638_v60 = vld [vmem:[#allocation26_spill] sm:$0xff] }
 0x48c   : > { %v3533_v5 = vmax.f32 %v3532_v0, %v19632_v9  ;;  %v3611_v2 = vmax.f32 %v3610_v41, %v19633_v1  ;;  %v13148_v38 = vpop.eup %8159  ;;  %6254 = vmatpush1.bf16.msra.mxu0 %v5979_v44  ;;  %v19637_v55 = vld [vmem:[#allocation221_spill] sm:$0xff]  ;;  %8173 = vpow2.f32 %v19638_v60  ;;  %v19642_v1 = vld [vmem:[#allocation136_spill] sm:$0xff]  ;;  %v19643_v16 = vld [vmem:[#allocation231_spill] sm:$0xff] }
 0x48d   : > { %v3497_v27 = vmax.f32 %v3496_v15, %v19636_v21  ;;  %v3575_v46 = vmax.f32 %v3574_v20, %v19637_v55  ;;  %v5520_v56 = vadd.f32 %v13135_v17, %v5519_v43  ;;  %v19639_v0 = vld [vmem:[#allocation5_spill] sm:$0xff]  ;;  %6255 = vmatprep.subr.bf16.mxu0 %v5982_v63  ;;  %v13164_v49 = vpop.eup %8161  ;;  %v19644_v28 = vld [vmem:[#allocation35_spill] sm:$0xff]  ;;  %v19645_v15 = vld [vmem:[#allocation170_spill] sm:$0xff] }
 0x48e   : > { %v19640_v41 = vpack.c.bf16 %v19639_v0, %v19639_v0  ;;  %v19641_v9 = vld [vmem:[#allocation245_spill] sm:$0xff]  ;;  %v3534_v44 = vmax.f32 %v3533_v5, %v19643_v16  ;;  %8175 = vpow2.f32 %v19644_v28  ;;  %v19647_v60 = vld [vmem:[#allocation8_spill] sm:$0xff]  ;;  %v13175_v63 = vpop.eup %8163  ;;  %v19650_v5 = vld [vmem:[#allocation214_spill] sm:$0xff] }
 0x48f   : > { %v5940_v6 = vpack.c.bf16 %v19642_v1, %v19641_v9  ;;  %v19646_v20 = vld [vmem:[#allocation125_spill] sm:$0xff]  ;;  %v19648_v43 = vpack.c.bf16 %v19647_v60, %v19647_v60  ;;  %v5521_v1 = vadd.f32 %v13141_v23, %v5520_v56  ;;  %v19651_v28 = vld [vmem:[#allocation68_spill] sm:$0xff]  ;;  %v19653_v60 = vpack.c.bf16 %v19608_v29, %v19607_v33  ;;  %v13191_v50 = vpop.eup %8165  ;;  %v19669_v33 = vld [vmem:[#allocation199_spill] sm:$0xff] }
 0x490   : > { %6194 = vmatmul.mubr.bf16.vlgmr.msra.gmra.mrb[4].mxu1 %v19640_v41  ;;  %v5592_v21 = vadd.f32 %v19646_v20, %v19645_v15  ;;  %v19649_v0 = vld [vmem:[#allocation69_spill] sm:$0xff]  ;;  %v5939_v16 = vpack.c.bf16 %v19651_v28, %v19650_v5  ;;  %v19652_v15 = vld [vmem:[#allocation51_spill] sm:$0xff]  ;;  %v19657_v28 = vld [vmem:[#allocation38_spill] sm:$0xff]  ;;  %v19659_v29 = vpack.c.bf16 %v13012_v53, %v13004_v13  ;;  %v13202_v9 = vpop.eup %8167 }
 0x491   : > { %6203 = vmatpush1.bf16.msra.mxu1 %v5937_v36  ;;  %6234 = vmatprep.mubr.bf16.mxu1 %v19648_v43  ;;  %v3612_v41 = vmax.f32 %v3611_v2, %v19649_v0  ;;  %v3498_v20 = vmax.f32 %v3497_v27, %v19652_v15  ;;  %v19654_v2 = vld [vmem:[#allocation265_spill] sm:$0xff]  ;;  %v19655_v0 = vld [vmem:[#allocation108_spill] sm:$0xff]  ;;  %v5522_v5 = vadd.f32 %v13148_v38, %v5521_v1  ;;  %v19658_v36 = vld [vmem:[#allocation47_spill] sm:$0xff] }
 0x492   : > { %6204 = vmatprep.subr.bf16.mxu1 %v5940_v6  ;;  %6256 = vmatpush1.bf16.msra.mxu0 %v19653_v60  ;;  %v3576_v43 = vmax.f32 %v3575_v46, %v19654_v2  ;;  %v3535_v56 = vmax.f32 %v3534_v44, %v19655_v0  ;;  %v19656_v6 = vld [vmem:[#allocation267_spill] sm:$0xff]  ;;  %v5942_v27 = vpack.c.bf16 %v19658_v36, %v19657_v28  ;;  %v19660_v46 = vld [vmem:[#allocation268_spill] sm:$0xff]  ;;  %v19661_v44 = vld [vmem:[#allocation133_spill] sm:$0xff]  ;;  %v13208_v28 = vpop.eup %8169 }
 0x493   : > { %v3613_v55 = vmax.f32 %v3612_v41, %v19656_v6  ;;  %6257 = vmatprep.subr.bf16.mxu0 %v19659_v29  ;;  %v3499_v60 = vmax.f32 %v3498_v20, %v19660_v46  ;;  %v5593_v41 = vadd.f32 %v19661_v44, %v5592_v21  ;;  %v19662_v0 = vld [vmem:[#allocation269_spill] sm:$0xff]  ;;  %v19663_v1 = vld [vmem:[#allocation271_spill] sm:$0xff]  ;;  %v19664_v2 = vld [vmem:[#allocation272_spill] sm:$0xff]  ;;  %v5523_v13 = vadd.f32 %v13164_v49, %v5522_v5 }
 0x494   : > { %v3577_v15 = vmax.f32 %v3576_v43, %v19662_v0  ;;  %v3536_v6 = vmax.f32 %v3535_v56, %v19663_v1  ;;  %v19665_v53 = vld [vmem:[#allocation62_spill] sm:$0xff]  ;;  %v19666_v43 = vld [vmem:[#allocation220_spill] sm:$0xff]  ;;  %v19667_v29 = vld [vmem:[#allocation227_spill] sm:$0xff] }
 0x495   : > { %6205 = vmatpush1.bf16.msra.mxu1 %v5939_v16  ;;  %v3614_v36 = vmax.f32 %v3613_v55, %v19664_v2  ;;  %8177 = vpow2.f32 %v19665_v53  ;;  %v13216_v16 = vpop.eup %8171  ;;  %v5941_v56 = vpack.c.bf16 %v19667_v29, %v19666_v43  ;;  %v19668_v55 = vpack.c.bf16 %v19617_v47, %v19616_v32  ;;  %v19670_v1 = vld [vmem:[#allocation274_spill] sm:$0xff]  ;;  %v19675_v47 = vld [vmem:[#allocation163_spill] sm:$0xff] }
 0x496   : > { %6206 = vmatprep.subr.bf16.mxu1 %v5942_v27  ;;  %v3500_v53 = vmax.f32 %v3499_v60, %v19669_v33  ;;  %v3578_v5 = vmax.f32 %v3577_v15, %v19670_v1  ;;  %v5524_v20 = vadd.f32 %v13175_v63, %v5523_v13  ;;  %v19671_v46 = vld [vmem:[#allocation210_spill] sm:$0xff]  ;;  %v19673_v2 = vpack.c.bf16 %v13025_v25, %v13018_v26  ;;  %v19677_v27 = vld [vmem:[#allocation203_spill] sm:$0xff]  ;;  %v19678_v13 = vld [vmem:[#allocation280_spill] sm:$0xff]  ;;  %v13240_v0 = vpop.eup %8173 }
 0x497   : > { %6258 = vmatpush1.bf16.msra.mxu0 %v19668_v55  ;;  %v19672_v21 = vld [vmem:[#allocation50_spill] sm:$0xff]  ;;  %v3615_v32 = vmax.f32 %v3614_v36, %v19675_v47  ;;  %v19676_v55 = vld [vmem:[#allocation139_spill] sm:$0xff]  ;;  %19679 = vst [vmem:[#allocation34_spill] sm:$0xff] %v13240_v0 }
 0x498   : > { %v5944_v44 = vpack.c.bf16 %v19672_v21, %v19671_v46  ;;  %6259 = vmatprep.subr.bf16.mxu0 %v19673_v2  ;;  %v19674_v43 = vld [vmem:[#allocation90_spill] sm:$0xff]  ;;  %v5594_v60 = vadd.f32 %v19676_v55, %v5593_v41  ;;  %v3501_v33 = vmax.f32 %v3500_v53, %v19677_v27  ;;  %v3579_v1 = vmax.f32 %v3578_v5, %v19678_v13  ;;  %v19680_v26 = vld [vmem:[#allocation283_spill] sm:$0xff]  ;;  %v19681_v2 = vld [vmem:[#allocation284_spill] sm:$0xff]  ;;  %v13247_v36 = vpop.eup %8175 }
 0x499   : > { %v3537_v29 = vmax.f32 %v3536_v6, %v19674_v43  ;;  %6207 = vmatpush1.bf16.msra.mxu1 %v5941_v56  ;;  %v5525_v46 = vadd.f32 %v13191_v50, %v5524_v20  ;;  %v3616_v6 = vmax.f32 %v3615_v32, %v19681_v2  ;;  %19682 = vst [vmem:[#allocation143_spill] sm:$0xff] %v13247_v36  ;;  %v19683_v21 = vld [vmem:[#allocation229_spill] sm:$0xff]  ;;  %v19684_v56 = vld [vmem:[#allocation230_spill] sm:$0xff]  ;;  %v19685_v53 = vld [vmem:[#allocation116_spill] sm:$0xff] }
 0x49a   : > { %6208 = vmatprep.subr.bf16.mxu1 %v5944_v44  ;;  %v5943_v15 = vpack.c.bf16 %v19684_v56, %v19683_v21  ;;  %v19686_v43 = vld [vmem:[#allocation56_spill] sm:$0xff]  ;;  %v19687_v27 = vpack.c.bf16 %v19627_v4, %v19626_v24  ;;  %v19688_v20 = vld [vmem:[#allocation287_spill] sm:$0xff]  ;;  %v19689_v41 = vpack.c.bf16 %v13039_v14, %v13032_v10  ;;  %v19693_v4 = vld [vmem:[#allocation149_spill] sm:$0xff]  ;;  %v5595_v14 = vadd.f32 %v13240_v0, %v5594_v60 }
 0x49b   : > { %v3538_v25 = vmax.f32 %v3537_v29, %v19680_v26  ;;  %v5946_v5 = vpack.c.bf16 %v19686_v43, %v19685_v53  ;;  %v3502_v29 = vmax.f32 %v3501_v33, %v19688_v20  ;;  %v5526_v32 = vadd.f32 %v13202_v9, %v5525_v46  ;;  %v19690_v26 = vld [vmem:[#allocation288_spill] sm:$0xff]  ;;  %v19691_v56 = vld [vmem:[#allocation291_spill] sm:$0xff]  ;;  %v19698_v47 = vld [vmem:[#allocation294_spill] sm:$0xff] }
 0x49c   : > { %6260 = vmatpush1.bf16.msra.mxu0 %v19687_v27  ;;  %v3580_v21 = vmax.f32 %v3579_v1, %v19690_v26  ;;  %v19692_v24 = vld [vmem:[#allocation235_spill] sm:$0xff]  ;;  %v19694_v55 = vld [vmem:[#allocation100_spill] sm:$0xff]  ;;  %v19701_v26 = vld [vmem:[#allocation97_spill] sm:$0xff] }
 0x49d   : > { %6261 = vmatprep.subr.bf16.mxu0 %v19689_v41  ;;  %v3539_v53 = vmax.f32 %v3538_v25, %v19691_v56  ;;  %v5558_v27 = vadd.f32 %v19693_v4, %v19692_v24  ;;  %v19695_v44 = vld [vmem:[#allocation31_spill] sm:$0xff]  ;;  %6209 = vmatpush1.bf16.msra.mxu1 %v5943_v15  ;;  %v19697_v46 = vld [vmem:[#allocation292_spill] sm:$0xff]  ;;  %v3503_v10 = vmax.f32 %v3502_v29, %v19698_v47  ;;  %v19700_v25 = vld [vmem:[#allocation297_spill] sm:$0xff]  ;;  %8179 = vpow2.f32 %v19701_v26 }
 0x49e   : > { %v19696_v2 = vsub.f32 %v19694_v55, %v19695_v44  ;;  %v3617_v20 = vmax.f32 %v3616_v6, %v19697_v46  ;;  %v5527_v1 = vadd.f32 %v13208_v28, %v5526_v32  ;;  %6210 = vmatprep.subr.bf16.mxu1 %v5946_v5  ;;  %v19699_v41 = vld [vmem:[#allocation295_spill] sm:$0xff]  ;;  %v19702_v24 = vld [vmem:[#allocation233_spill] sm:$0xff]  ;;  %v19703_v4 = vld [vmem:[#allocation234_spill] sm:$0xff]  ;;  %v19704_v15 = vpack.c.bf16 %v19631_v61, %v19630_v30 }
 0x49f   : > { %v3581_v43 = vmax.f32 %v3580_v21, %v19699_v41  ;;  %v3540_v56 = vmax.f32 %v3539_v53, %v19700_v25  ;;  %v5945_v55 = vpack.c.bf16 %v19703_v4, %v19702_v24  ;;  %v3504_v60 = vmax.f32 %v3503_v10, %v12889_v58  ;;  %v13286_v29 = vpop.eup %8177  ;;  %v19707_v32 = vld [vmem:[#allocation72_spill] sm:$0xff]  ;;  %v19708_v21 = vld [vmem:[#allocation99_spill] sm:$0xff]  ;;  %v19710_v61 = vld [vmem:[#allocation98_spill] sm:$0xff] }
 0x4a0   : > { %v4787_v33 = vmul.f32 1.442695, %v19696_v2  ;;  %6262 = vmatpush1.bf16.msra.mxu0 %v19704_v15  ;;  %v19705_v2 = vld [vmem:[#allocation298_spill] sm:$0xff]  ;;  %19706 = vst [vmem:[#allocation147_spill] sm:$0xff] %v13286_v29  ;;  %v13289_v5 = vadd.f32 %v13216_v16, %v5527_v1  ;;  %v5948_v53 = vpack.c.bf16 %v19708_v21, %v19707_v32  ;;  %v19709_v26 = vpack.c.bf16 %v13053_v34, %v13046_v12  ;;  %v19712_v24 = vld [vmem:[#allocation173_spill] sm:$0xff]  ;;  %v19716_v34 = vld [vmem:[#allocation256_spill] sm:$0xff] }
 0x4a1   : > { %v3618_v6 = vmax.f32 %v3617_v20, %v19705_v2  ;;  %v3582_v4 = vmax.f32 %v3581_v43, %v12891_v11  ;;  %v3541_v30 = vmax.f32 %v3540_v56, %v12899_v45  ;;  %8181 = vpow2.f32 %v19710_v61  ;;  %v19711_v20 = vld [vmem:[#allocation86_spill] sm:$0xff]  ;;  %6211 = vmatpush1.bf16.msra.mxu1 %v5945_v55  ;;  %v19713_v1 = vld [vmem:[#allocation49_spill] sm:$0xff]  ;;  %v19724_v47 = vld [vmem:[#allocation75_spill] sm:$0xff] }
 0x4a2   : > { %6263 = vmatprep.subr.bf16.mxu0 %v19709_v26  ;;  %v5559_v10 = vadd.f32 %v19711_v20, %v5558_v27  ;;  %v3505_v25 = vmax.f32 %v3504_v60, %v19713_v1  ;;  %v19714_v58 = vld [vmem:[#allocation225_spill] sm:$0xff]  ;;  %v5596_v12 = vadd.f32 %v13247_v36, %v5595_v14  ;;  %6212 = vmatprep.subr.bf16.mxu1 %v5948_v53  ;;  %v19717_v26 = vld [vmem:[#allocation196_spill] sm:$0xff]  ;;  %8183 = vpow2.f32 %v4787_v33  ;;  %v19719_v45 = vld [vmem:[#allocation238_spill] sm:$0xff] }
 0x4a3   : > { %v3619_v15 = vmax.f32 %v3618_v6, %v19712_v24  ;;  %v19715_v32 = vsub.f32 %v19714_v58, %v19695_v44  ;;  %v3583_v43 = vmax.f32 %v3582_v4, %v19716_v34  ;;  %v3542_v56 = vmax.f32 %v3541_v30, %v19717_v26  ;;  %v19718_v61 = vld [vmem:[#allocation237_spill] sm:$0xff]  ;;  %v19721_v6 = vld [vmem:[#allocation224_spill] sm:$0xff]  ;;  %v19726_v20 = vld [vmem:[#allocation159_spill] sm:$0xff] }
 0x4a4   : > { %v5947_v27 = vpack.c.bf16 %v19719_v45, %v19718_v61  ;;  %v19720_v55 = vpack.c.bf16 %v12685_v8, %v12674_v19  ;;  %v19722_v1 = vld [vmem:[#allocation137_spill] sm:$0xff]  ;;  %v19727_v33 = vpack.c.bf16 %v13135_v17, %v13120_v62  ;;  %v19728_v30 = vld [vmem:[#allocation216_spill] sm:$0xff]  ;;  %v19736_v17 = vld [vmem:[#allocation10_spill] sm:$0xff] }
 0x4a5   : > { %v4791_v21 = vmul.f32 1.442695, %v19715_v32  ;;  %v3620_v60 = vmax.f32 %v3619_v15, %v19721_v6  ;;  %v3506_v58 = vmax.f32 %v3505_v25, %v19722_v1  ;;  %v19723_v32 = vld [vmem:[#allocation276_spill] sm:$0xff]  ;;  %v19725_v53 = vld [vmem:[#allocation153_spill] sm:$0xff]  ;;  %v3584_v45 = vmax.f32 %v3583_v43, %v19728_v30  ;;  %v19732_v15 = vld [vmem:[#allocation22_spill] sm:$0xff] }
 0x4a6   : > { %6264 = vmatpush1.bf16.msra.mxu0 %v19720_v55  ;;  %v5415_v14 = vadd.f32 %v19724_v47, %v19723_v32  ;;  %v5950_v4 = vpack.c.bf16 %v19726_v20, %v19725_v53  ;;  %v19729_v61 = vld [vmem:[#allocation145_spill] sm:$0xff]  ;;  %v19731_v8 = vld [vmem:[#allocation120_spill] sm:$0xff]  ;;  %v5560_v36 = vadd.f32 %v19732_v15, %v5559_v10  ;;  %6213 = vmatpush1.bf16.msra.mxu1 %v5947_v27  ;;  %v19734_v32 = vld [vmem:[#allocation167_spill] sm:$0xff] }
 0x4a7   : > { %6265 = vmatprep.subr.bf16.mxu0 %v19727_v33  ;;  %v3543_v26 = vmax.f32 %v3542_v56, %v19729_v61  ;;  %v19730_v19 = vld [vmem:[#allocation277_spill] sm:$0xff]  ;;  %v3507_v0 = vmax.f32 %v3506_v58, %v19734_v32  ;;  %v19735_v6 = vld [vmem:[#allocation87_spill] sm:$0xff]  ;;  %v5597_v20 = vadd.f32 %v13286_v29, %v5596_v12  ;;  %v3585_v62 = vmax.f32 %v3584_v45, %v19736_v17  ;;  %v19738_v53 = vld [vmem:[#allocation78_spill] sm:$0xff]  ;;  %v13362_v61 = vpop.f32.mrb[236].mxu0 }
 0x4a8   : > { %v5451_v55 = vadd.f32 %v19731_v8, %v19730_v19  ;;  %v19733_v25 = vld [vmem:[#allocation73_spill] sm:$0xff]  ;;  %8185 = vpow2.f32 %v19735_v6  ;;  %6214 = vmatprep.subr.bf16.mxu1 %v5950_v4  ;;  %v19737_v56 = vld [vmem:[#allocation219_spill] sm:$0xff]  ;;  %v19739_v10 = vld [vmem:[#allocation240_spill] sm:$0xff]  ;;  %19753 = vst [vmem:[#allocation155_spill] sm:$0xff] %v13362_v61 }
 0x4a9   : > { %v3621_v1 = vmax.f32 %v3620_v60, %v19733_v25  ;;  %v3544_v43 = vmax.f32 %v3543_v26, %v13116_v7  ;;  %v13335_v33 = vadd.f32 %v19738_v53, %v19737_v56  ;;  %8187 = vpow2.f32 %v4791_v21  ;;  %v19740_v27 = vld [vmem:[#allocation76_spill] sm:$0xff]  ;;  %v19742_v12 = vld [vmem:[#allocation223_spill] sm:$0xff]  ;;  %v19743_v58 = vld [vmem:[#allocation226_spill] sm:$0xff] }
 0x4aa   : > { %v5949_v19 = vpack.c.bf16 %v19740_v27, %v19739_v10  ;;  %v19741_v60 = vpack.c.bf16 %v12703_v59, %v12696_v57  ;;  %v13345_v4 = vadd.f32 %v19743_v58, %v19742_v12  ;;  %v19744_v45 = vld [vmem:[#allocation118_spill] sm:$0xff]  ;;  %v19745_v26 = vld [vmem:[#allocation85_spill] sm:$0xff]  ;;  %v19746_v7 = vld [vmem:[#allocation248_spill] sm:$0xff]  ;;  %v19747_v21 = vpack.c.bf16 %v13148_v38, %v13141_v23  ;;  %v13353_v10 = vpop.eup %8179 }
 0x4ab   : > { %v3622_v6 = vmax.f32 %v3621_v1, %v13118_v3  ;;  %8189 = vpow2.f32 %v19744_v45  ;;  %v5952_v56 = vpack.c.bf16 %v19746_v7, %v19745_v26  ;;  %v3586_v53 = vrot.slane %v3585_v62, 4  ;;  %19748 = vst [vmem:[#allocation156_spill] sm:$0xff] %v13353_v10  ;;  %v19749_v57 = vld [vmem:[#allocation79_spill] sm:$0xff]  ;;  %v19750_v1 = vld [vmem:[#allocation146_spill] sm:$0xff]  ;;  %v13360_v45 = vpop.f32.mrb[188].mxu1  ;;  %v19754_v7 = vld [vmem:[#allocation232_spill] sm:$0xff] }
 0x4ac   : > { %6266 = vmatpush1.bf16.msra.mxu0 %v19741_v60  ;;  %v13356_v59 = vadd.f32 %v19749_v57, %v5415_v14  ;;  %v5452_v27 = vadd.f32 %v19750_v1, %v5451_v55  ;;  %v19751_v60 = vld [vmem:[#allocation106_spill] sm:$0xff]  ;;  %6215 = vmatpush1.bf16.msra.mxu1 %v5949_v19  ;;  %19752 = vst [vmem:[#allocation150_spill] sm:$0xff] %v13360_v45  ;;  %v13369_v15 = vpop.f32.mrb[189].mxu1  ;;  %v13371_v55 = vpop.eup %8181  ;;  %v19761_v29 = vld [vmem:[#allocation113_spill] sm:$0xff]  ;;  %v19837_v17 = vld [vmem:[#allocation24_spill] sm:$0xff] }
 0x4ad   : > { %6267 = vmatprep.subr.bf16.mxu0 %v19747_v21  ;;  %v5561_v12 = vadd.f32 %v19751_v60, %v5560_v36  ;;  %v3623_v58 = vrot.slane %v3622_v6, 4  ;;  %v19755_v26 = vld [vmem:[#allocation46_spill] sm:$0xff]  ;;  %v5598_v21 = vadd.f32 %v13353_v10, %v5597_v20  ;;  %6216 = vmatprep.subr.bf16.mxu1 %v5952_v56  ;;  %v3587_v32 = vmax.f32 %v3585_v62, %v3586_v53  ;;  %v19759_v36 = vld [vmem:[#allocation239_spill] sm:$0xff]  ;;  %v19762_v61 = vld [vmem:[#allocation121_spill] sm:$0xff]  ;;  %v13382_v56 = vpop.f32.mrb[190].mxu1 }
 0x4ae   : > { %v19756_v38 = vsub.f32 %v19754_v7, %v19755_v26  ;;  %v3508_v14 = vmax.f32 %v3507_v0, %v13360_v45  ;;  %19757 = vst [vmem:[#allocation188_spill] sm:$0xff] %v13369_v15  ;;  %19758 = vst [vmem:[#allocation80_spill] sm:$0xff] %v13371_v55  ;;  %v19760_v19 = vsub.f32 %v19759_v36, %v19755_v26  ;;  %v19765_v0 = vld [vmem:[#allocation236_spill] sm:$0xff]  ;;  %v19767_v45 = vld [vmem:[#allocation58_spill] sm:$0xff] }
 0x4af   : > { %v5951_v3 = vpack.c.bf16 %v19762_v61, %v19761_v29  ;;  %v19763_v7 = vpack.c.bf16 %v12723_v54, %v12710_v40  ;;  %v3624_v20 = vmax.f32 %v3622_v6, %v3623_v58  ;;  %v3545_v62 = vmax.f32 %v3544_v43, %v13369_v15  ;;  %19764 = vst [vmem:[#allocation91_spill] sm:$0xff] %v13382_v56  ;;  %v19768_v10 = vld [vmem:[#allocation141_spill] sm:$0xff]  ;;  %v13393_v54 = vpop.f32.mrb[191].mxu1  ;;  %v13395_v61 = vpop.eup %8183  ;;  %v19772_v6 = vld [vmem:[#allocation40_spill] sm:$0xff]  ;;  %v19838_v30 = vld [vmem:[#allocation187_spill] sm:$0xff] }
 0x4b0   : > { %v4793_v23 = vmul.f32 1.442695, %v19756_v38  ;;  %v4797_v60 = vmul.f32 1.442695, %v19760_v19  ;;  %v19766_v53 = vsub.f32 %v19765_v0, %v19695_v44  ;;  %v5954_v26 = vpack.c.bf16 %v19768_v10, %v19767_v45  ;;  %19770 = vst [vmem:[#allocation135_spill] sm:$0xff] %v13393_v54  ;;  %19771 = vst [vmem:[#allocation161_spill] sm:$0xff] %v13395_v61 }
 0x4b1   : > { %6268 = vmatpush1.bf16.msra.mxu0 %v19763_v7  ;;  %v19769_v36 = vpack.c.bf16 %v13175_v63, %v13164_v49  ;;  %v3588_v29 = vrot.slane %v3587_v32, 2  ;;  %v3509_v40 = vmax.f32 %v3508_v14, %v13382_v56  ;;  %v5562_v43 = vadd.f32 %v13371_v55, %v5561_v12  ;;  %6217 = vmatpush1.bf16.msra.mxu1 %v5951_v3  ;;  %v13402_v45 = vpop.f32.mrb[192].mxu1  ;;  %v19776_v12 = vld [vmem:[#allocation242_spill] sm:$0xff]  ;;  %v19830_v56 = vld [vmem:[#allocation228_spill] sm:$0xff] }
 0x4b2   : > { %v4795_v38 = vmul.f32 1.442695, %v19766_v53  ;;  %v19773_v58 = vsub.f32 %v19772_v6, %v19695_v44  ;;  %v3625_v7 = vrot.slane %v3624_v20, 2  ;;  %v3546_v10 = vmax.f32 %v3545_v62, %v13393_v54  ;;  %19774 = vst [vmem:[#allocation168_spill] sm:$0xff] %v13402_v45  ;;  %6218 = vmatprep.subr.bf16.mxu1 %v5954_v26  ;;  %v13406_v0 = vpop.f32.mrb[193].mxu1  ;;  %v19777_v53 = vld [vmem:[#allocation92_spill] sm:$0xff] }
 0x4b3   : > { %6269 = vmatprep.subr.bf16.mxu0 %v19769_v36  ;;  %8191 = vpow2.f32 %v4793_v23  ;;  %v5599_v49 = vadd.f32 %v13395_v61, %v5598_v21  ;;  %v3589_v63 = vmax.f32 %v3587_v32, %v3588_v29  ;;  %v3510_v14 = vmax.f32 %v3509_v40, %v13402_v45  ;;  %19775 = vst [vmem:[#allocation222_spill] sm:$0xff] %v13406_v0  ;;  %v13416_v23 = vpop.f32.mrb[194].mxu1  ;;  %v13418_v21 = vpop.eup %8185  ;;  %v19781_v32 = vld [vmem:[#allocation66_spill] sm:$0xff]  ;;  %v19782_v26 = vld [vmem:[#allocation151_spill] sm:$0xff] }
 0x4b4   : > { %v4799_v19 = vmul.f32 1.442695, %v19773_v58  ;;  %8193 = vpow2.f32 %v4797_v60  ;;  %v5953_v44 = vpack.c.bf16 %v19777_v53, %v19776_v12  ;;  %v19778_v3 = vpack.c.bf16 %v12745_v51, %v12732_v31  ;;  %19779 = vst [vmem:[#allocation158_spill] sm:$0xff] %v13416_v23  ;;  %19780 = vst [vmem:[#allocation30_spill] sm:$0xff] %v13418_v21  ;;  %v13428_v51 = vpop.eup %8187  ;;  %v19788_v12 = vld [vmem:[#allocation95_spill] sm:$0xff]  ;;  %v19829_v45 = vld [vmem:[#allocation190_spill] sm:$0xff] }
 0x4b5   : > { %v3626_v62 = vmax.f32 %v3624_v20, %v3625_v7  ;;  %v13414_v36 = vmax.f32 %v3546_v10, %v13406_v0  ;;  %8195 = vpow2.f32 %v4795_v38  ;;  %v5956_v29 = vpack.c.bf16 %v19782_v26, %v19781_v32  ;;  %19784 = vst [vmem:[#allocation175_spill] sm:$0xff] %v13428_v51  ;;  %v19785_v20 = vld [vmem:[#allocation103_spill] sm:$0xff]  ;;  %v13436_v7 = vpop.eup %8189  ;;  %v19787_v10 = vld [vmem:[#allocation174_spill] sm:$0xff]  ;;  %v19793_v26 = vld [vmem:[#allocation160_spill] sm:$0xff] }
 0x4b6   : > { %6270 = vmatpush1.bf16.msra.mxu0 %v19778_v3  ;;  %v19783_v60 = vpack.c.bf16 %v13202_v9, %v13191_v50  ;;  %v3590_v40 = vrot.slane %v3589_v63, 1  ;;  %v13426_v31 = vmax.f32 %v3510_v14, %v13416_v23  ;;  %v13431_v6 = vadd.f32 %v19785_v20, %v5452_v27  ;;  %6219 = vmatpush1.bf16.msra.mxu1 %v5953_v44  ;;  %v19786_v9 = vld [vmem:[#allocation243_spill] sm:$0xff]  ;;  %v19940_v25 = vld [vmem:[#allocation286_spill] sm:$0xff] }
 0x4b7   : > { %v13434_v58 = vadd.f32 %v13418_v21, %v5562_v43  ;;  %8197 = vpow2.f32 %v4799_v19  ;;  %v3627_v38 = vrot.slane %v3626_v62, 1  ;;  %v5600_v50 = vadd.f32 %v13428_v51, %v5599_v49  ;;  %6220 = vmatprep.subr.bf16.mxu1 %v5956_v29  ;;  %v19789_v53 = vld [vmem:[#allocation191_spill] sm:$0xff]  ;;  %v19792_v19 = vld [vmem:[#allocation104_spill] sm:$0xff]  ;;  %v19795_v49 = vld [vmem:[#allocation246_spill] sm:$0xff] }
 0x4b8   : > { %6271 = vmatprep.subr.bf16.mxu0 %v19783_v60  ;;  %v5955_v14 = vpack.c.bf16 %v19787_v10, %v19786_v9  ;;  %v5958_v3 = vpack.c.bf16 %v19789_v53, %v19788_v12  ;;  %v13443_v32 = vmax.f32 %v3589_v63, %v3590_v40  ;;  %v19790_v27 = vpack.c.bf16 %v12812_v37, %v12763_v39  ;;  %v19791_v43 = vld [vmem:[#allocation179_spill] sm:$0xff]  ;;  %v19794_v60 = vld [vmem:[#allocation84_spill] sm:$0xff]  ;;  %v19800_v10 = vld [vmem:[#allocation93_spill] sm:$0xff] }
 0x4b9   : > { %v5957_v44 = vpack.c.bf16 %v19792_v19, %v19791_v43  ;;  %v5960_v0 = vpack.c.bf16 %v19794_v60, %v19793_v26  ;;  %v19796_v29 = vld [vmem:[#allocation112_spill] sm:$0xff]  ;;  %v13454_v15 = vmax.f32 %v3626_v62, %v3627_v38  ;;  %v19797_v9 = vpack.c.bf16 %v13216_v16, %v13208_v28  ;;  %v19798_v63 = vld [vmem:[#allocation183_spill] sm:$0xff]  ;;  %v19801_v53 = vld [vmem:[#allocation201_spill] sm:$0xff] }
 0x4ba   : > { %6272 = vmatpush1.bf16.msra.mxu0 %v19790_v27  ;;  %v5959_v54 = vpack.c.bf16 %v19796_v29, %v19795_v49  ;;  %v19799_v39 = vld [vmem:[#allocation32_spill] sm:$0xff]  ;;  %6221 = vmatpush1.bf16.msra.mxu1 %v5955_v14  ;;  %v19803_v43 = vld [vmem:[#allocation23_spill] sm:$0xff]  ;;  %v19806_v49 = vld [vmem:[#allocation117_spill] sm:$0xff]  ;;  %v19810_v28 = vpack.c.bf16 %v12857_v42, %v12839_v48  ;;  %v5343_v61 = vadd.f32 %v19829_v45, %v13335_v33 }
 0x4bb   : > { %6273 = vmatprep.subr.bf16.mxu0 %v19797_v9  ;;  %v19802_v62 = vld [vmem:[#allocation204_spill] sm:$0xff]  ;;  %v19805_v26 = vld [vmem:[#allocation71_spill] sm:$0xff]  ;;  %6222 = vmatprep.subr.bf16.mxu1 %v5958_v3  ;;  %v19807_v9 = vld [vmem:[#allocation142_spill] sm:$0xff]  ;;  %v5380_v13 = vadd.f32 %v19830_v56, %v13345_v4 }
 0x4bc   : > { %v19804_v16 = vld [vmem:[#allocation60_spill] sm:$0xff]  ;;  %v19808_v14 = vld [vmem:[#allocation57_spill] sm:$0xff]  ;;  %v19811_v19 = vld [vmem:[#allocation194_spill] sm:$0xff] }
 0x4bd   : > { %v19809_v38 = vld [vmem:[#allocation52_spill] sm:$0xff]  ;;  %v19812_v3 = vld [vmem:[#allocation130_spill] sm:$0xff]  ;;  %v13494_v12 = vpop.eup %8191  ;;  %v19815_v60 = vld [vmem:[#allocation185_spill] sm:$0xff]  ;;  %v5381_v34 = vrot.slane %v5380_v13, 4 }
 0x4be   : > { %6274 = vmatpush1.bf16.msra.mxu0 %v19810_v28  ;;  %19813 = vst [vmem:[#allocation29_spill] sm:$0xff] %v13494_v12  ;;  %v19814_v42 = vld [vmem:[#allocation36_spill] sm:$0xff]  ;;  %v13504_v23 = vpop.eup %8193  ;;  %6223 = vmatpush1.bf16.msra.mxu1 %v5957_v44  ;;  %v19817_v29 = vld [vmem:[#allocation206_spill] sm:$0xff]  ;;  %v19822_v28 = vld [vmem:[#allocation9_spill] sm:$0xff]  ;;  %v5564_v27 = vadd.f32 %v13494_v12, %v13434_v58  ;;  %v19846_v58 = vsub.f32 %v19799_v39, %v13443_v32 }
 0x4bf   : > { %19816 = vst [vmem:[#allocation209_spill] sm:$0xff] %v13504_v23  ;;  %v13514_v51 = vpop.eup %8195  ;;  %6224 = vmatprep.subr.bf16.mxu1 %v5960_v0  ;;  %v19823_v40 = vpack.c.bf16 %v19822_v28, %v19822_v28  ;;  %v19827_v37 = vld [vmem:[#allocation14_spill] sm:$0xff]  ;;  %v5454_v28 = vadd.f32 %v13436_v7, %v13431_v6  ;;  %v19835_v56 = vld [vmem:[#allocation247_spill] sm:$0xff]  ;;  %v5344_v0 = vrot.slane %v5343_v61, 4  ;;  %v20004_v45 = vld [vmem:[#allocation256_spill] sm:$0xff] }
 0x4c0   : > { %19821 = vst [vmem:[#allocation189_spill] sm:$0xff] %v13514_v51  ;;  %v19828_v55 = vpack.c.bf16 %v19827_v37, %v19827_v37  ;;  %v19831_v37 = vld [vmem:[#allocation166_spill] sm:$0xff]  ;;  %v5601_v4 = vadd.f32 %v13514_v51, %v5600_v50  ;;  %v5565_v48 = vadd.f32 %v13504_v23, %v5564_v27  ;;  %v19845_v23 = vld [vmem:[#allocation53_spill] sm:$0xff]  ;;  %v4933_v50 = vmul.f32 1.442695, %v19846_v58  ;;  %v19852_v58 = vld [vmem:[#allocation208_spill] sm:$0xff] }
 0x4c1   : > { %6276 = vmatmul.mubr.bf16.vlgmr.msra.gmra.mrb[44].mxu0 %v19823_v40  ;;  %v13525_v21 = vpop.eup %8197  ;;  %v19833_v40 = vld [vmem:[#allocation82_spill] sm:$0xff]  ;;  %v5455_v6 = vrot.slane %v5454_v28, 4 }
 0x4c2   : > { %19826 = vst [vmem:[#allocation6_spill] sm:$0xff] %v13525_v21  ;;  %6357 = vmatprep.mubr.bf16.mxu0 %v19828_v55  ;;  %v19832_v55 = vld [vmem:[#allocation195_spill] sm:$0xff]  ;;  %v5417_v11 = vadd.f32 %v19833_v40, %v13356_v59  ;;  %6225 = vmatpush1.bf16.msra.mxu1 %v5959_v54  ;;  %v19834_v33 = vld [vmem:[#allocation154_spill] sm:$0xff]  ;;  %v5964_v59 = vpack.c.bf16 %v19838_v30, %v19837_v17  ;;  %v19842_v30 = vld [vmem:[#allocation12_spill] sm:$0xff] }
 0x4c3   : > { %v5962_v44 = vpack.c.bf16 %v19832_v55, %v19831_v37  ;;  %v19836_v37 = vld [vmem:[#allocation21_spill] sm:$0xff]  ;;  %v19839_v54 = vld [vmem:[#allocation7_spill] sm:$0xff]  ;;  %v5966_v17 = vpack.c.bf16 %v19750_v1, %v19731_v8  ;;  %v19862_v1 = vld [vmem:[#allocation128_spill] sm:$0xff] }
 0x4c4   : > { %v5961_v55 = vpack.c.bf16 %v19836_v37, %v19835_v56  ;;  %v5418_v41 = vrot.slane %v5417_v11, 4  ;;  %v19841_v56 = vsub.f32 %v19798_v63, %v13443_v32  ;;  %v19854_v8 = vld [vmem:[#allocation177_spill] sm:$0xff]  ;;  %v19861_v63 = vsub.f32 %v19800_v10, %v13443_v32  ;;  %v19946_v2 = vld [vmem:[#allocation290_spill] sm:$0xff] }
 0x4c5   : > { %6226 = vmatprep.subr.bf16.mxu1 %v5962_v44  ;;  %v5602_v44 = vadd.f32 %v13525_v21, %v5601_v4  ;;  %v13585_v21 = vadd.f32 %v5381_v34, %v5380_v13  ;;  %v5965_v4 = vpack.c.bf16 %v19724_v47, %v19852_v58  ;;  %v19856_v34 = vld [vmem:[#allocation182_spill] sm:$0xff]  ;;  %v13618_v47 = vpop.f32.mrb[237].mxu0  ;;  %v19870_v13 = vld [vmem:[#allocation296_spill] sm:$0xff]  ;;  %v5529_v10 = vrot.slane %v13289_v5, 4 }
 0x4c6   : > { %6227 = vmatpush1.bf16.msra.mxu1 %v5961_v55  ;;  %v4929_v37 = vmul.f32 1.442695, %v19841_v56  ;;  %v19844_v55 = vld [vmem:[#allocation211_spill] sm:$0xff]  ;;  %v13581_v56 = vadd.f32 %v5344_v0, %v5343_v61  ;;  %v13587_v27 = vadd.f32 %v5418_v41, %v5417_v11  ;;  %v19853_v61 = vld [vmem:[#allocation198_spill] sm:$0xff]  ;;  %v4937_v41 = vmul.f32 1.442695, %v19861_v63 }
 0x4c7   : > { %6228 = vmatprep.subr.bf16.mxu1 %v5964_v59  ;;  %v5963_v51 = vpack.c.bf16 %v19845_v23, %v19844_v55  ;;  %19849 = vst [vmem:[#allocation42_spill] sm:$0xff] %v13585_v21  ;;  %v13589_v23 = vadd.f32 %v5455_v6, %v5454_v28  ;;  %v5566_v55 = vrot.slane %v5565_v48, 4  ;;  %v5603_v39 = vrot.slane %v5602_v44, 4  ;;  %v19855_v11 = vld [vmem:[#allocation178_spill] sm:$0xff]  ;;  %19864 = vst [vmem:[#allocation102_spill] sm:$0xff] %v13618_v47  ;;  %v13620_v0 = vpop.f32.mrb[195].mxu1 }
 0x4c8   : > { %19850 = vst [vmem:[#allocation61_spill] sm:$0xff] %v13587_v27  ;;  %8199 = vpow2.f32 %v4929_v37  ;;  %v19857_v28 = vld [vmem:[#allocation218_spill] sm:$0xff]  ;;  %19865 = vst [vmem:[#allocation212_spill] sm:$0xff] %v13620_v0  ;;  %v19869_v63 = vld [vmem:[#allocation119_spill] sm:$0xff]  ;;  %v5492_v59 = vrot.slane %v19870_v13, 4  ;;  %v19956_v21 = vsub.f32 %v19815_v60, %v13443_v32 }
 0x4c9   : > { %19851 = vst [vmem:[#allocation77_spill] sm:$0xff] %v13589_v23  ;;  %8201 = vpow2.f32 %v4933_v50  ;;  %v19858_v6 = vld [vmem:[#allocation186_spill] sm:$0xff]  ;;  %v19859_v50 = vld [vmem:[#allocation101_spill] sm:$0xff]  ;;  %v13609_v58 = vadd.f32 %v5566_v55, %v5565_v48  ;;  %v13622_v37 = vadd.f32 %v5603_v39, %v5602_v44  ;;  %v19886_v27 = vld [vmem:[#allocation107_spill] sm:$0xff]  ;;  %v19897_v39 = vpack.c.bf16 %v19842_v30, %v19842_v30 }
 0x4ca   : > { %6229 = vmatpush1.bf16.msra.mxu1 %v5963_v51  ;;  %v5968_v51 = vpack.c.bf16 %v13436_v7, %v19785_v20  ;;  %v19863_v20 = vld [vmem:[#allocation172_spill] sm:$0xff]  ;;  %v19867_v48 = vld [vmem:[#allocation193_spill] sm:$0xff]  ;;  %v5967_v7 = vpack.c.bf16 %v19833_v40, %v19749_v57  ;;  %8203 = vpow2.f32 %v4937_v41  ;;  %v19878_v57 = vsub.f32 %v19801_v53, %v13443_v32  ;;  %v19888_v23 = vld [vmem:[#allocation43_spill] sm:$0xff] }
 0x4cb   : > { %6230 = vmatprep.subr.bf16.mxu1 %v5966_v17  ;;  %19860 = vst [vmem:[#allocation74_spill] sm:$0xff] %v13609_v58  ;;  %19866 = vst [vmem:[#allocation28_spill] sm:$0xff] %v13622_v37  ;;  %v19868_v55 = vld [vmem:[#allocation157_spill] sm:$0xff]  ;;  %v19874_v37 = vld [vmem:[#allocation123_spill] sm:$0xff]  ;;  %v19902_v30 = vsub.f32 %v19805_v26, %v13443_v32  ;;  %v5005_v46 = vmul.f32 1.442695, %v19956_v21 }
 0x4cc   : > { %v4941_v40 = vmul.f32 1.442695, %v19878_v57  ;;  %v13702_v57 = vadd.f32 %v5492_v59, %v19870_v13  ;;  %v19906_v59 = vld [vmem:[#allocation261_spill] sm:$0xff]  ;;  %v19907_v13 = vld [vmem:[#allocation262_spill] sm:$0xff] }
 0x4cd   : > { %v19963_v21 = vld [vmem:[#allocation221_spill] sm:$0xff] }
 0x4ce   : > { %6231 = vmatpush1.bf16.msra.mxu1 %v5965_v4  ;;  %8205 = vpow2.f32 %v4941_v40  ;;  %19900 = vst [vmem:[#allocation5_spill] sm:$0xff] %v13702_v57  ;;  %v19914_v57 = vld [vmem:[#allocation140_spill] sm:$0xff] }
 0x4cf   : > { %6232 = vmatprep.subr.bf16.mxu1 %v5968_v51  ;;  %v19873_v51 = vld [vmem:[#allocation259_spill] sm:$0xff] }
 0x4d0   : > { %v6002_v4 = vpack.c.bf16 %v19874_v37, %v19873_v51  ;;  %v19887_v51 = vld [vmem:[#allocation132_spill] sm:$0xff] }
 0x4d1   : > { %v6001_v37 = vpack.c.bf16 %v19887_v51, %v19886_v27  ;;  %v19893_v27 = vpack.c.bf16 %v19839_v54, %v19839_v54  ;;  %v19898_v54 = vsub.f32 %v19804_v16, %v13443_v32  ;;  %v4957_v16 = vmul.f32 1.442695, %v19902_v30  ;;  %v19910_v30 = vld [vmem:[#allocation122_spill] sm:$0xff] }
 0x4d2   : > { %6233 = vmatpush1.bf16.msra.mxu1 %v5967_v7  ;;  %v13667_v12 = vpop.eup %8199  ;;  %v19891_v7 = vsub.f32 %v19802_v62, %v13443_v32  ;;  %v19895_v62 = vsub.f32 %v19803_v43, %v13443_v32  ;;  %v19936_v43 = vld [vmem:[#allocation253_spill] sm:$0xff] }
 0x4d3   : > { %6284 = vmatprep.subr.bf16.mxu1 %v6002_v4  ;;  %v19889_v4 = vld [vmem:[#allocation260_spill] sm:$0xff]  ;;  %19890 = vst [vmem:[#allocation207_spill] sm:$0xff] %v13667_v12 }
 0x4d4   : > { %v6004_v44 = vpack.c.bf16 %v19889_v4, %v19888_v23  ;;  %v4945_v47 = vmul.f32 1.442695, %v19891_v7  ;;  %v13681_v23 = vpop.eup %8201  ;;  %v4949_v51 = vmul.f32 1.442695, %v19895_v62  ;;  %v19905_v62 = vsub.f32 %v19806_v49, %v13443_v32  ;;  %v19943_v4 = vld [vmem:[#allocation255_spill] sm:$0xff] }
 0x4d5   : > { %6235 = vmatmul.mubr.bf16.vlgmr.msra.gmra.mrb[8].mxu1 %v19893_v27  ;;  %19894 = vst [vmem:[#allocation26_spill] sm:$0xff] %v13681_v23  ;;  %v4953_v27 = vmul.f32 1.442695, %v19898_v54  ;;  %v19904_v54 = vld [vmem:[#allocation200_spill] sm:$0xff]  ;;  %v5683_v40 = vadd.f32 %v13681_v23, %v13667_v12  ;;  %v6006_v7 = vpack.c.bf16 %v19907_v13, %v19906_v59  ;;  %v19913_v49 = vsub.f32 %v19808_v14, %v13443_v32  ;;  %v19916_v13 = vld [vmem:[#allocation266_spill] sm:$0xff]  ;;  %v19923_v14 = vld [vmem:[#allocation275_spill] sm:$0xff] }
 0x4d6   : > { %6285 = vmatpush1.bf16.msra.mxu1 %v6001_v37  ;;  %6316 = vmatprep.mubr.bf16.mxu1 %v19897_v39  ;;  %v13705_v37 = vadd.f32 %v5529_v10, %v13289_v5  ;;  %v19903_v39 = vld [vmem:[#allocation27_spill] sm:$0xff]  ;;  %8207 = vpow2.f32 %v4945_v47  ;;  %v19908_v5 = vsub.f32 %v19807_v9, %v13443_v32  ;;  %v19915_v59 = vld [vmem:[#allocation144_spill] sm:$0xff]  ;;  %v19917_v23 = vld [vmem:[#allocation270_spill] sm:$0xff] }
 0x4d7   : > { %6286 = vmatprep.subr.bf16.mxu1 %v6004_v44  ;;  %v6003_v41 = vpack.c.bf16 %v19904_v54, %v19903_v39  ;;  %v4961_v44 = vmul.f32 1.442695, %v19905_v62  ;;  %8209 = vpow2.f32 %v4949_v51  ;;  %v19909_v10 = vld [vmem:[#allocation55_spill] sm:$0xff]  ;;  %v19912_v54 = vld [vmem:[#allocation264_spill] sm:$0xff]  ;;  %v4969_v62 = vmul.f32 1.442695, %v19913_v49 }
 0x4d8   : > { %19901 = vst [vmem:[#allocation245_spill] sm:$0xff] %v13705_v37  ;;  %v4965_v26 = vmul.f32 1.442695, %v19908_v5  ;;  %v6005_v39 = vpack.c.bf16 %v19910_v30, %v19909_v10  ;;  %v19911_v47 = vld [vmem:[#allocation263_spill] sm:$0xff]  ;;  %8211 = vpow2.f32 %v4953_v27  ;;  %v6007_v51 = vpack.c.bf16 %v19915_v59, %v19914_v57  ;;  %v13733_v5 = vpop.eup %8203  ;;  %v19920_v30 = vld [vmem:[#allocation96_spill] sm:$0xff]  ;;  %v19921_v27 = vld [vmem:[#allocation162_spill] sm:$0xff] }
 0x4d9   : > { %v6008_v37 = vpack.c.bf16 %v19912_v54, %v19911_v47  ;;  %v6010_v9 = vpack.c.bf16 %v19917_v23, %v19916_v13  ;;  %19918 = vst [vmem:[#allocation136_spill] sm:$0xff] %v13733_v5  ;;  %8213 = vpow2.f32 %v4957_v16  ;;  %v6009_v47 = vpack.c.bf16 %v19921_v27, %v19920_v30  ;;  %v19922_v54 = vld [vmem:[#allocation273_spill] sm:$0xff]  ;;  %v19925_v59 = vld [vmem:[#allocation63_spill] sm:$0xff]  ;;  %v19928_v30 = vld [vmem:[#allocation278_spill] sm:$0xff] }
 0x4da   : > { %6287 = vmatpush1.bf16.msra.mxu1 %v6003_v41  ;;  %v19919_v41 = vsub.f32 %v19809_v38, %v13443_v32  ;;  %v6012_v49 = vpack.c.bf16 %v19923_v14, %v19922_v54  ;;  %8215 = vpow2.f32 %v4961_v44  ;;  %v19924_v57 = vsub.f32 %v19811_v19, %v13443_v32  ;;  %v19926_v13 = vld [vmem:[#allocation83_spill] sm:$0xff]  ;;  %v19930_v54 = vld [vmem:[#allocation65_spill] sm:$0xff]  ;;  %v19934_v16 = vld [vmem:[#allocation282_spill] sm:$0xff] }
 0x4db   : > { %6288 = vmatprep.subr.bf16.mxu1 %v6006_v7  ;;  %v5684_v23 = vadd.f32 %v13733_v5, %v5683_v40  ;;  %8217 = vpow2.f32 %v4965_v26  ;;  %v19927_v38 = vsub.f32 %v19812_v3, %v13443_v32  ;;  %v19929_v27 = vld [vmem:[#allocation279_spill] sm:$0xff]  ;;  %v19931_v44 = vld [vmem:[#allocation249_spill] sm:$0xff]  ;;  %v19932_v19 = vsub.f32 %v19581_v22, %v13443_v32  ;;  %v19935_v5 = vld [vmem:[#allocation252_spill] sm:$0xff] }
 0x4dc   : > { %v4973_v10 = vmul.f32 1.442695, %v19919_v41  ;;  %v4977_v7 = vmul.f32 1.442695, %v19924_v57  ;;  %8219 = vpow2.f32 %v4969_v62  ;;  %v19933_v57 = vld [vmem:[#allocation281_spill] sm:$0xff]  ;;  %v3512_v62 = vrot.slane %v13426_v31, 4 }
 0x4dd   : > { %v4981_v41 = vmul.f32 1.442695, %v19927_v38  ;;  %v4985_v40 = vmul.f32 1.442695, %v19932_v19  ;;  %v13762_v38 = vpop.eup %8205  ;;  %v19939_v14 = vld [vmem:[#allocation285_spill] sm:$0xff]  ;;  %v19942_v3 = vld [vmem:[#allocation254_spill] sm:$0xff] }
 0x4de   : > { %6289 = vmatpush1.bf16.msra.mxu1 %v6005_v39  ;;  %19937 = vst [vmem:[#allocation35_spill] sm:$0xff] %v13762_v38  ;;  %8221 = vpow2.f32 %v4973_v10  ;;  %v19938_v39 = vsub.f32 %v19588_v35, %v13443_v32  ;;  %v5685_v26 = vadd.f32 %v13762_v38, %v5684_v23  ;;  %v19944_v35 = vsub.f32 %v19603_v52, %v13443_v32  ;;  %v19947_v22 = vld [vmem:[#allocation44_spill] sm:$0xff]  ;;  %v19983_v52 = vld [vmem:[#allocation106_spill] sm:$0xff] }
 0x4df   : > { %6290 = vmatprep.subr.bf16.mxu1 %v6008_v37  ;;  %8223 = vpow2.f32 %v4977_v7  ;;  %v19941_v37 = vsub.f32 %v19595_v18, %v13443_v32  ;;  %v19948_v7 = vld [vmem:[#allocation215_spill] sm:$0xff]  ;;  %v19950_v18 = vsub.f32 %v19814_v42, %v13443_v32 }
 0x4e0   : > { %v4989_v12 = vmul.f32 1.442695, %v19938_v39  ;;  %8225 = vpow2.f32 %v4981_v41  ;;  %v4997_v10 = vmul.f32 1.442695, %v19944_v35  ;;  %v19945_v39 = vld [vmem:[#allocation289_spill] sm:$0xff]  ;;  %v13783_v58 = vpop.eup %8207  ;;  %v19978_v35 = vld [vmem:[#allocation156_spill] sm:$0xff] }
 0x4e1   : > { %v4993_v19 = vmul.f32 1.442695, %v19941_v37  ;;  %19949 = vst [vmem:[#allocation170_spill] sm:$0xff] %v13783_v58  ;;  %8227 = vpow2.f32 %v4985_v40  ;;  %v5001_v23 = vmul.f32 1.442695, %v19950_v18  ;;  %v19951_v41 = vld [vmem:[#allocation293_spill] sm:$0xff]  ;;  %v13792_v38 = vpop.eup %8209  ;;  %v3513_v40 = vmax.f32 %v13426_v31, %v3512_v62 }
 0x4e2   : > { %6291 = vmatpush1.bf16.msra.mxu1 %v6007_v51  ;;  %v19952_v37 = vld [vmem:[#allocation125_spill] sm:$0xff]  ;;  %19955 = vst [vmem:[#allocation8_spill] sm:$0xff] %v13792_v38  ;;  %8229 = vpow2.f32 %v4989_v12  ;;  %v13800_v18 = vpop.eup %8211  ;;  %v5686_v51 = vadd.f32 %v13783_v58, %v5685_v26  ;;  %v13808_v12 = vmax.f32 %v13414_v36, %v13620_v0  ;;  %v19964_v31 = vsub.f32 %v19963_v21, %v13443_v32  ;;  %v19971_v0 = vld [vmem:[#allocation143_spill] sm:$0xff] }
 0x4e3   : > { %6292 = vmatprep.subr.bf16.mxu1 %v6010_v9  ;;  %19959 = vst [vmem:[#allocation214_spill] sm:$0xff] %v13800_v18  ;;  %8231 = vpow2.f32 %v4993_v19  ;;  %v19960_v9 = vsub.f32 %v19817_v29, %v13443_v32  ;;  %v13810_v60 = vpop.eup %8213  ;;  %v3514_v42 = vrot.slane %v3513_v40, 2  ;;  %v19968_v26 = vld [vmem:[#allocation265_spill] sm:$0xff] }
 0x4e4   : > { %19961 = vst [vmem:[#allocation68_spill] sm:$0xff] %v13808_v12  ;;  %19962 = vst [vmem:[#allocation38_spill] sm:$0xff] %v13810_v60  ;;  %8233 = vpow2.f32 %v4997_v10  ;;  %v5013_v62 = vmul.f32 1.442695, %v19964_v31  ;;  %v13817_v29 = vpop.eup %8215  ;;  %v5687_v21 = vadd.f32 %v13792_v38, %v5686_v51  ;;  %v19988_v12 = vld [vmem:[#allocation161_spill] sm:$0xff]  ;;  %v19991_v51 = vld [vmem:[#allocation288_spill] sm:$0xff] }
 0x4e5   : > { %v5009_v24 = vmul.f32 1.442695, %v19960_v9  ;;  %19967 = vst [vmem:[#allocation47_spill] sm:$0xff] %v13817_v29  ;;  %8235 = vpow2.f32 %v5001_v23  ;;  %v19969_v9 = vsub.f32 %v19968_v26, %v13443_v32  ;;  %v13826_v31 = vpop.eup %8217  ;;  %v3515_v17 = vmax.f32 %v3513_v40, %v3514_v42 }
 0x4e6   : > { %6293 = vmatpush1.bf16.msra.mxu1 %v6009_v47  ;;  %19974 = vst [vmem:[#allocation62_spill] sm:$0xff] %v13826_v31  ;;  %8237 = vpow2.f32 %v5005_v46  ;;  %v19975_v47 = vld [vmem:[#allocation269_spill] sm:$0xff]  ;;  %v13833_v26 = vpop.eup %8219  ;;  %v19992_v46 = vsub.f32 %v19991_v51, %v13443_v32 }
 0x4e7   : > { %v5017_v36 = vmul.f32 1.442695, %v19969_v9  ;;  %6294 = vmatprep.subr.bf16.mxu1 %v6012_v49  ;;  %v19976_v53 = vsub.f32 %v19975_v47, %v13443_v32  ;;  %19979 = vst [vmem:[#allocation220_spill] sm:$0xff] %v13833_v26  ;;  %8239 = vpow2.f32 %v5009_v24  ;;  %v19980_v49 = vld [vmem:[#allocation274_spill] sm:$0xff]  ;;  %v3516_v47 = vrot.slane %v3515_v17, 1 }
 0x4e8   : > { %v19981_v9 = vsub.f32 %v19980_v49, %v13443_v32  ;;  %v13841_v58 = vpop.eup %8221  ;;  %8241 = vpow2.f32 %v5013_v62  ;;  %v19987_v24 = vpack.c.bf16 %v19926_v13, %v19925_v59  ;;  %v19989_v49 = vld [vmem:[#allocation175_spill] sm:$0xff]  ;;  %v5033_v38 = vmul.f32 1.442695, %v19992_v46  ;;  %v20001_v46 = vld [vmem:[#allocation213_spill] sm:$0xff] }
 0x4e9   : > { %v5021_v19 = vmul.f32 1.442695, %v19976_v53  ;;  %19984 = vst [vmem:[#allocation227_spill] sm:$0xff] %v13841_v58  ;;  %v19985_v53 = vld [vmem:[#allocation280_spill] sm:$0xff]  ;;  %v13851_v23 = vpop.eup %8223  ;;  %8243 = vpow2.f32 %v5017_v36  ;;  %v19993_v62 = vpack.c.bf16 %v19929_v27, %v19928_v30  ;;  %v19996_v59 = vrot.slane %v13581_v56, 2  ;;  %v19999_v36 = vld [vmem:[#allocation295_spill] sm:$0xff] }
 0x4ea   : > { %v5025_v10 = vmul.f32 1.442695, %v19981_v9  ;;  %v19986_v40 = vsub.f32 %v19985_v53, %v13443_v32  ;;  %6295 = vmatpush1.bf16.msra.mxu1 %v19987_v24  ;;  %19990 = vst [vmem:[#allocation210_spill] sm:$0xff] %v13851_v23  ;;  %v19994_v53 = vld [vmem:[#allocation80_spill] sm:$0xff]  ;;  %v13866_v24 = vpop.eup %8225  ;;  %v20000_v9 = vsub.f32 %v19999_v36, %v13443_v32  ;;  %v20002_v23 = vsub.f32 %v20001_v46, %v13443_v32 }
 0x4eb   : > { %6296 = vmatprep.subr.bf16.mxu1 %v19993_v62  ;;  %v13864_v13 = vadd.f32 %v19996_v59, %v13581_v56  ;;  %19998 = vst [vmem:[#allocation229_spill] sm:$0xff] %v13866_v24  ;;  %8245 = vpow2.f32 %v5021_v19  ;;  %v13874_v27 = vmax.f32 %v3515_v17, %v3516_v47  ;;  %v13876_v62 = vpop.eup %8227  ;;  %v20005_v56 = vsub.f32 %v20004_v45, %v13443_v32  ;;  %v20010_v45 = vld [vmem:[#allocation202_spill] sm:$0xff] }
 0x4ec   : > { %v5029_v42 = vmul.f32 1.442695, %v19986_v40  ;;  %v19995_v40 = vld [vmem:[#allocation30_spill] sm:$0xff]  ;;  %v5037_v51 = vmul.f32 1.442695, %v20000_v9  ;;  %20003 = vst [vmem:[#allocation230_spill] sm:$0xff] %v13876_v62  ;;  %8247 = vpow2.f32 %v5025_v10  ;;  %v5688_v24 = vadd.f32 %v13800_v18, %v5687_v21  ;;  %v13885_v9 = vpop.eup %8229 }
 0x4ed   : > { %19997 = vst [vmem:[#allocation50_spill] sm:$0xff] %v13864_v13  ;;  %v5041_v30 = vmul.f32 1.442695, %v20002_v23  ;;  %v5045_v59 = vmul.f32 1.442695, %v20005_v56  ;;  %v20006_v19 = vsub.f32 %v19834_v33, %v13454_v15  ;;  %20007 = vst [vmem:[#allocation116_spill] sm:$0xff] %v13885_v9  ;;  %v20008_v17 = vsub.f32 %v19853_v61, %v13454_v15  ;;  %v13898_v33 = vpop.eup %8231 }
 0x4ee   : > { %8249 = vpow2.f32 %v5029_v42  ;;  %v20009_v10 = vsub.f32 %v19854_v8, %v13454_v15  ;;  %v20011_v21 = vpack.c.bf16 %v19931_v44, %v19930_v54  ;;  %20012 = vst [vmem:[#allocation56_spill] sm:$0xff] %v13898_v33  ;;  %v20013_v42 = vld [vmem:[#allocation110_spill] sm:$0xff]  ;;  %v20014_v61 = vld [vmem:[#allocation45_spill] sm:$0xff]  ;;  %v13909_v46 = vpop.eup %8233  ;;  %v20018_v54 = vsub.f32 %v19855_v11, %v13454_v15 }
 0x4ef   : > { %v4931_v36 = vmul.f32 1.442695, %v20006_v19  ;;  %v4935_v23 = vmul.f32 1.442695, %v20008_v17  ;;  %8251 = vpow2.f32 %v5033_v38  ;;  %v20015_v17 = vld [vmem:[#allocation94_spill] sm:$0xff]  ;;  %20017 = vst [vmem:[#allocation235_spill] sm:$0xff] %v13909_v46  ;;  %v20019_v38 = vsub.f32 %v19856_v34, %v13454_v15  ;;  %v13919_v33 = vpop.eup %8235 }
 0x4f0   : > { %v4939_v47 = vmul.f32 1.442695, %v20009_v10  ;;  %6297 = vmatpush1.bf16.msra.mxu1 %v20011_v21  ;;  %v20016_v10 = vpack.c.bf16 %v19934_v16, %v19933_v57  ;;  %8253 = vpow2.f32 %v5037_v51  ;;  %v4943_v44 = vmul.f32 1.442695, %v20018_v54  ;;  %v20020_v19 = vld [vmem:[#allocation111_spill] sm:$0xff]  ;;  %20021 = vst [vmem:[#allocation100_spill] sm:$0xff] %v13919_v33  ;;  %v13931_v34 = vpop.eup %8237 }
 0x4f1   : > { %v4947_v21 = vmul.f32 1.442695, %v20019_v38  ;;  %8255 = vpow2.f32 %v5041_v30  ;;  %v20022_v16 = vld [vmem:[#allocation138_spill] sm:$0xff]  ;;  %v20024_v8 = vld [vmem:[#allocation241_spill] sm:$0xff]  ;;  %v13927_v54 = vpop.f32.mrb[238].mxu0  ;;  %v13929_v46 = vpop.f32.mrb[196].mxu1  ;;  %v5689_v38 = vadd.f32 %v13810_v60, %v5688_v24  ;;  %v20028_v30 = vsub.f32 %v19857_v28, %v13454_v15 }
 0x4f2   : > { %6298 = vmatprep.subr.bf16.mxu1 %v20016_v10  ;;  %v20023_v10 = vld [vmem:[#allocation39_spill] sm:$0xff]  ;;  %20025 = vst [vmem:[#allocation31_spill] sm:$0xff] %v13927_v54  ;;  %20026 = vst [vmem:[#allocation97_spill] sm:$0xff] %v13929_v46  ;;  %8257 = vpow2.f32 %v5045_v59  ;;  %v20029_v57 = vld [vmem:[#allocation114_spill] sm:$0xff]  ;;  %v13939_v51 = vpop.f32.mrb[239].mxu0  ;;  %v13941_v9 = vpop.f32.mrb[197].mxu1  ;;  %v20032_v11 = vpack.c.bf16 %v19936_v43, %v19935_v5  ;;  %v20039_v43 = vpack.c.bf16 %v19940_v25, %v19939_v14 }
 0x4f3   : > { %20027 = vst [vmem:[#allocation233_spill] sm:$0xff] %v13931_v34  ;;  %v4951_v56 = vmul.f32 1.442695, %v20028_v30  ;;  %20030 = vst [vmem:[#allocation234_spill] sm:$0xff] %v13939_v51  ;;  %v13946_v62 = vpop.eup %8239  ;;  %8259 = vpow2.f32 %v4931_v36  ;;  %v20034_v24 = vld [vmem:[#allocation126_spill] sm:$0xff]  ;;  %v20035_v28 = vld [vmem:[#allocation105_spill] sm:$0xff]  ;;  %v20041_v36 = vsub.f32 %v19858_v6, %v13454_v15  ;;  %v20042_v30 = vsub.f32 %v19859_v50, %v13454_v15 }
 0x4f4   : > { %20031 = vst [vmem:[#allocation72_spill] sm:$0xff] %v13941_v9  ;;  %6299 = vmatpush1.bf16.msra.mxu1 %v20032_v11  ;;  %20033 = vst [vmem:[#allocation99_spill] sm:$0xff] %v13946_v62  ;;  %v20036_v34 = vld [vmem:[#allocation184_spill] sm:$0xff]  ;;  %v13954_v60 = vpop.f32.mrb[240].mxu0  ;;  %v13956_v18 = vpop.f32.mrb[198].mxu1  ;;  %8261 = vpow2.f32 %v4935_v23  ;;  %v20043_v33 = vld [vmem:[#allocation131_spill] sm:$0xff]  ;;  %v20054_v23 = vsub.f32 %v19863_v20, %v13454_v15 }
 0x4f5   : > { %20037 = vst [vmem:[#allocation98_spill] sm:$0xff] %v13954_v60  ;;  %20038 = vst [vmem:[#allocation225_spill] sm:$0xff] %v13956_v18  ;;  %6300 = vmatprep.subr.bf16.mxu1 %v20039_v43  ;;  %v13961_v5 = vpop.eup %8241  ;;  %v4955_v11 = vmul.f32 1.442695, %v20041_v36  ;;  %v4959_v59 = vmul.f32 1.442695, %v20042_v30  ;;  %8263 = vpow2.f32 %v4939_v47 }
 0x4f6   : > { %20040 = vst [vmem:[#allocation237_spill] sm:$0xff] %v13961_v5  ;;  %v13971_v9 = vpop.f32.mrb[241].mxu0  ;;  %v13973_v60 = vpop.f32.mrb[199].mxu1  ;;  %v20047_v14 = vld [vmem:[#allocation152_spill] sm:$0xff]  ;;  %v20048_v6 = vld [vmem:[#allocation25_spill] sm:$0xff]  ;;  %8265 = vpow2.f32 %v4943_v44  ;;  %v20061_v20 = vld [vmem:[#allocation51_spill] sm:$0xff] }
 0x4f7   : > { %20044 = vst [vmem:[#allocation238_spill] sm:$0xff] %v13971_v9  ;;  %20045 = vst [vmem:[#allocation276_spill] sm:$0xff] %v13973_v60  ;;  %v13975_v25 = vpop.eup %8243  ;;  %v20049_v36 = vld [vmem:[#allocation176_spill] sm:$0xff]  ;;  %v13983_v30 = vpop.f32.mrb[242].mxu0  ;;  %v4967_v60 = vmul.f32 1.442695, %v20054_v23  ;;  %8267 = vpow2.f32 %v4947_v21  ;;  %v5690_v21 = vadd.f32 %v13817_v29, %v5689_v38 }
 0x4f8   : > { %20046 = vst [vmem:[#allocation75_spill] sm:$0xff] %v13975_v25  ;;  %20050 = vst [vmem:[#allocation153_spill] sm:$0xff] %v13983_v30  ;;  %v13985_v5 = vpop.f32.mrb[200].mxu1  ;;  %v13987_v62 = vpop.eup %8245  ;;  %v20053_v25 = vsub.f32 %v19862_v1, %v13454_v15  ;;  %v20055_v43 = vld [vmem:[#allocation33_spill] sm:$0xff]  ;;  %v20060_v1 = vld [vmem:[#allocation88_spill] sm:$0xff]  ;;  %8269 = vpow2.f32 %v4951_v56 }
 0x4f9   : > { %20051 = vst [vmem:[#allocation159_spill] sm:$0xff] %v13985_v5  ;;  %20052 = vst [vmem:[#allocation277_spill] sm:$0xff] %v13987_v62  ;;  %v13997_v46 = vpop.f32.mrb[243].mxu0  ;;  %v13999_v50 = vpop.f32.mrb[201].mxu1  ;;  %v20058_v5 = vpack.c.bf16 %v19943_v4, %v19942_v3  ;;  %v20062_v62 = vld [vmem:[#allocation268_spill] sm:$0xff]  ;;  %v20065_v4 = vpack.c.bf16 %v19946_v2, %v19945_v39  ;;  %8271 = vpow2.f32 %v4955_v11  ;;  %v20072_v2 = vld [vmem:[#allocation203_spill] sm:$0xff]  ;;  %v20079_v39 = vsub.f32 %v19869_v63, %v13454_v15 }
 0x4fa   : > { %v4963_v47 = vmul.f32 1.442695, %v20053_v25  ;;  %20056 = vst [vmem:[#allocation120_spill] sm:$0xff] %v13997_v46  ;;  %20057 = vst [vmem:[#allocation87_spill] sm:$0xff] %v13999_v50  ;;  %v14004_v44 = vpop.eup %8247  ;;  %v14012_v30 = vpop.f32.mrb[244].mxu0  ;;  %v20068_v25 = vld [vmem:[#allocation199_spill] sm:$0xff]  ;;  %8273 = vpow2.f32 %v4959_v59 }
 0x4fb   : > { %6301 = vmatpush1.bf16.msra.mxu1 %v20058_v5  ;;  %20059 = vst [vmem:[#allocation219_spill] sm:$0xff] %v14004_v44  ;;  %20063 = vst [vmem:[#allocation78_spill] sm:$0xff] %v14012_v30  ;;  %v14014_v46 = vpop.f32.mrb[202].mxu1  ;;  %v14019_v3 = vpop.eup %8249  ;;  %v20067_v5 = vsub.f32 %v19867_v48, %v13454_v15  ;;  %v20073_v38 = vld [vmem:[#allocation287_spill] sm:$0xff]  ;;  %v4979_v29 = vmul.f32 1.442695, %v20079_v39 }
 0x4fc   : > { %20064 = vst [vmem:[#allocation240_spill] sm:$0xff] %v14014_v46  ;;  %6302 = vmatprep.subr.bf16.mxu1 %v20065_v4  ;;  %20066 = vst [vmem:[#allocation76_spill] sm:$0xff] %v14019_v3  ;;  %v14027_v44 = vpop.f32.mrb[245].mxu0  ;;  %v14029_v50 = vpop.f32.mrb[203].mxu1  ;;  %v20074_v4 = vld [vmem:[#allocation294_spill] sm:$0xff]  ;;  %v20080_v56 = vld [vmem:[#allocation148_spill] sm:$0xff]  ;;  %8275 = vpow2.f32 %v4963_v47 }
 0x4fd   : > { %v4971_v23 = vmul.f32 1.442695, %v20067_v5  ;;  %20069 = vst [vmem:[#allocation223_spill] sm:$0xff] %v14027_v44  ;;  %20070 = vst [vmem:[#allocation226_spill] sm:$0xff] %v14029_v50  ;;  %v14031_v46 = vpop.eup %8251  ;;  %v14039_v5 = vpop.f32.mrb[246].mxu0  ;;  %8277 = vpow2.f32 %v4967_v60  ;;  %v20092_v47 = vld [vmem:[#allocation37_spill] sm:$0xff] }
 0x4fe   : > { %20071 = vst [vmem:[#allocation118_spill] sm:$0xff] %v14031_v46  ;;  %20075 = vst [vmem:[#allocation85_spill] sm:$0xff] %v14039_v5  ;;  %v14041_v3 = vpop.f32.mrb[204].mxu1  ;;  %v14043_v9 = vpop.eup %8253  ;;  %v20078_v46 = vsub.f32 %v19868_v55, %v13454_v15  ;;  %v20085_v55 = vld [vmem:[#allocation49_spill] sm:$0xff]  ;;  %v20107_v60 = vld [vmem:[#allocation68_spill] sm:$0xff] }
 0x4ff   : > { %20076 = vst [vmem:[#allocation248_spill] sm:$0xff] %v14041_v3  ;;  %20077 = vst [vmem:[#allocation79_spill] sm:$0xff] %v14043_v9  ;;  %v14053_v44 = vpop.f32.mrb[247].mxu0  ;;  %v14055_v48 = vpop.f32.mrb[205].mxu1  ;;  %v20083_v3 = vpack.c.bf16 %v19948_v7, %v19947_v22  ;;  %v20090_v22 = vpack.c.bf16 %v19952_v37, %v19951_v41  ;;  %8279 = vpow2.f32 %v4971_v23  ;;  %v20106_v23 = vsub.f32 %v20010_v45, %v13874_v27  ;;  %v20132_v13 = vld [vmem:[#allocation81_spill] sm:$0xff] }
 0x500   : > { %v4975_v11 = vmul.f32 1.442695, %v20078_v46  ;;  %20081 = vst [vmem:[#allocation146_spill] sm:$0xff] %v14053_v44  ;;  %20082 = vst [vmem:[#allocation232_spill] sm:$0xff] %v14055_v48  ;;  %v14060_v59 = vpop.eup %8255  ;;  %v14068_v5 = vpop.f32.mrb[248].mxu0  ;;  %v3549_v37 = vrot.slane %v20107_v60, 4  ;;  %v20117_v45 = vsub.f32 %v20013_v42, %v13874_v27 }
 0x501   : > { %6303 = vmatpush1.bf16.msra.mxu1 %v20083_v3  ;;  %20084 = vst [vmem:[#allocation46_spill] sm:$0xff] %v14060_v59  ;;  %20088 = vst [vmem:[#allocation239_spill] sm:$0xff] %v14068_v5  ;;  %v14070_v44 = vpop.f32.mrb[206].mxu1  ;;  %v14075_v7 = vpop.eup %8257  ;;  %v20093_v3 = vsub.f32 %v20092_v47, %v13454_v15  ;;  %v20094_v59 = vld [vmem:[#allocation48_spill] sm:$0xff]  ;;  %v20109_v47 = vld [vmem:[#allocation257_spill] sm:$0xff] }
 0x502   : > { %20089 = vst [vmem:[#allocation113_spill] sm:$0xff] %v14070_v44  ;;  %6304 = vmatprep.subr.bf16.mxu1 %v20090_v22  ;;  %20091 = vst [vmem:[#allocation121_spill] sm:$0xff] %v14075_v7  ;;  %v20095_v39 = vsub.f32 %v20094_v59, %v13454_v15  ;;  %v14085_v30 = vpop.f32.mrb[249].mxu0  ;;  %v14087_v44 = vpop.f32.mrb[207].mxu1  ;;  %8281 = vpow2.f32 %v4975_v11  ;;  %v20110_v22 = vld [vmem:[#allocation181_spill] sm:$0xff] }
 0x503   : > { %v4983_v46 = vmul.f32 1.442695, %v20093_v3  ;;  %20097 = vst [vmem:[#allocation236_spill] sm:$0xff] %v14085_v30  ;;  %20098 = vst [vmem:[#allocation58_spill] sm:$0xff] %v14087_v44  ;;  %v14089_v41 = vpop.eup %8259  ;;  %v14099_v7 = vpop.f32.mrb[208].mxu1  ;;  %v5691_v44 = vadd.f32 %v13826_v31, %v5690_v21  ;;  %v20111_v59 = vpack.c.bf16 %v20109_v47, %v20110_v22  ;;  %v20114_v3 = vld [vmem:[#allocation216_spill] sm:$0xff]  ;;  %8283 = vpow2.f32 %v4979_v29 }
 0x504   : > { %v4987_v48 = vmul.f32 1.442695, %v20095_v39  ;;  %20099 = vst [vmem:[#allocation141_spill] sm:$0xff] %v14089_v41  ;;  %v14097_v39 = vpop.f32.mrb[250].mxu0  ;;  %20104 = vst [vmem:[#allocation242_spill] sm:$0xff] %v14099_v7  ;;  %v14101_v5 = vpop.eup %8261  ;;  %v20115_v21 = vsub.f32 %v20114_v3, %v13443_v32  ;;  %v20118_v31 = vld [vmem:[#allocation139_spill] sm:$0xff] }
 0x505   : > { %20103 = vst [vmem:[#allocation40_spill] sm:$0xff] %v14097_v39  ;;  %20105 = vst [vmem:[#allocation92_spill] sm:$0xff] %v14101_v5  ;;  %v4801_v30 = vmul.f32 1.442695, %v20106_v23  ;;  %v14108_v50 = vpop.f32.mrb[251].mxu0  ;;  %6305 = vmatpush1.bf16.msra.mxu1 %v20111_v59  ;;  %v14113_v39 = vpop.f32.mrb[209].mxu1  ;;  %8285 = vpow2.f32 %v4983_v46 }
 0x506   : > { %20108 = vst [vmem:[#allocation66_spill] sm:$0xff] %v14108_v50  ;;  %20112 = vst [vmem:[#allocation151_spill] sm:$0xff] %v14113_v39  ;;  %v14115_v7 = vpop.eup %8263  ;;  %v14120_v11 = vmul.f32 1.442695, %v20115_v21  ;;  %v4805_v23 = vmul.f32 1.442695, %v20117_v45  ;;  %8287 = vpow2.f32 %v4987_v48 }
 0x507   : > { %20113 = vst [vmem:[#allocation103_spill] sm:$0xff] %v14115_v7  ;;  %v20119_v50 = vld [vmem:[#allocation133_spill] sm:$0xff]  ;;  %v14129_v47 = vpop.eup %8265  ;;  %v20122_v59 = vld [vmem:[#allocation10_spill] sm:$0xff]  ;;  %v20125_v3 = vld [vmem:[#allocation251_spill] sm:$0xff]  ;;  %v14139_v42 = vpop.f32.mrb[252].mxu0  ;;  %8289 = vpow2.f32 %v4801_v30 }
 0x508   : > { %20116 = vst [vmem:[#allocation243_spill] sm:$0xff] %v14120_v11  ;;  %v20120_v9 = vpack.c.bf16 %v20118_v31, %v20119_v50  ;;  %20121 = vst [vmem:[#allocation174_spill] sm:$0xff] %v14129_v47  ;;  %v20123_v39 = vsub.f32 %v20122_v59, %v13443_v32  ;;  %v20126_v29 = vsub.f32 %v20125_v3, %v13454_v15  ;;  %v14141_v45 = vpop.f32.mrb[210].mxu1  ;;  %v20129_v31 = vld [vmem:[#allocation189_spill] sm:$0xff]  ;;  %v14145_v22 = vpop.eup %8267  ;;  %v20134_v59 = vld [vmem:[#allocation171_spill] sm:$0xff]  ;;  %8291 = vpow2.f32 %v4805_v23 }
 0x509   : > { %20127 = vst [vmem:[#allocation191_spill] sm:$0xff] %v14139_v42  ;;  %20128 = vst [vmem:[#allocation179_spill] sm:$0xff] %v14141_v45  ;;  %v20133_v32 = vsub.f32 %v20132_v13, %v13454_v15  ;;  %v20135_v46 = vsub.f32 %v20134_v59, %v13454_v15  ;;  %v20136_v3 = vsub.f32 %v20014_v61, %v13874_v27  ;;  %v14156_v11 = vpop.eup %8269  ;;  %v20138_v50 = vld [vmem:[#allocation70_spill] sm:$0xff]  ;;  %v14168_v47 = vpop.f32.mrb[211].mxu1 }
 0x50a   : > { %6306 = vmatprep.subr.bf16.mxu1 %v20120_v9  ;;  %v14134_v63 = vmul.f32 1.442695, %v20123_v39  ;;  %v4991_v21 = vmul.f32 1.442695, %v20126_v29  ;;  %v20130_v9 = vld [vmem:[#allocation6_spill] sm:$0xff]  ;;  %20131 = vst [vmem:[#allocation104_spill] sm:$0xff] %v14145_v22  ;;  %v5692_v45 = vadd.f32 %v13833_v26, %v5691_v44  ;;  %v20139_v42 = vsub.f32 %v20138_v50, %v13454_v15  ;;  %v14170_v61 = vpop.eup %8271 }
 0x50b   : > { %v4995_v39 = vmul.f32 1.442695, %v20133_v32  ;;  %v4809_v29 = vmul.f32 1.442695, %v20136_v3  ;;  %20137 = vst [vmem:[#allocation160_spill] sm:$0xff] %v14156_v11  ;;  %v3550_v13 = vmax.f32 %v20107_v60, %v3549_v37  ;;  %v14163_v32 = vpop.f32.mrb[253].mxu0  ;;  %v20152_v37 = vsub.f32 %v20015_v17, %v13874_v27 }
 0x50c   : > { %20124 = vst [vmem:[#allocation95_spill] sm:$0xff] %v14134_v63  ;;  %v4999_v63 = vmul.f32 1.442695, %v20135_v46  ;;  %v5003_v48 = vmul.f32 1.442695, %v20139_v42  ;;  %20140 = vst [vmem:[#allocation84_spill] sm:$0xff] %v14163_v32  ;;  %8293 = vpow2.f32 %v4991_v21 }
 0x50d   : > { %v20141_v22 = vld [vmem:[#allocation127_spill] sm:$0xff]  ;;  %v20142_v59 = vld [vmem:[#allocation258_spill] sm:$0xff]  ;;  %20144 = vst [vmem:[#allocation246_spill] sm:$0xff] %v14168_v47  ;;  %20145 = vst [vmem:[#allocation112_spill] sm:$0xff] %v14170_v61  ;;  %v4813_v60 = vmul.f32 1.442695, %v20152_v37  ;;  %8295 = vpow2.f32 %v4809_v29 }
 0x50e   : > { %v20143_v46 = vpack.c.bf16 %v20141_v22, %v20142_v59  ;;  %v20146_v3 = vld [vmem:[#allocation197_spill] sm:$0xff]  ;;  %v20149_v50 = vld [vmem:[#allocation59_spill] sm:$0xff]  ;;  %v20153_v22 = vld [vmem:[#allocation34_spill] sm:$0xff]  ;;  %v14202_v17 = vpop.f32.mrb[212].mxu1  ;;  %8297 = vpow2.f32 %v4995_v39 }
 0x50f   : > { %v20147_v44 = vsub.f32 %v20146_v3, %v13454_v15  ;;  %v20150_v30 = vsub.f32 %v20149_v50, %v13454_v15  ;;  %v20154_v59 = vpack.c.bf16 %v19971_v0, %v20153_v22  ;;  %v20156_v3 = vld [vmem:[#allocation69_spill] sm:$0xff]  ;;  %v20159_v50 = vld [vmem:[#allocation267_spill] sm:$0xff]  ;;  %20163 = vst [vmem:[#allocation60_spill] sm:$0xff] %v14202_v17  ;;  %v20167_v21 = vld [vmem:[#allocation272_spill] sm:$0xff]  ;;  %v14224_v22 = vadd.f32 %v13841_v58, %v5692_v45 }
 0x510   : > { %6307 = vmatpush1.bf16.msra.mxu1 %v20143_v46  ;;  %v14188_v46 = vpop.eup %8273  ;;  %v20164_v37 = vld [vmem:[#allocation29_spill] sm:$0xff]  ;;  %8299 = vpow2.f32 %v4813_v60  ;;  %v20198_v60 = vsub.f32 %v20023_v10, %v13874_v27 }
 0x511   : > { %v14175_v26 = vmul.f32 1.442695, %v20147_v44  ;;  %v14180_v42 = vmul.f32 1.442695, %v20150_v30  ;;  %6308 = vmatprep.subr.bf16.mxu1 %v20154_v59  ;;  %20155 = vst [vmem:[#allocation93_spill] sm:$0xff] %v14188_v46  ;;  %v20157_v44 = vsub.f32 %v20156_v3, %v13454_v15  ;;  %v20160_v30 = vsub.f32 %v20159_v50, %v13454_v15  ;;  %v20165_v0 = vld [vmem:[#allocation209_spill] sm:$0xff]  ;;  %v14206_v59 = vpop.eup %8275 }
 0x512   : > { %20166 = vst [vmem:[#allocation71_spill] sm:$0xff] %v14206_v59  ;;  %v20168_v46 = vsub.f32 %v20167_v21, %v13454_v15  ;;  %v14221_v61 = vpop.eup %8277  ;;  %20175 = vst [vmem:[#allocation52_spill] sm:$0xff] %v14224_v22  ;;  %v20176_v59 = vld [vmem:[#allocation284_spill] sm:$0xff]  ;;  %v20181_v29 = vld [vmem:[#allocation149_spill] sm:$0xff]  ;;  %8301 = vpow2.f32 %v4999_v63  ;;  %v20202_v63 = vsub.f32 %v20024_v8, %v13874_v27 }
 0x513   : > { %20148 = vst [vmem:[#allocation183_spill] sm:$0xff] %v14175_v26  ;;  %20151 = vst [vmem:[#allocation32_spill] sm:$0xff] %v14180_v42  ;;  %v14193_v26 = vmul.f32 1.442695, %v20157_v44  ;;  %v14198_v23 = vmul.f32 1.442695, %v20160_v30  ;;  %v20173_v30 = vsub.f32 %v20020_v19, %v13874_v27 }
 0x514   : > { %v14200_v42 = vpop.f32.mrb[254].mxu0  ;;  %v14211_v3 = vmul.f32 1.442695, %v20168_v46  ;;  %v20170_v44 = vld [vmem:[#allocation163_spill] sm:$0xff]  ;;  %20174 = vst [vmem:[#allocation57_spill] sm:$0xff] %v14221_v61  ;;  %v20177_v46 = vsub.f32 %v20176_v59, %v13454_v15  ;;  %v14236_v19 = vpop.f32.mrb[213].mxu1 }
 0x515   : > { %20158 = vst [vmem:[#allocation201_spill] sm:$0xff] %v14193_v26  ;;  %20161 = vst [vmem:[#allocation204_spill] sm:$0xff] %v14198_v23  ;;  %v20171_v26 = vsub.f32 %v20170_v44, %v13454_v15  ;;  %v4817_v23 = vmul.f32 1.442695, %v20173_v30  ;;  %v14231_v44 = vpop.f32.mrb[255].mxu0  ;;  %v14238_v30 = vpop.eup %8279  ;;  %v20185_v61 = vld [vmem:[#allocation292_spill] sm:$0xff] }
 0x516   : > { %20162 = vst [vmem:[#allocation23_spill] sm:$0xff] %v14200_v42  ;;  %20169 = vst [vmem:[#allocation117_spill] sm:$0xff] %v14211_v3  ;;  %v14229_v21 = vmul.f32 1.442695, %v20177_v46  ;;  %v3551_v3 = vrot.slane %v3550_v13, 2  ;;  %v20186_v45 = vsub.f32 %v20185_v61, %v13454_v15  ;;  %v20188_v22 = vld [vmem:[#allocation298_spill] sm:$0xff]  ;;  %v14256_v58 = vpop.eup %8281 }
 0x517   : > { %v14216_v50 = vmul.f32 1.442695, %v20171_v26  ;;  %20179 = vst [vmem:[#allocation130_spill] sm:$0xff] %v14231_v44  ;;  %v20180_v26 = vld [vmem:[#allocation86_spill] sm:$0xff]  ;;  %20183 = vst [vmem:[#allocation36_spill] sm:$0xff] %v14236_v19  ;;  %v20189_v59 = vsub.f32 %v20188_v22, %v13454_v15  ;;  %v20195_v61 = vld [vmem:[#allocation173_spill] sm:$0xff]  ;;  %v5720_v22 = vadd.f32 %v14101_v5, %v14089_v41  ;;  %8303 = vpow2.f32 %v4817_v23 }
 0x518   : > { %20178 = vst [vmem:[#allocation194_spill] sm:$0xff] %v14229_v21  ;;  %20184 = vst [vmem:[#allocation185_spill] sm:$0xff] %v14238_v30  ;;  %v14243_v39 = vmul.f32 1.442695, %v20186_v45  ;;  %v20191_v21 = vsub.f32 %v20022_v16, %v13874_v27  ;;  %v20196_v45 = vsub.f32 %v20195_v61, %v13454_v15  ;;  %v4825_v16 = vmul.f32 1.442695, %v20198_v60 }
 0x519   : > { %20172 = vst [vmem:[#allocation142_spill] sm:$0xff] %v14216_v50  ;;  %v20182_v50 = vpack.c.bf16 %v20180_v26, %v20181_v29  ;;  %v14248_v46 = vmul.f32 1.442695, %v20189_v59  ;;  %20194 = vst [vmem:[#allocation14_spill] sm:$0xff] %v14256_v58  ;;  %v14270_v59 = vpop.f32.mrb[214].mxu1  ;;  %8305 = vpow2.f32 %v5003_v48  ;;  %v20207_v23 = vsub.f32 %v20036_v34, %v13874_v27  ;;  %v20258_v30 = vld [vmem:[#allocation89_spill] sm:$0xff] }
 0x51a   : > { %20187 = vst [vmem:[#allocation206_spill] sm:$0xff] %v14243_v39  ;;  %v4821_v26 = vmul.f32 1.442695, %v20191_v21  ;;  %v14261_v39 = vmul.f32 1.442695, %v20196_v45  ;;  %v14268_v21 = vpop.f32.mrb[0].mxu0  ;;  %v20204_v45 = vsub.f32 %v20034_v24, %v13874_v27  ;;  %v20214_v34 = vsub.f32 %v20047_v14, %v13874_v27 }
 0x51b   : > { %6309 = vmatpush1.bf16.msra.mxu1 %v20182_v50  ;;  %20190 = vst [vmem:[#allocation9_spill] sm:$0xff] %v14248_v46  ;;  %v20192_v50 = vld [vmem:[#allocation147_spill] sm:$0xff]  ;;  %20199 = vst [vmem:[#allocation228_spill] sm:$0xff] %v14268_v21  ;;  %v4845_v8 = vmul.f32 1.442695, %v20207_v23  ;;  %v14296_v24 = vpop.f32.mrb[215].mxu1  ;;  %v20219_v14 = vsub.f32 %v20055_v43, %v13874_v27  ;;  %v20225_v43 = vsub.f32 %v20062_v62, %v13874_v27 }
 0x51c   : > { %v20193_v29 = vpack.c.bf16 %v19978_v35, %v20192_v50  ;;  %20197 = vst [vmem:[#allocation190_spill] sm:$0xff] %v14261_v39  ;;  %20200 = vst [vmem:[#allocation166_spill] sm:$0xff] %v14270_v59  ;;  %v14272_v35 = vpop.eup %8283  ;;  %v4829_v50 = vmul.f32 1.442695, %v20202_v63  ;;  %v4837_v10 = vmul.f32 1.442695, %v20204_v45  ;;  %v20206_v39 = vsub.f32 %v20035_v28, %v13874_v27 }
 0x51d   : > { %20201 = vst [vmem:[#allocation195_spill] sm:$0xff] %v14272_v35  ;;  %v14283_v60 = vpop.eup %8285  ;;  %v3552_v63 = vmax.f32 %v3550_v13, %v3551_v3  ;;  %v14291_v35 = vpop.f32.mrb[1].mxu0  ;;  %20211 = vst [vmem:[#allocation247_spill] sm:$0xff] %v14296_v24  ;;  %8307 = vpow2.f32 %v4821_v26  ;;  %v20213_v28 = vsub.f32 %v20043_v33, %v13874_v27  ;;  %v20215_v13 = vsub.f32 %v20048_v6, %v13874_v27  ;;  %v20271_v5 = vld [vmem:[#allocation11_spill] sm:$0xff]  ;;  %v20302_v24 = vld [vmem:[#allocation192_spill] sm:$0xff] }
 0x51e   : > { %6310 = vmatprep.subr.bf16.mxu1 %v20193_v29  ;;  %v20203_v29 = vsub.f32 %v20029_v57, %v13874_v27  ;;  %20205 = vst [vmem:[#allocation82_spill] sm:$0xff] %v14283_v60  ;;  %v4841_v46 = vmul.f32 1.442695, %v20206_v39  ;;  %20208 = vst [vmem:[#allocation154_spill] sm:$0xff] %v14291_v35  ;;  %v20209_v57 = vld [vmem:[#allocation22_spill] sm:$0xff]  ;;  %v14298_v45 = vpop.eup %8287  ;;  %v14315_v26 = vadd.f32 %v14115_v7, %v5720_v22  ;;  %8309 = vpow2.f32 %v4825_v16  ;;  %v14325_v6 = vpop.f32.mrb[2].mxu0 }
 0x51f   : > { %20212 = vst [vmem:[#allocation21_spill] sm:$0xff] %v14298_v45  ;;  %v4849_v48 = vmul.f32 1.442695, %v20213_v28  ;;  %v4853_v39 = vmul.f32 1.442695, %v20214_v34  ;;  %v14312_v23 = vpop.eup %8289  ;;  %v20218_v33 = vsub.f32 %v20049_v36, %v13874_v27  ;;  %20220 = vst [vmem:[#allocation187_spill] sm:$0xff] %v14325_v6  ;;  %8311 = vpow2.f32 %v4829_v50 }
 0x520   : > { %v4833_v61 = vmul.f32 1.442695, %v20203_v29  ;;  %v20210_v29 = vpack.c.bf16 %v19983_v52, %v20209_v57  ;;  %v4857_v3 = vmul.f32 1.442695, %v20215_v13  ;;  %v20216_v52 = vpack.c.bf16 %v19989_v49, %v19988_v12  ;;  %20217 = vst [vmem:[#allocation24_spill] sm:$0xff] %v14312_v23  ;;  %v14327_v28 = vpop.f32.mrb[216].mxu1  ;;  %v14329_v12 = vpop.eup %8291 }
 0x521   : > { %v4861_v57 = vmul.f32 1.442695, %v20218_v33  ;;  %20221 = vst [vmem:[#allocation7_spill] sm:$0xff] %v14327_v28  ;;  %20222 = vst [vmem:[#allocation12_spill] sm:$0xff] %v14329_v12  ;;  %v20223_v49 = vsub.f32 %v20060_v1, %v13874_v27  ;;  %v20224_v36 = vsub.f32 %v20061_v20, %v13874_v27  ;;  %v14344_v34 = vmul.f32 1.442695, %v20225_v43  ;;  %v14346_v13 = vpop.eup %8293 }
 0x522   : > { %6311 = vmatpush1.bf16.msra.mxu1 %v20210_v29  ;;  %v14323_v29 = vmul.f32 1.442695, %v20219_v14  ;;  %20226 = vst [vmem:[#allocation211_spill] sm:$0xff] %v14346_v13  ;;  %8313 = vpow2.f32 %v4833_v61  ;;  %v20227_v50 = vsub.f32 %v20068_v25, %v13874_v27  ;;  %v20228_v1 = vsub.f32 %v20072_v2, %v13874_v27  ;;  %v14360_v14 = vpop.f32.mrb[3].mxu0  ;;  %v14365_v61 = vpop.f32.mrb[217].mxu1  ;;  %v20234_v43 = vld [vmem:[#allocation102_spill] sm:$0xff] }
 0x523   : > { %6312 = vmatprep.subr.bf16.mxu1 %v20216_v52  ;;  %v14334_v22 = vmul.f32 1.442695, %v20223_v49  ;;  %v14339_v16 = vmul.f32 1.442695, %v20224_v36  ;;  %v5609_v20 = vadd.f32 %v14329_v12, %v14312_v23  ;;  %20229 = vst [vmem:[#allocation53_spill] sm:$0xff] %v14360_v14  ;;  %v20230_v62 = vpack.c.bf16 %v19995_v40, %v19994_v53  ;;  %20231 = vst [vmem:[#allocation208_spill] sm:$0xff] %v14365_v61  ;;  %v14367_v49 = vpop.eup %8295 }
 0x524   : > { %v14351_v52 = vmul.f32 1.442695, %v20227_v50  ;;  %v14356_v33 = vmul.f32 1.442695, %v20228_v1  ;;  %20232 = vst [vmem:[#allocation198_spill] sm:$0xff] %v14367_v49  ;;  %8315 = vpow2.f32 %v4837_v10  ;;  %v3553_v25 = vrot.slane %v3552_v63, 1  ;;  %v14380_v40 = vpop.eup %8297 }
 0x525   : > { %v20233_v36 = vld [vmem:[#allocation155_spill] sm:$0xff]  ;;  %v3740_v50 = vmax.f32 %v20234_v43, %v13939_v51  ;;  %v14373_v1 = vpop.f32.mrb[4].mxu0  ;;  %v20236_v13 = vpack.c.bf16 %v20130_v9, %v20129_v31  ;;  %v14378_v53 = vpop.f32.mrb[218].mxu1  ;;  %20238 = vst [vmem:[#allocation182_spill] sm:$0xff] %v14380_v40  ;;  %8317 = vpow2.f32 %v4841_v46  ;;  %v20239_v10 = vsub.f32 %v20073_v38, %v13874_v27  ;;  %v20240_v51 = vld [vmem:[#allocation97_spill] sm:$0xff]  ;;  %v20244_v46 = vld [vmem:[#allocation98_spill] sm:$0xff] }
 0x526   : > { %6313 = vmatpush1.bf16.msra.mxu1 %v20230_v62  ;;  %v3703_v2 = vmax.f32 %v20233_v36, %v13927_v54  ;;  %20235 = vst [vmem:[#allocation177_spill] sm:$0xff] %v14373_v1  ;;  %20237 = vst [vmem:[#allocation178_spill] sm:$0xff] %v14378_v53  ;;  %v5610_v54 = vadd.f32 %v14367_v49, %v5609_v20  ;;  %v14390_v36 = vpop.f32.mrb[5].mxu0  ;;  %v14392_v45 = vpop.f32.mrb[219].mxu1  ;;  %8319 = vpow2.f32 %v4845_v8  ;;  %v20245_v38 = vld [vmem:[#allocation238_spill] sm:$0xff]  ;;  %v20284_v53 = vld [vmem:[#allocation169_spill] sm:$0xff] }
 0x527   : > { %6314 = vmatprep.subr.bf16.mxu1 %v20236_v13  ;;  %v14385_v62 = vmul.f32 1.442695, %v20239_v10  ;;  %20241 = vst [vmem:[#allocation218_spill] sm:$0xff] %v14390_v36  ;;  %20242 = vst [vmem:[#allocation186_spill] sm:$0xff] %v14392_v45  ;;  %v14394_v31 = vpop.eup %8299  ;;  %v14396_v9 = vmax.f32 %v3552_v63, %v3553_v25  ;;  %v14402_v10 = vmax.f32 %v3740_v50, %v20245_v38  ;;  %v14404_v40 = vpop.f32.mrb[6].mxu0  ;;  %8321 = vpow2.f32 %v4849_v48  ;;  %v20250_v63 = vld [vmem:[#allocation276_spill] sm:$0xff] }
 0x528   : > { %20243 = vst [vmem:[#allocation101_spill] sm:$0xff] %v14394_v31  ;;  %v14399_v13 = vmax.f32 %v3703_v2, %v20244_v46  ;;  %20246 = vst [vmem:[#allocation128_spill] sm:$0xff] %v14404_v40  ;;  %v14406_v20 = vpop.f32.mrb[220].mxu1  ;;  %v14408_v43 = vpop.eup %8301  ;;  %v20249_v60 = vsub.f32 %v20074_v4, %v13874_v27  ;;  %v5611_v8 = vadd.f32 %v14394_v31, %v5610_v54  ;;  %v20251_v25 = vld [vmem:[#allocation72_spill] sm:$0xff]  ;;  %8323 = vpow2.f32 %v4853_v39  ;;  %v20257_v48 = vld [vmem:[#allocation205_spill] sm:$0xff] }
 0x529   : > { %20247 = vst [vmem:[#allocation172_spill] sm:$0xff] %v14406_v20  ;;  %20248 = vst [vmem:[#allocation193_spill] sm:$0xff] %v14408_v43  ;;  %v14418_v46 = vpop.f32.mrb[7].mxu0  ;;  %v20253_v50 = vpack.c.bf16 %v20165_v0, %v20164_v37  ;;  %v14423_v38 = vpop.f32.mrb[221].mxu1  ;;  %v20256_v4 = vld [vmem:[#allocation180_spill] sm:$0xff]  ;;  %8325 = vpow2.f32 %v4857_v3  ;;  %v20262_v0 = vsub.f32 %v20080_v56, %v13874_v27  ;;  %v20272_v54 = vpack.c.bf16 %v20271_v5, %v20271_v5  ;;  %v20276_v45 = vld [vmem:[#allocation109_spill] sm:$0xff] }
 0x52a   : > { %v14413_v58 = vmul.f32 1.442695, %v20249_v60  ;;  %20252 = vst [vmem:[#allocation157_spill] sm:$0xff] %v14418_v46  ;;  %20254 = vst [vmem:[#allocation119_spill] sm:$0xff] %v14423_v38  ;;  %v14425_v43 = vpop.eup %8303  ;;  %v14433_v11 = vpop.f32.mrb[8].mxu0  ;;  %v20263_v60 = vld [vmem:[#allocation244_spill] sm:$0xff]  ;;  %8327 = vpow2.f32 %v4861_v57  ;;  %v20275_v57 = vsub.f32 %v20085_v55, %v13874_v27 }
 0x52b   : > { %6315 = vmatpush1.bf16.msra.mxu1 %v20253_v50  ;;  %20255 = vst [vmem:[#allocation296_spill] sm:$0xff] %v14425_v43  ;;  %20259 = vst [vmem:[#allocation259_spill] sm:$0xff] %v14433_v11  ;;  %v14435_v20 = vpop.f32.mrb[222].mxu1  ;;  %v14437_v37 = vpop.eup %8305  ;;  %v14442_v39 = vmul.f32 1.442695, %v20262_v0  ;;  %v5612_v50 = vadd.f32 %v14425_v43, %v5611_v8  ;;  %v20269_v0 = vld [vmem:[#allocation67_spill] sm:$0xff]  ;;  %8329 = vpow2.f32 %v14323_v29 }
 0x52c   : > { %20260 = vst [vmem:[#allocation123_spill] sm:$0xff] %v14435_v20  ;;  %20261 = vst [vmem:[#allocation107_spill] sm:$0xff] %v14437_v37  ;;  %v14447_v38 = vpop.f32.mrb[9].mxu0  ;;  %v14449_v2 = vpop.f32.mrb[223].mxu1  ;;  %v20267_v37 = vld [vmem:[#allocation124_spill] sm:$0xff]  ;;  %v20268_v20 = vld [vmem:[#allocation165_spill] sm:$0xff]  ;;  %8331 = vpow2.f32 %v14334_v22 }
 0x52d   : > { %20264 = vst [vmem:[#allocation132_spill] sm:$0xff] %v14447_v38  ;;  %20265 = vst [vmem:[#allocation43_spill] sm:$0xff] %v14449_v2  ;;  %v14451_v7 = vpop.eup %8307  ;;  %v14459_v8 = vpop.f32.mrb[10].mxu0  ;;  %v4901_v3 = vmul.f32 1.442695, %v20275_v57  ;;  %v20278_v38 = vld [vmem:[#allocation16_spill] sm:$0xff]  ;;  %8333 = vpow2.f32 %v14339_v16 }
 0x52e   : > { %20266 = vst [vmem:[#allocation260_spill] sm:$0xff] %v14451_v7  ;;  %20270 = vst [vmem:[#allocation27_spill] sm:$0xff] %v14459_v8  ;;  %6317 = vmatmul.mubr.bf16.vlgmr.msra.gmra.mrb[12].mxu1 %v20272_v54  ;;  %v14464_v41 = vpop.f32.mrb[224].mxu1  ;;  %v14466_v2 = vpop.eup %8309  ;;  %v5613_v56 = vadd.f32 %v14451_v7, %v5612_v50  ;;  %v20279_v5 = vpack.c.bf16 %v20278_v38, %v20278_v38  ;;  %v20282_v55 = vld [vmem:[#allocation115_spill] sm:$0xff]  ;;  %v20283_v50 = vld [vmem:[#allocation134_spill] sm:$0xff]  ;;  %8335 = vpow2.f32 %v14344_v34 }
 0x52f   : > { %20273 = vst [vmem:[#allocation200_spill] sm:$0xff] %v14464_v41  ;;  %20274 = vst [vmem:[#allocation261_spill] sm:$0xff] %v14466_v2  ;;  %v14475_v8 = vpop.f32.mrb[11].mxu0  ;;  %v14480_v54 = vpop.f32.mrb[225].mxu1  ;;  %v20290_v28 = vld [vmem:[#allocation250_spill] sm:$0xff]  ;;  %v20295_v7 = vld [vmem:[#allocation164_spill] sm:$0xff]  ;;  %8337 = vpow2.f32 %v14351_v52 }
 0x530   : > { %20277 = vst [vmem:[#allocation262_spill] sm:$0xff] %v14475_v8  ;;  %6398 = vmatprep.mubr.bf16.mxu1 %v20279_v5  ;;  %20280 = vst [vmem:[#allocation55_spill] sm:$0xff] %v14480_v54  ;;  %v14482_v41 = vpop.eup %8311  ;;  %v14491_v8 = vpop.f32.mrb[12].mxu0  ;;  %v20288_v5 = vld [vmem:[#allocation137_spill] sm:$0xff]  ;;  %v5614_v29 = vadd.f32 %v14466_v2, %v5613_v56  ;;  %8339 = vpow2.f32 %v14356_v33  ;;  %v20307_v59 = vld [vmem:[#allocation231_spill] sm:$0xff] }
 0x531   : > { %20281 = vst [vmem:[#allocation122_spill] sm:$0xff] %v14482_v41  ;;  %20285 = vst [vmem:[#allocation263_spill] sm:$0xff] %v14491_v8  ;;  %v14493_v11 = vpop.f32.mrb[226].mxu1  ;;  %v14495_v38 = vpop.eup %8313  ;;  %v20289_v22 = vsub.f32 %v20288_v5, %v13874_v27  ;;  %8341 = vpow2.f32 %v14385_v62  ;;  %v20314_v19 = vld [vmem:[#allocation271_spill] sm:$0xff]  ;;  %v20325_v14 = vld [vmem:[#allocation297_spill] sm:$0xff] }
 0x532   : > { %20286 = vst [vmem:[#allocation264_spill] sm:$0xff] %v14493_v11  ;;  %20287 = vst [vmem:[#allocation140_spill] sm:$0xff] %v14495_v38  ;;  %v14504_v46 = vpop.f32.mrb[13].mxu0  ;;  %v14506_v61 = vpop.f32.mrb[227].mxu1  ;;  %v20294_v11 = vld [vmem:[#allocation64_spill] sm:$0xff]  ;;  %v5615_v16 = vadd.f32 %v14482_v41, %v5614_v29  ;;  %8343 = vpow2.f32 %v14413_v58  ;;  %v20319_v49 = vld [vmem:[#allocation283_spill] sm:$0xff] }
 0x533   : > { %v4905_v54 = vmul.f32 1.442695, %v20289_v22  ;;  %20291 = vst [vmem:[#allocation144_spill] sm:$0xff] %v14504_v46  ;;  %20292 = vst [vmem:[#allocation266_spill] sm:$0xff] %v14506_v61  ;;  %v14508_v8 = vpop.eup %8315  ;;  %v20296_v22 = vld [vmem:[#allocation54_spill] sm:$0xff]  ;;  %v14517_v2 = vpop.f32.mrb[14].mxu0  ;;  %8345 = vpow2.f32 %v14442_v39 }
 0x534   : > { %20293 = vst [vmem:[#allocation270_spill] sm:$0xff] %v14508_v8  ;;  %20297 = vst [vmem:[#allocation96_spill] sm:$0xff] %v14517_v2  ;;  %v14519_v57 = vpop.f32.mrb[228].mxu1  ;;  %v14521_v46 = vpop.eup %8317  ;;  %v20300_v61 = vld [vmem:[#allocation167_spill] sm:$0xff]  ;;  %v5616_v52 = vadd.f32 %v14495_v38, %v5615_v16  ;;  %8347 = vpow2.f32 %v4901_v3  ;;  %v20329_v39 = vld [vmem:[#allocation196_spill] sm:$0xff] }
 0x535   : > { %20298 = vst [vmem:[#allocation162_spill] sm:$0xff] %v14519_v57  ;;  %20299 = vst [vmem:[#allocation273_spill] sm:$0xff] %v14521_v46  ;;  %v20301_v34 = vsub.f32 %v20300_v61, %v13874_v27  ;;  %v14530_v40 = vpop.f32.mrb[15].mxu0  ;;  %v14532_v56 = vpop.f32.mrb[229].mxu1  ;;  %v20306_v57 = vld [vmem:[#allocation41_spill] sm:$0xff]  ;;  %8349 = vpow2.f32 %v4905_v54  ;;  %v20335_v6 = vld [vmem:[#allocation299_spill] sm:$0xff] }
 0x536   : > { %20303 = vst [vmem:[#allocation275_spill] sm:$0xff] %v14530_v40  ;;  %20304 = vst [vmem:[#allocation63_spill] sm:$0xff] %v14532_v56  ;;  %v14534_v2 = vpop.eup %8319  ;;  %v14543_v41 = vpop.f32.mrb[16].mxu0  ;;  %v20312_v56 = vld [vmem:[#allocation150_spill] sm:$0xff]  ;;  %v5617_v62 = vadd.f32 %v14508_v8, %v5616_v52  ;;  %v20366_v42 = vld [vmem:[#allocation73_spill] sm:$0xff] }
 0x537   : > { %v4909_v43 = vmul.f32 1.442695, %v20301_v34  ;;  %20305 = vst [vmem:[#allocation83_spill] sm:$0xff] %v14534_v2  ;;  %v20308_v34 = vld [vmem:[#allocation108_spill] sm:$0xff]  ;;  %20309 = vst [vmem:[#allocation278_spill] sm:$0xff] %v14543_v41  ;;  %v14545_v5 = vpop.f32.mrb[230].mxu1  ;;  %v14547_v40 = vpop.eup %8321  ;;  %v20313_v33 = vsub.f32 %v20312_v56, %v13874_v27  ;;  %v20367_v32 = vsub.f32 %v20366_v42, %v13454_v15 }
 0x538   : > { %20310 = vst [vmem:[#allocation279_spill] sm:$0xff] %v14545_v5  ;;  %20311 = vst [vmem:[#allocation65_spill] sm:$0xff] %v14547_v40  ;;  %v14556_v31 = vpop.f32.mrb[17].mxu0  ;;  %v14558_v29 = vpop.f32.mrb[231].mxu1  ;;  %v20318_v5 = vld [vmem:[#allocation90_spill] sm:$0xff]  ;;  %v5618_v12 = vadd.f32 %v14521_v46, %v5617_v62 }
 0x539   : > { %v4913_v36 = vmul.f32 1.442695, %v20313_v33  ;;  %20315 = vst [vmem:[#allocation249_spill] sm:$0xff] %v14556_v31  ;;  %20316 = vst [vmem:[#allocation281_spill] sm:$0xff] %v14558_v29  ;;  %v14560_v41 = vpop.eup %8323  ;;  %v20320_v33 = vld [vmem:[#allocation291_spill] sm:$0xff]  ;;  %v14569_v38 = vpop.f32.mrb[18].mxu0  ;;  %8351 = vpow2.f32 %v4909_v43  ;;  %v20357_v43 = vsub.f32 %v20263_v60, %v14396_v9 }
 0x53a   : > { %20317 = vst [vmem:[#allocation282_spill] sm:$0xff] %v14560_v41  ;;  %20321 = vst [vmem:[#allocation252_spill] sm:$0xff] %v14569_v38  ;;  %v14571_v61 = vpop.f32.mrb[232].mxu1  ;;  %v14573_v31 = vpop.eup %8325  ;;  %v20323_v29 = vld [vmem:[#allocation91_spill] sm:$0xff] }
 0x53b   : > { %20322 = vst [vmem:[#allocation253_spill] sm:$0xff] %v14571_v61  ;;  %v20324_v58 = vsub.f32 %v20323_v29, %v13874_v27  ;;  %v14582_v17 = vpop.f32.mrb[19].mxu0  ;;  %v14584_v16 = vpop.f32.mrb[233].mxu1  ;;  %v20328_v61 = vld [vmem:[#allocation217_spill] sm:$0xff]  ;;  %8353 = vpow2.f32 %v4913_v36 }
 0x53c   : > { %20326 = vst [vmem:[#allocation285_spill] sm:$0xff] %v14582_v17  ;;  %20327 = vst [vmem:[#allocation286_spill] sm:$0xff] %v14584_v16  ;;  %v14586_v38 = vpop.eup %8327  ;;  %v20330_v29 = vld [vmem:[#allocation145_spill] sm:$0xff]  ;;  %v14594_v52 = vpop.f32.mrb[20].mxu0  ;;  %v20333_v16 = vld [vmem:[#allocation168_spill] sm:$0xff] }
 0x53d   : > { %v4917_v1 = vmul.f32 1.442695, %v20324_v58  ;;  %20331 = vst [vmem:[#allocation254_spill] sm:$0xff] %v14594_v52  ;;  %v14596_v8 = vpop.f32.mrb[234].mxu1  ;;  %v14598_v56 = vpop.eup %8329  ;;  %v20334_v17 = vsub.f32 %v20333_v16, %v13874_v27  ;;  %v20344_v52 = vsub.f32 %v20256_v4, %v14396_v9 }
 0x53e   : > { %20332 = vst [vmem:[#allocation255_spill] sm:$0xff] %v14596_v8  ;;  %v14606_v35 = vpop.f32.mrb[21].mxu0  ;;  %v14608_v21 = vpop.f32.mrb[235].mxu1  ;;  %v14682_v8 = vmul.f32 1.442695, %v20367_v32  ;;  %v20374_v32 = vsub.f32 %v20269_v0, %v14396_v9 }
 0x53f   : > { %v4921_v3 = vmul.f32 1.442695, %v20334_v17  ;;  %20336 = vst [vmem:[#allocation289_spill] sm:$0xff] %v14606_v35  ;;  %20337 = vst [vmem:[#allocation290_spill] sm:$0xff] %v14608_v21  ;;  %v14610_v58 = vpop.eup %8331  ;;  %v14618_v62 = vpop.f32.mrb[22].mxu0  ;;  %v5619_v21 = vadd.f32 %v14534_v2, %v5618_v12  ;;  %8355 = vpow2.f32 %v4917_v1  ;;  %v20349_v12 = vsub.f32 %v20257_v48, %v14396_v9  ;;  %v20350_v35 = vld [vmem:[#allocation153_spill] sm:$0xff] }
 0x540   : > { %20341 = vst [vmem:[#allocation44_spill] sm:$0xff] %v14618_v62  ;;  %v14620_v46 = vpop.f32.mrb[236].mxu1  ;;  %v14622_v23 = vpop.eup %8333  ;;  %v4803_v47 = vmul.f32 1.442695, %v20344_v52  ;;  %v20351_v52 = vld [vmem:[#allocation224_spill] sm:$0xff]  ;;  %v20359_v2 = vld [vmem:[#allocation61_spill] sm:$0xff] }
 0x541   : > { %20342 = vst [vmem:[#allocation215_spill] sm:$0xff] %v14620_v46  ;;  %v14630_v44 = vpop.f32.mrb[23].mxu0  ;;  %v14632_v54 = vpop.f32.mrb[237].mxu1  ;;  %v20347_v46 = vld [vmem:[#allocation158_spill] sm:$0xff]  ;;  %v4807_v17 = vmul.f32 1.442695, %v20349_v12  ;;  %v5620_v1 = vadd.f32 %v14547_v40, %v5619_v21 }
 0x542   : > { %20345 = vst [vmem:[#allocation293_spill] sm:$0xff] %v14630_v44  ;;  %20346 = vst [vmem:[#allocation125_spill] sm:$0xff] %v14632_v54  ;;  %v14634_v16 = vpop.eup %8335  ;;  %v20348_v62 = vsub.f32 %v20347_v46, %v13874_v27  ;;  %v20352_v44 = vsub.f32 %v20351_v52, %v13454_v15  ;;  %8357 = vpow2.f32 %v4803_v47  ;;  %v20354_v27 = vsub.f32 %v20258_v30, %v14396_v9  ;;  %v14657_v48 = vpop.f32.mrb[238].mxu1  ;;  %v20364_v40 = vld [vmem:[#allocation77_spill] sm:$0xff] }
 0x543   : > { %v14644_v4 = vpop.eup %8337  ;;  %20356 = vst [vmem:[#allocation143_spill] sm:$0xff] %v14657_v48  ;;  %8359 = vpow2.f32 %v4807_v17  ;;  %v4815_v52 = vmul.f32 1.442695, %v20357_v43  ;;  %v5420_v21 = vrot.slane %v20359_v2, 2  ;;  %v5621_v30 = vadd.f32 %v14560_v41, %v5620_v1  ;;  %v14674_v17 = vpop.f32.mrb[239].mxu1  ;;  %20368 = vst [vmem:[#allocation280_spill] sm:$0xff] %v14682_v8 }
 0x544   : > { %v4925_v36 = vmul.f32 1.442695, %v20348_v62  ;;  %v14649_v54 = vmul.f32 1.442695, %v20352_v44  ;;  %v4811_v46 = vmul.f32 1.442695, %v20354_v27  ;;  %v14659_v12 = vpop.eup %8339  ;;  %8361 = vpow2.f32 %v4921_v3 }
 0x545   : > { %v14655_v62 = vpop.f32.mrb[24].mxu0  ;;  %v20358_v44 = vld [vmem:[#allocation42_spill] sm:$0xff]  ;;  %v14666_v47 = vpop.eup %8341  ;;  %v20361_v27 = vsub.f32 %v20267_v37, %v14396_v9  ;;  %20363 = vst [vmem:[#allocation274_spill] sm:$0xff] %v14674_v17  ;;  %v5457_v60 = vrot.slane %v20364_v40, 2  ;;  %v20370_v37 = vsub.f32 %v20268_v20, %v14396_v9  ;;  %v20371_v17 = vld [vmem:[#allocation129_spill] sm:$0xff]  ;;  %v20376_v20 = vsub.f32 %v20276_v45, %v14396_v9 }
 0x546   : > { %20353 = vst [vmem:[#allocation221_spill] sm:$0xff] %v14649_v54  ;;  %20355 = vst [vmem:[#allocation265_spill] sm:$0xff] %v14655_v62  ;;  %v5383_v54 = vrot.slane %v20358_v44, 2  ;;  %v14672_v62 = vpop.f32.mrb[25].mxu0  ;;  %v14677_v43 = vpop.eup %8343  ;;  %v20369_v3 = vld [vmem:[#allocation174_spill] sm:$0xff]  ;;  %8363 = vpow2.f32 %v4925_v36  ;;  %v20372_v41 = vsub.f32 %v20371_v17, %v13454_v15 }
 0x547   : > { %20360 = vst [vmem:[#allocation269_spill] sm:$0xff] %v14666_v47  ;;  %v4819_v48 = vmul.f32 1.442695, %v20361_v27  ;;  %20362 = vst [vmem:[#allocation156_spill] sm:$0xff] %v14672_v62  ;;  %v5722_v1 = vadd.f32 %v20369_v3, %v14315_v26  ;;  %v4823_v27 = vmul.f32 1.442695, %v20370_v37  ;;  %v14689_v62 = vpop.eup %8345  ;;  %8365 = vpow2.f32 %v4811_v46 }
 0x548   : > { %20365 = vst [vmem:[#allocation106_spill] sm:$0xff] %v14677_v43  ;;  %v14694_v47 = vmul.f32 1.442695, %v20372_v41  ;;  %v5622_v43 = vadd.f32 %v14573_v31, %v5621_v30  ;;  %v4827_v42 = vmul.f32 1.442695, %v20374_v32  ;;  %v14700_v26 = vpop.f32.mrb[26].mxu0  ;;  %v14702_v36 = vpop.eup %8347  ;;  %8367 = vpow2.f32 %v4815_v52 }
 0x549   : > { %20375 = vst [vmem:[#allocation175_spill] sm:$0xff] %v14700_v26  ;;  %v4831_v37 = vmul.f32 1.442695, %v20376_v20  ;;  %v14708_v15 = vadd.f32 %v5383_v54, %v20358_v44  ;;  %v14711_v41 = vadd.f32 %v5420_v21, %v20359_v2  ;;  %v14713_v46 = vpop.eup %8349  ;;  %8369 = vpow2.f32 %v4819_v48  ;;  %v14719_v52 = vpop.f32.mrb[27].mxu0  ;;  %v20382_v54 = vld [vmem:[#allocation104_spill] sm:$0xff] }
 0x54a   : > { %20373 = vst [vmem:[#allocation161_spill] sm:$0xff] %v14694_v47  ;;  %v5623_v0 = vadd.f32 %v14586_v38, %v5622_v43  ;;  %v20379_v30 = vsub.f32 %v20282_v55, %v14396_v9  ;;  %20380 = vst [vmem:[#allocation30_spill] sm:$0xff] %v14719_v52  ;;  %v14722_v45 = vadd.f32 %v5457_v60, %v20364_v40  ;;  %v14724_v32 = vpop.eup %8351  ;;  %8371 = vpow2.f32 %v4823_v27  ;;  %v20430_v26 = vld [vmem:[#allocation40_spill] sm:$0xff] }
 0x54b   : > { %20377 = vst [vmem:[#allocation288_spill] sm:$0xff] %v14708_v15  ;;  %20378 = vst [vmem:[#allocation80_spill] sm:$0xff] %v14711_v41  ;;  %v14727_v44 = vadd.f32 %v20382_v54, %v5722_v1  ;;  %v20384_v2 = vsub.f32 %v20283_v50, %v14396_v9  ;;  %v20385_v48 = vsub.f32 %v20284_v53, %v14396_v9  ;;  %v14735_v43 = vpop.eup %8353  ;;  %8373 = vpow2.f32 %v4827_v42 }
 0x54c   : > { %v4835_v17 = vmul.f32 1.442695, %v20379_v30  ;;  %20381 = vst [vmem:[#allocation295_spill] sm:$0xff] %v14722_v45  ;;  %v5624_v20 = vadd.f32 %v14598_v56, %v5623_v0  ;;  %v20386_v40 = vsub.f32 %v20290_v28, %v14396_v9  ;;  %v20387_v1 = vsub.f32 %v20294_v11, %v14396_v9  ;;  %v14744_v30 = vpop.f32.mrb[28].mxu0  ;;  %v14746_v50 = vpop.eup %8355 }
 0x54d   : > { %20383 = vst [vmem:[#allocation213_spill] sm:$0xff] %v14727_v44  ;;  %v4839_v21 = vmul.f32 1.442695, %v20384_v2  ;;  %v4843_v55 = vmul.f32 1.442695, %v20385_v48  ;;  %20388 = vst [vmem:[#allocation256_spill] sm:$0xff] %v14744_v30  ;;  %8375 = vpow2.f32 %v4831_v37  ;;  %v20389_v53 = vsub.f32 %v20295_v7, %v14396_v9  ;;  %v14759_v11 = vpop.eup %8357 }
 0x54e   : > { %v4847_v60 = vmul.f32 1.442695, %v20386_v40  ;;  %v4851_v27 = vmul.f32 1.442695, %v20387_v1  ;;  %v20390_v42 = vsub.f32 %v20296_v22, %v14396_v9  ;;  %v20391_v28 = vsub.f32 %v20302_v24, %v14396_v9  ;;  %v14774_v24 = vpop.eup %8359 }
 0x54f   : > { %v4855_v2 = vmul.f32 1.442695, %v20389_v53  ;;  %v5625_v40 = vadd.f32 %v14610_v58, %v5624_v20  ;;  %8377 = vpow2.f32 %v4835_v17  ;;  %v20392_v37 = vsub.f32 %v20306_v57, %v14396_v9  ;;  %v14772_v53 = vpop.f32.mrb[29].mxu0 }
 0x550   : > { %v4859_v0 = vmul.f32 1.442695, %v20390_v42  ;;  %v14757_v48 = vmul.f32 1.442695, %v20391_v28  ;;  %v20393_v7 = vsub.f32 %v20307_v59, %v14396_v9  ;;  %20394 = vst [vmem:[#allocation202_spill] sm:$0xff] %v14772_v53  ;;  %8379 = vpow2.f32 %v4839_v21 }
 0x551   : > { %v14765_v1 = vmul.f32 1.442695, %v20392_v37  ;;  %v20395_v42 = vsub.f32 %v20308_v34, %v14396_v9  ;;  %v20396_v57 = vsub.f32 %v20314_v19, %v14396_v9  ;;  %v20397_v59 = vsub.f32 %v20318_v5, %v14396_v9  ;;  %v14791_v37 = vpop.eup %8361 }
 0x552   : > { %v14770_v22 = vmul.f32 1.442695, %v20393_v7  ;;  %v5626_v7 = vadd.f32 %v14622_v23, %v5625_v40  ;;  %8381 = vpow2.f32 %v4843_v55  ;;  %v20398_v34 = vsub.f32 %v20319_v49, %v14396_v9  ;;  %v14806_v5 = vpop.eup %8363 }
 0x553   : > { %v14779_v20 = vmul.f32 1.442695, %v20395_v42  ;;  %v14784_v17 = vmul.f32 1.442695, %v20396_v57  ;;  %v14789_v28 = vmul.f32 1.442695, %v20397_v59  ;;  %v20399_v19 = vsub.f32 %v20320_v33, %v14396_v9 }
 0x554   : > { %v14797_v21 = vmul.f32 1.442695, %v20398_v34  ;;  %v14804_v57 = vpop.f32.mrb[30].mxu0  ;;  %8383 = vpow2.f32 %v4847_v60  ;;  %v20401_v59 = vsub.f32 %v20325_v14, %v14396_v9  ;;  %v20402_v49 = vsub.f32 %v20328_v61, %v14396_v9  ;;  %v20406_v61 = vld [vmem:[#allocation78_spill] sm:$0xff] }
 0x555   : > { %v14802_v42 = vmul.f32 1.442695, %v20399_v19  ;;  %20400 = vst [vmem:[#allocation110_spill] sm:$0xff] %v14804_v57  ;;  %v5646_v33 = vadd.f32 %v14774_v24, %v14759_v11  ;;  %v14820_v34 = vpop.f32.mrb[31].mxu0  ;;  %v14822_v19 = vpop.eup %8365  ;;  %v5627_v45 = vadd.f32 %v14634_v16, %v5626_v7  ;;  %v20404_v60 = vsub.f32 %v20329_v39, %v14396_v9  ;;  %v20412_v57 = vld [vmem:[#allocation87_spill] sm:$0xff] }
 0x556   : > { %v14811_v40 = vmul.f32 1.442695, %v20401_v59  ;;  %v14816_v55 = vmul.f32 1.442695, %v20402_v49  ;;  %20403 = vst [vmem:[#allocation45_spill] sm:$0xff] %v14820_v34  ;;  %v20405_v59 = vld [vmem:[#allocation120_spill] sm:$0xff]  ;;  %v20407_v49 = vmax.f32 %v14399_v13, %v20350_v35  ;;  %v14838_v8 = vpop.eup %8367  ;;  %v20409_v7 = vsub.f32 %v20330_v29, %v14396_v9 }
 0x557   : > { %v14828_v14 = vmul.f32 1.442695, %v20404_v60  ;;  %v3742_v41 = vmax.f32 %v14402_v10, %v20405_v59  ;;  %v14836_v47 = vpop.f32.mrb[32].mxu0  ;;  %v5647_v39 = vadd.f32 %v14822_v19, %v5646_v33  ;;  %v20410_v60 = vld [vmem:[#allocation159_spill] sm:$0xff]  ;;  %v20411_v10 = vmax.f32 %v20240_v51, %v13956_v18  ;;  %v14856_v35 = vpop.eup %8369  ;;  %v20417_v18 = vld [vmem:[#allocation85_spill] sm:$0xff] }
 0x558   : > { %v3706_v15 = vmax.f32 %v20407_v49, %v20406_v61  ;;  %20408 = vst [vmem:[#allocation94_spill] sm:$0xff] %v14836_v47  ;;  %v14843_v34 = vmul.f32 1.442695, %v20409_v7  ;;  %v20413_v13 = vmax.f32 %v20251_v25, %v20250_v63  ;;  %v14854_v61 = vpop.f32.mrb[33].mxu0  ;;  %v5628_v29 = vadd.f32 %v14644_v4, %v5627_v45  ;;  %v20416_v47 = vld [vmem:[#allocation223_spill] sm:$0xff]  ;;  %v14868_v51 = vpop.eup %8371  ;;  %v20420_v25 = vld [vmem:[#allocation226_spill] sm:$0xff] }
 0x559   : > { %v3630_v59 = vmax.f32 %v20411_v10, %v20410_v60  ;;  %20414 = vst [vmem:[#allocation111_spill] sm:$0xff] %v14854_v61  ;;  %v20415_v7 = vsub.f32 %v20335_v6, %v14396_v9  ;;  %v3743_v53 = vmax.f32 %v3742_v41, %v20416_v47  ;;  %v14866_v60 = vpop.f32.mrb[34].mxu0  ;;  %8385 = vpow2.f32 %v4851_v27  ;;  %v14875_v6 = vpop.eup %8373  ;;  %v20422_v41 = vld [vmem:[#allocation188_spill] sm:$0xff]  ;;  %v20425_v27 = vld [vmem:[#allocation239_spill] sm:$0xff] }
 0x55a   : > { %v3667_v49 = vmax.f32 %v20413_v13, %v20412_v57  ;;  %v3707_v10 = vmax.f32 %v3706_v15, %v20417_v18  ;;  %20418 = vst [vmem:[#allocation138_spill] sm:$0xff] %v14866_v60  ;;  %v5648_v13 = vadd.f32 %v14838_v8, %v5647_v39  ;;  %v20419_v57 = vld [vmem:[#allocation240_spill] sm:$0xff]  ;;  %v14873_v61 = vpop.f32.mrb[35].mxu0  ;;  %v20423_v15 = vsub.f32 %v20422_v41, %v14396_v9  ;;  %v20424_v18 = vld [vmem:[#allocation146_spill] sm:$0xff]  ;;  %v14885_v39 = vpop.eup %8375 }
 0x55b   : > { %v14862_v33 = vmul.f32 1.442695, %v20415_v7  ;;  %v3631_v63 = vmax.f32 %v3630_v59, %v20419_v57  ;;  %20421 = vst [vmem:[#allocation39_spill] sm:$0xff] %v14873_v61  ;;  %v5629_v7 = vadd.f32 %v14659_v12, %v5628_v29  ;;  %v3744_v60 = vmax.f32 %v3743_v53, %v20424_v18  ;;  %v20427_v57 = vld [vmem:[#allocation232_spill] sm:$0xff]  ;;  %v14890_v52 = vpop.eup %8377  ;;  %v20428_v29 = vld [vmem:[#allocation269_spill] sm:$0xff] }
 0x55c   : > { %v3668_v45 = vmax.f32 %v3667_v49, %v20420_v25  ;;  %v14881_v47 = vmul.f32 1.442695, %v20423_v15  ;;  %v3708_v30 = vmax.f32 %v3707_v10, %v20425_v27  ;;  %8387 = vpow2.f32 %v4855_v2  ;;  %v20426_v49 = vld [vmem:[#allocation248_spill] sm:$0xff]  ;;  %v14895_v18 = vpop.eup %8379  ;;  %v20431_v10 = vld [vmem:[#allocation113_spill] sm:$0xff] }
 0x55d   : > { %v5649_v59 = vadd.f32 %v14856_v35, %v5648_v13  ;;  %v3632_v25 = vmax.f32 %v3631_v63, %v20426_v49  ;;  %v5630_v44 = vadd.f32 %v20428_v29, %v5629_v7  ;;  %8389 = vpow2.f32 %v4859_v0  ;;  %v20429_v41 = vld [vmem:[#allocation236_spill] sm:$0xff]  ;;  %v20432_v63 = vld [vmem:[#allocation58_spill] sm:$0xff]  ;;  %v20435_v7 = vld [vmem:[#allocation191_spill] sm:$0xff] }
 0x55e   : > { %v3669_v61 = vmax.f32 %v3668_v45, %v20427_v57  ;;  %v3745_v15 = vmax.f32 %v3744_v60, %v20429_v41  ;;  %v3709_v53 = vmax.f32 %v3708_v30, %v20430_v26  ;;  %8391 = vpow2.f32 %v14757_v48  ;;  %v14901_v45 = vpop.eup %8381  ;;  %v20433_v57 = vld [vmem:[#allocation106_spill] sm:$0xff]  ;;  %v20439_v26 = vld [vmem:[#allocation23_spill] sm:$0xff] }
 0x55f   : > { %v5650_v2 = vadd.f32 %v14868_v51, %v5649_v59  ;;  %v3633_v13 = vmax.f32 %v3632_v25, %v20431_v10  ;;  %v5631_v27 = vadd.f32 %v20433_v57, %v5630_v44  ;;  %8393 = vpow2.f32 %v14765_v1  ;;  %v20434_v0 = vld [vmem:[#allocation66_spill] sm:$0xff]  ;;  %v14907_v41 = vpop.eup %8383  ;;  %v20437_v10 = vld [vmem:[#allocation151_spill] sm:$0xff]  ;;  %v20438_v44 = vld [vmem:[#allocation84_spill] sm:$0xff] }
 0x560   : > { %v3670_v49 = vmax.f32 %v3669_v61, %v20432_v63  ;;  %v3746_v60 = vmax.f32 %v3745_v15, %v20434_v0  ;;  %v3710_v30 = vmax.f32 %v3709_v53, %v20435_v7  ;;  %8395 = vpow2.f32 %v14770_v22  ;;  %v20436_v59 = vld [vmem:[#allocation242_spill] sm:$0xff]  ;;  %v20440_v0 = vld [vmem:[#allocation179_spill] sm:$0xff] }
 0x561   : > { %v5651_v48 = vadd.f32 %v14875_v6, %v5650_v2  ;;  %v3634_v25 = vmax.f32 %v3633_v13, %v20436_v59  ;;  %v5632_v63 = vadd.f32 %v14689_v62, %v5631_v27  ;;  %8397 = vpow2.f32 %v14779_v20  ;;  %v20441_v7 = vld [vmem:[#allocation246_spill] sm:$0xff] }
 0x562   : > { %v3671_v61 = vmax.f32 %v3670_v49, %v20437_v10  ;;  %v3747_v1 = vmax.f32 %v3746_v60, %v20438_v44  ;;  %v3711_v15 = vmax.f32 %v3710_v30, %v20439_v26  ;;  %8399 = vpow2.f32 %v14784_v17  ;;  %v20442_v49 = vld [vmem:[#allocation130_spill] sm:$0xff]  ;;  %v20443_v10 = vld [vmem:[#allocation228_spill] sm:$0xff] }
 0x563   : > { %v5652_v53 = vadd.f32 %v14885_v39, %v5651_v48  ;;  %v3635_v22 = vmax.f32 %v3634_v25, %v20440_v0  ;;  %v5633_v13 = vadd.f32 %v14702_v36, %v5632_v63  ;;  %8401 = vpow2.f32 %v14789_v28  ;;  %v14925_v59 = vpop.eup %8385  ;;  %v20444_v30 = vld [vmem:[#allocation24_spill] sm:$0xff]  ;;  %v20447_v63 = vld [vmem:[#allocation154_spill] sm:$0xff] }
 0x564   : > { %v3672_v2 = vmax.f32 %v3671_v61, %v20441_v7  ;;  %v3748_v27 = vmax.f32 %v3747_v1, %v20442_v49  ;;  %v3712_v20 = vmax.f32 %v3711_v15, %v20443_v10  ;;  %8403 = vpow2.f32 %v14797_v21  ;;  %v20445_v48 = vld [vmem:[#allocation12_spill] sm:$0xff]  ;;  %v14933_v61 = vpop.f32.mrb[240].mxu1  ;;  %v20448_v15 = vld [vmem:[#allocation187_spill] sm:$0xff] }
 0x565   : > { %v5653_v17 = vadd.f32 %v14890_v52, %v5652_v53  ;;  %v6034_v60 = vpack.c.bf16 %v14774_v24, %v14759_v11  ;;  %v6033_v25 = vpack.c.bf16 %v20445_v48, %v20444_v30  ;;  %20446 = vst [vmem:[#allocation241_spill] sm:$0xff] %v14933_v61  ;;  %v5634_v28 = vadd.f32 %v14713_v46, %v5633_v13  ;;  %v14939_v0 = vpop.f32.mrb[241].mxu1  ;;  %v20450_v53 = vld [vmem:[#allocation60_spill] sm:$0xff] }
 0x566   : > { %8405 = vpow2.f32 %v14802_v42  ;;  %v3749_v1 = vmax.f32 %v3748_v27, %v20447_v63  ;;  %v3713_v7 = vmax.f32 %v3712_v20, %v20448_v15  ;;  %20449 = vst [vmem:[#allocation114_spill] sm:$0xff] %v14939_v0  ;;  %v14941_v21 = vpop.eup %8387  ;;  %v6036_v24 = vpack.c.bf16 %v14838_v8, %v14822_v19  ;;  %v14948_v30 = vpop.f32.mrb[242].mxu1  ;;  %v20452_v20 = vld [vmem:[#allocation53_spill] sm:$0xff]  ;;  %v20465_v26 = vld [vmem:[#allocation296_spill] sm:$0xff] }
 0x567   : > { %8407 = vpow2.f32 %v14811_v40  ;;  %v5654_v11 = vadd.f32 %v14895_v18, %v5653_v17  ;;  %6325 = vmatprep.subr.bf16.mxu0 %v6034_v60  ;;  %v3636_v13 = vmax.f32 %v3635_v22, %v20450_v53  ;;  %20451 = vst [vmem:[#allocation126_spill] sm:$0xff] %v14948_v30  ;;  %v14950_v42 = vpop.eup %8389  ;;  %v5635_v27 = vadd.f32 %v14724_v32, %v5634_v28  ;;  %v20453_v40 = vld [vmem:[#allocation177_spill] sm:$0xff]  ;;  %v14956_v17 = vpop.f32.mrb[243].mxu1  ;;  %v20456_v22 = vld [vmem:[#allocation198_spill] sm:$0xff] }
 0x568   : > { %8409 = vpow2.f32 %v14816_v55  ;;  %v3750_v48 = vmax.f32 %v3749_v1, %v20452_v20  ;;  %6326 = vmatpush1.bf16.msra.mxu0 %v6033_v25  ;;  %v3714_v63 = vmax.f32 %v3713_v7, %v20453_v40  ;;  %20454 = vst [vmem:[#allocation105_spill] sm:$0xff] %v14956_v17  ;;  %v14958_v60 = vpop.f32.mrb[36].mxu0  ;;  %v14960_v8 = vpop.eup %8391  ;;  %v20457_v28 = vld [vmem:[#allocation101_spill] sm:$0xff]  ;;  %v20458_v55 = vld [vmem:[#allocation36_spill] sm:$0xff]  ;;  %v20460_v20 = vld [vmem:[#allocation218_spill] sm:$0xff]  ;;  %v6038_v40 = vpack.c.bf16 %v14868_v51, %v14856_v35 }
 0x569   : > { %20455 = vst [vmem:[#allocation184_spill] sm:$0xff] %v14958_v60  ;;  %8411 = vpow2.f32 %v14828_v14  ;;  %v5655_v19 = vadd.f32 %v14901_v45, %v5654_v11  ;;  %6327 = vmatprep.subr.bf16.mxu0 %v6036_v24  ;;  %v6035_v53 = vpack.c.bf16 %v20457_v28, %v20456_v22  ;;  %v3673_v49 = vmax.f32 %v3672_v2, %v20458_v55  ;;  %v14967_v1 = vpop.f32.mrb[37].mxu0  ;;  %v14969_v25 = vpop.eup %8393  ;;  %v20461_v14 = vld [vmem:[#allocation166_spill] sm:$0xff]  ;;  %v20463_v2 = vld [vmem:[#allocation128_spill] sm:$0xff]  ;;  %v20464_v55 = vld [vmem:[#allocation247_spill] sm:$0xff] }
 0x56a   : > { %20459 = vst [vmem:[#allocation131_spill] sm:$0xff] %v14967_v1  ;;  %v5636_v7 = vadd.f32 %v14735_v43, %v5635_v27  ;;  %v3751_v44 = vmax.f32 %v3750_v48, %v20460_v20  ;;  %v3637_v15 = vmax.f32 %v3636_v13, %v20461_v14  ;;  %v14976_v11 = vpop.f32.mrb[38].mxu0  ;;  %v14978_v24 = vpop.eup %8395  ;;  %v3715_v28 = vmax.f32 %v3714_v63, %v20463_v2  ;;  %v20466_v1 = vld [vmem:[#allocation260_spill] sm:$0xff]  ;;  %v20468_v35 = vld [vmem:[#allocation157_spill] sm:$0xff]  ;;  %v20472_v2 = vld [vmem:[#allocation122_spill] sm:$0xff] }
 0x56b   : > { %20462 = vst [vmem:[#allocation152_spill] sm:$0xff] %v14976_v11  ;;  %v5656_v22 = vadd.f32 %v14907_v41, %v5655_v19  ;;  %v3674_v10 = vmax.f32 %v3673_v49, %v20464_v55  ;;  %v6037_v27 = vpack.c.bf16 %v20466_v1, %v20465_v26  ;;  %v14985_v60 = vpop.f32.mrb[39].mxu0  ;;  %v14987_v48 = vpop.eup %8397  ;;  %v6040_v14 = vpack.c.bf16 %v14885_v39, %v14875_v6  ;;  %v20469_v19 = vld [vmem:[#allocation7_spill] sm:$0xff]  ;;  %v20471_v55 = vld [vmem:[#allocation261_spill] sm:$0xff]  ;;  %v20473_v11 = vld [vmem:[#allocation208_spill] sm:$0xff] }
 0x56c   : > { %20467 = vst [vmem:[#allocation25_spill] sm:$0xff] %v14985_v60  ;;  %v5637_v51 = vadd.f32 %v14746_v50, %v5636_v7  ;;  %6328 = vmatpush1.bf16.msra.mxu0 %v6035_v53  ;;  %v3752_v13 = vmax.f32 %v3751_v44, %v20468_v35  ;;  %v3638_v20 = vmax.f32 %v3637_v15, %v20469_v19  ;;  %v14994_v63 = vpop.eup %8399  ;;  %v20470_v26 = vld [vmem:[#allocation259_spill] sm:$0xff]  ;;  %v20474_v35 = vld [vmem:[#allocation132_spill] sm:$0xff]  ;;  %v20475_v15 = vld [vmem:[#allocation178_spill] sm:$0xff]  ;;  %8413 = vpow2.f32 %v14843_v34 }
 0x56d   : > { %v5657_v49 = vadd.f32 %v14925_v59, %v5656_v22  ;;  %6329 = vmatprep.subr.bf16.mxu0 %v6038_v40  ;;  %v3716_v1 = vmax.f32 %v3715_v28, %v20470_v26  ;;  %v6039_v60 = vpack.c.bf16 %v20472_v2, %v20471_v55  ;;  %v3675_v7 = vmax.f32 %v3674_v10, %v20473_v11  ;;  %v15001_v53 = vpop.eup %8401  ;;  %v15008_v22 = vpop.f32.mrb[244].mxu1  ;;  %v20477_v55 = vld [vmem:[#allocation27_spill] sm:$0xff]  ;;  %v20478_v10 = vld [vmem:[#allocation141_spill] sm:$0xff]  ;;  %v20479_v11 = vld [vmem:[#allocation92_spill] sm:$0xff] }
 0x56e   : > { %v5638_v44 = vadd.f32 %v14791_v37, %v5637_v51  ;;  %v3753_v6 = vmax.f32 %v3752_v13, %v20474_v35  ;;  %v6042_v39 = vpack.c.bf16 %v14895_v18, %v14890_v52  ;;  %v3639_v19 = vmax.f32 %v3638_v20, %v20475_v15  ;;  %20476 = vst [vmem:[#allocation176_spill] sm:$0xff] %v15008_v22  ;;  %v15010_v40 = vpop.eup %8403  ;;  %v20480_v17 = vld [vmem:[#allocation186_spill] sm:$0xff]  ;;  %v15017_v30 = vpop.f32.mrb[245].mxu1  ;;  %v20484_v15 = vld [vmem:[#allocation140_spill] sm:$0xff] }
 0x56f   : > { %v5658_v28 = vadd.f32 %v14941_v21, %v5657_v49  ;;  %v3717_v2 = vmax.f32 %v3716_v1, %v20477_v55  ;;  %v6066_v26 = vpack.c.bf16 %v20479_v11, %v20478_v10  ;;  %v3676_v51 = vmax.f32 %v3675_v7, %v20480_v17  ;;  %20481 = vst [vmem:[#allocation33_spill] sm:$0xff] %v15017_v30  ;;  %v20483_v52 = vld [vmem:[#allocation262_spill] sm:$0xff]  ;;  %v15029_v55 = vpop.f32.mrb[246].mxu1  ;;  %v20487_v7 = vld [vmem:[#allocation135_spill] sm:$0xff]  ;;  %v20496_v30 = vld [vmem:[#allocation273_spill] sm:$0xff] }
 0x570   : > { %v15019_v13 = vpop.eup %8405  ;;  %v15022_v18 = vadd.f32 %v14806_v5, %v5638_v44  ;;  %6330 = vmatpush1.bf16.msra.mxu0 %v6037_v27  ;;  %v3754_v20 = vmax.f32 %v3753_v6, %v20483_v52  ;;  %v20485_v35 = vld [vmem:[#allocation270_spill] sm:$0xff]  ;;  %v6044_v1 = vpack.c.bf16 %v14907_v41, %v14901_v45  ;;  %20486 = vst [vmem:[#allocation51_spill] sm:$0xff] %v15029_v55  ;;  %v20489_v6 = vld [vmem:[#allocation207_spill] sm:$0xff]  ;;  %v15042_v41 = vpop.f32.mrb[40].mxu0  ;;  %v20494_v52 = vld [vmem:[#allocation172_spill] sm:$0xff]  ;;  %8415 = vpow2.f32 %v14862_v33 }
 0x571   : > { %v6041_v49 = vpack.c.bf16 %v20485_v35, %v20484_v15  ;;  %v15031_v11 = vpop.eup %8407  ;;  %v20488_v10 = vsub.f32 %v20487_v7, %v14396_v9  ;;  %v5659_v27 = vadd.f32 %v14950_v42, %v5658_v28  ;;  %6331 = vmatprep.subr.bf16.mxu0 %v6040_v14  ;;  %6366 = vmatprep.subr.bf16.mxu1 %v6066_v26  ;;  %v15040_v15 = vpop.f32.mrb[247].mxu1  ;;  %v20493_v17 = vld [vmem:[#allocation103_spill] sm:$0xff]  ;;  %8417 = vpow2.f32 %v14881_v47  ;;  %v20521_v47 = vld [vmem:[#allocation249_spill] sm:$0xff] }
 0x572   : > { %20482 = vst [vmem:[#allocation88_spill] sm:$0xff] %v15022_v18  ;;  %v20490_v18 = vld [vmem:[#allocation26_spill] sm:$0xff]  ;;  %20491 = vst [vmem:[#allocation268_spill] sm:$0xff] %v15040_v15  ;;  %v15044_v45 = vpop.eup %8409  ;;  %v6068_v34 = vpack.c.bf16 %v20369_v3, %v20493_v17  ;;  %v3640_v55 = vmax.f32 %v3639_v19, %v20494_v52  ;;  %v20495_v7 = vld [vmem:[#allocation263_spill] sm:$0xff]  ;;  %v15052_v26 = vpop.f32.mrb[41].mxu0  ;;  %v6046_v3 = vpack.c.bf16 %v14941_v21, %v14925_v59 }
 0x573   : > { %v4919_v44 = vmul.f32 1.442695, %v20488_v10  ;;  %v6065_v35 = vpack.c.bf16 %v20490_v18, %v20489_v6  ;;  %20492 = vst [vmem:[#allocation199_spill] sm:$0xff] %v15042_v41  ;;  %v3718_v10 = vmax.f32 %v3717_v2, %v20495_v7  ;;  %v20497_v28 = vld [vmem:[#allocation83_spill] sm:$0xff]  ;;  %20498 = vst [vmem:[#allocation203_spill] sm:$0xff] %v15052_v26  ;;  %v15054_v22 = vpop.eup %8411  ;;  %v5660_v18 = vadd.f32 %v14960_v8, %v5659_v27  ;;  %v20500_v15 = vld [vmem:[#allocation144_spill] sm:$0xff] }
 0x574   : > { %v6043_v14 = vpack.c.bf16 %v20497_v28, %v20496_v30  ;;  %v20499_v6 = vld [vmem:[#allocation119_spill] sm:$0xff]  ;;  %v3755_v0 = vmax.f32 %v3754_v20, %v20500_v15  ;;  %v15061_v17 = vpop.f32.mrb[42].mxu0  ;;  %v20502_v19 = vld [vmem:[#allocation222_spill] sm:$0xff]  ;;  %v20504_v28 = vld [vmem:[#allocation212_spill] sm:$0xff]  ;;  %6332 = vmatpush1.bf16.msra.mxu0 %v6039_v60 }
 0x575   : > { %6367 = vmatpush1.bf16.msra.mxu1 %v6065_v35  ;;  %v3677_v41 = vmax.f32 %v3676_v51, %v20499_v6  ;;  %20501 = vst [vmem:[#allocation287_spill] sm:$0xff] %v15061_v17  ;;  %v20503_v30 = vsub.f32 %v20502_v19, %v14396_v9  ;;  %v20505_v52 = vsub.f32 %v20504_v28, %v14396_v9  ;;  %v20506_v51 = vld [vmem:[#allocation123_spill] sm:$0xff]  ;;  %v20507_v59 = vld [vmem:[#allocation136_spill] sm:$0xff]  ;;  %v20514_v60 = vld [vmem:[#allocation282_spill] sm:$0xff]  ;;  %8419 = vpow2.f32 %v4919_v44 }
 0x576   : > { %6368 = vmatprep.subr.bf16.mxu1 %v6068_v34  ;;  %v3641_v35 = vmax.f32 %v3640_v55, %v20506_v51  ;;  %v5661_v20 = vadd.f32 %v14969_v25, %v5660_v18  ;;  %6333 = vmatprep.subr.bf16.mxu0 %v6042_v39  ;;  %v20508_v21 = vld [vmem:[#allocation35_spill] sm:$0xff]  ;;  %v20509_v15 = vld [vmem:[#allocation96_spill] sm:$0xff]  ;;  %v6048_v55 = vpack.c.bf16 %v14960_v8, %v14950_v42  ;;  %v15083_v18 = vpop.f32.mrb[248].mxu1  ;;  %v20517_v28 = vld [vmem:[#allocation278_spill] sm:$0xff] }
 0x577   : > { %v4923_v2 = vmul.f32 1.442695, %v20503_v30  ;;  %v4927_v27 = vmul.f32 1.442695, %v20505_v52  ;;  %v6067_v6 = vpack.c.bf16 %v20508_v21, %v20507_v59  ;;  %v3719_v33 = vmax.f32 %v3718_v10, %v20509_v15  ;;  %v20510_v7 = vld [vmem:[#allocation43_spill] sm:$0xff]  ;;  %v20511_v19 = vld [vmem:[#allocation160_spill] sm:$0xff] }
 0x578   : > { %v3678_v17 = vmax.f32 %v3677_v41, %v20510_v7  ;;  %v6070_v30 = vpack.c.bf16 %v20511_v19, %v20382_v54  ;;  %v20512_v26 = vld [vmem:[#allocation275_spill] sm:$0xff]  ;;  %v20513_v52 = vld [vmem:[#allocation65_spill] sm:$0xff]  ;;  %20515 = vst [vmem:[#allocation294_spill] sm:$0xff] %v15083_v18  ;;  %v5662_v39 = vadd.f32 %v14978_v24, %v5661_v20  ;;  %v20516_v10 = vld [vmem:[#allocation200_spill] sm:$0xff]  ;;  %v15089_v54 = vpop.f32.mrb[249].mxu1  ;;  %6334 = vmatpush1.bf16.msra.mxu0 %v6041_v49 }
 0x579   : > { %v3756_v9 = vmax.f32 %v3755_v0, %v20512_v26  ;;  %v6045_v34 = vpack.c.bf16 %v20514_v60, %v20513_v52  ;;  %6369 = vmatpush1.bf16.msra.mxu1 %v6067_v6  ;;  %v3642_v41 = vmax.f32 %v3641_v35, %v20516_v10  ;;  %v3720_v59 = vmax.f32 %v3719_v33, %v20517_v28  ;;  %v15091_v0 = vpop.f32.mrb[43].mxu0  ;;  %v20520_v8 = vld [vmem:[#allocation55_spill] sm:$0xff]  ;;  %v15097_v20 = vpop.f32.mrb[250].mxu1  ;;  %v20523_v35 = vld [vmem:[#allocation170_spill] sm:$0xff]  ;;  %v20524_v33 = vld [vmem:[#allocation8_spill] sm:$0xff] }
 0x57a   : > { %20518 = vst [vmem:[#allocation148_spill] sm:$0xff] %v15089_v54  ;;  %20519 = vst [vmem:[#allocation49_spill] sm:$0xff] %v15091_v0  ;;  %6370 = vmatprep.subr.bf16.mxu1 %v6070_v30  ;;  %v3679_v21 = vmax.f32 %v3678_v17, %v20520_v8  ;;  %v5663_v6 = vadd.f32 %v14987_v48, %v5662_v39  ;;  %6335 = vmatprep.subr.bf16.mxu0 %v6044_v1  ;;  %v20525_v49 = vld [vmem:[#allocation264_spill] sm:$0xff]  ;;  %v15105_v7 = vpop.f32.mrb[251].mxu1  ;;  %v20528_v10 = vld [vmem:[#allocation93_spill] sm:$0xff]  ;;  %v15112_v1 = vpop.eup %8413  ;;  %8421 = vpow2.f32 %v4923_v2 }
 0x57b   : > { %v3757_v52 = vmax.f32 %v3756_v9, %v20521_v47  ;;  %20522 = vst [vmem:[#allocation37_spill] sm:$0xff] %v15097_v20  ;;  %v6069_v60 = vpack.c.bf16 %v20524_v33, %v20523_v35  ;;  %v3643_v30 = vmax.f32 %v3642_v41, %v20525_v49  ;;  %20526 = vst [vmem:[#allocation48_spill] sm:$0xff] %v15105_v7  ;;  %v20527_v42 = vld [vmem:[#allocation112_spill] sm:$0xff]  ;;  %v20530_v51 = vld [vmem:[#allocation266_spill] sm:$0xff]  ;;  %8423 = vpow2.f32 %v4927_v27  ;;  %v15128_v27 = vpop.eup %8415 }
 0x57c   : > { %v6072_v17 = vpack.c.bf16 %v20528_v10, %v20527_v42  ;;  %v20529_v8 = vld [vmem:[#allocation252_spill] sm:$0xff]  ;;  %v3680_v47 = vmax.f32 %v3679_v21, %v20530_v51  ;;  %v20531_v26 = vld [vmem:[#allocation285_spill] sm:$0xff]  ;;  %v5664_v35 = vadd.f32 %v14994_v63, %v5663_v6  ;;  %6336 = vmatpush1.bf16.msra.mxu0 %v6043_v14  ;;  %v20533_v44 = vld [vmem:[#allocation38_spill] sm:$0xff] }
 0x57d   : > { %v3721_v9 = vmax.f32 %v3720_v59, %v20529_v8  ;;  %v3758_v39 = vmax.f32 %v3757_v52, %v20531_v26  ;;  %6371 = vmatpush1.bf16.msra.mxu1 %v6069_v60  ;;  %v20532_v59 = vld [vmem:[#allocation214_spill] sm:$0xff]  ;;  %6337 = vmatprep.subr.bf16.mxu0 %v6046_v3  ;;  %v20536_v60 = vld [vmem:[#allocation63_spill] sm:$0xff]  ;;  %v20537_v8 = vld [vmem:[#allocation289_spill] sm:$0xff] }
 0x57e   : > { %6372 = vmatprep.subr.bf16.mxu1 %v6072_v17  ;;  %v6071_v21 = vpack.c.bf16 %v20533_v44, %v20532_v59  ;;  %v20534_v51 = vld [vmem:[#allocation162_spill] sm:$0xff]  ;;  %v5665_v2 = vadd.f32 %v15001_v53, %v5664_v35  ;;  %v3681_v41 = vmax.f32 %v3680_v47, %v20536_v60  ;;  %v20538_v14 = vld [vmem:[#allocation71_spill] sm:$0xff]  ;;  %v20539_v17 = vld [vmem:[#allocation57_spill] sm:$0xff] }
 0x57f   : > { %v3644_v52 = vmax.f32 %v3643_v30, %v20534_v51  ;;  %v20535_v49 = vld [vmem:[#allocation254_spill] sm:$0xff]  ;;  %v3759_v33 = vmax.f32 %v3758_v39, %v20537_v8  ;;  %v6074_v28 = vpack.c.bf16 %v20539_v17, %v20538_v14  ;;  %v20540_v30 = vld [vmem:[#allocation279_spill] sm:$0xff]  ;;  %v20541_v59 = vld [vmem:[#allocation44_spill] sm:$0xff] }
 0x580   : > { %v3722_v26 = vmax.f32 %v3721_v9, %v20535_v49  ;;  %v20542_v3 = vld [vmem:[#allocation183_spill] sm:$0xff]  ;;  %v5666_v6 = vadd.f32 %v15010_v40, %v5665_v2  ;;  %v20543_v47 = vld [vmem:[#allocation281_spill] sm:$0xff]  ;;  %v20545_v8 = vld [vmem:[#allocation32_spill] sm:$0xff]  ;;  %6338 = vmatpush1.bf16.msra.mxu0 %v6045_v34 }
 0x581   : > { %v3645_v9 = vmax.f32 %v3644_v52, %v20540_v30  ;;  %8425 = vpow2.f32 %v20542_v3  ;;  %6373 = vmatpush1.bf16.msra.mxu1 %v6071_v21  ;;  %v3682_v60 = vmax.f32 %v3681_v41, %v20543_v47  ;;  %v20544_v39 = vld [vmem:[#allocation293_spill] sm:$0xff]  ;;  %v20546_v49 = vld [vmem:[#allocation47_spill] sm:$0xff]  ;;  %v20547_v15 = vld [vmem:[#allocation62_spill] sm:$0xff]  ;;  %v15147_v3 = vpop.eup %8417  ;;  %6339 = vmatprep.subr.bf16.mxu0 %v6048_v55 }
 0x582   : > { %v3723_v35 = vmax.f32 %v3722_v26, %v20541_v59  ;;  %v3760_v51 = vmax.f32 %v3759_v33, %v20544_v39  ;;  %8427 = vpow2.f32 %v20545_v8  ;;  %6374 = vmatprep.subr.bf16.mxu1 %v6074_v28  ;;  %v6073_v44 = vpack.c.bf16 %v20547_v15, %v20546_v49  ;;  %v20548_v41 = vld [vmem:[#allocation185_spill] sm:$0xff]  ;;  %v20549_v33 = vld [vmem:[#allocation14_spill] sm:$0xff]  ;;  %v15154_v30 = vpop.eup %8419  ;;  %v20553_v26 = vld [vmem:[#allocation156_spill] sm:$0xff] }
 0x583   : > { %v5667_v21 = vadd.f32 %v15019_v13, %v5666_v6  ;;  %v6076_v2 = vpack.c.bf16 %v20549_v33, %v20548_v41  ;;  %v20550_v8 = vld [vmem:[#allocation253_spill] sm:$0xff]  ;;  %v20552_v49 = vld [vmem:[#allocation286_spill] sm:$0xff]  ;;  %v20557_v59 = vld [vmem:[#allocation204_spill] sm:$0xff] }
 0x584   : > { %v3646_v34 = vmax.f32 %v3645_v9, %v20550_v8  ;;  %v20551_v28 = vld [vmem:[#allocation265_spill] sm:$0xff]  ;;  %v3683_v52 = vmax.f32 %v3682_v60, %v20552_v49  ;;  %v3761_v39 = vmax.f32 %v3760_v51, %v20553_v26  ;;  %v20555_v9 = vld [vmem:[#allocation255_spill] sm:$0xff]  ;;  %v20559_v51 = vpack.c.bf16 %v14586_v38, %v14573_v31  ;;  %v20560_v60 = vld [vmem:[#allocation290_spill] sm:$0xff] }
 0x585   : > { %v3724_v47 = vmax.f32 %v3723_v35, %v20551_v28  ;;  %v20554_v55 = vld [vmem:[#allocation201_spill] sm:$0xff]  ;;  %v5668_v33 = vadd.f32 %v15031_v11, %v5667_v21  ;;  %6375 = vmatpush1.bf16.msra.mxu1 %v6073_v44  ;;  %v20556_v35 = vld [vmem:[#allocation175_spill] sm:$0xff]  ;;  %v15174_v21 = vpop.eup %8421 }
 0x586   : > { %8429 = vpow2.f32 %v20554_v55  ;;  %v3647_v8 = vmax.f32 %v3646_v34, %v20555_v9  ;;  %v20558_v41 = vld [vmem:[#allocation213_spill] sm:$0xff]  ;;  %6340 = vmatpush1.bf16.msra.mxu0 %v20559_v51  ;;  %6376 = vmatprep.subr.bf16.mxu1 %v6076_v2  ;;  %v3684_v6 = vmax.f32 %v3683_v52, %v20560_v60  ;;  %v20561_v55 = vld [vmem:[#allocation30_spill] sm:$0xff]  ;;  %v20564_v34 = vld [vmem:[#allocation227_spill] sm:$0xff]  ;;  %v15186_v52 = vpop.eup %8423 }
 0x587   : > { %v3725_v28 = vmax.f32 %v3724_v47, %v20556_v35  ;;  %8431 = vpow2.f32 %v20557_v59  ;;  %v5724_v15 = vadd.f32 %v20511_v19, %v20558_v41  ;;  %v3762_v49 = vmax.f32 %v3761_v39, %v20561_v55  ;;  %v20563_v59 = vld [vmem:[#allocation220_spill] sm:$0xff]  ;;  %v20565_v39 = vld [vmem:[#allocation195_spill] sm:$0xff]  ;;  %v20566_v41 = vld [vmem:[#allocation82_spill] sm:$0xff] }
 0x588   : > { %v5669_v44 = vadd.f32 %v15044_v45, %v5668_v33  ;;  %v20562_v47 = vpack.c.bf16 %v14978_v24, %v14969_v25  ;;  %v6075_v19 = vpack.c.bf16 %v20564_v34, %v20563_v59  ;;  %v6078_v2 = vpack.c.bf16 %v20566_v41, %v20565_v39  ;;  %v20567_v51 = vld [vmem:[#allocation215_spill] sm:$0xff]  ;;  %v20568_v60 = vld [vmem:[#allocation256_spill] sm:$0xff]  ;;  %v20570_v34 = vld [vmem:[#allocation202_spill] sm:$0xff] }
 0x589   : > { %v3648_v33 = vmax.f32 %v3647_v8, %v20567_v51  ;;  %v3726_v9 = vmax.f32 %v3725_v28, %v20568_v60  ;;  %v3763_v31 = vmax.f32 %v3762_v49, %v20570_v34  ;;  %v20571_v55 = vld [vmem:[#allocation117_spill] sm:$0xff]  ;;  %v5725_v26 = vadd.f32 %v20527_v42, %v5724_v15  ;;  %v20573_v28 = vld [vmem:[#allocation143_spill] sm:$0xff]  ;;  %v20579_v15 = vld [vmem:[#allocation274_spill] sm:$0xff] }
 0x58a   : > { %6341 = vmatprep.subr.bf16.mxu0 %v20562_v47  ;;  %v5670_v24 = vadd.f32 %v15054_v22, %v5669_v44  ;;  %6377 = vmatpush1.bf16.msra.mxu1 %v6075_v19  ;;  %v20569_v47 = vld [vmem:[#allocation125_spill] sm:$0xff]  ;;  %8433 = vpow2.f32 %v20571_v55  ;;  %v20572_v8 = vpack.c.bf16 %v14610_v58, %v14598_v56  ;;  %v20574_v44 = vld [vmem:[#allocation110_spill] sm:$0xff]  ;;  %v20601_v34 = vld [vmem:[#allocation39_spill] sm:$0xff] }
 0x58b   : > { %v3685_v59 = vmax.f32 %v3684_v6, %v20569_v47  ;;  %6378 = vmatprep.subr.bf16.mxu1 %v6078_v2  ;;  %v3649_v25 = vmax.f32 %v3648_v33, %v20573_v28  ;;  %v3727_v19 = vmax.f32 %v3726_v9, %v20574_v44  ;;  %v15206_v51 = vpop.eup %8425  ;;  %v20576_v6 = vpack.c.bf16 %v14994_v63, %v14987_v48  ;;  %v20577_v55 = vld [vmem:[#allocation210_spill] sm:$0xff]  ;;  %v20578_v38 = vld [vmem:[#allocation229_spill] sm:$0xff] }
 0x58c   : > { %6342 = vmatpush1.bf16.msra.mxu0 %v20572_v8  ;;  %20575 = vst [vmem:[#allocation68_spill] sm:$0xff] %v15206_v51  ;;  %v5671_v49 = vadd.f32 %v15112_v1, %v5670_v24  ;;  %v6077_v42 = vpack.c.bf16 %v20578_v38, %v20577_v55  ;;  %v20580_v56 = vld [vmem:[#allocation45_spill] sm:$0xff]  ;;  %v15216_v2 = vpop.eup %8427  ;;  %v20582_v33 = vld [vmem:[#allocation142_spill] sm:$0xff]  ;;  %v20584_v8 = vld [vmem:[#allocation211_spill] sm:$0xff]  ;;  %v20587_v24 = vpack.c.bf16 %v14634_v16, %v14622_v23 }
 0x58d   : > { %6343 = vmatprep.subr.bf16.mxu0 %v20576_v6  ;;  %v3686_v47 = vmax.f32 %v3685_v59, %v20579_v15  ;;  %v3764_v58 = vmax.f32 %v3763_v31, %v20580_v56  ;;  %20581 = vst [vmem:[#allocation257_spill] sm:$0xff] %v15216_v2  ;;  %8435 = vpow2.f32 %v20582_v33  ;;  %v20583_v9 = vld [vmem:[#allocation21_spill] sm:$0xff]  ;;  %v3650_v59 = vmax.f32 %v3649_v25, %v14933_v61  ;;  %v20585_v6 = vld [vmem:[#allocation94_spill] sm:$0xff]  ;;  %v20593_v15 = vld [vmem:[#allocation116_spill] sm:$0xff] }
 0x58e   : > { %v6080_v28 = vpack.c.bf16 %v20584_v8, %v20583_v9  ;;  %v5672_v63 = vadd.f32 %v15128_v27, %v5671_v49  ;;  %6379 = vmatpush1.bf16.msra.mxu1 %v6077_v42  ;;  %v3728_v31 = vmax.f32 %v3727_v19, %v20585_v6  ;;  %v20586_v33 = vld [vmem:[#allocation194_spill] sm:$0xff]  ;;  %v5726_v8 = vadd.f32 %v20528_v10, %v5725_v26  ;;  %v20589_v49 = vld [vmem:[#allocation111_spill] sm:$0xff] }
 0x58f   : > { %8437 = vpow2.f32 %v20586_v33  ;;  %v20588_v48 = vld [vmem:[#allocation114_spill] sm:$0xff]  ;;  %v3765_v42 = vmax.f32 %v3764_v58, %v20589_v49  ;;  %v20591_v19 = vpack.c.bf16 %v15010_v40, %v15001_v53  ;;  %v20600_v49 = vld [vmem:[#allocation105_spill] sm:$0xff] }
 0x590   : > { %6344 = vmatpush1.bf16.msra.mxu0 %v20587_v24  ;;  %6380 = vmatprep.subr.bf16.mxu1 %v6080_v28  ;;  %v3687_v9 = vmax.f32 %v3686_v47, %v20588_v48  ;;  %v15237_v56 = vpop.eup %8429  ;;  %v5673_v25 = vadd.f32 %v15147_v3, %v5672_v63  ;;  %v20592_v33 = vld [vmem:[#allocation230_spill] sm:$0xff]  ;;  %v20599_v24 = vld [vmem:[#allocation193_spill] sm:$0xff] }
 0x591   : > { %20590 = vst [vmem:[#allocation181_spill] sm:$0xff] %v15237_v56  ;;  %6345 = vmatprep.subr.bf16.mxu0 %v20591_v19  ;;  %v6079_v10 = vpack.c.bf16 %v20593_v15, %v20592_v33  ;;  %v20594_v26 = vld [vmem:[#allocation126_spill] sm:$0xff]  ;;  %v15247_v28 = vpop.eup %8431  ;;  %v3766_v41 = vmax.f32 %v3765_v42, %v20601_v34  ;;  %v20602_v53 = vld [vmem:[#allocation9_spill] sm:$0xff]  ;;  %v20603_v19 = vld [vmem:[#allocation176_spill] sm:$0xff] }
 0x592   : > { %v3651_v61 = vmax.f32 %v3650_v59, %v20594_v26  ;;  %v20595_v23 = vld [vmem:[#allocation138_spill] sm:$0xff]  ;;  %20596 = vst [vmem:[#allocation216_spill] sm:$0xff] %v15247_v28  ;;  %v3688_v63 = vmax.f32 %v3687_v9, %v20600_v49  ;;  %v5674_v40 = vadd.f32 %v15154_v30, %v5673_v25  ;;  %v20604_v26 = vld [vmem:[#allocation184_spill] sm:$0xff]  ;;  %v20607_v9 = vld [vmem:[#allocation33_spill] sm:$0xff] }
 0x593   : > { %v3729_v16 = vmax.f32 %v3728_v31, %v20595_v23  ;;  %v20597_v47 = vld [vmem:[#allocation206_spill] sm:$0xff]  ;;  %6381 = vmatpush1.bf16.msra.mxu1 %v6079_v10  ;;  %v20608_v49 = vld [vmem:[#allocation131_spill] sm:$0xff]  ;;  %v20610_v10 = vld [vmem:[#allocation56_spill] sm:$0xff] }
 0x594   : > { %8439 = vpow2.f32 %v20597_v47  ;;  %v20598_v58 = vld [vmem:[#allocation182_spill] sm:$0xff]  ;;  %v3652_v59 = vmax.f32 %v3651_v61, %v20603_v19  ;;  %v5727_v47 = vadd.f32 %v20538_v14, %v5726_v8  ;;  %v3689_v42 = vmax.f32 %v3688_v63, %v20607_v9  ;;  %v20612_v19 = vld [vmem:[#allocation51_spill] sm:$0xff]  ;;  %v20613_v8 = vld [vmem:[#allocation152_spill] sm:$0xff] }
 0x595   : > { %v6082_v48 = vpack.c.bf16 %v20599_v24, %v20598_v58  ;;  %8441 = vpow2.f32 %v20602_v53  ;;  %v3730_v31 = vmax.f32 %v3729_v16, %v20604_v26  ;;  %v20605_v15 = vld [vmem:[#allocation190_spill] sm:$0xff]  ;;  %v20606_v24 = vpack.c.bf16 %v14659_v12, %v14644_v4  ;;  %v20611_v16 = vld [vmem:[#allocation235_spill] sm:$0xff]  ;;  %v15273_v4 = vpop.eup %8433  ;;  %v20615_v12 = vld [vmem:[#allocation221_spill] sm:$0xff] }
 0x596   : > { %8443 = vpow2.f32 %v20605_v15  ;;  %v3767_v53 = vmax.f32 %v3766_v41, %v20608_v49  ;;  %v5675_v25 = vadd.f32 %v15174_v21, %v5674_v40  ;;  %v20609_v61 = vpack.c.bf16 %v15031_v11, %v15019_v13  ;;  %20614 = vst [vmem:[#allocation139_spill] sm:$0xff] %v15273_v4  ;;  %v20618_v40 = vld [vmem:[#allocation25_spill] sm:$0xff]  ;;  %v20619_v13 = vld [vmem:[#allocation280_spill] sm:$0xff]  ;;  %v20760_v26 = vld [vmem:[#allocation202_spill] sm:$0xff] }
 0x597   : > { %6346 = vmatpush1.bf16.msra.mxu0 %v20606_v24  ;;  %6382 = vmatprep.subr.bf16.mxu1 %v6082_v48  ;;  %v6081_v15 = vpack.c.bf16 %v20611_v16, %v20610_v10  ;;  %v3653_v14 = vmax.f32 %v3652_v59, %v20612_v19  ;;  %v3731_v58 = vmax.f32 %v3730_v31, %v20613_v8  ;;  %8445 = vpow2.f32 %v20615_v12  ;;  %v20616_v48 = vld [vmem:[#allocation107_spill] sm:$0xff]  ;;  %v20617_v24 = vld [vmem:[#allocation268_spill] sm:$0xff]  ;;  %v15286_v19 = vpop.eup %8435  ;;  %v20623_v12 = vld [vmem:[#allocation161_spill] sm:$0xff] }
 0x598   : > { %6347 = vmatprep.subr.bf16.mxu0 %v20609_v61  ;;  %v6084_v41 = vpack.c.bf16 %v15206_v51, %v20616_v48  ;;  %v3690_v63 = vmax.f32 %v3689_v42, %v20617_v24  ;;  %v3768_v9 = vmax.f32 %v3767_v53, %v20618_v40  ;;  %8447 = vpow2.f32 %v20619_v13  ;;  %v20621_v31 = vld [vmem:[#allocation199_spill] sm:$0xff]  ;;  %20622 = vst [vmem:[#allocation10_spill] sm:$0xff] %v15286_v19  ;;  %v20766_v23 = vld [vmem:[#allocation21_spill] sm:$0xff] }
 0x599   : > { %v15282_v11 = vadd.f32 %v15186_v52, %v5675_v25  ;;  %6383 = vmatpush1.bf16.msra.mxu1 %v6081_v15  ;;  %v3654_v59 = vmax.f32 %v3653_v14, %v15083_v18  ;;  %v3732_v61 = vmax.f32 %v3731_v58, %v20621_v31  ;;  %8449 = vpow2.f32 %v20623_v12  ;;  %v20625_v53 = vld [vmem:[#allocation203_spill] sm:$0xff]  ;;  %v20626_v25 = vld [vmem:[#allocation288_spill] sm:$0xff]  ;;  %v20629_v14 = vld [vmem:[#allocation233_spill] sm:$0xff] }
 0x59a   : > { %v20624_v51 = vpack.c.bf16 %v20433_v57, %v20428_v29  ;;  %6384 = vmatprep.subr.bf16.mxu1 %v6084_v41  ;;  %v3691_v42 = vmax.f32 %v3690_v63, %v15089_v54  ;;  %v3769_v13 = vmax.f32 %v3768_v9, %v20625_v53  ;;  %v20627_v15 = vpack.c.bf16 %v15054_v22, %v15044_v45  ;;  %v20628_v58 = vld [vmem:[#allocation100_spill] sm:$0xff]  ;;  %v20630_v18 = vld [vmem:[#allocation287_spill] sm:$0xff]  ;;  %v20706_v53 = vld [vmem:[#allocation265_spill] sm:$0xff] }
 0x59b   : > { %20620 = vst [vmem:[#allocation133_spill] sm:$0xff] %v15282_v11  ;;  %v5385_v11 = vrot.slane %v20626_v25, 1  ;;  %v6083_v24 = vpack.c.bf16 %v20629_v14, %v20628_v58  ;;  %v3655_v12 = vmax.f32 %v3654_v59, %v15097_v20  ;;  %v3733_v48 = vmax.f32 %v3732_v61, %v20630_v18  ;;  %v20631_v57 = vld [vmem:[#allocation80_spill] sm:$0xff]  ;;  %v20633_v41 = vld [vmem:[#allocation243_spill] sm:$0xff]  ;;  %v20755_v18 = vld [vmem:[#allocation293_spill] sm:$0xff] }
 0x59c   : > { %6348 = vmatpush1.bf16.msra.mxu0 %v20624_v51  ;;  %v5422_v29 = vrot.slane %v20631_v57, 1  ;;  %v15303_v51 = vpop.eup %8437  ;;  %8451 = vpow2.f32 %v20633_v41  ;;  %v6086_v9 = vpack.c.bf16 %v15237_v56, %v15216_v2  ;;  %v3692_v63 = vmax.f32 %v3691_v42, %v15105_v7  ;;  %v20634_v45 = vld [vmem:[#allocation95_spill] sm:$0xff]  ;;  %v20637_v20 = vld [vmem:[#allocation52_spill] sm:$0xff] }
 0x59d   : > { %6349 = vmatprep.subr.bf16.mxu0 %v20627_v15  ;;  %20632 = vst [vmem:[#allocation251_spill] sm:$0xff] %v15303_v51  ;;  %v3770_v22 = vmax.f32 %v3769_v13, %v15091_v0  ;;  %8453 = vpow2.f32 %v20634_v45  ;;  %v5728_v15 = vadd.f32 %v20539_v17, %v5727_v47  ;;  %6385 = vmatpush1.bf16.msra.mxu1 %v6083_v24  ;;  %v3734_v59 = vrot.slane %v3733_v48, 4  ;;  %v20635_v61 = vld [vmem:[#allocation295_spill] sm:$0xff]  ;;  %v15322_v13 = vpop.f32.mrb[252].mxu1  ;;  %v20640_v45 = vld [vmem:[#allocation50_spill] sm:$0xff]  ;;  %v20756_v31 = vld [vmem:[#allocation156_spill] sm:$0xff] }
 0x59e   : > { %v5459_v54 = vrot.slane %v20635_v61, 1  ;;  %v15313_v14 = vpop.eup %8439  ;;  %v15317_v41 = vadd.f32 %v20577_v55, %v20637_v20  ;;  %v20638_v56 = vpack.c.bf16 %v14702_v36, %v14689_v62  ;;  %6386 = vmatprep.subr.bf16.mxu1 %v6086_v9  ;;  %20639 = vst [vmem:[#allocation6_spill] sm:$0xff] %v15322_v13  ;;  %v20641_v17 = vrot.slane %v20640_v45, 1  ;;  %v20644_v55 = vld [vmem:[#allocation99_spill] sm:$0xff]  ;;  %v20645_v62 = vld [vmem:[#allocation237_spill] sm:$0xff]  ;;  %v15338_v2 = vpop.f32.mrb[253].mxu1 }
 0x59f   : > { %20636 = vst [vmem:[#allocation189_spill] sm:$0xff] %v15313_v14  ;;  %v3771_v42 = vrot.slane %v3770_v22, 4  ;;  %v15328_v24 = vadd.f32 %v5385_v11, %v20626_v25  ;;  %v15330_v7 = vpop.eup %8441  ;;  %v20643_v20 = vpack.c.bf16 %v15128_v27, %v15112_v1  ;;  %v6085_v36 = vpack.c.bf16 %v20645_v62, %v20644_v55  ;;  %20646 = vst [vmem:[#allocation171_spill] sm:$0xff] %v15338_v2  ;;  %v15348_v27 = vpop.f32.mrb[254].mxu1  ;;  %v20660_v55 = vld [vmem:[#allocation277_spill] sm:$0xff] }
 0x5a0   : > { %6350 = vmatpush1.bf16.msra.mxu0 %v20638_v56  ;;  %v5349_v47 = vadd.f32 %v20641_v17, %v20640_v45  ;;  %20642 = vst [vmem:[#allocation81_spill] sm:$0xff] %v15330_v7  ;;  %v3735_v56 = vmax.f32 %v3733_v48, %v3734_v59  ;;  %v3656_v9 = vmax.f32 %v3655_v12, %v15322_v13  ;;  %v15343_v45 = vpop.eup %8443  ;;  %20648 = vst [vmem:[#allocation127_spill] sm:$0xff] %v15348_v27  ;;  %v20649_v17 = vld [vmem:[#allocation5_spill] sm:$0xff] }
 0x5a1   : > { %6351 = vmatprep.subr.bf16.mxu0 %v20643_v20  ;;  %v15341_v58 = vadd.f32 %v5422_v29, %v20631_v57  ;;  %20647 = vst [vmem:[#allocation70_spill] sm:$0xff] %v15343_v45  ;;  %v6088_v11 = vpack.c.bf16 %v15273_v4, %v15247_v28  ;;  %v3772_v25 = vmax.f32 %v3770_v22, %v3771_v42  ;;  %v5494_v20 = vrot.slane %v20649_v17, 2  ;;  %v20650_v48 = vld [vmem:[#allocation185_spill] sm:$0xff]  ;;  %v15355_v29 = vpop.f32.mrb[255].mxu1  ;;  %v15360_v4 = vpop.eup %8445 }
 0x5a2   : > { %v3693_v1 = vmax.f32 %v3692_v63, %v15338_v2  ;;  %v15352_v59 = vadd.f32 %v20650_v48, %v5728_v15  ;;  %6387 = vmatpush1.bf16.msra.mxu1 %v6085_v36  ;;  %v3736_v12 = vrot.slane %v3735_v56, 2  ;;  %v3657_v57 = vmax.f32 %v3656_v9, %v15348_v27  ;;  %20651 = vst [vmem:[#allocation258_spill] sm:$0xff] %v15355_v29  ;;  %v15366_v42 = vpop.f32.mrb[0].mxu1  ;;  %v20655_v36 = vld [vmem:[#allocation245_spill] sm:$0xff]  ;;  %v20656_v9 = vld [vmem:[#allocation74_spill] sm:$0xff]  ;;  %v15370_v2 = vpop.eup %8447 }
 0x5a3   : > { %v15358_v62 = vadd.f32 %v5459_v54, %v20635_v61  ;;  %20652 = vst [vmem:[#allocation197_spill] sm:$0xff] %v15360_v4  ;;  %v20653_v63 = vpack.c.bf16 %v14724_v32, %v14713_v46  ;;  %6388 = vmatprep.subr.bf16.mxu1 %v6088_v11  ;;  %v3773_v22 = vrot.slane %v3772_v25, 2  ;;  %20654 = vst [vmem:[#allocation59_spill] sm:$0xff] %v15366_v42  ;;  %v5531_v48 = vrot.slane %v20655_v36, 2  ;;  %v20659_v61 = vld [vmem:[#allocation75_spill] sm:$0xff]  ;;  %v15381_v27 = vpop.eup %8449 }
 0x5a4   : > { %v3694_v15 = vmax.f32 %v3693_v1, %v15355_v29  ;;  %v5568_v28 = vrot.slane %v20656_v9, 2  ;;  %20657 = vst [vmem:[#allocation34_spill] sm:$0xff] %v15370_v2  ;;  %v20658_v54 = vpack.c.bf16 %v15154_v30, %v15147_v3  ;;  %v6087_v46 = vpack.c.bf16 %v20660_v55, %v20659_v61  ;;  %v20662_v1 = vld [vmem:[#allocation28_spill] sm:$0xff]  ;;  %20663 = vst [vmem:[#allocation267_spill] sm:$0xff] %v15381_v27 }
 0x5a5   : > { %6352 = vmatpush1.bf16.msra.mxu0 %v20653_v63  ;;  %v3737_v32 = vmax.f32 %v3735_v56, %v3736_v12  ;;  %v3658_v11 = vmax.f32 %v3657_v57, %v15366_v42  ;;  %v15378_v63 = vpop.f32.mrb[1].mxu1  ;;  %v5605_v29 = vrot.slane %v20662_v1, 2  ;;  %v6090_v13 = vpack.c.bf16 %v15303_v51, %v15286_v19  ;;  %v20666_v56 = vld [vmem:[#allocation219_spill] sm:$0xff]  ;;  %v20667_v12 = vld [vmem:[#allocation76_spill] sm:$0xff]  ;;  %v20701_v19 = vld [vmem:[#allocation278_spill] sm:$0xff] }
 0x5a6   : > { %6353 = vmatprep.subr.bf16.mxu0 %v20658_v54  ;;  %20661 = vst [vmem:[#allocation69_spill] sm:$0xff] %v15378_v63  ;;  %v3774_v16 = vmax.f32 %v3772_v25, %v3773_v22  ;;  %v15386_v10 = vmax.f32 %v3694_v15, %v15378_v63  ;;  %v15388_v30 = vpop.f32.mrb[2].mxu1  ;;  %v15391_v3 = vadd.f32 %v5494_v20, %v20649_v17  ;;  %8455 = vrcp.f32 %v5349_v47  ;;  %v15398_v61 = vpop.eup %8451  ;;  %v20671_v20 = vld [vmem:[#allocation118_spill] sm:$0xff]  ;;  %v20672_v22 = vld [vmem:[#allocation79_spill] sm:$0xff] }
 0x5a7   : > { %20665 = vst [vmem:[#allocation209_spill] sm:$0xff] %v15388_v30  ;;  %6389 = vmatpush1.bf16.msra.mxu1 %v6087_v46  ;;  %v6089_v57 = vpack.c.bf16 %v20667_v12, %v20666_v56  ;;  %v3738_v54 = vrot.slane %v3737_v32, 1  ;;  %v15396_v55 = vmax.f32 %v3658_v11, %v15388_v30  ;;  %20669 = vst [vmem:[#allocation163_spill] sm:$0xff] %v15398_v61  ;;  %v15408_v12 = vpop.eup %8453  ;;  %v20694_v56 = vld [vmem:[#allocation13_spill] sm:$0xff]  ;;  %v20697_v63 = vld [vmem:[#allocation263_spill] sm:$0xff]  ;;  %8457 = vrcp.f32 %v15328_v24 }
 0x5a8   : > { %20664 = vst [vmem:[#allocation29_spill] sm:$0xff] %v15386_v10  ;;  %v20670_v25 = vpack.c.bf16 %v14746_v50, %v14735_v43  ;;  %6390 = vmatprep.subr.bf16.mxu1 %v6090_v13  ;;  %v6092_v17 = vpack.c.bf16 %v15330_v7, %v15313_v14  ;;  %v6091_v15 = vpack.c.bf16 %v20672_v22, %v20671_v20  ;;  %v3775_v46 = vrot.slane %v3774_v16, 1  ;;  %v20675_v50 = vld [vmem:[#allocation46_spill] sm:$0xff]  ;;  %v20676_v13 = vld [vmem:[#allocation121_spill] sm:$0xff]  ;;  %v20705_v14 = vld [vmem:[#allocation44_spill] sm:$0xff] }
 0x5a9   : > { %20668 = vst [vmem:[#allocation272_spill] sm:$0xff] %v15396_v55  ;;  %v5532_v51 = vadd.f32 %v5531_v48, %v20655_v36  ;;  %20673 = vst [vmem:[#allocation284_spill] sm:$0xff] %v15408_v12  ;;  %v20674_v47 = vpack.c.bf16 %v15186_v52, %v15174_v21  ;;  %v6094_v43 = vpack.c.bf16 %v15360_v4, %v15343_v45  ;;  %v5496_v36 = vrot.slane %v15391_v3, 1  ;;  %v20678_v52 = vld [vmem:[#allocation155_spill] sm:$0xff]  ;;  %v20680_v45 = vld [vmem:[#allocation98_spill] sm:$0xff] }
 0x5aa   : > { %6354 = vmatpush1.bf16.msra.mxu0 %v20670_v25  ;;  %v6093_v11 = vpack.c.bf16 %v20676_v13, %v20675_v50  ;;  %v6096_v25 = vpack.c.bf16 %v15381_v27, %v15370_v2  ;;  %v15419_v7 = vmax.f32 %v3737_v32, %v3738_v54  ;;  %v15421_v22 = vmax.f32 %v3774_v16, %v3775_v46  ;;  %v20679_v4 = vld [vmem:[#allocation31_spill] sm:$0xff]  ;;  %v20681_v32 = vld [vmem:[#allocation153_spill] sm:$0xff]  ;;  %v20699_v10 = vld [vmem:[#allocation18_spill] sm:$0xff] }
 0x5ab   : > { %6355 = vmatprep.subr.bf16.mxu0 %v20674_v47  ;;  %v5569_v48 = vadd.f32 %v5568_v28, %v20656_v9  ;;  %v5606_v21 = vadd.f32 %v5605_v29, %v20662_v1  ;;  %6391 = vmatpush1.bf16.msra.mxu1 %v6089_v57  ;;  %v20682_v54 = vpack.c.bf16 %v14806_v5, %v14791_v37  ;;  %v20683_v28 = vld [vmem:[#allocation78_spill] sm:$0xff]  ;;  %v20684_v9 = vld [vmem:[#allocation85_spill] sm:$0xff]  ;;  %v20685_v57 = vld [vmem:[#allocation239_spill] sm:$0xff]  ;;  %v5533_v46 = vrot.slane %v5532_v51, 1 }
 0x5ac   : > { %20677 = vst [vmem:[#allocation86_spill] sm:$0xff] %v15419_v7  ;;  %v4225_v47 = vsub.f32 %v20678_v52, %v15419_v7  ;;  %v4227_v13 = vsub.f32 %v20679_v4, %v15419_v7  ;;  %v4229_v27 = vsub.f32 %v20680_v45, %v15419_v7  ;;  %6392 = vmatprep.subr.bf16.mxu1 %v6092_v17  ;;  %v20686_v45 = vld [vmem:[#allocation40_spill] sm:$0xff]  ;;  %v20687_v16 = vld [vmem:[#allocation191_spill] sm:$0xff]  ;;  %v20691_v1 = vld [vmem:[#allocation177_spill] sm:$0xff]  ;;  %8459 = vrcp.f32 %v15341_v58 }
 0x5ad   : > { %v20688_v37 = vld [vmem:[#allocation23_spill] sm:$0xff]  ;;  %v20689_v17 = vld [vmem:[#allocation228_spill] sm:$0xff]  ;;  %v20695_v2 = vpack.c.bf16 %v20694_v56, %v20694_v56  ;;  %v5570_v42 = vrot.slane %v5569_v48, 1  ;;  %v20700_v20 = vpack.c.bf16 %v20699_v10, %v20699_v10  ;;  %v5607_v0 = vrot.slane %v5606_v21, 1  ;;  %v20707_v55 = vld [vmem:[#allocation14_spill] sm:$0xff] }
 0x5ae   : > { %6356 = vmatpush1.bf16.msra.mxu0 %v20682_v54  ;;  %v20690_v29 = vld [vmem:[#allocation187_spill] sm:$0xff]  ;;  %v20692_v4 = vld [vmem:[#allocation128_spill] sm:$0xff]  ;;  %v20703_v54 = vld [vmem:[#allocation254_spill] sm:$0xff]  ;;  %v5534_v56 = vadd.f32 %v5533_v46, %v5532_v51  ;;  %8461 = vrcp.f32 %v15358_v62  ;;  %v20717_v46 = vsub.f32 %v20687_v16, %v15419_v7  ;;  %v20725_v16 = vsub.f32 %v20689_v17, %v15419_v7 }
 0x5af   : > { %v20693_v52 = vld [vmem:[#allocation259_spill] sm:$0xff]  ;;  %6393 = vmatpush1.bf16.msra.mxu1 %v6091_v15  ;;  %v5497_v15 = vadd.f32 %v5496_v36, %v15391_v3  ;;  %v20708_v10 = vld [vmem:[#allocation102_spill] sm:$0xff]  ;;  %v5695_v3 = vadd.f32 %v20578_v38, %v15317_v41  ;;  %v20710_v36 = vld [vmem:[#allocation20_spill] sm:$0xff]  ;;  %v20711_v38 = vsub.f32 %v20681_v32, %v15419_v7 }
 0x5b0   : > { %v20696_v5 = vld [vmem:[#allocation27_spill] sm:$0xff]  ;;  %6394 = vmatprep.subr.bf16.mxu1 %v6094_v43  ;;  %v15477_v50 = vpop.eup %8455  ;;  %v5608_v43 = vadd.f32 %v5607_v0, %v5606_v21  ;;  %v534_v58 = vpack.c.bf16 %v20710_v36, %v20710_v36  ;;  %v20712_v62 = vld [vmem:[#allocation82_spill] sm:$0xff] }
 0x5b1   : > { %6358 = vmatmul.mubr.bf16.vlgmr.msra.gmra.mrb[48].mxu0 %v20695_v2  ;;  %v20702_v2 = vld [vmem:[#allocation252_spill] sm:$0xff]  ;;  %20704 = vst [vmem:[#allocation149_spill] sm:$0xff] %v15477_v50  ;;  %v5730_v50 = vadd.f32 %v20707_v55, %v15352_v59  ;;  %v5185_v55 = vmul.f32 1.442695, %v4225_v47  ;;  %8463 = vrcp.f32 %v5497_v15  ;;  %v20709_v24 = vld [vmem:[#allocation15_spill] sm:$0xff]  ;;  %v15519_v0 = vadd.f32 %v20592_v33, %v5695_v3  ;;  %v15542_v15 = vpop.eup %8457  ;;  %v20732_v17 = vld [vmem:[#allocation66_spill] sm:$0xff] }
 0x5b2   : > { %6439 = vmatprep.mubr.bf16.mxu0 %v20700_v20  ;;  %v5571_v20 = vadd.f32 %v5570_v42, %v5569_v48  ;;  %v529_v51 = vpack.c.bf16 %v20709_v24, %v20709_v24  ;;  %8465 = vrcp.f32 %v5534_v56  ;;  %v5193_v42 = vmul.f32 1.442695, %v4229_v27  ;;  %20718 = vst [vmem:[#allocation292_spill] sm:$0xff] %v15542_v15  ;;  %v20722_v3 = vld [vmem:[#allocation120_spill] sm:$0xff]  ;;  %v20736_v36 = vld [vmem:[#allocation130_spill] sm:$0xff] }
 0x5b3   : > { %6395 = vmatpush1.bf16.msra.mxu1 %v6093_v11  ;;  %v6095_v11 = vpack.c.bf16 %v15408_v12, %v15398_v61  ;;  %v5731_v59 = vadd.f32 %v20565_v39, %v5730_v50  ;;  %v5197_v41 = vmul.f32 1.442695, %v20711_v38  ;;  %v20713_v50 = vsub.f32 %v20683_v28, %v15419_v7  ;;  %v20752_v12 = vld [vmem:[#allocation285_spill] sm:$0xff] }
 0x5b4   : > { %6396 = vmatprep.subr.bf16.mxu1 %v6096_v25  ;;  %v5189_v25 = vmul.f32 1.442695, %v4227_v13  ;;  %8467 = vrcp.f32 %v5571_v20  ;;  %v20714_v13 = vsub.f32 %v20684_v9, %v15419_v7  ;;  %v20715_v33 = vsub.f32 %v20685_v57, %v15419_v7  ;;  %v20720_v20 = vld [vmem:[#allocation234_spill] sm:$0xff] }
 0x5b5   : > { %8469 = vrcp.f32 %v5608_v43  ;;  %v15525_v39 = vadd.f32 %v20712_v62, %v5731_v59  ;;  %v5201_v27 = vmul.f32 1.442695, %v20713_v50  ;;  %v20716_v47 = vsub.f32 %v20686_v45, %v15419_v7  ;;  %v20721_v57 = vld [vmem:[#allocation238_spill] sm:$0xff]  ;;  %v20744_v59 = vld [vmem:[#allocation132_spill] sm:$0xff]  ;;  %v20748_v43 = vld [vmem:[#allocation275_spill] sm:$0xff] }
 0x5b6   : > { %8471 = vpow2.f32 %v5185_v55  ;;  %v5205_v48 = vmul.f32 1.442695, %v20714_v13  ;;  %v5209_v21 = vmul.f32 1.442695, %v20715_v33  ;;  %v5217_v56 = vmul.f32 1.442695, %v20717_v46  ;;  %v15555_v24 = vpop.eup %8459 }
 0x5b7   : > { %6397 = vmatpush1.bf16.msra.mxu1 %v6095_v11  ;;  %8473 = vpow2.f32 %v5189_v25  ;;  %v5213_v32 = vmul.f32 1.442695, %v20716_v47  ;;  %v20719_v28 = vsub.f32 %v20688_v37, %v15419_v7  ;;  %v15553_v55 = vpop.f32.mrb[3].mxu1  ;;  %20724 = vst [vmem:[#allocation147_spill] sm:$0xff] %v15555_v24  ;;  %v20726_v37 = vld [vmem:[#allocation223_spill] sm:$0xff]  ;;  %v20727_v25 = vld [vmem:[#allocation146_spill] sm:$0xff]  ;;  %v20730_v38 = vsub.f32 %v20690_v29, %v15419_v7 }
 0x5b8   : > { %8475 = vpow2.f32 %v5193_v42  ;;  %20723 = vst [vmem:[#allocation298_spill] sm:$0xff] %v15553_v55  ;;  %v15566_v42 = vpop.eup %8461  ;;  %v20733_v33 = vld [vmem:[#allocation84_spill] sm:$0xff]  ;;  %v20739_v13 = vld [vmem:[#allocation53_spill] sm:$0xff]  ;;  %v20740_v47 = vld [vmem:[#allocation218_spill] sm:$0xff] }
 0x5b9   : > { %v5221_v9 = vmul.f32 1.442695, %v20719_v28  ;;  %8477 = vpow2.f32 %v5197_v41  ;;  %20729 = vst [vmem:[#allocation22_spill] sm:$0xff] %v15566_v42  ;;  %v5229_v62 = vmul.f32 1.442695, %v20730_v38  ;;  %v20731_v41 = vld [vmem:[#allocation236_spill] sm:$0xff]  ;;  %v20735_v28 = vsub.f32 %v20691_v1, %v15419_v7 }
 0x5ba   : > { %6399 = vmatmul.mubr.bf16.vlgmr.msra.gmra.mrb[16].mxu1 %v529_v51  ;;  %v5225_v51 = vmul.f32 1.442695, %v20725_v16  ;;  %8479 = vpow2.f32 %v5201_v27  ;;  %v20737_v38 = vld [vmem:[#allocation154_spill] sm:$0xff]  ;;  %v20741_v27 = vld [vmem:[#allocation157_spill] sm:$0xff]  ;;  %v20747_v11 = vld [vmem:[#allocation144_spill] sm:$0xff] }
 0x5bb   : > { %6480 = vmatprep.mubr.bf16.mxu1 %v534_v58  ;;  %v15564_v58 = vpop.f32.mrb[4].mxu1  ;;  %v15577_v46 = vpop.eup %8463  ;;  %v5233_v16 = vmul.f32 1.442695, %v20735_v28  ;;  %8481 = vpow2.f32 %v5205_v48  ;;  %v20743_v28 = vsub.f32 %v20692_v4, %v15419_v7  ;;  %v20745_v48 = vld [vmem:[#allocation262_spill] sm:$0xff] }
 0x5bc   : > { %20728 = vst [vmem:[#allocation173_spill] sm:$0xff] %v15564_v58  ;;  %20734 = vst [vmem:[#allocation180_spill] sm:$0xff] %v15577_v46  ;;  %v15586_v50 = vpop.eup %8465  ;;  %8483 = vpow2.f32 %v5209_v21  ;;  %v20749_v21 = vld [vmem:[#allocation249_spill] sm:$0xff]  ;;  %v5733_v58 = vadd.f32 %v20766_v23, %v15525_v39  ;;  %v20773_v23 = vsub.f32 %v20702_v2, %v15419_v7 }
 0x5bd   : > { %20738 = vst [vmem:[#allocation205_spill] sm:$0xff] %v15586_v50  ;;  %v5237_v29 = vmul.f32 1.442695, %v20743_v28  ;;  %8485 = vpow2.f32 %v5213_v32  ;;  %v20751_v28 = vsub.f32 %v20693_v52, %v15419_v7  ;;  %v20753_v32 = vld [vmem:[#allocation289_spill] sm:$0xff] }
 0x5be   : > { %v15594_v1 = vpop.eup %8467  ;;  %8487 = vpow2.f32 %v5217_v56  ;;  %v20757_v56 = vld [vmem:[#allocation30_spill] sm:$0xff]  ;;  %v5261_v39 = vmul.f32 1.442695, %v20773_v23 }
 0x5bf   : > { %20742 = vst [vmem:[#allocation89_spill] sm:$0xff] %v15594_v1  ;;  %v15603_v45 = vpop.eup %8469  ;;  %v5241_v30 = vmul.f32 1.442695, %v20751_v28  ;;  %8489 = vpow2.f32 %v5221_v9  ;;  %v20759_v28 = vsub.f32 %v20696_v5, %v15419_v7  ;;  %v20761_v9 = vld [vmem:[#allocation45_spill] sm:$0xff]  ;;  %v20764_v5 = vsub.f32 %v20697_v63, %v15419_v7  ;;  %v20767_v1 = vld [vmem:[#allocation96_spill] sm:$0xff] }
 0x5c0   : > { %20746 = vst [vmem:[#allocation244_spill] sm:$0xff] %v15603_v45  ;;  %v15611_v4 = vpop.eup %8471  ;;  %8491 = vpow2.f32 %v5225_v51  ;;  %v20762_v45 = vld [vmem:[#allocation111_spill] sm:$0xff]  ;;  %v20768_v51 = vsub.f32 %v20767_v1, %v15419_v7  ;;  %v20771_v63 = vsub.f32 %v20701_v19, %v15419_v7  ;;  %v20775_v1 = vld [vmem:[#allocation116_spill] sm:$0xff] }
 0x5c1   : > { %20750 = vst [vmem:[#allocation124_spill] sm:$0xff] %v15611_v4  ;;  %v15620_v61 = vpop.eup %8473  ;;  %v5245_v8 = vmul.f32 1.442695, %v20759_v28  ;;  %8493 = vpow2.f32 %v5229_v62  ;;  %v5249_v28 = vmul.f32 1.442695, %v20764_v5  ;;  %v20765_v62 = vld [vmem:[#allocation203_spill] sm:$0xff] }
 0x5c2   : > { %20754 = vst [vmem:[#allocation165_spill] sm:$0xff] %v15620_v61  ;;  %v15628_v52 = vpop.eup %8475  ;;  %8495 = vpow2.f32 %v5233_v16  ;;  %v5253_v6 = vmul.f32 1.442695, %v20768_v51  ;;  %v20769_v16 = vld [vmem:[#allocation49_spill] sm:$0xff]  ;;  %v5257_v5 = vmul.f32 1.442695, %v20771_v63  ;;  %v5697_v51 = vadd.f32 %v20775_v1, %v15519_v0 }
 0x5c3   : > { %20758 = vst [vmem:[#allocation67_spill] sm:$0xff] %v15628_v52  ;;  %v15643_v15 = vpop.eup %8477  ;;  %8497 = vpow2.f32 %v5237_v29  ;;  %v20778_v19 = vld [vmem:[#allocation211_spill] sm:$0xff]  ;;  %v20781_v0 = vsub.f32 %v20706_v53, %v15419_v7  ;;  %v20788_v53 = vld [vmem:[#allocation182_spill] sm:$0xff] }
 0x5c4   : > { %20763 = vst [vmem:[#allocation11_spill] sm:$0xff] %v15643_v15  ;;  %v15659_v46 = vpop.eup %8479  ;;  %8499 = vpow2.f32 %v5241_v30  ;;  %v20776_v30 = vsub.f32 %v20703_v54, %v15419_v7  ;;  %v5734_v63 = vadd.f32 %v20778_v19, %v5733_v58  ;;  %v20783_v54 = vsub.f32 %v20708_v10, %v15421_v22 }
 0x5c5   : > { %20770 = vst [vmem:[#allocation109_spill] sm:$0xff] %v15659_v46  ;;  %v15664_v24 = vpop.eup %8481  ;;  %8501 = vpow2.f32 %v5245_v8  ;;  %v20779_v8 = vsub.f32 %v20705_v14, %v15419_v7  ;;  %v20786_v14 = vsub.f32 %v20720_v20, %v15421_v22  ;;  %v20878_v7 = vld [vmem:[#allocation176_spill] sm:$0xff] }
 0x5c6   : > { %20772 = vst [vmem:[#allocation16_spill] sm:$0xff] %v15664_v24  ;;  %v15669_v29 = vpop.eup %8483  ;;  %8503 = vpow2.f32 %v5249_v28  ;;  %v5265_v50 = vmul.f32 1.442695, %v20776_v30  ;;  %v5273_v28 = vmul.f32 1.442695, %v20781_v0  ;;  %v5735_v0 = vadd.f32 %v20788_v53, %v5734_v63  ;;  %v20871_v24 = vld [vmem:[#allocation215_spill] sm:$0xff] }
 0x5c7   : > { %20774 = vst [vmem:[#allocation115_spill] sm:$0xff] %v15669_v29  ;;  %v15676_v42 = vpop.eup %8485  ;;  %8505 = vpow2.f32 %v5253_v6  ;;  %v5269_v2 = vmul.f32 1.442695, %v20779_v8  ;;  %v5187_v30 = vmul.f32 1.442695, %v20783_v54  ;;  %v20785_v6 = vld [vmem:[#allocation56_spill] sm:$0xff]  ;;  %v20794_v63 = vsub.f32 %v20726_v37, %v15421_v22 }
 0x5c8   : > { %20777 = vst [vmem:[#allocation134_spill] sm:$0xff] %v15676_v42  ;;  %v15682_v23 = vpop.eup %8487  ;;  %8507 = vpow2.f32 %v5257_v5  ;;  %v5698_v19 = vadd.f32 %v20785_v6, %v5697_v51  ;;  %v5191_v5 = vmul.f32 1.442695, %v20786_v14  ;;  %v20791_v51 = vsub.f32 %v20722_v3, %v15421_v22  ;;  %v20792_v54 = vld [vmem:[#allocation272_spill] sm:$0xff] }
 0x5c9   : > { %20780 = vst [vmem:[#allocation169_spill] sm:$0xff] %v15682_v23  ;;  %v15687_v1 = vpop.eup %8489  ;;  %8509 = vpow2.f32 %v5261_v39  ;;  %v20789_v39 = vsub.f32 %v20721_v57, %v15421_v22  ;;  %v3660_v6 = vrot.slane %v20792_v54, 4  ;;  %v20796_v57 = vld [vmem:[#allocation235_spill] sm:$0xff]  ;;  %v20864_v23 = vsub.f32 %v20765_v62, %v15421_v22  ;;  %v20874_v62 = vld [vmem:[#allocation241_spill] sm:$0xff] }
 0x5ca   : > { %20782 = vst [vmem:[#allocation137_spill] sm:$0xff] %v15687_v1  ;;  %v15692_v58 = vpop.eup %8491  ;;  %8511 = vpow2.f32 %v5265_v50  ;;  %v5199_v50 = vmul.f32 1.442695, %v20791_v51  ;;  %v5699_v53 = vadd.f32 %v20796_v57, %v5698_v19  ;;  %v20799_v51 = vld [vmem:[#allocation193_spill] sm:$0xff]  ;;  %v20802_v19 = vsub.f32 %v20732_v17, %v15421_v22 }
 0x5cb   : > { %20784 = vst [vmem:[#allocation250_spill] sm:$0xff] %v15692_v58  ;;  %v15698_v8 = vpop.eup %8493  ;;  %8513 = vpow2.f32 %v5269_v2  ;;  %v5195_v1 = vmul.f32 1.442695, %v20789_v39  ;;  %v5203_v2 = vmul.f32 1.442695, %v20794_v63  ;;  %v3661_v63 = vmax.f32 %v20792_v54, %v3660_v6 }
 0x5cc   : > { %20787 = vst [vmem:[#allocation64_spill] sm:$0xff] %v15698_v8  ;;  %v15704_v10 = vpop.eup %8495  ;;  %8515 = vpow2.f32 %v5273_v28  ;;  %v20797_v28 = vsub.f32 %v20727_v25, %v15421_v22  ;;  %v20803_v25 = vld [vmem:[#allocation29_spill] sm:$0xff]  ;;  %v20808_v17 = vsub.f32 %v20736_v36, %v15421_v22  ;;  %v20814_v36 = vsub.f32 %v20740_v47, %v15421_v22 }
 0x5cd   : > { %20790 = vst [vmem:[#allocation164_spill] sm:$0xff] %v15704_v10  ;;  %v15710_v20 = vpop.eup %8497  ;;  %8517 = vpow2.f32 %v5187_v30  ;;  %v5736_v10 = vadd.f32 %v20799_v51, %v5735_v0  ;;  %v20800_v30 = vsub.f32 %v20731_v41, %v15421_v22  ;;  %v15735_v57 = vmax.f32 %v20803_v25, %v15553_v55  ;;  %v20887_v55 = vld [vmem:[#allocation59_spill] sm:$0xff] }
 0x5ce   : > { %20793 = vst [vmem:[#allocation54_spill] sm:$0xff] %v15710_v20  ;;  %v15715_v14 = vpop.eup %8499  ;;  %8519 = vpow2.f32 %v5191_v5  ;;  %v5207_v39 = vmul.f32 1.442695, %v20797_v28  ;;  %v5215_v5 = vmul.f32 1.442695, %v20802_v19  ;;  %v20805_v41 = vsub.f32 %v20733_v33, %v15421_v22  ;;  %v20810_v19 = vld [vmem:[#allocation107_spill] sm:$0xff] }
 0x5cf   : > { %20795 = vst [vmem:[#allocation167_spill] sm:$0xff] %v15715_v14  ;;  %v15721_v3 = vpop.eup %8501  ;;  %8521 = vpow2.f32 %v5195_v1  ;;  %v5211_v20 = vmul.f32 1.442695, %v20800_v30  ;;  %v5223_v54 = vmul.f32 1.442695, %v20808_v17  ;;  %v3662_v6 = vrot.slane %v3661_v63, 2 }
 0x5d0   : > { %20798 = vst [vmem:[#allocation192_spill] sm:$0xff] %v15721_v3  ;;  %v15727_v37 = vpop.eup %8503  ;;  %8523 = vpow2.f32 %v5199_v50  ;;  %v5219_v1 = vmul.f32 1.442695, %v20805_v41  ;;  %v20807_v50 = vld [vmem:[#allocation100_spill] sm:$0xff]  ;;  %v15753_v25 = vadd.f32 %v20810_v19, %v5736_v10  ;;  %v20811_v33 = vsub.f32 %v20737_v38, %v15421_v22 }
 0x5d1   : > { %20801 = vst [vmem:[#allocation41_spill] sm:$0xff] %v15727_v37  ;;  %v15737_v28 = vpop.eup %8505  ;;  %8525 = vpow2.f32 %v5203_v2  ;;  %v15745_v51 = vadd.f32 %v20807_v50, %v5699_v53  ;;  %v20812_v53 = vsub.f32 %v20739_v13, %v15421_v22  ;;  %v5235_v50 = vmul.f32 1.442695, %v20814_v36 }
 0x5d2   : > { %20804 = vst [vmem:[#allocation231_spill] sm:$0xff] %v15737_v28  ;;  %v15742_v0 = vpop.eup %8507  ;;  %8527 = vpow2.f32 %v5207_v39  ;;  %v5227_v2 = vmul.f32 1.442695, %v20811_v33  ;;  %v20815_v10 = vsub.f32 %v20741_v27, %v15421_v22  ;;  %v20817_v38 = vsub.f32 %v20744_v59, %v15421_v22 }
 0x5d3   : > { %20806 = vst [vmem:[#allocation108_spill] sm:$0xff] %v15742_v0  ;;  %v15750_v30 = vpop.eup %8509  ;;  %8529 = vpow2.f32 %v5211_v20  ;;  %v5231_v41 = vmul.f32 1.442695, %v20812_v53  ;;  %v3663_v20 = vmax.f32 %v3661_v63, %v3662_v6  ;;  %v20818_v33 = vsub.f32 %v20745_v48, %v15421_v22  ;;  %v20853_v0 = vld [vmem:[#allocation7_spill] sm:$0xff] }
 0x5d4   : > { %20809 = vst [vmem:[#allocation150_spill] sm:$0xff] %v15750_v30  ;;  %v15761_v39 = vpop.eup %8511  ;;  %8531 = vpow2.f32 %v5215_v5  ;;  %v5239_v17 = vmul.f32 1.442695, %v20815_v10  ;;  %v5243_v13 = vmul.f32 1.442695, %v20817_v38  ;;  %v20819_v47 = vsub.f32 %v20747_v11, %v15421_v22 }
 0x5d5   : > { %20813 = vst [vmem:[#allocation271_spill] sm:$0xff] %v15761_v39  ;;  %v15769_v19 = vpop.eup %8513  ;;  %8533 = vpow2.f32 %v5219_v1  ;;  %v5247_v5 = vmul.f32 1.442695, %v20818_v33  ;;  %v20821_v27 = vsub.f32 %v20748_v43, %v15421_v22  ;;  %v20822_v1 = vsub.f32 %v20749_v21, %v15421_v22  ;;  %v15856_v39 = vpop.f32.mrb[5].mxu1 }
 0x5d6   : > { %20816 = vst [vmem:[#allocation90_spill] sm:$0xff] %v15769_v19  ;;  %v5251_v53 = vmul.f32 1.442695, %v20819_v47  ;;  %v15780_v36 = vpop.eup %8515  ;;  %8535 = vpow2.f32 %v5223_v54  ;;  %v3664_v6 = vrot.slane %v3663_v20, 1  ;;  %v20823_v48 = vsub.f32 %v20752_v12, %v15421_v22  ;;  %20842 = vst [vmem:[#allocation196_spill] sm:$0xff] %v15856_v39  ;;  %v6199_v28 = vpop.f32.mrb[6].mxu1 }
 0x5d7   : > { %20820 = vst [vmem:[#allocation283_spill] sm:$0xff] %v15780_v36  ;;  %v5255_v63 = vmul.f32 1.442695, %v20821_v27  ;;  %v5259_v59 = vmul.f32 1.442695, %v20822_v1  ;;  %v15788_v10 = vpop.eup %8517  ;;  %8537 = vpow2.f32 %v5227_v2  ;;  %v20824_v38 = vsub.f32 %v20753_v32, %v15421_v22  ;;  %v20845_v36 = vld [vmem:[#allocation242_spill] sm:$0xff] }
 0x5d8   : > { %v5263_v11 = vmul.f32 1.442695, %v20823_v48  ;;  %v20825_v43 = vsub.f32 %v20755_v18, %v15421_v22  ;;  %v15799_v47 = vpop.eup %8519  ;;  %8539 = vpow2.f32 %v5231_v41  ;;  %v20826_v21 = vsub.f32 %v20756_v31, %v15421_v22 }
 0x5d9   : > { %v5267_v54 = vmul.f32 1.442695, %v20824_v38  ;;  %v20827_v12 = vsub.f32 %v20757_v56, %v15421_v22  ;;  %v15811_v1 = vmax.f32 %v3663_v20, %v3664_v6  ;;  %v15813_v32 = vpop.eup %8521  ;;  %8541 = vpow2.f32 %v5235_v50 }
 0x5da   : > { %v5271_v33 = vmul.f32 1.442695, %v20825_v43  ;;  %v15804_v27 = vmul.f32 1.442695, %v20826_v21  ;;  %20828 = vst [vmem:[#allocation291_spill] sm:$0xff] %v15813_v32  ;;  %v20829_v18 = vsub.f32 %v20760_v26, %v15421_v22  ;;  %v20830_v31 = vsub.f32 %v20761_v9, %v15421_v22  ;;  %v15827_v38 = vpop.eup %8523  ;;  %v20833_v26 = vld [vmem:[#allocation97_spill] sm:$0xff] }
 0x5db   : > { %v15809_v2 = vmul.f32 1.442695, %v20827_v12  ;;  %v5868_v56 = vadd.f32 %v15799_v47, %v15788_v10  ;;  %20831 = vst [vmem:[#allocation91_spill] sm:$0xff] %v15827_v38  ;;  %8543 = vpow2.f32 %v5239_v17  ;;  %v20832_v20 = vsub.f32 %v20762_v45, %v15421_v22  ;;  %v20834_v43 = vld [vmem:[#allocation225_spill] sm:$0xff]  ;;  %v15838_v9 = vpop.eup %8525  ;;  %v20837_v17 = vld [vmem:[#allocation240_spill] sm:$0xff] }
 0x5dc   : > { %v15818_v48 = vmul.f32 1.442695, %v20829_v18  ;;  %v15823_v41 = vmul.f32 1.442695, %v20830_v31  ;;  %20835 = vst [vmem:[#allocation297_spill] sm:$0xff] %v15838_v9  ;;  %8545 = vpow2.f32 %v5243_v13  ;;  %v20836_v18 = vld [vmem:[#allocation159_spill] sm:$0xff]  ;;  %v15845_v45 = vpop.eup %8527 }
 0x5dd   : > { %v15832_v50 = vmul.f32 1.442695, %v20832_v20  ;;  %v5869_v12 = vadd.f32 %v15813_v32, %v5868_v56  ;;  %20838 = vst [vmem:[#allocation217_spill] sm:$0xff] %v15845_v45  ;;  %8547 = vpow2.f32 %v5247_v5  ;;  %v20839_v20 = vsub.f32 %v20601_v34, %v15421_v22  ;;  %v20840_v21 = vld [vmem:[#allocation248_spill] sm:$0xff]  ;;  %v20841_v13 = vld [vmem:[#allocation113_spill] sm:$0xff]  ;;  %v15858_v31 = vpop.f32.mrb[44].mxu0  ;;  %v15860_v30 = vpop.eup %8529 }
 0x5de   : > { %20843 = vst [vmem:[#allocation145_spill] sm:$0xff] %v15858_v31  ;;  %20844 = vst [vmem:[#allocation168_spill] sm:$0xff] %v15860_v30  ;;  %8549 = vpow2.f32 %v5251_v53  ;;  %v15867_v19 = vpop.f32.mrb[45].mxu0  ;;  %v15869_v37 = vpop.eup %8531  ;;  %v20849_v56 = vsub.f32 %v20608_v49, %v15421_v22  ;;  %v20850_v53 = vld [vmem:[#allocation60_spill] sm:$0xff]  ;;  %v5307_v39 = vmul.f32 1.442695, %v20864_v23 }
 0x5df   : > { %v15850_v6 = vmul.f32 1.442695, %v20839_v20  ;;  %v5870_v5 = vadd.f32 %v15827_v38, %v5869_v12  ;;  %v20846_v20 = vld [vmem:[#allocation179_spill] sm:$0xff]  ;;  %20847 = vst [vmem:[#allocation299_spill] sm:$0xff] %v15867_v19  ;;  %20848 = vst [vmem:[#allocation158_spill] sm:$0xff] %v15869_v37  ;;  %8551 = vpow2.f32 %v5255_v63  ;;  %v20851_v12 = vld [vmem:[#allocation166_spill] sm:$0xff]  ;;  %v15878_v8 = vpop.eup %8533  ;;  %v20894_v38 = vsub.f32 %v20836_v18, %v15811_v1 }
 0x5e0   : > { %v5299_v3 = vmul.f32 1.442695, %v20849_v56  ;;  %v6200_v34 = vpop.f32.mrb[7].mxu1  ;;  %v6281_v31 = vpop.f32.mrb[46].mxu0  ;;  %20852 = vst [vmem:[#allocation224_spill] sm:$0xff] %v15878_v8  ;;  %8553 = vpow2.f32 %v5259_v59  ;;  %v20854_v19 = vld [vmem:[#allocation178_spill] sm:$0xff] }
 0x5e1   : > { %v5871_v28 = vadd.f32 %v15838_v9, %v5870_v5  ;;  %v6282_v56 = vpop.f32.mrb[47].mxu0  ;;  %v15885_v58 = vpop.f32.mrb[8].mxu1  ;;  %8555 = vpow2.f32 %v5263_v11  ;;  %v20857_v31 = vsub.f32 %v20618_v40, %v15421_v22  ;;  %v20858_v59 = vld [vmem:[#allocation172_spill] sm:$0xff]  ;;  %v20859_v5 = vld [vmem:[#allocation123_spill] sm:$0xff]  ;;  %v20868_v40 = vld [vmem:[#allocation253_spill] sm:$0xff]  ;;  %v20877_v9 = vsub.f32 %v20769_v16, %v15421_v22 }
 0x5e2   : > { %20855 = vst [vmem:[#allocation42_spill] sm:$0xff] %v15885_v58  ;;  %v15887_v14 = vpop.eup %8535  ;;  %v15896_v63 = vpop.f32.mrb[9].mxu1  ;;  %8557 = vpow2.f32 %v5267_v54  ;;  %v20861_v49 = vld [vmem:[#allocation200_spill] sm:$0xff]  ;;  %v20866_v54 = vld [vmem:[#allocation279_spill] sm:$0xff]  ;;  %v20884_v16 = vld [vmem:[#allocation6_spill] sm:$0xff] }
 0x5e3   : > { %20856 = vst [vmem:[#allocation61_spill] sm:$0xff] %v15887_v14  ;;  %v5303_v34 = vmul.f32 1.442695, %v20857_v31  ;;  %20860 = vst [vmem:[#allocation77_spill] sm:$0xff] %v15896_v63  ;;  %v15898_v42 = vpop.eup %8537  ;;  %v5872_v56 = vadd.f32 %v15845_v45, %v5871_v28  ;;  %v20862_v58 = vld [vmem:[#allocation264_spill] sm:$0xff]  ;;  %v6240_v31 = vpop.f32.mrb[10].mxu1  ;;  %8559 = vpow2.f32 %v5271_v33 }
 0x5e4   : > { %v15905_v29 = vpop.eup %8539  ;;  %v20865_v63 = vld [vmem:[#allocation162_spill] sm:$0xff]  ;;  %v6241_v46 = vpop.f32.mrb[11].mxu1  ;;  %8561 = vpow2.f32 %v15804_v27  ;;  %v20869_v11 = vld [vmem:[#allocation255_spill] sm:$0xff]  ;;  %v3697_v27 = vrot.slane %v15735_v57, 4  ;;  %v5311_v28 = vmul.f32 1.442695, %v20877_v9  ;;  %v20890_v9 = vsub.f32 %v20833_v26, %v15811_v1 }
 0x5e5   : > { %20863 = vst [vmem:[#allocation73_spill] sm:$0xff] %v15905_v29  ;;  %v15914_v45 = vpop.eup %8541  ;;  %v5873_v31 = vadd.f32 %v15860_v30, %v5872_v56  ;;  %8563 = vpow2.f32 %v15809_v2  ;;  %v20872_v46 = vld [vmem:[#allocation143_spill] sm:$0xff]  ;;  %v20875_v30 = vld [vmem:[#allocation126_spill] sm:$0xff]  ;;  %v20896_v26 = vld [vmem:[#allocation68_spill] sm:$0xff] }
 0x5e6   : > { %20867 = vst [vmem:[#allocation174_spill] sm:$0xff] %v15914_v45  ;;  %v15922_v23 = vpop.eup %8543  ;;  %8565 = vpow2.f32 %v15818_v48  ;;  %v20879_v48 = vld [vmem:[#allocation51_spill] sm:$0xff]  ;;  %v20881_v33 = vld [vmem:[#allocation294_spill] sm:$0xff]  ;;  %v5057_v35 = vmul.f32 1.442695, %v20890_v9  ;;  %v5738_v9 = vadd.f32 %v20896_v26, %v15753_v25  ;;  %v20901_v25 = vsub.f32 %v20841_v13, %v15811_v1 }
 0x5e7   : > { %20870 = vst [vmem:[#allocation129_spill] sm:$0xff] %v15922_v23  ;;  %v15930_v44 = vpop.eup %8545  ;;  %v5874_v56 = vadd.f32 %v15869_v37, %v5873_v31  ;;  %8567 = vpow2.f32 %v15823_v41  ;;  %v20882_v41 = vld [vmem:[#allocation37_spill] sm:$0xff]  ;;  %v20885_v31 = vld [vmem:[#allocation127_spill] sm:$0xff]  ;;  %v20907_v13 = vsub.f32 %v20846_v20, %v15811_v1  ;;  %v20912_v20 = vsub.f32 %v20853_v0, %v15811_v1 }
 0x5e8   : > { %20873 = vst [vmem:[#allocation104_spill] sm:$0xff] %v15930_v44  ;;  %v15938_v60 = vpop.eup %8547  ;;  %8569 = vpow2.f32 %v15832_v50  ;;  %v3698_v50 = vmax.f32 %v15735_v57, %v3697_v27  ;;  %v20891_v57 = vsub.f32 %v20834_v43, %v15811_v1  ;;  %v20897_v43 = vsub.f32 %v20837_v17, %v15811_v1  ;;  %v20903_v17 = vld [vmem:[#allocation99_spill] sm:$0xff] }
 0x5e9   : > { %20876 = vst [vmem:[#allocation188_spill] sm:$0xff] %v15938_v60  ;;  %v15948_v37 = vpop.eup %8549  ;;  %v5875_v2 = vadd.f32 %v15878_v8, %v5874_v56  ;;  %8571 = vpow2.f32 %v15850_v6  ;;  %v20888_v8 = vld [vmem:[#allocation209_spill] sm:$0xff]  ;;  %v20917_v0 = vsub.f32 %v20861_v49, %v15811_v1 }
 0x5ea   : > { %20880 = vst [vmem:[#allocation269_spill] sm:$0xff] %v15948_v37  ;;  %v15956_v22 = vpop.eup %8551  ;;  %8573 = vpow2.f32 %v5299_v3  ;;  %v5061_v27 = vmul.f32 1.442695, %v20891_v57  ;;  %v5069_v57 = vmul.f32 1.442695, %v20897_v43  ;;  %v20906_v43 = vld [vmem:[#allocation257_spill] sm:$0xff] }
 0x5eb   : > { %20883 = vst [vmem:[#allocation106_spill] sm:$0xff] %v15956_v22  ;;  %v15964_v52 = vpop.eup %8553  ;;  %v5876_v56 = vadd.f32 %v15887_v14, %v5875_v2  ;;  %8575 = vpow2.f32 %v5303_v34  ;;  %v20893_v2 = vld [vmem:[#allocation233_spill] sm:$0xff]  ;;  %v5065_v34 = vmul.f32 1.442695, %v20894_v38 }
 0x5ec   : > { %20886 = vst [vmem:[#allocation24_spill] sm:$0xff] %v15964_v52  ;;  %v15971_v6 = vpop.eup %8555  ;;  %v5701_v14 = vadd.f32 %v20893_v2, %v15745_v51  ;;  %8577 = vpow2.f32 %v5307_v39  ;;  %v20899_v39 = vsub.f32 %v20840_v21, %v15811_v1 }
 0x5ed   : > { %20889 = vst [vmem:[#allocation12_spill] sm:$0xff] %v15971_v6  ;;  %v15979_v3 = vpop.eup %8557  ;;  %v5877_v15 = vadd.f32 %v15898_v42, %v5876_v56  ;;  %8579 = vpow2.f32 %v5311_v28  ;;  %v5077_v28 = vmul.f32 1.442695, %v20901_v25 }
 0x5ee   : > { %20892 = vst [vmem:[#allocation198_spill] sm:$0xff] %v15979_v3  ;;  %v15987_v32 = vpop.eup %8559  ;;  %v3699_v3 = vrot.slane %v3698_v50, 2  ;;  %8581 = vpow2.f32 %v5057_v35  ;;  %v5073_v38 = vmul.f32 1.442695, %v20899_v39  ;;  %v16008_v2 = vadd.f32 %v20903_v17, %v5701_v14 }
 0x5ef   : > { %20895 = vst [vmem:[#allocation101_spill] sm:$0xff] %v15987_v32  ;;  %v15994_v6 = vpop.eup %8561  ;;  %v5878_v51 = vadd.f32 %v15905_v29, %v5877_v15  ;;  %8583 = vpow2.f32 %v5061_v27  ;;  %v20904_v35 = vsub.f32 %v20845_v36, %v15811_v1  ;;  %v16017_v27 = vadd.f32 %v20906_v43, %v5738_v9 }
 0x5f0   : > { %20898 = vst [vmem:[#allocation296_spill] sm:$0xff] %v15994_v6  ;;  %v16000_v18 = vpop.eup %8563  ;;  %8585 = vpow2.f32 %v5065_v34  ;;  %v5085_v39 = vmul.f32 1.442695, %v20907_v13  ;;  %v3700_v25 = vmax.f32 %v3698_v50, %v3699_v3  ;;  %v20909_v36 = vsub.f32 %v20850_v53, %v15811_v1 }
 0x5f1   : > { %20900 = vst [vmem:[#allocation260_spill] sm:$0xff] %v16000_v18  ;;  %v16005_v56 = vpop.eup %8565  ;;  %v5879_v26 = vadd.f32 %v15914_v45, %v5878_v51  ;;  %v5081_v15 = vmul.f32 1.442695, %v20904_v35  ;;  %8587 = vpow2.f32 %v5069_v57  ;;  %v20910_v17 = vsub.f32 %v20851_v12, %v15811_v1 }
 0x5f2   : > { %20902 = vst [vmem:[#allocation261_spill] sm:$0xff] %v16005_v56  ;;  %v16014_v21 = vpop.eup %8567  ;;  %8589 = vpow2.f32 %v5073_v38  ;;  %v5089_v34 = vmul.f32 1.442695, %v20909_v36  ;;  %v5097_v50 = vmul.f32 1.442695, %v20912_v20  ;;  %v20913_v3 = vsub.f32 %v20854_v19, %v15811_v1 }
 0x5f3   : > { %20905 = vst [vmem:[#allocation122_spill] sm:$0xff] %v16014_v21  ;;  %v16022_v14 = vpop.eup %8569  ;;  %v5880_v51 = vadd.f32 %v15922_v23, %v5879_v26  ;;  %v5093_v9 = vmul.f32 1.442695, %v20910_v17  ;;  %8591 = vpow2.f32 %v5077_v28  ;;  %v20914_v38 = vsub.f32 %v20858_v59, %v15811_v1  ;;  %v20976_v23 = vld [vmem:[#allocation105_spill] sm:$0xff] }
 0x5f4   : > { %20908 = vst [vmem:[#allocation141_spill] sm:$0xff] %v16022_v14  ;;  %v16031_v35 = vpop.eup %8571  ;;  %v5101_v57 = vmul.f32 1.442695, %v20913_v3  ;;  %8593 = vpow2.f32 %v5081_v15  ;;  %v20916_v28 = vsub.f32 %v20859_v5, %v15811_v1  ;;  %v5113_v13 = vmul.f32 1.442695, %v20917_v0 }
 0x5f5   : > { %20911 = vst [vmem:[#allocation92_spill] sm:$0xff] %v16031_v35  ;;  %v5105_v53 = vmul.f32 1.442695, %v20914_v38  ;;  %v16042_v26 = vpop.eup %8573  ;;  %v5881_v12 = vadd.f32 %v15930_v44, %v5880_v51  ;;  %8595 = vpow2.f32 %v5085_v39  ;;  %v20918_v19 = vsub.f32 %v20862_v58, %v15811_v1 }
 0x5f6   : > { %20915 = vst [vmem:[#allocation140_spill] sm:$0xff] %v16042_v26  ;;  %v5109_v43 = vmul.f32 1.442695, %v20916_v28  ;;  %v16051_v36 = vpop.eup %8575  ;;  %v20919_v17 = vsub.f32 %v20865_v63, %v15811_v1  ;;  %v20920_v15 = vsub.f32 %v20866_v54, %v15811_v1  ;;  %8597 = vpow2.f32 %v5089_v34 }
 0x5f7   : > { %v5117_v59 = vmul.f32 1.442695, %v20918_v19  ;;  %v16062_v20 = vpop.eup %8577  ;;  %v5882_v49 = vadd.f32 %v15938_v60, %v5881_v12  ;;  %v20921_v39 = vsub.f32 %v20868_v40, %v15811_v1  ;;  %v20922_v58 = vsub.f32 %v20869_v11, %v15811_v1  ;;  %v20967_v60 = vld [vmem:[#allocation266_spill] sm:$0xff] }
 0x5f8   : > { %v5121_v51 = vmul.f32 1.442695, %v20919_v17  ;;  %v5125_v5 = vmul.f32 1.442695, %v20920_v15  ;;  %v16071_v28 = vpop.eup %8579  ;;  %8599 = vpow2.f32 %v5093_v9  ;;  %v20924_v63 = vsub.f32 %v20871_v24, %v15811_v1 }
 0x5f9   : > { %v5129_v3 = vmul.f32 1.442695, %v20921_v39  ;;  %v5133_v38 = vmul.f32 1.442695, %v20922_v58  ;;  %20923 = vst [vmem:[#allocation270_spill] sm:$0xff] %v16071_v28  ;;  %v20925_v0 = vsub.f32 %v20872_v46, %v15811_v1  ;;  %v20926_v34 = vsub.f32 %v20874_v62, %v15811_v1  ;;  %v16084_v19 = vpop.eup %8581 }
 0x5fa   : > { %v5137_v54 = vmul.f32 1.442695, %v20924_v63  ;;  %v5883_v11 = vadd.f32 %v15948_v37, %v5882_v49  ;;  %8601 = vpow2.f32 %v5097_v50  ;;  %v20927_v9 = vsub.f32 %v20875_v30, %v15811_v1  ;;  %v16097_v15 = vpop.eup %8583  ;;  %v20965_v37 = vld [vmem:[#allocation43_spill] sm:$0xff] }
 0x5fb   : > { %v5141_v12 = vmul.f32 1.442695, %v20925_v0  ;;  %v16082_v40 = vmul.f32 1.442695, %v20926_v34  ;;  %v20928_v24 = vsub.f32 %v20878_v7, %v15811_v1  ;;  %8603 = vpow2.f32 %v5101_v57  ;;  %v16114_v7 = vpop.eup %8585 }
 0x5fc   : > { %v16090_v17 = vmul.f32 1.442695, %v20927_v9  ;;  %v20929_v62 = vsub.f32 %v20879_v48, %v15811_v1  ;;  %v20930_v50 = vsub.f32 %v20881_v33, %v15811_v1  ;;  %v20931_v30 = vsub.f32 %v20882_v41, %v15811_v1  ;;  %20932 = vst [vmem:[#allocation135_spill] sm:$0xff] %v16114_v7  ;;  %v16127_v34 = vpop.eup %8587 }
 0x5fd   : > { %v16095_v46 = vmul.f32 1.442695, %v20928_v24  ;;  %v5884_v63 = vadd.f32 %v15956_v22, %v5883_v11  ;;  %8605 = vpow2.f32 %v5105_v53  ;;  %v20933_v48 = vsub.f32 %v20884_v16, %v15811_v1  ;;  %20935 = vst [vmem:[#allocation207_spill] sm:$0xff] %v16127_v34  ;;  %v16136_v16 = vpop.eup %8589 }
 0x5fe   : > { %v16102_v39 = vmul.f32 1.442695, %v20929_v62  ;;  %v16107_v49 = vmul.f32 1.442695, %v20930_v50  ;;  %v16112_v58 = vmul.f32 1.442695, %v20931_v30  ;;  %v20934_v33 = vsub.f32 %v20885_v31, %v15811_v1 }
 0x5ff   : > { %v16120_v57 = vmul.f32 1.442695, %v20933_v48  ;;  %8607 = vpow2.f32 %v5109_v43  ;;  %v20936_v41 = vsub.f32 %v20887_v55, %v15811_v1  ;;  %v5757_v53 = vadd.f32 %v16097_v15, %v16084_v19  ;;  %20937 = vst [vmem:[#allocation26_spill] sm:$0xff] %v16136_v16  ;;  %v16146_v55 = vpop.eup %8591 }
 0x600   : > { %v16125_v0 = vmul.f32 1.442695, %v20934_v33  ;;  %v3701_v11 = vrot.slane %v3700_v25, 1  ;;  %v5885_v24 = vadd.f32 %v15964_v52, %v5884_v63  ;;  %8609 = vpow2.f32 %v5113_v13  ;;  %20939 = vst [vmem:[#allocation103_spill] sm:$0xff] %v16146_v55  ;;  %v16153_v63 = vpop.eup %8593  ;;  %v20941_v13 = vld [vmem:[#allocation12_spill] sm:$0xff] }
 0x601   : > { %v16132_v9 = vmul.f32 1.442695, %v20936_v41  ;;  %v20938_v31 = vsub.f32 %v20888_v8, %v15811_v1  ;;  %v6130_v43 = vpack.c.bf16 %v15799_v47, %v15788_v10  ;;  %8611 = vpow2.f32 %v5117_v59  ;;  %20940 = vst [vmem:[#allocation273_spill] sm:$0xff] %v16153_v63  ;;  %v20942_v8 = vld [vmem:[#allocation291_spill] sm:$0xff]  ;;  %v16160_v59 = vpop.eup %8595 }
 0x602   : > { %v5758_v50 = vadd.f32 %v16114_v7, %v5757_v53  ;;  %v16149_v30 = vmax.f32 %v3700_v25, %v3701_v11  ;;  %v6129_v48 = vpack.c.bf16 %v15620_v61, %v15611_v4  ;;  %v5886_v33 = vadd.f32 %v20941_v13, %v5885_v24  ;;  %v20943_v1 = vld [vmem:[#allocation91_spill] sm:$0xff]  ;;  %20946 = vst [vmem:[#allocation83_spill] sm:$0xff] %v16160_v59  ;;  %v20947_v53 = vld [vmem:[#allocation72_spill] sm:$0xff]  ;;  %v20950_v24 = vld [vmem:[#allocation198_spill] sm:$0xff] }
 0x603   : > { %v16142_v62 = vmul.f32 1.442695, %v20938_v31  ;;  %8613 = vpow2.f32 %v5121_v51  ;;  %6448 = vmatprep.subr.bf16.mxu1 %v6130_v43  ;;  %v6132_v41 = vpack.c.bf16 %v20943_v1, %v20942_v8  ;;  %v20944_v10 = vld [vmem:[#allocation67_spill] sm:$0xff]  ;;  %v20948_v61 = vld [vmem:[#allocation276_spill] sm:$0xff]  ;;  %v16167_v51 = vpop.eup %8597 }
 0x604   : > { %v20945_v47 = vld [vmem:[#allocation11_spill] sm:$0xff]  ;;  %8615 = vpow2.f32 %v5125_v5  ;;  %v5759_v25 = vadd.f32 %v16127_v34, %v5758_v50  ;;  %6449 = vmatpush1.bf16.msra.mxu1 %v6129_v48  ;;  %20949 = vst [vmem:[#allocation222_spill] sm:$0xff] %v16167_v51  ;;  %v5887_v43 = vadd.f32 %v20950_v24, %v5886_v33  ;;  %v16174_v50 = vpop.eup %8599  ;;  %v20954_v4 = vld [vmem:[#allocation232_spill] sm:$0xff]  ;;  %v20985_v5 = vld [vmem:[#allocation69_spill] sm:$0xff] }
 0x605   : > { %v6131_v31 = vpack.c.bf16 %v20945_v47, %v20944_v10  ;;  %8617 = vpow2.f32 %v5129_v3  ;;  %v20951_v8 = vld [vmem:[#allocation87_spill] sm:$0xff]  ;;  %v20952_v47 = vld [vmem:[#allocation226_spill] sm:$0xff]  ;;  %6450 = vmatprep.subr.bf16.mxu1 %v6132_v41  ;;  %20953 = vst [vmem:[#allocation212_spill] sm:$0xff] %v16174_v50  ;;  %v16181_v33 = vpop.eup %8601  ;;  %v20960_v48 = vld [vmem:[#allocation36_spill] sm:$0xff] }
 0x606   : > { %8619 = vpow2.f32 %v5133_v38  ;;  %v5760_v11 = vadd.f32 %v16136_v16, %v5759_v25  ;;  %v20955_v10 = vld [vmem:[#allocation58_spill] sm:$0xff]  ;;  %20956 = vst [vmem:[#allocation136_spill] sm:$0xff] %v16181_v33  ;;  %v5888_v3 = vadd.f32 %v15987_v32, %v5887_v43  ;;  %v20957_v1 = vld [vmem:[#allocation151_spill] sm:$0xff]  ;;  %v16188_v38 = vpop.eup %8603  ;;  %v20962_v24 = vld [vmem:[#allocation208_spill] sm:$0xff]  ;;  %v20990_v29 = vsub.f32 %v20952_v47, %v16149_v30 }
 0x607   : > { %8621 = vpow2.f32 %v5137_v54  ;;  %v20958_v41 = vld [vmem:[#allocation246_spill] sm:$0xff]  ;;  %20959 = vst [vmem:[#allocation35_spill] sm:$0xff] %v16188_v38  ;;  %v20961_v13 = vld [vmem:[#allocation247_spill] sm:$0xff]  ;;  %v16195_v43 = vpop.eup %8605  ;;  %v20980_v34 = vld [vmem:[#allocation48_spill] sm:$0xff] }
 0x608   : > { %8623 = vpow2.f32 %v5141_v12  ;;  %v5761_v25 = vadd.f32 %v16146_v55, %v5760_v11  ;;  %6451 = vmatpush1.bf16.msra.mxu1 %v6131_v31  ;;  %v5889_v54 = vadd.f32 %v15994_v6, %v5888_v3  ;;  %v20963_v12 = vld [vmem:[#allocation186_spill] sm:$0xff]  ;;  %v20964_v31 = vld [vmem:[#allocation119_spill] sm:$0xff]  ;;  %v20995_v47 = vld [vmem:[#allocation181_spill] sm:$0xff] }
 0x609   : > { %8625 = vpow2.f32 %v16082_v40  ;;  %v16203_v11 = vpop.eup %8607  ;;  %v20966_v32 = vld [vmem:[#allocation55_spill] sm:$0xff]  ;;  %v20972_v55 = vld [vmem:[#allocation290_spill] sm:$0xff] }
 0x60a   : > { %8627 = vpow2.f32 %v16090_v17  ;;  %v5762_v52 = vadd.f32 %v16153_v63, %v5761_v25  ;;  %v16211_v6 = vpop.eup %8609  ;;  %v5890_v40 = vadd.f32 %v16000_v18, %v5889_v54  ;;  %v20968_v3 = vld [vmem:[#allocation63_spill] sm:$0xff]  ;;  %v20969_v63 = vld [vmem:[#allocation281_spill] sm:$0xff]  ;;  %v20971_v17 = vld [vmem:[#allocation286_spill] sm:$0xff] }
 0x60b   : > { %8629 = vpow2.f32 %v16095_v46  ;;  %v16219_v44 = vpop.eup %8611  ;;  %v20973_v54 = vld [vmem:[#allocation125_spill] sm:$0xff] }
 0x60c   : > { %8631 = vpow2.f32 %v16102_v39  ;;  %v5763_v25 = vadd.f32 %v16160_v59, %v5762_v52  ;;  %v5891_v46 = vadd.f32 %v16005_v56, %v5890_v40  ;;  %v20974_v59 = vld [vmem:[#allocation274_spill] sm:$0xff]  ;;  %v20977_v40 = vld [vmem:[#allocation33_spill] sm:$0xff] }
 0x60d   : > { %v16227_v18 = vpop.eup %8613  ;;  %8633 = vpow2.f32 %v16107_v49  ;;  %v20975_v39 = vld [vmem:[#allocation114_spill] sm:$0xff] }
 0x60e   : > { %20970 = vst [vmem:[#allocation160_spill] sm:$0xff] %v16227_v18  ;;  %v16235_v16 = vpop.eup %8615  ;;  %8635 = vpow2.f32 %v16112_v58  ;;  %v5764_v52 = vadd.f32 %v16167_v51, %v5763_v25  ;;  %v5892_v49 = vadd.f32 %v16014_v21, %v5891_v46  ;;  %v20978_v51 = vld [vmem:[#allocation268_spill] sm:$0xff]  ;;  %v20982_v46 = vld [vmem:[#allocation171_spill] sm:$0xff] }
 0x60f   : > { %v16243_v56 = vpop.eup %8617  ;;  %8637 = vpow2.f32 %v16120_v57  ;;  %v20979_v58 = vld [vmem:[#allocation148_spill] sm:$0xff] }
 0x610   : > { %v16251_v45 = vpop.eup %8619  ;;  %8639 = vpow2.f32 %v16125_v0  ;;  %v5765_v25 = vadd.f32 %v16174_v50, %v5764_v52  ;;  %v5893_v57 = vadd.f32 %v16022_v14, %v5892_v49  ;;  %v20983_v50 = vld [vmem:[#allocation258_spill] sm:$0xff]  ;;  %v20988_v49 = vsub.f32 %v20948_v61, %v16149_v30 }
 0x611   : > { %v16259_v21 = vpop.eup %8621  ;;  %8641 = vpow2.f32 %v16132_v9  ;;  %v20993_v61 = vsub.f32 %v20954_v4, %v16149_v30  ;;  %v20999_v4 = vld [vmem:[#allocation175_spill] sm:$0xff] }
 0x612   : > { %v16267_v7 = vpop.eup %8623  ;;  %8643 = vpow2.f32 %v16142_v62  ;;  %v5766_v52 = vadd.f32 %v16181_v33, %v5765_v25  ;;  %v5894_v9 = vadd.f32 %v16031_v35, %v5893_v57  ;;  %v20987_v62 = vsub.f32 %v20947_v53, %v16149_v30  ;;  %v20991_v53 = vld [vmem:[#allocation237_spill] sm:$0xff] }
 0x613   : > { %20981 = vst [vmem:[#allocation65_spill] sm:$0xff] %v16267_v7  ;;  %v16275_v14 = vpop.eup %8625  ;;  %v20989_v57 = vsub.f32 %v20951_v8, %v16149_v30  ;;  %v5071_v7 = vmul.f32 1.442695, %v20990_v29  ;;  %v16313_v29 = vadd.f32 %v20995_v47, %v16017_v27 }
 0x614   : > { %20984 = vst [vmem:[#allocation282_spill] sm:$0xff] %v16275_v14  ;;  %v5059_v25 = vmul.f32 1.442695, %v20987_v62  ;;  %v16285_v33 = vpop.eup %8627  ;;  %v5767_v22 = vadd.f32 %v16188_v38, %v5766_v52  ;;  %v5063_v14 = vmul.f32 1.442695, %v20988_v49  ;;  %v16301_v62 = vadd.f32 %v20991_v53, %v16008_v2  ;;  %v16307_v38 = vpop.f32.mrb[12].mxu1 }
 0x615   : > { %v5067_v35 = vmul.f32 1.442695, %v20989_v57  ;;  %v16297_v0 = vpop.eup %8629  ;;  %v5895_v52 = vadd.f32 %v16042_v26, %v5894_v9  ;;  %v5075_v49 = vmul.f32 1.442695, %v20993_v61  ;;  %20994 = vst [vmem:[#allocation8_spill] sm:$0xff] %v16307_v38  ;;  %20996 = vst [vmem:[#allocation112_spill] sm:$0xff] %v16313_v29  ;;  %v20997_v2 = vsub.f32 %v20955_v10, %v16149_v30 }
 0x616   : > { %20992 = vst [vmem:[#allocation170_spill] sm:$0xff] %v16301_v62  ;;  %8645 = vpow2.f32 %v5059_v25  ;;  %v16309_v8 = vpop.eup %8631  ;;  %v5768_v57 = vadd.f32 %v16195_v43, %v5767_v22  ;;  %v16319_v25 = vpop.f32.mrb[13].mxu1  ;;  %v21000_v61 = vld [vmem:[#allocation86_spill] sm:$0xff]  ;;  %v21003_v22 = vsub.f32 %v20957_v1, %v16149_v30  ;;  %v21004_v10 = vld [vmem:[#allocation256_spill] sm:$0xff] }
 0x617   : > { %8647 = vpow2.f32 %v5063_v14  ;;  %v5079_v9 = vmul.f32 1.442695, %v20997_v2  ;;  %20998 = vst [vmem:[#allocation93_spill] sm:$0xff] %v16319_v25  ;;  %v16321_v53 = vpop.eup %8633  ;;  %v21001_v62 = vsub.f32 %v20999_v4, %v21000_v61  ;;  %v5896_v26 = vadd.f32 %v16051_v36, %v5895_v52  ;;  %v6322_v14 = vpop.f32.mrb[14].mxu1  ;;  %v21008_v1 = vld [vmem:[#allocation110_spill] sm:$0xff] }
 0x618   : > { %8649 = vpow2.f32 %v5067_v35  ;;  %v5083_v27 = vmul.f32 1.442695, %v21003_v22  ;;  %v16332_v47 = vpop.eup %8635  ;;  %v21005_v2 = vsub.f32 %v21004_v10, %v21000_v61  ;;  %v5769_v25 = vadd.f32 %v16203_v11, %v5768_v57  ;;  %v6323_v35 = vpop.f32.mrb[15].mxu1 }
 0x619   : > { %v16326_v38 = vmul.f32 1.442695, %v21001_v62  ;;  %8651 = vpow2.f32 %v5071_v7  ;;  %v21007_v62 = vsub.f32 %v20958_v41, %v16149_v30  ;;  %v16343_v4 = vpop.eup %8637  ;;  %v21009_v22 = vsub.f32 %v21008_v1, %v21000_v61 }
 0x61a   : > { %v16337_v29 = vmul.f32 1.442695, %v21005_v2  ;;  %8653 = vpow2.f32 %v5075_v49  ;;  %v21011_v10 = vsub.f32 %v20960_v48, %v16149_v30  ;;  %v16354_v7 = vpop.eup %8639  ;;  %v5770_v41 = vadd.f32 %v16211_v6, %v5769_v25 }
 0x61b   : > { %21002 = vst [vmem:[#allocation214_spill] sm:$0xff] %v16326_v38  ;;  %v5087_v52 = vmul.f32 1.442695, %v21007_v62  ;;  %v16348_v14 = vmul.f32 1.442695, %v21009_v22  ;;  %v5897_v38 = vadd.f32 %v16062_v20, %v5896_v26  ;;  %8655 = vpow2.f32 %v5079_v9  ;;  %v16363_v22 = vpop.eup %8641 }
 0x61c   : > { %21006 = vst [vmem:[#allocation38_spill] sm:$0xff] %v16337_v29  ;;  %v5091_v57 = vmul.f32 1.442695, %v21011_v10  ;;  %v21012_v2 = vsub.f32 %v20961_v13, %v16149_v30  ;;  %v21013_v35 = vsub.f32 %v20962_v24, %v16149_v30  ;;  %8657 = vpow2.f32 %v5083_v27  ;;  %v16374_v13 = vpop.eup %8643 }
 0x61d   : > { %21010 = vst [vmem:[#allocation71_spill] sm:$0xff] %v16348_v14  ;;  %v16366_v26 = vadd.f32 %v16071_v28, %v5897_v38  ;;  %v21015_v48 = vsub.f32 %v20963_v12, %v16149_v30  ;;  %v21016_v9 = vsub.f32 %v20964_v31, %v16149_v30  ;;  %21017 = vst [vmem:[#allocation183_spill] sm:$0xff] %v16374_v13  ;;  %8659 = vpow2.f32 %v5087_v52  ;;  %v21040_v14 = vld [vmem:[#allocation16_spill] sm:$0xff] }
 0x61e   : > { %v5095_v62 = vmul.f32 1.442695, %v21012_v2  ;;  %v5099_v1 = vmul.f32 1.442695, %v21013_v35  ;;  %v5771_v10 = vadd.f32 %v16219_v44, %v5770_v41  ;;  %v21018_v24 = vsub.f32 %v20965_v37, %v16149_v30 }
 0x61f   : > { %21014 = vst [vmem:[#allocation57_spill] sm:$0xff] %v16366_v26  ;;  %v5103_v49 = vmul.f32 1.442695, %v21015_v48  ;;  %v5107_v25 = vmul.f32 1.442695, %v21016_v9  ;;  %v21019_v38 = vsub.f32 %v20966_v32, %v16149_v30  ;;  %8661 = vpow2.f32 %v5091_v57 }
 0x620   : > { %v5111_v2 = vmul.f32 1.442695, %v21018_v24  ;;  %v21020_v12 = vsub.f32 %v20967_v60, %v16149_v30  ;;  %v21021_v31 = vsub.f32 %v20968_v3, %v16149_v30  ;;  %v21022_v52 = vsub.f32 %v20969_v63, %v16149_v30  ;;  %v8646_v24 = vpop.eup %8645 }
 0x621   : > { %v5115_v27 = vmul.f32 1.442695, %v21019_v38  ;;  %v5772_v37 = vadd.f32 %v16227_v18, %v5771_v10  ;;  %8663 = vpow2.f32 %v5095_v62  ;;  %v21023_v32 = vsub.f32 %v20971_v17, %v16149_v30  ;;  %v8648_v17 = vpop.eup %8647 }
 0x622   : > { %v5119_v35 = vmul.f32 1.442695, %v21020_v12  ;;  %v5123_v48 = vmul.f32 1.442695, %v21021_v31  ;;  %v5127_v41 = vmul.f32 1.442695, %v21022_v52  ;;  %v21024_v57 = vsub.f32 %v20972_v55, %v16149_v30 }
 0x623   : > { %v5131_v9 = vmul.f32 1.442695, %v21023_v32  ;;  %8665 = vpow2.f32 %v5099_v1  ;;  %v21025_v3 = vsub.f32 %v20973_v54, %v16149_v30  ;;  %v21026_v63 = vsub.f32 %v20974_v59, %v16149_v30  ;;  %v8650_v59 = vpop.eup %8649 }
 0x624   : > { %v5135_v60 = vmul.f32 1.442695, %v21024_v57  ;;  %v21027_v62 = vsub.f32 %v20975_v39, %v16149_v30  ;;  %v5773_v31 = vadd.f32 %v16235_v16, %v5772_v37  ;;  %8667 = vpow2.f32 %v5103_v49 }
 0x625   : > { %v5139_v38 = vmul.f32 1.442695, %v21025_v3  ;;  %v5143_v12 = vmul.f32 1.442695, %v21026_v63  ;;  %v21028_v55 = vsub.f32 %v20976_v23, %v16149_v30  ;;  %v21029_v54 = vsub.f32 %v20977_v40, %v16149_v30  ;;  %v8652_v40 = vpop.eup %8651 }
 0x626   : > { %v16408_v10 = vmul.f32 1.442695, %v21027_v62  ;;  %8669 = vpow2.f32 %v5107_v25  ;;  %v21030_v39 = vsub.f32 %v20978_v51, %v16149_v30  ;;  %v21031_v49 = vsub.f32 %v20979_v58, %v16149_v30  ;;  %v8654_v62 = vpop.eup %8653 }
 0x627   : > { %v16414_v1 = vmul.f32 1.442695, %v21028_v55  ;;  %v16419_v52 = vmul.f32 1.442695, %v21029_v54  ;;  %v21032_v23 = vsub.f32 %v20980_v34, %v16149_v30  ;;  %v5774_v3 = vadd.f32 %v16243_v56, %v5773_v31  ;;  %v21035_v34 = vld [vmem:[#allocation297_spill] sm:$0xff] }
 0x628   : > { %v16424_v32 = vmul.f32 1.442695, %v21030_v39  ;;  %v16429_v37 = vmul.f32 1.442695, %v21031_v49  ;;  %8671 = vpow2.f32 %v5111_v2  ;;  %v21033_v25 = vsub.f32 %v20982_v46, %v16149_v30  ;;  %v21036_v54 = vld [vmem:[#allocation217_spill] sm:$0xff]  ;;  %v21037_v49 = vld [vmem:[#allocation168_spill] sm:$0xff]  ;;  %v8656_v2 = vpop.eup %8655 }
 0x629   : > { %v16434_v57 = vmul.f32 1.442695, %v21032_v23  ;;  %v5794_v63 = vadd.f32 %v8648_v17, %v8646_v24  ;;  %8673 = vpow2.f32 %v5115_v27  ;;  %v21034_v58 = vsub.f32 %v20983_v50, %v16149_v30  ;;  %v21038_v23 = vld [vmem:[#allocation158_spill] sm:$0xff]  ;;  %v16454_v27 = vpop.eup %8657  ;;  %v21041_v50 = vld [vmem:[#allocation224_spill] sm:$0xff] }
 0x62a   : > { %v16440_v51 = vmul.f32 1.442695, %v21033_v25  ;;  %v6134_v39 = vpack.c.bf16 %v21036_v54, %v21035_v34  ;;  %v6136_v31 = vpack.c.bf16 %v21038_v23, %v21037_v49  ;;  %v5775_v26 = vadd.f32 %v16251_v45, %v5774_v3  ;;  %v21039_v25 = vld [vmem:[#allocation109_spill] sm:$0xff]  ;;  %v16460_v54 = vpop.eup %8659 }
 0x62b   : > { %v16445_v55 = vmul.f32 1.442695, %v21034_v58  ;;  %8675 = vpow2.f32 %v5119_v35  ;;  %v5795_v46 = vadd.f32 %v8650_v59, %v5794_v63  ;;  %v6133_v29 = vpack.c.bf16 %v21040_v14, %v21039_v25  ;;  %v21042_v58 = vld [vmem:[#allocation61_spill] sm:$0xff]  ;;  %v21072_v25 = vld [vmem:[#allocation180_spill] sm:$0xff]  ;;  %v21075_v14 = vld [vmem:[#allocation94_spill] sm:$0xff] }
 0x62c   : > { %8677 = vpow2.f32 %v5123_v48  ;;  %6452 = vmatprep.subr.bf16.mxu1 %v6134_v39  ;;  %v6138_v13 = vpack.c.bf16 %v21042_v58, %v21041_v50  ;;  %v6098_v28 = vpack.c.bf16 %v8648_v17, %v8646_v24  ;;  %v6097_v34 = vpack.c.bf16 %v16097_v15, %v16084_v19  ;;  %v16468_v48 = vpop.eup %8661  ;;  %v21044_v19 = vld [vmem:[#allocation73_spill] sm:$0xff]  ;;  %v21045_v17 = vld [vmem:[#allocation135_spill] sm:$0xff] }
 0x62d   : > { %v5776_v3 = vadd.f32 %v16259_v21, %v5775_v26  ;;  %8679 = vpow2.f32 %v5127_v41  ;;  %v21043_v35 = vsub.f32 %v20985_v5, %v16149_v30  ;;  %v5796_v49 = vadd.f32 %v8652_v40, %v5795_v46  ;;  %6453 = vmatpush1.bf16.msra.mxu1 %v6133_v29  ;;  %v21046_v39 = vld [vmem:[#allocation207_spill] sm:$0xff]  ;;  %v16474_v41 = vpop.eup %8663  ;;  %v21047_v23 = vld [vmem:[#allocation65_spill] sm:$0xff]  ;;  %v21049_v29 = vld [vmem:[#allocation134_spill] sm:$0xff] }
 0x62e   : > { %8681 = vpow2.f32 %v5131_v9  ;;  %6454 = vmatprep.subr.bf16.mxu1 %v6136_v31  ;;  %6407 = vmatprep.subr.bf16.mxu0 %v6098_v28  ;;  %v6100_v24 = vpack.c.bf16 %v8652_v40, %v8650_v59  ;;  %v6140_v15 = vpack.c.bf16 %v21044_v19, %v15898_v42  ;;  %v6099_v26 = vpack.c.bf16 %v21046_v39, %v21045_v17  ;;  %v21048_v46 = vld [vmem:[#allocation115_spill] sm:$0xff]  ;;  %v16479_v9 = vpop.eup %8665  ;;  %v21050_v59 = vld [vmem:[#allocation174_spill] sm:$0xff]  ;;  %v21051_v42 = vld [vmem:[#allocation129_spill] sm:$0xff] }
 0x62f   : > { %v16466_v63 = vmul.f32 1.442695, %v21043_v35  ;;  %v5777_v5 = vadd.f32 %v21047_v23, %v5776_v3  ;;  %8683 = vpow2.f32 %v5135_v60  ;;  %v5797_v50 = vadd.f32 %v8654_v62, %v5796_v49  ;;  %6408 = vmatpush1.bf16.msra.mxu0 %v6097_v34  ;;  %v21052_v31 = vld [vmem:[#allocation26_spill] sm:$0xff]  ;;  %v21053_v35 = vld [vmem:[#allocation103_spill] sm:$0xff]  ;;  %v16485_v17 = vpop.eup %8667 }
 0x630   : > { %v6135_v58 = vpack.c.bf16 %v21049_v29, %v21048_v46  ;;  %8685 = vpow2.f32 %v5139_v38  ;;  %6409 = vmatprep.subr.bf16.mxu0 %v6100_v24  ;;  %v6102_v28 = vpack.c.bf16 %v8656_v2, %v8654_v62  ;;  %v6142_v40 = vpack.c.bf16 %v21051_v42, %v21050_v59  ;;  %v21054_v3 = vld [vmem:[#allocation282_spill] sm:$0xff]  ;;  %v16491_v38 = vpop.eup %8669  ;;  %v21057_v24 = vld [vmem:[#allocation104_spill] sm:$0xff] }
 0x631   : > { %v6101_v19 = vpack.c.bf16 %v21053_v35, %v21052_v31  ;;  %v5778_v60 = vadd.f32 %v21054_v3, %v5777_v5  ;;  %8687 = vpow2.f32 %v5143_v12  ;;  %v21055_v49 = vld [vmem:[#allocation298_spill] sm:$0xff]  ;;  %v5798_v29 = vadd.f32 %v8656_v2, %v5797_v50  ;;  %v21058_v59 = vld [vmem:[#allocation188_spill] sm:$0xff]  ;;  %v21059_v31 = vld [vmem:[#allocation273_spill] sm:$0xff] }
 0x632   : > { %v21056_v39 = vsub.f32 %v21055_v49, %v16149_v30  ;;  %6455 = vmatpush1.bf16.msra.mxu1 %v6135_v58  ;;  %8689 = vpow2.f32 %v16408_v10  ;;  %v6104_v62 = vpack.c.bf16 %v16460_v54, %v16454_v27  ;;  %v21060_v5 = vld [vmem:[#allocation83_spill] sm:$0xff]  ;;  %v16500_v35 = vpop.eup %8671  ;;  %v21061_v50 = vld [vmem:[#allocation169_spill] sm:$0xff]  ;;  %v6106_v49 = vpack.c.bf16 %v16474_v41, %v16468_v48  ;;  %v21066_v42 = vld [vmem:[#allocation212_spill] sm:$0xff] }
 0x633   : > { %6456 = vmatprep.subr.bf16.mxu1 %v6138_v13  ;;  %v6103_v12 = vpack.c.bf16 %v21060_v5, %v21059_v31  ;;  %v5779_v30 = vadd.f32 %v16285_v33, %v5778_v60  ;;  %8691 = vpow2.f32 %v16414_v1  ;;  %v5799_v2 = vadd.f32 %v16454_v27, %v5798_v29  ;;  %v21062_v10 = vld [vmem:[#allocation137_spill] sm:$0xff]  ;;  %6410 = vmatpush1.bf16.msra.mxu0 %v6099_v26  ;;  %v16507_v58 = vpop.eup %8673  ;;  %v21064_v31 = vld [vmem:[#allocation106_spill] sm:$0xff]  ;;  %v21068_v29 = vld [vmem:[#allocation64_spill] sm:$0xff] }
 0x634   : > { %v5183_v34 = vmul.f32 1.442695, %v21056_v39  ;;  %v6137_v13 = vpack.c.bf16 %v21062_v10, %v21061_v50  ;;  %8693 = vpow2.f32 %v16419_v52  ;;  %6411 = vmatprep.subr.bf16.mxu0 %v6102_v28  ;;  %v21063_v39 = vld [vmem:[#allocation269_spill] sm:$0xff]  ;;  %v21065_v60 = vld [vmem:[#allocation222_spill] sm:$0xff]  ;;  %v6108_v5 = vpack.c.bf16 %v16485_v17, %v16479_v9  ;;  %v21070_v50 = vld [vmem:[#allocation12_spill] sm:$0xff] }
 0x635   : > { %v16516_v46 = vpop.eup %8675  ;;  %v5780_v27 = vadd.f32 %v16297_v0, %v5779_v30  ;;  %8695 = vpow2.f32 %v16424_v32  ;;  %v5800_v26 = vadd.f32 %v16460_v54, %v5799_v2  ;;  %v21067_v52 = vld [vmem:[#allocation250_spill] sm:$0xff]  ;;  %v21071_v30 = vld [vmem:[#allocation145_spill] sm:$0xff]  ;;  %v21076_v1 = vsub.f32 %v21075_v14, %v21000_v61 }
 0x636   : > { %6457 = vmatpush1.bf16.msra.mxu1 %v6137_v13  ;;  %v6139_v28 = vpack.c.bf16 %v21068_v29, %v21067_v52  ;;  %v16523_v10 = vpop.eup %8677  ;;  %8697 = vpow2.f32 %v16429_v37  ;;  %v16532_v32 = vmul.f32 %v21072_v25, %v21071_v30  ;;  %v21073_v37 = vld [vmem:[#allocation299_spill] sm:$0xff] }
 0x637   : > { %6458 = vmatprep.subr.bf16.mxu1 %v6140_v15  ;;  %v16534_v54 = vpop.eup %8679  ;;  %v5781_v2 = vadd.f32 %v16309_v8, %v5780_v27  ;;  %8699 = vpow2.f32 %v16434_v57  ;;  %v5801_v13 = vadd.f32 %v16468_v48, %v5800_v26  ;;  %6412 = vmatpush1.bf16.msra.mxu0 %v6101_v19  ;;  %v21074_v15 = vld [vmem:[#allocation205_spill] sm:$0xff]  ;;  %v16548_v25 = vmul.f32 1.442695, %v21076_v1  ;;  %v21078_v27 = vld [vmem:[#allocation136_spill] sm:$0xff]  ;;  %v21079_v30 = vld [vmem:[#allocation35_spill] sm:$0xff] }
 0x638   : > { %v16541_v29 = vmul.f32 %v21074_v15, %v21073_v37  ;;  %v16543_v52 = vpop.eup %8681  ;;  %8701 = vpow2.f32 %v16440_v51  ;;  %6413 = vmatprep.subr.bf16.mxu0 %v6104_v62  ;;  %v21081_v1 = vld [vmem:[#allocation101_spill] sm:$0xff]  ;;  %v21082_v62 = vld [vmem:[#allocation164_spill] sm:$0xff]  ;;  %v21083_v57 = vld [vmem:[#allocation54_spill] sm:$0xff] }
 0x639   : > { %21077 = vst [vmem:[#allocation32_spill] sm:$0xff] %v16548_v25  ;;  %v16555_v19 = vpop.eup %8683  ;;  %v5782_v26 = vadd.f32 %v16321_v53, %v5781_v2  ;;  %8703 = vpow2.f32 %v16445_v55  ;;  %v5802_v37 = vadd.f32 %v16474_v41, %v5801_v13  ;;  %v6141_v48 = vpack.c.bf16 %v21083_v57, %v21082_v62  ;;  %v21086_v57 = vld [vmem:[#allocation173_spill] sm:$0xff]  ;;  %v21091_v13 = vld [vmem:[#allocation196_spill] sm:$0xff] }
 0x63a   : > { %6459 = vmatpush1.bf16.msra.mxu1 %v6139_v28  ;;  %v16562_v51 = vpop.eup %8685  ;;  %8705 = vpow2.f32 %v16466_v63  ;;  %v21087_v62 = vld [vmem:[#allocation149_spill] sm:$0xff]  ;;  %v21092_v63 = vld [vmem:[#allocation292_spill] sm:$0xff] }
 0x63b   : > { %6460 = vmatprep.subr.bf16.mxu1 %v6142_v40  ;;  %v16571_v2 = vpop.eup %8687  ;;  %v5783_v41 = vadd.f32 %v16332_v47, %v5782_v26  ;;  %8707 = vpow2.f32 %v5183_v34  ;;  %v5803_v28 = vadd.f32 %v16479_v9, %v5802_v37  ;;  %6414 = vmatpush1.bf16.msra.mxu0 %v6103_v12  ;;  %v16581_v14 = vmul.f32 %v21087_v62, %v21086_v57  ;;  %v21096_v55 = vld [vmem:[#allocation92_spill] sm:$0xff]  ;;  %v21098_v34 = vld [vmem:[#allocation147_spill] sm:$0xff] }
 0x63c   : > { %v16577_v15 = vpop.eup %8689  ;;  %6415 = vmatprep.subr.bf16.mxu0 %v6106_v49  ;;  %v16595_v57 = vmul.f32 %v21092_v63, %v21091_v13  ;;  %v21094_v26 = vpack.c.bf16 %v21058_v59, %v21057_v24  ;;  %v21101_v63 = vld [vmem:[#allocation22_spill] sm:$0xff]  ;;  %v21102_v59 = vld [vmem:[#allocation167_spill] sm:$0xff] }
 0x63d   : > { %21088 = vst [vmem:[#allocation47_spill] sm:$0xff] %v16581_v14  ;;  %v16589_v12 = vpop.eup %8691  ;;  %v5784_v37 = vadd.f32 %v16343_v4, %v5783_v41  ;;  %v5804_v40 = vadd.f32 %v16485_v17, %v5803_v28  ;;  %v21095_v41 = vld [vmem:[#allocation141_spill] sm:$0xff]  ;;  %v21097_v28 = vld [vmem:[#allocation42_spill] sm:$0xff]  ;;  %v21104_v17 = vpack.c.bf16 %v21066_v42, %v21065_v60 }
 0x63e   : > { %21093 = vst [vmem:[#allocation62_spill] sm:$0xff] %v16595_v57  ;;  %6461 = vmatpush1.bf16.msra.mxu1 %v6141_v48  ;;  %v16599_v62 = vpop.eup %8693  ;;  %v16610_v13 = vmul.f32 %v21098_v34, %v21097_v28  ;;  %v21100_v48 = vld [vmem:[#allocation77_spill] sm:$0xff]  ;;  %v21106_v60 = vld [vmem:[#allocation214_spill] sm:$0xff] }
 0x63f   : > { %6462 = vmatprep.subr.bf16.mxu1 %v21094_v26  ;;  %v16614_v25 = vmul.f32 %v21101_v63, %v21100_v48  ;;  %v16616_v49 = vpop.eup %8695  ;;  %v5785_v18 = vadd.f32 %v16354_v7, %v5784_v37  ;;  %v5805_v24 = vadd.f32 %v16491_v38, %v5804_v40  ;;  %v21103_v26 = vld [vmem:[#allocation192_spill] sm:$0xff]  ;;  %6416 = vmatpush1.bf16.msra.mxu0 %v21104_v17  ;;  %8709 = vpow2.f32 %v21106_v60  ;;  %v21108_v40 = vld [vmem:[#allocation41_spill] sm:$0xff]  ;;  %v21111_v48 = vld [vmem:[#allocation183_spill] sm:$0xff] }
 0x640   : > { %21099 = vst [vmem:[#allocation201_spill] sm:$0xff] %v16610_v13  ;;  %v6143_v9 = vpack.c.bf16 %v21103_v26, %v21102_v59  ;;  %v16627_v28 = vpop.eup %8697  ;;  %6417 = vmatprep.subr.bf16.mxu0 %v6108_v5  ;;  %v21105_v63 = vld [vmem:[#allocation140_spill] sm:$0xff]  ;;  %v21107_v37 = vpack.c.bf16 %v21064_v31, %v21063_v39  ;;  %v21109_v26 = vld [vmem:[#allocation231_spill] sm:$0xff]  ;;  %v21113_v31 = vpack.c.bf16 %v21079_v30, %v21078_v27  ;;  %v21115_v14 = vld [vmem:[#allocation38_spill] sm:$0xff] }
 0x641   : > { %v16637_v42 = vpop.eup %8699  ;;  %v5786_v17 = vadd.f32 %v16363_v22, %v5785_v18  ;;  %v5806_v5 = vadd.f32 %v16500_v35, %v5805_v24  ;;  %v6145_v59 = vpack.c.bf16 %v21109_v26, %v21108_v40  ;;  %v21110_v18 = vld [vmem:[#allocation270_spill] sm:$0xff]  ;;  %8711 = vpow2.f32 %v21115_v14  ;;  %v21121_v26 = vld [vmem:[#allocation24_spill] sm:$0xff] }
 0x642   : > { %6463 = vmatpush1.bf16.msra.mxu1 %v6143_v9  ;;  %v16644_v34 = vpop.eup %8701  ;;  %v21114_v9 = vpack.c.bf16 %v16500_v35, %v16491_v38  ;;  %v21116_v35 = vld [vmem:[#allocation8_spill] sm:$0xff]  ;;  %v21119_v27 = vld [vmem:[#allocation138_spill] sm:$0xff]  ;;  %v21122_v40 = vpack.c.bf16 %v21070_v50, %v21121_v26 }
 0x643   : > { %6464 = vmatprep.subr.bf16.mxu1 %v21107_v37  ;;  %v16657_v24 = vpop.eup %8703  ;;  %v16660_v13 = vadd.f32 %v21111_v48, %v5786_v17  ;;  %v5807_v39 = vadd.f32 %v16507_v58, %v5806_v5  ;;  %6418 = vmatpush1.bf16.msra.mxu0 %v21113_v31  ;;  %v21118_v5 = vld [vmem:[#allocation71_spill] sm:$0xff]  ;;  %v21126_v57 = vld [vmem:[#allocation150_spill] sm:$0xff]  ;;  %v21132_v14 = vld [vmem:[#allocation184_spill] sm:$0xff] }
 0x644   : > { %v16670_v60 = vpop.eup %8705  ;;  %6419 = vmatprep.subr.bf16.mxu0 %v21114_v9  ;;  %v21117_v9 = vld [vmem:[#allocation89_spill] sm:$0xff]  ;;  %8713 = vpow2.f32 %v21118_v5  ;;  %v21135_v50 = vld [vmem:[#allocation216_spill] sm:$0xff]  ;;  %v21138_v26 = vld [vmem:[#allocation198_spill] sm:$0xff] }
 0x645   : > { %21112 = vst [vmem:[#allocation204_spill] sm:$0xff] %v16660_v13  ;;  %v16683_v31 = vpop.eup %8707  ;;  %v5808_v37 = vadd.f32 %v16516_v46, %v5807_v39  ;;  %v16691_v17 = vmul.f32 %v21117_v9, %v21116_v35  ;;  %v21120_v13 = vsub.f32 %v21119_v27, %v21000_v61  ;;  %v21124_v39 = vld [vmem:[#allocation244_spill] sm:$0xff]  ;;  %v21127_v27 = vpack.c.bf16 %v16203_v11, %v16195_v43 }
 0x646   : > { %6465 = vmatpush1.bf16.msra.mxu1 %v6145_v59  ;;  %v21123_v59 = vld [vmem:[#allocation93_spill] sm:$0xff]  ;;  %v21125_v9 = vld [vmem:[#allocation108_spill] sm:$0xff] }
 0x647   : > { %v5293_v30 = vmul.f32 1.442695, %v21120_v13  ;;  %6466 = vmatprep.subr.bf16.mxu1 %v21122_v40  ;;  %v16704_v38 = vmul.f32 %v21124_v39, %v21123_v59  ;;  %v5809_v35 = vadd.f32 %v16523_v10, %v5808_v37  ;;  %v6147_v5 = vpack.c.bf16 %v21126_v57, %v21125_v9  ;;  %6420 = vmatpush1.bf16.msra.mxu0 %v21127_v27  ;;  %v21129_v40 = vld [vmem:[#allocation170_spill] sm:$0xff]  ;;  %v21130_v59 = vld [vmem:[#allocation75_spill] sm:$0xff]  ;;  %v21131_v39 = vld [vmem:[#allocation32_spill] sm:$0xff] }
 0x648   : > { %v21128_v13 = vpack.c.bf16 %v16516_v46, %v16507_v58  ;;  %v5704_v37 = vadd.f32 %v21130_v59, %v21129_v40  ;;  %8715 = vpow2.f32 %v21131_v39  ;;  %v21133_v57 = vsub.f32 %v21132_v14, %v21000_v61  ;;  %v21134_v27 = vld [vmem:[#allocation112_spill] sm:$0xff]  ;;  %v21141_v39 = vld [vmem:[#allocation90_spill] sm:$0xff] }
 0x649   : > { %v5810_v11 = vadd.f32 %v16534_v54, %v5809_v35  ;;  %v5741_v9 = vadd.f32 %v21135_v50, %v21134_v27  ;;  %8717 = vpow2.f32 %v5293_v30  ;;  %v21136_v46 = vld [vmem:[#allocation152_spill] sm:$0xff]  ;;  %v21139_v40 = vpack.c.bf16 %v21081_v1, %v21138_v26  ;;  %v16734_v59 = vpop.eup %8709  ;;  %v21144_v50 = vld [vmem:[#allocation277_spill] sm:$0xff]  ;;  %v21145_v1 = vld [vmem:[#allocation199_spill] sm:$0xff] }
 0x64a   : > { %6421 = vmatprep.subr.bf16.mxu0 %v21128_v13  ;;  %v5297_v43 = vmul.f32 1.442695, %v21133_v57  ;;  %6467 = vmatpush1.bf16.msra.mxu1 %v6147_v5  ;;  %v21137_v58 = vsub.f32 %v21136_v46, %v21000_v61  ;;  %v21140_v57 = vld [vmem:[#allocation271_spill] sm:$0xff]  ;;  %v21142_v5 = vpack.c.bf16 %v16219_v44, %v16211_v6  ;;  %v21143_v30 = vpack.c.bf16 %v16534_v54, %v16523_v10  ;;  %v21151_v10 = vld [vmem:[#allocation296_spill] sm:$0xff] }
 0x64b   : > { %6468 = vmatprep.subr.bf16.mxu1 %v21139_v40  ;;  %v5811_v14 = vadd.f32 %v16543_v52, %v5810_v11  ;;  %v6149_v35 = vpack.c.bf16 %v21141_v39, %v21140_v57  ;;  %v5705_v27 = vadd.f32 %v21144_v50, %v5704_v37  ;;  %v21146_v26 = vsub.f32 %v21145_v1, %v21000_v61  ;;  %v21148_v39 = vld [vmem:[#allocation287_spill] sm:$0xff]  ;;  %v16757_v37 = vpop.eup %8711 }
 0x64c   : > { %v5301_v13 = vmul.f32 1.442695, %v21137_v58  ;;  %6422 = vmatpush1.bf16.msra.mxu0 %v21142_v5  ;;  %8719 = vpow2.f32 %v5297_v43  ;;  %v21147_v58 = vld [vmem:[#allocation139_spill] sm:$0xff]  ;;  %v21149_v44 = vsub.f32 %v21148_v39, %v21000_v61  ;;  %v21150_v5 = vld [vmem:[#allocation260_spill] sm:$0xff]  ;;  %v21156_v61 = vpack.c.bf16 %v16555_v19, %v16543_v52 }
 0x64d   : > { %6423 = vmatprep.subr.bf16.mxu0 %v21143_v30  ;;  %v5305_v46 = vmul.f32 1.442695, %v21146_v26  ;;  %v5812_v11 = vadd.f32 %v16555_v19, %v5811_v14  ;;  %v5742_v40 = vadd.f32 %v21147_v58, %v5741_v9  ;;  %v21152_v54 = vpack.c.bf16 %v21150_v5, %v21151_v10  ;;  %v21153_v30 = vld [vmem:[#allocation283_spill] sm:$0xff]  ;;  %v21154_v14 = vld [vmem:[#allocation160_spill] sm:$0xff]  ;;  %v21158_v26 = vld [vmem:[#allocation10_spill] sm:$0xff] }
 0x64e   : > { %6469 = vmatpush1.bf16.msra.mxu1 %v6149_v35  ;;  %8721 = vpow2.f32 %v5301_v13  ;;  %v5309_v6 = vmul.f32 1.442695, %v21149_v44  ;;  %v6151_v50 = vpack.c.bf16 %v16734_v59, %v21153_v30  ;;  %v21155_v35 = vpack.c.bf16 %v16235_v16, %v21154_v14  ;;  %v16765_v9 = vpop.eup %8713  ;;  %v21157_v13 = vld [vmem:[#allocation219_spill] sm:$0xff]  ;;  %v21159_v58 = vld [vmem:[#allocation122_spill] sm:$0xff]  ;;  %v21160_v44 = vld [vmem:[#allocation261_spill] sm:$0xff] }
 0x64f   : > { %6470 = vmatprep.subr.bf16.mxu1 %v21152_v54  ;;  %v5813_v43 = vadd.f32 %v16562_v51, %v5812_v11  ;;  %v5706_v39 = vadd.f32 %v21157_v13, %v5705_v27  ;;  %8723 = vpow2.f32 %v5305_v46  ;;  %v5743_v11 = vadd.f32 %v21158_v26, %v5742_v40  ;;  %v21164_v40 = vld [vmem:[#allocation76_spill] sm:$0xff]  ;;  %v21169_v13 = vld [vmem:[#allocation118_spill] sm:$0xff] }
 0x650   : > { %6424 = vmatpush1.bf16.msra.mxu0 %v21155_v35  ;;  %8725 = vpow2.f32 %v5309_v6  ;;  %v21161_v5 = vpack.c.bf16 %v21159_v58, %v21160_v44  ;;  %v6153_v52 = vpack.c.bf16 %v16765_v9, %v16757_v37  ;;  %v21162_v19 = vpack.c.bf16 %v16251_v45, %v16243_v56  ;;  %v21174_v44 = vld [vmem:[#allocation79_spill] sm:$0xff] }
 0x651   : > { %6425 = vmatprep.subr.bf16.mxu0 %v21156_v61  ;;  %v5814_v1 = vadd.f32 %v16571_v2, %v5813_v43  ;;  %v21163_v46 = vpack.c.bf16 %v16571_v2, %v16562_v51  ;;  %v5707_v6 = vadd.f32 %v21164_v40, %v5706_v39  ;;  %v21165_v43 = vld [vmem:[#allocation251_spill] sm:$0xff]  ;;  %v21166_v14 = vpack.c.bf16 %v21096_v55, %v21095_v41  ;;  %v21170_v39 = vld [vmem:[#allocation189_spill] sm:$0xff] }
 0x652   : > { %6471 = vmatpush1.bf16.msra.mxu1 %v6151_v50  ;;  %v16776_v16 = vpop.eup %8715  ;;  %v5744_v50 = vadd.f32 %v21165_v43, %v5743_v11  ;;  %v21167_v51 = vpack.c.bf16 %v21047_v23, %v16259_v21  ;;  %v21168_v61 = vpack.c.bf16 %v16589_v12, %v16577_v15  ;;  %v21171_v26 = vpack.c.bf16 %v16051_v36, %v21105_v63 }
 0x653   : > { %6472 = vmatprep.subr.bf16.mxu1 %v21161_v5  ;;  %v5815_v10 = vadd.f32 %v16577_v15, %v5814_v1  ;;  %v16784_v27 = vpop.eup %8717  ;;  %v5708_v55 = vadd.f32 %v21169_v13, %v5707_v6  ;;  %v21172_v15 = vpack.c.bf16 %v16285_v33, %v21054_v3  ;;  %v21173_v58 = vpack.c.bf16 %v16616_v49, %v16599_v62  ;;  %v21175_v5 = vld [vmem:[#allocation81_spill] sm:$0xff]  ;;  %v21181_v6 = vld [vmem:[#allocation70_spill] sm:$0xff] }
 0x654   : > { %6426 = vmatpush1.bf16.msra.mxu0 %v21162_v19  ;;  %v6155_v56 = vpack.c.bf16 %v16784_v27, %v16776_v16  ;;  %v5745_v1 = vadd.f32 %v21170_v39, %v5744_v50  ;;  %v21179_v19 = vld [vmem:[#allocation46_spill] sm:$0xff] }
 0x655   : > { %6427 = vmatprep.subr.bf16.mxu0 %v21163_v46  ;;  %v5816_v54 = vadd.f32 %v16589_v12, %v5815_v10  ;;  %v5709_v36 = vadd.f32 %v21174_v44, %v5708_v55  ;;  %v21191_v55 = vld [vmem:[#allocation34_spill] sm:$0xff] }
 0x656   : > { %6473 = vmatpush1.bf16.msra.mxu1 %v6153_v52  ;;  %v16795_v35 = vpop.eup %8719  ;;  %v5746_v10 = vadd.f32 %v21175_v5, %v5745_v1  ;;  %v21176_v52 = vpack.c.bf16 %v21110_v18, %v16062_v20  ;;  %v21180_v20 = vld [vmem:[#allocation19_spill] sm:$0xff] }
 0x657   : > { %6474 = vmatprep.subr.bf16.mxu1 %v21166_v14  ;;  %v5817_v45 = vadd.f32 %v16599_v62, %v5816_v54  ;;  %v21178_v62 = vpack.c.bf16 %v16637_v42, %v16627_v28  ;;  %v5710_v46 = vadd.f32 %v21179_v19, %v5709_v36  ;;  %v533_v18 = vpack.c.bf16 %v21180_v20, %v21180_v20  ;;  %v21185_v14 = vld [vmem:[#allocation197_spill] sm:$0xff] }
 0x658   : > { %6428 = vmatpush1.bf16.msra.mxu0 %v21167_v51  ;;  %v16803_v2 = vpop.eup %8721  ;;  %v5747_v54 = vadd.f32 %v21181_v6, %v5746_v10  ;;  %v21198_v36 = vld [vmem:[#allocation201_spill] sm:$0xff] }
 0x659   : > { %6429 = vmatprep.subr.bf16.mxu0 %v21168_v61  ;;  %v5818_v41 = vadd.f32 %v16616_v49, %v5817_v45  ;;  %v16814_v11 = vpop.eup %8723  ;;  %v6157_v23 = vpack.c.bf16 %v16803_v2, %v16795_v35  ;;  %v21177_v49 = vpack.c.bf16 %v16309_v8, %v16297_v0  ;;  %v21182_v0 = vpack.c.bf16 %v16332_v47, %v16321_v53  ;;  %v21187_v61 = vld [vmem:[#allocation133_spill] sm:$0xff] }
 0x65a   : > { %6475 = vmatpush1.bf16.msra.mxu1 %v6155_v56  ;;  %v16822_v12 = vpop.eup %8725  ;;  %v21183_v8 = vpack.c.bf16 %v16657_v24, %v16644_v34  ;;  %v5748_v45 = vadd.f32 %v21185_v14, %v5747_v54  ;;  %v21186_v56 = vld [vmem:[#allocation88_spill] sm:$0xff]  ;;  %v5677_v13 = vrot.slane %v21187_v61, 4  ;;  %v21188_v53 = vpack.c.bf16 %v16354_v7, %v16343_v4  ;;  %v21194_v7 = vld [vmem:[#allocation62_spill] sm:$0xff] }
 0x65b   : > { %6476 = vmatprep.subr.bf16.mxu1 %v21171_v26  ;;  %v5819_v21 = vadd.f32 %v16627_v28, %v5818_v41  ;;  %v6159_v3 = vpack.c.bf16 %v16822_v12, %v16814_v11  ;;  %v21184_v28 = vld [vmem:[#allocation121_spill] sm:$0xff]  ;;  %v5640_v51 = vrot.slane %v21186_v56, 4  ;;  %v21189_v47 = vpack.c.bf16 %v16683_v31, %v16670_v60 }
 0x65c   : > { %6430 = vmatpush1.bf16.msra.mxu0 %v21172_v15  ;;  %v5749_v41 = vadd.f32 %v21191_v55, %v5748_v45  ;;  %v5678_v1 = vadd.f32 %v5677_v13, %v21187_v61  ;;  %v21192_v26 = vpack.c.bf16 %v21111_v48, %v16363_v22  ;;  %v21197_v15 = vld [vmem:[#allocation267_spill] sm:$0xff]  ;;  %v21201_v22 = vmov 0  }
 0x65d   : > { %6431 = vmatprep.subr.bf16.mxu0 %v21173_v58  ;;  %v5820_v63 = vadd.f32 %v16637_v42, %v5819_v21  ;;  %v5711_v42 = vadd.f32 %v21184_v28, %v5710_v46  ;;  %v5641_v39 = vadd.f32 %v5640_v51, %v21186_v56  ;;  %v21193_v21 = vld [vmem:[#allocation17_spill] sm:$0xff]  ;;  %v21202_v48 = vpack.c.bf16 %v16704_v38, %v16541_v29 }
 0x65e   : > { %6477 = vmatpush1.bf16.msra.mxu1 %v6157_v23  ;;  %v531_v4 = vpack.c.bf16 %v21193_v21, %v21193_v21  ;;  %v21195_v23 = vpack.c.bf16 %v16614_v25, %v21194_v7  ;;  %v5750_v58 = vadd.f32 %v21197_v15, %v5749_v41  ;;  %v5679_v10 = vrot.slane %v5678_v1, 2  ;;  %v21204_v21 = vld [vmem:[#allocation124_spill] sm:$0xff] }
 0x65f   : > { %6478 = vmatprep.subr.bf16.mxu1 %v21176_v52  ;;  %v5821_v33 = vadd.f32 %v16644_v34, %v5820_v63  ;;  %v21190_v34 = vld [vmem:[#allocation163_spill] sm:$0xff]  ;;  %v5642_v44 = vrot.slane %v5641_v39, 2 }
 0x660   : > { %6432 = vmatpush1.bf16.msra.mxu0 %v21177_v49  ;;  %v21199_v63 = vld [vmem:[#allocation47_spill] sm:$0xff]  ;;  %v5751_v25 = vrot.slane %v5750_v58, 4  ;;  %v5680_v49 = vadd.f32 %v5679_v10, %v5678_v1 }
 0x661   : > { %6433 = vmatprep.subr.bf16.mxu0 %v21178_v62  ;;  %v5822_v40 = vadd.f32 %v16657_v24, %v5821_v33  ;;  %v5712_v24 = vadd.f32 %v21190_v34, %v5711_v42  ;;  %v21200_v5 = vpack.c.bf16 %v21198_v36, %v21199_v63  ;;  %v5643_v33 = vadd.f32 %v5642_v44, %v5641_v39  ;;  %v21209_v36 = vld [vmem:[#allocation16_spill] sm:$0xff] }
 0x662   : > { %6479 = vmatpush1.bf16.msra.mxu1 %v6159_v3  ;;  %v21203_v3 = vpack.c.bf16 %v16691_v17, %v16532_v32  ;;  %v5752_v19 = vadd.f32 %v5751_v25, %v5750_v58  ;;  %v21208_v58 = vld [vmem:[#allocation109_spill] sm:$0xff] }
 0x663   : > { %v5823_v43 = vadd.f32 %v16670_v60, %v5822_v40  ;;  %v21196_v60 = vld [vmem:[#allocation284_spill] sm:$0xff]  ;;  %v5644_v46 = vrot.slane %v5643_v33, 1  ;;  %v5681_v40 = vrot.slane %v5680_v49, 1  ;;  %v21212_v25 = vld [vmem:[#allocation169_spill] sm:$0xff] }
 0x664   : > { %6434 = vmatpush1.bf16.msra.mxu0 %v21182_v0  ;;  %v5753_v6 = vrot.slane %v5752_v19, 2 }
 0x665   : > { %6481 = vmatmul.mubr.bf16.vlgmr.msra.gmra.mrb[20].mxu1 %v533_v18  ;;  %6435 = vmatprep.subr.bf16.mxu0 %v21183_v8  ;;  %v16856_v50 = vadd.f32 %v16683_v31, %v5823_v43  ;;  %v5713_v31 = vadd.f32 %v21196_v60, %v5712_v24  ;;  %v5645_v18 = vadd.f32 %v5644_v46, %v5643_v33  ;;  %v21215_v46 = vld [vmem:[#allocation64_spill] sm:$0xff] }
 0x666   : > { %v5682_v54 = vadd.f32 %v5681_v40, %v5680_v49  ;;  %v5754_v29 = vadd.f32 %v5753_v6, %v5752_v19  ;;  %v21217_v6 = vld [vmem:[#allocation54_spill] sm:$0xff] }
 0x667   : > { %v5714_v52 = vrot.slane %v5713_v31, 4  ;;  %8727 = vrcp.f32 %v5645_v18 }
 0x668   : > { %6436 = vmatpush1.bf16.msra.mxu0 %v21188_v53  ;;  %8729 = vrcp.f32 %v5682_v54  ;;  %v5755_v0 = vrot.slane %v5754_v29, 1 }
 0x669   : > { %6437 = vmatprep.subr.bf16.mxu0 %v21189_v47  ;;  %v5715_v62 = vadd.f32 %v5714_v52, %v5713_v31  ;;  %v21207_v31 = vld [vmem:[#allocation11_spill] sm:$0xff] }
 0x66a   : > { %v5756_v28 = vadd.f32 %v5755_v0, %v5754_v29 }
 0x66b   : > { %v5716_v20 = vrot.slane %v5715_v62, 2 }
 0x66c   : > { %6438 = vmatpush1.bf16.msra.mxu0 %v21192_v26 }
 0x66d   : > { %6601 = vmatprep.subr.bf16.mxu0 %v21195_v23  ;;  %v5717_v43 = vadd.f32 %v5716_v20, %v5715_v62  ;;  %v21206_v23 = vld [vmem:[#allocation67_spill] sm:$0xff]  ;;  %v21214_v62 = vld [vmem:[#allocation250_spill] sm:$0xff]  ;;  %v21216_v20 = vld [vmem:[#allocation164_spill] sm:$0xff] }
 0x66f   : > { %6440 = vmatmul.mubr.bf16.vlgmr.msra.gmra.mrb[52].mxu0 %v531_v4  ;;  %v5718_v38 = vrot.slane %v5717_v43, 1  ;;  %v21205_v4 = vld [vmem:[#allocation165_spill] sm:$0xff] }
 0x670   : > { %6602 = vmatpush1.bf16.msra.mxu0 %v21200_v5  ;;  %6633 = vmatprep.mubr.bf16.mxu0 %v21201_v22  ;;  %v5831_v7 = vadd.f32 %v21205_v4, %v21204_v21  ;;  %v21210_v5 = vld [vmem:[#allocation115_spill] sm:$0xff] }
 0x671   : > { %6603 = vmatprep.subr.bf16.mxu0 %v21202_v48  ;;  %v5719_v8 = vadd.f32 %v5718_v38, %v5717_v43  ;;  %v8728_v42 = vpop.eup %8727  ;;  %v21211_v48 = vld [vmem:[#allocation134_spill] sm:$0xff]  ;;  %v21218_v43 = vld [vmem:[#allocation167_spill] sm:$0xff]  ;;  %v21219_v38 = vld [vmem:[#allocation192_spill] sm:$0xff] }
 0x672   : > { %v8730_v17 = vpop.eup %8729  ;;  %v5832_v60 = vadd.f32 %v21206_v23, %v5831_v7 }
 0x673   : > { %8731 = vrcp.f32 %v5719_v8  ;;  %v21220_v8 = vld [vmem:[#allocation41_spill] sm:$0xff] }
 0x674   : > { %6604 = vmatpush1.bf16.msra.mxu0 %v21203_v3  ;;  %8733 = vrcp.f32 %v5756_v28  ;;  %v5833_v15 = vadd.f32 %v21207_v31, %v5832_v60  ;;  %v21213_v3 = vld [vmem:[#allocation137_spill] sm:$0xff] }
 0x676   : > { %v5834_v44 = vadd.f32 %v21208_v58, %v5833_v15  ;;  %v21225_v58 = vld [vmem:[#allocation57_spill] sm:$0xff] }
 0x678   : > { %v5835_v63 = vadd.f32 %v21209_v36, %v5834_v44  ;;  %v5899_v44 = vrot.slane %v21225_v58, 4 }
 0x67a   : > { %v5836_v10 = vadd.f32 %v21210_v5, %v5835_v63  ;;  %v21226_v63 = vld [vmem:[#allocation204_spill] sm:$0xff] }
 0x67c   : > { %v5837_v52 = vadd.f32 %v21211_v48, %v5836_v10 }
 0x67d   : > { %v8732_v13 = vpop.eup %8731 }
 0x67e   : > { %v8734_v47 = vpop.eup %8733  ;;  %v5838_v33 = vadd.f32 %v21212_v25, %v5837_v52 }
 0x680   : > { %v5839_v49 = vadd.f32 %v21213_v3, %v5838_v33 }
 0x682   : > { %v5840_v19 = vadd.f32 %v21214_v62, %v5839_v49 }
 0x684   : > { %v6359_v32 = vpop.f32.mrb[48].mxu0  ;;  %v5841_v40 = vadd.f32 %v21215_v46, %v5840_v19 }
 0x685   : > { %v6513_v14 = vmul.f32 %v8728_v42, %v6359_v32  ;;  %v6361_v45 = vpop.f32.mrb[49].mxu0  ;;  %v21221_v42 = vld [vmem:[#allocation231_spill] sm:$0xff] }
 0x686   : > { %v6514_v56 = vmul.f32 %v8730_v17, %v6361_v45  ;;  %v6363_v51 = vpop.f32.mrb[50].mxu0  ;;  %v5842_v18 = vadd.f32 %v21216_v20, %v5841_v40  ;;  %v1184_v17 = vld [vmem:[%s17048_s3 + $0x8] sm:$0xff]  ;;  %v1185_v45 = vld [vmem:[%s17048_s3 + $0x10] sm:$0xff] }
 0x687   : > { %v6364_v61 = vpop.f32.mrb[51].mxu0  ;;  %6536 = vperm.xlu1 %7658, %v1184_v17   ;;  %v21222_v51 = vld [vmem:[#allocation108_spill] sm:$0xff] }
 0x688   : > { %v5843_v54 = vadd.f32 %v21217_v6, %v5842_v18 }
 0x68a   : > { %v5844_v29 = vadd.f32 %v21218_v43, %v5843_v54 }
 0x68b   : > { %6541 = vperm.xlu1 %7658, %v1185_v45  }
 0x68c   : > { %v5845_v0 = vadd.f32 %v21219_v38, %v5844_v29 }
 0x68d   : > { %v6400_v53 = vpop.f32.mrb[16].mxu1 }
 0x68e   : > { %v6515_v34 = vmul.f32 %v8732_v13, %v6400_v53  ;;  %v6402_v24 = vpop.f32.mrb[17].mxu1  ;;  %v5846_v28 = vadd.f32 %v21220_v8, %v5845_v0  ;;  %v1186_v13 = vld [vmem:[%s17048_s3 + $0x18] sm:$0xff] }
 0x68f   : > { %v6516_v55 = vmul.f32 %v8734_v47, %v6402_v24  ;;  %v6404_v41 = vpop.f32.mrb[18].mxu1  ;;  %v1190_v53 = vld [vmem:[%s17048_s3 + $0x38] sm:$0xff]  ;;  %v21223_v47 = vld [vmem:[#allocation150_spill] sm:$0xff]  ;;  %6546 = vperm.xlu1 %7658, %v1186_v13   ;;  %v1187_v24 = vld [vmem:[%s17048_s3 + $0x20] sm:$0xff] }
 0x690   : > { %v6525_v39 = vpack.c.bf16 %v6515_v34, %v6513_v14  ;;  %v6405_v1 = vpop.f32.mrb[19].mxu1  ;;  %v5847_v32 = vadd.f32 %v21221_v42, %v5846_v28  ;;  %v1183_v14 = vld [vmem:[%s17048_s3] sm:$0xff]  ;;  %v1189_v41 = vld [vmem:[%s17048_s3 + $0x30] sm:$0xff] }
 0x691   : > { %v6526_v26 = vpack.c.bf16 %v6516_v55, %v6514_v56  ;;  %6531 = vperm.xlu0 %7657, %v1183_v14   ;;  %v1188_v56 = vld [vmem:[%s17048_s3 + $0x28] sm:$0xff]  ;;  %v7683_v13 = vld [vmem:[%s17047_s2] sm:$0xff]  }
 0x692   : > { %v5848_v61 = vadd.f32 %v21222_v51, %v5847_v32 }
 0x693   : > { %6605 = vmatprep.subr.bf16.mxu0 %v6526_v26  ;;  %6551 = vperm.xlu1 %7658, %v1187_v24  }
 0x694   : > { %6606 = vmatpush1.bf16.msra.mxu0 %v6525_v39  ;;  %v5849_v34 = vadd.f32 %v21223_v47, %v5848_v61  ;;  %v21224_v39 = vld [vmem:[#allocation90_spill] sm:$0xff]  ;;  %v7685_v47 = vld [vmem:[%s17047_s2 + $0x10] sm:$0xff]  }
 0x695   : > { %6556 = vperm.xlu0 %7657, %v1188_v56  }
 0x696   : > { %v5850_v55 = vadd.f32 %v21140_v57, %v5849_v34  ;;  %v7686_v34 = vld [vmem:[%s17047_s2 + $0x18] sm:$0xff]  }
 0x697   : > { %6561 = vperm.xlu1 %7658, %v1189_v41  }
 0x698   : > { %v5851_v1 = vadd.f32 %v21224_v39, %v5850_v55 }
 0x699   : > { %6566 = vperm.xlu0 %7657, %v1190_v53   ;;  %v7684_v53 = vld [vmem:[%s17047_s2 + $0x8] sm:$0xff]  }
 0x69a   : > { %v5852_v26 = vadd.f32 %v21153_v30, %v5851_v1 }
 0x69c   : > { %v5853_v21 = vadd.f32 %v16734_v59, %v5852_v26  ;;  %v5900_v59 = vadd.f32 %v5899_v44, %v21225_v58 }
 0x69e   : > { %v5854_v4 = vadd.f32 %v16757_v37, %v5853_v21  ;;  %v5901_v37 = vrot.slane %v5900_v59, 2 }
 0x6a0   : > { %v5855_v7 = vadd.f32 %v16765_v9, %v5854_v4  ;;  %v5788_v9 = vrot.slane %v21226_v63, 4 }
 0x6a2   : > { %v5856_v23 = vadd.f32 %v16776_v16, %v5855_v7  ;;  %v5825_v16 = vrot.slane %v16856_v50, 4 }
 0x6a4   : > { %v5857_v57 = vadd.f32 %v16784_v27, %v5856_v23  ;;  %v5902_v27 = vadd.f32 %v5901_v37, %v5900_v59 }
 0x6a6   : > { %v5858_v60 = vadd.f32 %v16795_v35, %v5857_v57  ;;  %v5789_v35 = vadd.f32 %v5788_v9, %v21226_v63 }
 0x6a8   : > { %v5859_v31 = vadd.f32 %v16803_v2, %v5858_v60  ;;  %v5826_v2 = vadd.f32 %v5825_v16, %v16856_v50  ;;  %v5790_v48 = vrot.slane %v5789_v35, 2 }
 0x6aa   : > { %v5860_v15 = vadd.f32 %v16814_v11, %v5859_v31  ;;  %v5903_v11 = vrot.slane %v5902_v27, 1  ;;  %v5827_v52 = vrot.slane %v5826_v2, 2  ;;  %v5791_v33 = vadd.f32 %v5790_v48, %v5789_v35 }
 0x6ac   : > { %v5861_v30 = vadd.f32 %v16822_v12, %v5860_v15  ;;  %v5904_v12 = vadd.f32 %v5903_v11, %v5902_v27  ;;  %v5828_v3 = vadd.f32 %v5827_v52, %v5826_v2  ;;  %v5792_v62 = vrot.slane %v5791_v33, 1 }
 0x6ae   : > { %v5862_v36 = vrot.slane %v5861_v30, 4  ;;  %8735 = vrcp.f32 %v5904_v12  ;;  %v5829_v19 = vrot.slane %v5828_v3, 1  ;;  %v5793_v40 = vadd.f32 %v5792_v62, %v5791_v33 }
 0x6b0   : > { %v5863_v5 = vadd.f32 %v5862_v36, %v5861_v30  ;;  %v5830_v20 = vadd.f32 %v5829_v19, %v5828_v3 }
 0x6b2   : > { %v5864_v10 = vrot.slane %v5863_v5, 2 }
 0x6b4   : > { %v5865_v25 = vadd.f32 %v5864_v10, %v5863_v5 }
 0x6b6   : > { %v5866_v49 = vrot.slane %v5865_v25, 1 }
 0x6b8   : > { %v5867_v46 = vadd.f32 %v5866_v49, %v5865_v25  ;;  %v8736_v6 = vpop.eup %8735 }
 0x6ba   : > { %8737 = vrcp.f32 %v5867_v46 }
 0x6bb   : > { %8739 = vrcp.f32 %v5793_v40 }
 0x6bc   : > { %8741 = vrcp.f32 %v5830_v20 }
 0x6c4   : > { %v8738_v38 = vpop.eup %8737 }
 0x6c5   : > { %v8740_v0 = vpop.eup %8739 }
 0x6c6   : > { %v8742_v28 = vpop.eup %8741 }
 0x706   : > { %v6537_v24 = vpop.permute.xlu1 %6536 }
 0x70a   : > { %v6542_v7 = vpop.permute.xlu1 %6541 }
 0x70e   : > { %v6547_v15 = vpop.permute.xlu1 %6546 }
 0x710   : > { %v6532_v55 = vpop.permute.xlu0 %6531 }
 0x712   : > { %v6552_v37 = vpop.permute.xlu1 %6551 }
 0x714   : > { %v6557_v5 = vpop.permute.xlu0 %6556 }
 0x716   : > { %v6562_v48 = vpop.permute.xlu1 %6561 }
 0x718   : > { %v6567_v33 = vpop.permute.xlu0 %6566 }
 0x738   : > { %v6482_v18 = vpop.f32.mrb[20].mxu1 }
 0x739   : > { %v6484_v50 = vpop.f32.mrb[21].mxu1  ;;  %v6519_v42 = vmul.f32 %v8738_v38, %v6482_v18 }
 0x73a   : > { %v6520_v54 = vmul.f32 %v8736_v6, %v6484_v50  ;;  %v6486_v43 = vpop.f32.mrb[22].mxu1 }
 0x73b   : > { %v6487_v29 = vpop.f32.mrb[23].mxu1 }
 0x742   : > { %v6441_v8 = vpop.f32.mrb[52].mxu0 }
 0x743   : > { %v6517_v32 = vmul.f32 %v8740_v0, %v6441_v8  ;;  %v6443_v17 = vpop.f32.mrb[53].mxu0 }
 0x744   : > { %v6518_v14 = vmul.f32 %v8742_v28, %v6443_v17  ;;  %v6445_v45 = vpop.f32.mrb[54].mxu0 }
 0x745   : > { %v6527_v56 = vpack.c.bf16 %v6519_v42, %v6517_v32  ;;  %v6446_v51 = vpop.f32.mrb[55].mxu0 }
 0x746   : > { %v6528_v61 = vpack.c.bf16 %v6520_v54, %v6518_v14 }
 0x748   : > { %6607 = vmatprep.subr.bf16.mxu0 %v6528_v61 }
 0x749   : > { %6608 = vmatpush1.bf16.msra.mxu0 %v6527_v56 }
 0x74c   : > { %6945 = vmatmul.mubr.msk.bf16.vlgmr.msra.gmra.mrb[56].mxu0 %vm329_vm0, %v7683_v13 }
 0x74d   : > { %6643 = vmatprep.mubr.bf16.mxu0 %v21201_v22 }
 0x754   : > { %6946 = vmatmul.mubr.msk.bf16.gmra.mrb[60].mxu0 %vm329_vm0, %v7684_v53 }
 0x755   : > { %6653 = vmatprep.mubr.bf16.mxu0 %v21201_v22 }
 0x75c   : > { %6947 = vmatmul.mubr.msk.bf16.gmra.mrb[64].mxu0 %vm329_vm0, %v7685_v47 }
 0x75d   : > { %6663 = vmatprep.mubr.bf16.mxu0 %v21201_v22 }
 0x764   : > { %6948 = vmatmul.mubr.msk.bf16.gmra.mrb[68].mxu0 %vm329_vm0, %v7686_v34 }
 0x81f   : > { %v6635_v41 = vpop.f32.mrb[56].mxu0 }
 0x820   : > { %v6636_v39 = vadd.f32 %v6635_v41, %v6532_v55  ;;  %v6637_v1 = vpop.f32.mrb[57].mxu0 }
 0x821   : > { %v6638_v26 = vadd.f32 %v6637_v1, %v6532_v55  ;;  %v6639_v21 = vpop.f32.mrb[58].mxu0 }
 0x822   : > { %6674 = vst [vmem:[%s16975_s5] sm:$0xff] %v6636_v39  ;;  %v6640_v22 = vadd.f32 %v6639_v21, %v6537_v24  ;;  %v6641_v4 = vpop.f32.mrb[59].mxu0 }
 0x823   : > { %6675 = vst [vmem:[%s16975_s5 + $0x8] sm:$0xff] %v6638_v26  ;;  %v6642_v23 = vadd.f32 %v6641_v4, %v6537_v24 }
 0x824   : > { %6676 = vst [vmem:[%s16975_s5 + $0x10] sm:$0xff] %v6640_v22 }
 0x825   : > { %6677 = vst [vmem:[%s16975_s5 + $0x18] sm:$0xff] %v6642_v23 }
 0x827   : > { %v6645_v57 = vpop.f32.mrb[60].mxu0 }
 0x828   : > { %v6646_v60 = vadd.f32 %v6645_v57, %v6542_v7  ;;  %v6647_v31 = vpop.f32.mrb[61].mxu0 }
 0x829   : > { %v6648_v58 = vadd.f32 %v6647_v31, %v6542_v7  ;;  %v6649_v44 = vpop.f32.mrb[62].mxu0 }
 0x82a   : > { %6678 = vst [vmem:[%s16975_s5 + $0x20] sm:$0xff] %v6646_v60  ;;  %v6650_v30 = vadd.f32 %v6649_v44, %v6547_v15  ;;  %v6651_v59 = vpop.f32.mrb[63].mxu0 }
 0x82b   : > { %6679 = vst [vmem:[%s16975_s5 + $0x28] sm:$0xff] %v6648_v58  ;;  %v6652_v36 = vadd.f32 %v6651_v59, %v6547_v15 }
 0x82c   : > { %6680 = vst [vmem:[%s16975_s5 + $0x30] sm:$0xff] %v6650_v30 }
 0x82d   : > { %6681 = vst [vmem:[%s16975_s5 + $0x38] sm:$0xff] %v6652_v36 }
 0x82f   : > { %v6655_v63 = vpop.f32.mrb[64].mxu0 }
 0x830   : > { %v6656_v9 = vadd.f32 %v6655_v63, %v6552_v37  ;;  %v6657_v16 = vpop.f32.mrb[65].mxu0 }
 0x831   : > { %v6658_v27 = vadd.f32 %v6657_v16, %v6552_v37  ;;  %v6659_v35 = vpop.f32.mrb[66].mxu0 }
 0x832   : > { %6682 = vst [vmem:[%s16975_s5 + $0x40] sm:$0xff] %v6656_v9  ;;  %v6660_v2 = vadd.f32 %v6659_v35, %v6557_v5  ;;  %v6661_v10 = vpop.f32.mrb[67].mxu0 }
 0x833   : > { %6683 = vst [vmem:[%s16975_s5 + $0x48] sm:$0xff] %v6658_v27  ;;  %v6662_v11 = vadd.f32 %v6661_v10, %v6557_v5 }
 0x834   : > { %6684 = vst [vmem:[%s16975_s5 + $0x50] sm:$0xff] %v6660_v2 }
 0x835   : > { %6685 = vst [vmem:[%s16975_s5 + $0x58] sm:$0xff] %v6662_v11 }
 0x837   : > { %v6665_v52 = vpop.f32.mrb[68].mxu0 }
 0x838   : > { %v6666_v25 = vadd.f32 %v6665_v52, %v6562_v48  ;;  %v6667_v12 = vpop.f32.mrb[69].mxu0 }
 0x839   : > { %v6668_v3 = vadd.f32 %v6667_v12, %v6562_v48  ;;  %v6669_v49 = vpop.f32.mrb[70].mxu0 }
 0x83a   : > { %6686 = vst [vmem:[%s16975_s5 + $0x60] sm:$0xff] %v6666_v25  ;;  %v6670_v62 = vadd.f32 %v6669_v49, %v6567_v33  ;;  %v6671_v19 = vpop.f32.mrb[71].mxu0 }
 0x83b   : > { %6687 = vst [vmem:[%s16975_s5 + $0x68] sm:$0xff] %v6668_v3  ;;  %v6672_v46 = vadd.f32 %v6671_v19, %v6567_v33 }
 0x83c   : > { %6688 = vst [vmem:[%s16975_s5 + $0x70] sm:$0xff] %v6670_v62 }
 0x83d   : > { %6689 = vst [vmem:[%s16975_s5 + $0x78] sm:$0xff] %v6672_v46 }
 0x83e   : > { %8756 = shalt.err (!%p8753_p3)
}
 0x83f   : > { %s8757_s20 = scalar_lea.hbm %s16995_s10, 2048  ;;  %s8761_s27 = scalar_lea.hbm %s17049_s4, 4096 }
 0x840   : > { %p8758_p4 = scmp.ne.s32.totalorder %s16995_s10, %s8757_s20  ;;  %p8762_p9 = scmp.lt.u32.totalorder %s16995_s10, %s17049_s4 }
 0x841   : > { %p8763_p10 = scmp.lt.u32.totalorder %s8761_s27, %s8757_s20  ;;  %p8765_p12 = scmp.lt.u32.totalorder %s8757_s20, %s16995_s10 }
 0x842   : > { %p8759_p7 = pnand %p8758_p4, %p8874_p5 }
 0x843   : > { %p8764_p11 = por %p8763_p10, %p8762_p9 }
 0x844   : > { %p8760_p8 = pneg %p8759_p7 }
 0x845   : > { %p8766_p13 = por %p8765_p12, %p8764_p11 }
 0x847   : > { %p8767_p0 = pnand %p8766_p13, %p8760_p8 }
 0x849   : > { %8770 = shalt.err (!%p8767_p0)
}
 0x84a   : > { %s8809_s30 = smov 256   ;;  %s8810_s5 = smov 16  }
 0x84b   : > { %6958 = dma.vmem_to_hbm [thread:$0]  (%p8874_p5), %s16997_s7, 2048, %s16995_s10, %s17004_s19, %s8809_s30, %s8809_s30, %s8810_s5  }
 0x84c PF: > { %p6964_p1 = scmp.ge.s32.totalorder %s8805_s18, 2  ;;  %s6719_s6 = sand.u32 1, %s8793_s15  }
 0x84d   : > { %s6720_s8 = scalar_lea.sflag [#allocation3], %s6719_s6 }
 0x84e   : > { %p6961_p2 = pnand %p6964_p1, %p8878_p6 }
 0x850   : > { %8788 = dma.done.wait (!%p6961_p2), %s6720_s8, 2048  }
 0x851   : > { %8790 = vsyncadd (!%p6961_p2), %s6720_s8, 4294965248  ;;  %p14_p3 = scmp.ge.s32.totalorder %s8861_s21, 4   ;;  %s21227_s15 = smov %s8797_s16 }
 0x852   : > { %s21228_s16 = smov %s8801_s17  ;;  %s21229_s17 = smov %s8872_s24 }
 0x853   : > { %s21230_s18 = smov %s8861_s21  ;;  %16 = sbr.rel (!%p14_p3) target bundleno = 3 (0x3), region = 71 }
 0x85a   :  { %6725 = vsyncpa [#allocation3], 1 }
 0x85b   :  { %6727 = vsyncpa [#allocation3 + $0x1], 1 }

</bundles_post_ra>
